<compile_context>
chip_gen: v7x
topology: tpu7x:2x2x1
jax: 0.10.0
libtpu: 0.0.40
codegen_flags: <defaults>
</compile_context>

<pallas_src>
import functools

import jax
import jax.numpy as jnp
from jax.experimental import pallas as pl
from jax.experimental.pallas import tpu as pltpu

# Make the pure-JAX reference (and the in-kernel dots) use full f32 precision
# so the correctness check is apples-to-apples.
jax.config.update("jax_default_matmul_precision", "highest")


def sage_conv_kernel(a_ref, x_ref, w_ref, wr_ref, b_ref, o_ref, *,
                     row_tile, apply_relu):
    """One node row-tile of: relu?( (A_mean @ x) @ W + x @ W_root + b )."""
    # Neighbor mean-aggregation for this tile of nodes: (T, N) @ (N, Cin).
    agg = jnp.dot(a_ref[...], x_ref[...], preferred_element_type=jnp.float32)

    # Root term reuses the VMEM-resident full x: slice this tile's rows.
    start = pl.multiple_of(pl.program_id(0) * row_tile, row_tile)
    x_tile = x_ref[pl.ds(start, row_tile), :]                    # (T, Cin)

    out = (jnp.dot(agg.astype(w_ref.dtype), w_ref[...],
                   preferred_element_type=jnp.float32)
           + jnp.dot(x_tile, wr_ref[...], preferred_element_type=jnp.float32)
           + b_ref[...])
    if apply_relu:
        out = jnp.maximum(out, 0.0)
    o_ref[...] = out.astype(o_ref.dtype)


def sage_conv_pallas(a_mean, x, w, w_root, b, *, apply_relu, row_tile=256):
    """Single fused SAGEConv layer (optionally + relu) as one pallas_call."""
    N, c_in = x.shape
    c_out = w.shape[1]
    assert a_mean.shape == (N, N)
    assert w.shape == (c_in, c_out) and w_root.shape == (c_in, c_out)
    assert b.shape == (1, c_out)

    row_tile = min(row_tile, N)
    assert N % row_tile == 0, "demo keeps N a multiple of row_tile"
    grid = (N // row_tile,)

    # Advisory cost hint: 2 matmul FLOP terms (A@x and the two dense projs).
    flops = 2 * N * (N * c_in + 2 * c_in * c_out)
    bytes_accessed = 4 * (N * N + N * c_in + 2 * c_in * c_out + c_out
                          + N * c_out)

    kernel = functools.partial(sage_conv_kernel, row_tile=row_tile,
                               apply_relu=apply_relu)
    return pl.pallas_call(
        kernel,
        out_shape=jax.ShapeDtypeStruct((N, c_out), x.dtype),
        grid_spec=pltpu.PrefetchScalarGridSpec(
            num_scalar_prefetch=0,
            grid=grid,
            in_specs=[
                # Streamed per grid step: this tile's adjacency rows.
                pl.BlockSpec((row_tile, N), lambda i: (i, 0)),
                # Resident across the grid (constant index maps):
                pl.BlockSpec((N, c_in), lambda i: (0, 0)),       # x (full)
                pl.BlockSpec((c_in, c_out), lambda i: (0, 0)),   # W
                pl.BlockSpec((c_in, c_out), lambda i: (0, 0)),   # W_root
                pl.BlockSpec((1, c_out), lambda i: (0, 0)),      # bias
            ],
            out_specs=pl.BlockSpec((row_tile, c_out), lambda i: (i, 0)),
        ),
        compiler_params=pltpu.CompilerParams(
            dimension_semantics=("parallel",)),   # v7x: both TCs take rows
        cost_estimate=pl.CostEstimate(
            flops=flops, transcendentals=0, bytes_accessed=bytes_accessed),
    )(a_mean, x, w, w_root, b)


@functools.partial(jax.jit, static_argnames=("row_tile",))
def sage_forward(a_mean, x, params, *, row_tile=256):
    """SAGE.forward: conv -> relu -> dropout(identity) for all but the last conv."""
    num_layers = len(params)
    for idx, (w, w_root, b) in enumerate(params):
        last = idx == num_layers - 1
        x = sage_conv_pallas(a_mean, x, w, w_root, b,
                             apply_relu=not last, row_tile=row_tile)
        # F.dropout(..., training=False) == identity (inference forward).
    return x


# ----------------------------- reference & init -----------------------------

def glorot(key, shape):
    limit = jnp.sqrt(6.0 / (shape[0] + shape[1]))
    return jax.random.uniform(key, shape, jnp.float32, -limit, limit)


def init_params(key, in_channels, hidden_channels, out_channels, num_layers):
    dims = [in_channels] + [hidden_channels] * (num_layers - 1) + [out_channels]
    params = []
    for i in range(num_layers):
        key, kw, kr = jax.random.split(key, 3)
        c_in, c_out = dims[i], dims[i + 1]
        params.append((glorot(kw, (c_in, c_out)),      # weight
                       glorot(kr, (c_in, c_out)),      # root_weight
                       jnp.zeros((1, c_out), jnp.float32)))  # bias (zeros)
    return params


def sage_forward_ref(a_mean, x, params):
    num_layers = len(params)
    for idx, (w, w_root, b) in enumerate(params):
        out = (a_mean @ x) @ w + x @ w_root + b
        if idx < num_layers - 1:
            out = jnp.maximum(out, 0.0)
        x = out
    return x


if __name__ == "__main__":
    # Small deterministic demo graph (real ogbl-ppa has ~576k nodes).
    N = 256                    # nodes
    E = 2048                   # edges
    in_channels, hidden_channels, out_channels = 64, 128, 64
    num_layers = 3

    key = jax.random.PRNGKey(0)
    k_edge, k_x, k_p = jax.random.split(key, 3)

    edge_index = jax.random.randint(k_edge, (2, E), 0, N)
    adj = jnp.zeros((N, N), jnp.float32).at[edge_index[0], edge_index[1]].add(1.0)
    deg = adj.sum(axis=1, keepdims=True)
    a_mean = adj / jnp.maximum(deg, 1.0)     # row-normalized == reduce='mean'

    x = jax.random.normal(k_x, (N, in_channels), jnp.float32)
    params = init_params(k_p, in_channels, hidden_channels, out_channels,
                         num_layers)

    # row_tile=128 -> grid=(2,) so both v7x TensorCores get work even at demo N.
    out = sage_forward(a_mean, x, params, row_tile=128)
    out = jax.block_until_ready(out)

    ref = sage_forward_ref(a_mean, x, params)
    assert out.shape == (N, out_channels)
    assert jnp.allclose(out, ref, atol=1e-3, rtol=1e-3), (
        "max abs err", float(jnp.max(jnp.abs(out - ref))))

    print("KERNEL_OK")
</pallas_src>

<mosaic_0001>
module attributes {stable_mosaic.version = 11 : i64} {
  func.func @sage_conv_kernel(%arg0: i32, %arg1: memref<128x256xf32, #tpu.memory_space<vmem>>, %arg2: memref<256x128xf32, #tpu.memory_space<vmem>>, %arg3: memref<128x128xf32, #tpu.memory_space<vmem>>, %arg4: memref<128x128xf32, #tpu.memory_space<vmem>>, %arg5: memref<1x128xf32, #tpu.memory_space<vmem>>, %arg6: memref<128x128xf32, #tpu.memory_space<vmem>>) attributes {dimension_semantics = [#tpu.dimension_semantics<parallel>], iteration_bounds = array<i64: 2>, scalar_prefetch = 0 : i64, scratch_operands = 0 : i64, tpu.core_type = #tpu.core_type<tc>, window_params = [{transform_indices = @transform_0, window_bounds = array<i64: 128, 256>}, {pipeline_mode = #tpu.pipeline_mode<synchronous>, transform_indices = @transform_1, window_bounds = array<i64: 256, 128>}, {pipeline_mode = #tpu.pipeline_mode<synchronous>, transform_indices = @transform_2, window_bounds = array<i64: 128, 128>}, {pipeline_mode = #tpu.pipeline_mode<synchronous>, transform_indices = @transform_3, window_bounds = array<i64: 128, 128>}, {pipeline_mode = #tpu.pipeline_mode<synchronous>, transform_indices = @transform_4, window_bounds = array<i64: 1, 128>}, {transform_indices = @transform_5, window_bounds = array<i64: 128, 128>}]} {
    %c0 = arith.constant 0 : index
    %c0_0 = arith.constant 0 : index
    %0 = vector.load %arg1[%c0, %c0_0] : memref<128x256xf32, #tpu.memory_space<vmem>>, vector<128x256xf32>
    %c0_1 = arith.constant 0 : index
    %c0_2 = arith.constant 0 : index
    %1 = vector.load %arg2[%c0_1, %c0_2] : memref<256x128xf32, #tpu.memory_space<vmem>>, vector<256x128xf32>
    %cst = arith.constant dense<0.000000e+00> : vector<128x128xf32>
    %2 = tpu.matmul %0, %1, %cst {dimension_numbers = #tpu.dot_dimension_numbers<[1], [0], [0], [1], [0, 0, 1, 1], [], []>, precision = #tpu.contract_precision<fp32>} : vector<128x256xf32>, vector<256x128xf32>, vector<128x128xf32> -> vector<128x128xf32>
    %c128_i32 = arith.constant 128 : i32
    %3 = arith.muli %arg0, %c128_i32 : i32
    %4 = tpu.assume_multiple %3, 128 : i32
    %5 = arith.index_cast %4 : i32 to index
    %c0_3 = arith.constant 0 : index
    %6 = vector.load %arg2[%5, %c0_3] : memref<256x128xf32, #tpu.memory_space<vmem>>, vector<128x128xf32>
    %c0_4 = arith.constant 0 : index
    %c0_5 = arith.constant 0 : index
    %7 = vector.load %arg3[%c0_4, %c0_5] : memref<128x128xf32, #tpu.memory_space<vmem>>, vector<128x128xf32>
    %cst_6 = arith.constant dense<0.000000e+00> : vector<128x128xf32>
    %8 = tpu.matmul %2, %7, %cst_6 {dimension_numbers = #tpu.dot_dimension_numbers<[1], [0], [0], [1], [0, 0, 1, 1], [], []>, precision = #tpu.contract_precision<fp32>} : vector<128x128xf32>, vector<128x128xf32>, vector<128x128xf32> -> vector<128x128xf32>
    %c0_7 = arith.constant 0 : index
    %c0_8 = arith.constant 0 : index
    %9 = vector.load %arg4[%c0_7, %c0_8] : memref<128x128xf32, #tpu.memory_space<vmem>>, vector<128x128xf32>
    %cst_9 = arith.constant dense<0.000000e+00> : vector<128x128xf32>
    %10 = tpu.matmul %6, %9, %cst_9 {dimension_numbers = #tpu.dot_dimension_numbers<[1], [0], [0], [1], [0, 0, 1, 1], [], []>, precision = #tpu.contract_precision<fp32>} : vector<128x128xf32>, vector<128x128xf32>, vector<128x128xf32> -> vector<128x128xf32>
    %11 = arith.addf %8, %10 : vector<128x128xf32>
    %c0_10 = arith.constant 0 : index
    %c0_11 = arith.constant 0 : index
    %12 = vector.load %arg5[%c0_10, %c0_11] : memref<1x128xf32, #tpu.memory_space<vmem>>, vector<1x128xf32>
    %13 = vector.broadcast %12 : vector<1x128xf32> to vector<128x128xf32>
    %14 = arith.addf %11, %13 : vector<128x128xf32>
    %cst_12 = arith.constant 0.000000e+00 : f32
    %15 = vector.broadcast %cst_12 : f32 to vector<128x128xf32>
    %16 = arith.maximumf %14, %15 : vector<128x128xf32>
    %c0_13 = arith.constant 0 : index
    %c0_14 = arith.constant 0 : index
    %17 = vector.load %arg6[%c0_13, %c0_14] : memref<128x128xf32, #tpu.memory_space<vmem>>, vector<128x128xf32>
    tpu.vector_store %arg6[%c0_13, %c0_14], %16 {strides = array<i32>} : memref<128x128xf32, #tpu.memory_space<vmem>>, vector<128x128xf32>,
    return
  }
  func.func @transform_0(%arg0: i32) -> (i32, i32) {
    %c0_i32 = arith.constant 0 : i32
    %c0_i32_0 = arith.constant 0 : i32
    return %arg0, %c0_i32 : i32, i32
  }
  func.func @transform_1(%arg0: i32) -> (i32, i32) {
    %c0_i32 = arith.constant 0 : i32
    %c0_i32_0 = arith.constant 0 : i32
    %c0_i32_1 = arith.constant 0 : i32
    return %c0_i32, %c0_i32_0 : i32, i32
  }
  func.func @transform_2(%arg0: i32) -> (i32, i32) {
    %c0_i32 = arith.constant 0 : i32
    %c0_i32_0 = arith.constant 0 : i32
    %c0_i32_1 = arith.constant 0 : i32
    return %c0_i32, %c0_i32_0 : i32, i32
  }
  func.func @transform_3(%arg0: i32) -> (i32, i32) {
    %c0_i32 = arith.constant 0 : i32
    %c0_i32_0 = arith.constant 0 : i32
    %c0_i32_1 = arith.constant 0 : i32
    return %c0_i32, %c0_i32_0 : i32, i32
  }
  func.func @transform_4(%arg0: i32) -> (i32, i32) {
    %c0_i32 = arith.constant 0 : i32
    %c0_i32_0 = arith.constant 0 : i32
    %c0_i32_1 = arith.constant 0 : i32
    return %c0_i32, %c0_i32_0 : i32, i32
  }
  func.func @transform_5(%arg0: i32) -> (i32, i32) {
    %c0_i32 = arith.constant 0 : i32
    %c0_i32_0 = arith.constant 0 : i32
    return %arg0, %c0_i32 : i32, i32
  }
}

module attributes {stable_mosaic.version = 11 : i64} {
  func.func @sage_conv_kernel(%arg0: i32, %arg1: memref<128x256xf32, #tpu.memory_space<vmem>>, %arg2: memref<256x64xf32, #tpu.memory_space<vmem>>, %arg3: memref<64x128xf32, #tpu.memory_space<vmem>>, %arg4: memref<64x128xf32, #tpu.memory_space<vmem>>, %arg5: memref<1x128xf32, #tpu.memory_space<vmem>>, %arg6: memref<128x128xf32, #tpu.memory_space<vmem>>) attributes {dimension_semantics = [#tpu.dimension_semantics<parallel>], iteration_bounds = array<i64: 2>, scalar_prefetch = 0 : i64, scratch_operands = 0 : i64, tpu.core_type = #tpu.core_type<tc>, window_params = [{transform_indices = @transform_0, window_bounds = array<i64: 128, 256>}, {pipeline_mode = #tpu.pipeline_mode<synchronous>, transform_indices = @transform_1, window_bounds = array<i64: 256, 64>}, {pipeline_mode = #tpu.pipeline_mode<synchronous>, transform_indices = @transform_2, window_bounds = array<i64: 64, 128>}, {pipeline_mode = #tpu.pipeline_mode<synchronous>, transform_indices = @transform_3, window_bounds = array<i64: 64, 128>}, {pipeline_mode = #tpu.pipeline_mode<synchronous>, transform_indices = @transform_4, window_bounds = array<i64: 1, 128>}, {transform_indices = @transform_5, window_bounds = array<i64: 128, 128>}]} {
    %c0 = arith.constant 0 : index
    %c0_0 = arith.constant 0 : index
    %0 = vector.load %arg1[%c0, %c0_0] : memref<128x256xf32, #tpu.memory_space<vmem>>, vector<128x256xf32>
    %c0_1 = arith.constant 0 : index
    %c0_2 = arith.constant 0 : index
    %1 = vector.load %arg2[%c0_1, %c0_2] : memref<256x64xf32, #tpu.memory_space<vmem>>, vector<256x64xf32>
    %cst = arith.constant dense<0.000000e+00> : vector<128x64xf32>
    %2 = tpu.matmul %0, %1, %cst {dimension_numbers = #tpu.dot_dimension_numbers<[1], [0], [0], [1], [0, 0, 1, 1], [], []>, precision = #tpu.contract_precision<fp32>} : vector<128x256xf32>, vector<256x64xf32>, vector<128x64xf32> -> vector<128x64xf32>
    %c128_i32 = arith.constant 128 : i32
    %3 = arith.muli %arg0, %c128_i32 : i32
    %4 = tpu.assume_multiple %3, 128 : i32
    %5 = arith.index_cast %4 : i32 to index
    %c0_3 = arith.constant 0 : index
    %6 = vector.load %arg2[%5, %c0_3] : memref<256x64xf32, #tpu.memory_space<vmem>>, vector<128x64xf32>
    %c0_4 = arith.constant 0 : index
    %c0_5 = arith.constant 0 : index
    %7 = vector.load %arg3[%c0_4, %c0_5] : memref<64x128xf32, #tpu.memory_space<vmem>>, vector<64x128xf32>
    %cst_6 = arith.constant dense<0.000000e+00> : vector<128x128xf32>
    %8 = tpu.matmul %2, %7, %cst_6 {dimension_numbers = #tpu.dot_dimension_numbers<[1], [0], [0], [1], [0, 0, 1, 1], [], []>, precision = #tpu.contract_precision<fp32>} : vector<128x64xf32>, vector<64x128xf32>, vector<128x128xf32> -> vector<128x128xf32>
    %c0_7 = arith.constant 0 : index
    %c0_8 = arith.constant 0 : index
    %9 = vector.load %arg4[%c0_7, %c0_8] : memref<64x128xf32, #tpu.memory_space<vmem>>, vector<64x128xf32>
    %cst_9 = arith.constant dense<0.000000e+00> : vector<128x128xf32>
    %10 = tpu.matmul %6, %9, %cst_9 {dimension_numbers = #tpu.dot_dimension_numbers<[1], [0], [0], [1], [0, 0, 1, 1], [], []>, precision = #tpu.contract_precision<fp32>} : vector<128x64xf32>, vector<64x128xf32>, vector<128x128xf32> -> vector<128x128xf32>
    %11 = arith.addf %8, %10 : vector<128x128xf32>
    %c0_10 = arith.constant 0 : index
    %c0_11 = arith.constant 0 : index
    %12 = vector.load %arg5[%c0_10, %c0_11] : memref<1x128xf32, #tpu.memory_space<vmem>>, vector<1x128xf32>
    %13 = vector.broadcast %12 : vector<1x128xf32> to vector<128x128xf32>
    %14 = arith.addf %11, %13 : vector<128x128xf32>
    %cst_12 = arith.constant 0.000000e+00 : f32
    %15 = vector.broadcast %cst_12 : f32 to vector<128x128xf32>
    %16 = arith.maximumf %14, %15 : vector<128x128xf32>
    %c0_13 = arith.constant 0 : index
    %c0_14 = arith.constant 0 : index
    %17 = vector.load %arg6[%c0_13, %c0_14] : memref<128x128xf32, #tpu.memory_space<vmem>>, vector<128x128xf32>
    tpu.vector_store %arg6[%c0_13, %c0_14], %16 {strides = array<i32>} : memref<128x128xf32, #tpu.memory_space<vmem>>, vector<128x128xf32>,
    return
  }
  func.func @transform_0(%arg0: i32) -> (i32, i32) {
    %c0_i32 = arith.constant 0 : i32
    %c0_i32_0 = arith.constant 0 : i32
    return %arg0, %c0_i32 : i32, i32
  }
  func.func @transform_1(%arg0: i32) -> (i32, i32) {
    %c0_i32 = arith.constant 0 : i32
    %c0_i32_0 = arith.constant 0 : i32
    %c0_i32_1 = arith.constant 0 : i32
    return %c0_i32, %c0_i32_0 : i32, i32
  }
  func.func @transform_2(%arg0: i32) -> (i32, i32) {
    %c0_i32 = arith.constant 0 : i32
    %c0_i32_0 = arith.constant 0 : i32
    %c0_i32_1 = arith.constant 0 : i32
    return %c0_i32, %c0_i32_0 : i32, i32
  }
  func.func @transform_3(%arg0: i32) -> (i32, i32) {
    %c0_i32 = arith.constant 0 : i32
    %c0_i32_0 = arith.constant 0 : i32
    %c0_i32_1 = arith.constant 0 : i32
    return %c0_i32, %c0_i32_0 : i32, i32
  }
  func.func @transform_4(%arg0: i32) -> (i32, i32) {
    %c0_i32 = arith.constant 0 : i32
    %c0_i32_0 = arith.constant 0 : i32
    %c0_i32_1 = arith.constant 0 : i32
    return %c0_i32, %c0_i32_0 : i32, i32
  }
  func.func @transform_5(%arg0: i32) -> (i32, i32) {
    %c0_i32 = arith.constant 0 : i32
    %c0_i32_0 = arith.constant 0 : i32
    return %arg0, %c0_i32 : i32, i32
  }
}

module attributes {stable_mosaic.version = 11 : i64} {
  func.func @sage_conv_kernel(%arg0: i32, %arg1: memref<128x256xf32, #tpu.memory_space<vmem>>, %arg2: memref<256x128xf32, #tpu.memory_space<vmem>>, %arg3: memref<128x64xf32, #tpu.memory_space<vmem>>, %arg4: memref<128x64xf32, #tpu.memory_space<vmem>>, %arg5: memref<1x64xf32, #tpu.memory_space<vmem>>, %arg6: memref<128x64xf32, #tpu.memory_space<vmem>>) attributes {dimension_semantics = [#tpu.dimension_semantics<parallel>], iteration_bounds = array<i64: 2>, scalar_prefetch = 0 : i64, scratch_operands = 0 : i64, tpu.core_type = #tpu.core_type<tc>, window_params = [{transform_indices = @transform_0, window_bounds = array<i64: 128, 256>}, {pipeline_mode = #tpu.pipeline_mode<synchronous>, transform_indices = @transform_1, window_bounds = array<i64: 256, 128>}, {pipeline_mode = #tpu.pipeline_mode<synchronous>, transform_indices = @transform_2, window_bounds = array<i64: 128, 64>}, {pipeline_mode = #tpu.pipeline_mode<synchronous>, transform_indices = @transform_3, window_bounds = array<i64: 128, 64>}, {pipeline_mode = #tpu.pipeline_mode<synchronous>, transform_indices = @transform_4, window_bounds = array<i64: 1, 64>}, {transform_indices = @transform_5, window_bounds = array<i64: 128, 64>}]} {
    %c0 = arith.constant 0 : index
    %c0_0 = arith.constant 0 : index
    %0 = vector.load %arg1[%c0, %c0_0] : memref<128x256xf32, #tpu.memory_space<vmem>>, vector<128x256xf32>
    %c0_1 = arith.constant 0 : index
    %c0_2 = arith.constant 0 : index
    %1 = vector.load %arg2[%c0_1, %c0_2] : memref<256x128xf32, #tpu.memory_space<vmem>>, vector<256x128xf32>
    %cst = arith.constant dense<0.000000e+00> : vector<128x128xf32>
    %2 = tpu.matmul %0, %1, %cst {dimension_numbers = #tpu.dot_dimension_numbers<[1], [0], [0], [1], [0, 0, 1, 1], [], []>, precision = #tpu.contract_precision<fp32>} : vector<128x256xf32>, vector<256x128xf32>, vector<128x128xf32> -> vector<128x128xf32>
    %c128_i32 = arith.constant 128 : i32
    %3 = arith.muli %arg0, %c128_i32 : i32
    %4 = tpu.assume_multiple %3, 128 : i32
    %5 = arith.index_cast %4 : i32 to index
    %c0_3 = arith.constant 0 : index
    %6 = vector.load %arg2[%5, %c0_3] : memref<256x128xf32, #tpu.memory_space<vmem>>, vector<128x128xf32>
    %c0_4 = arith.constant 0 : index
    %c0_5 = arith.constant 0 : index
    %7 = vector.load %arg3[%c0_4, %c0_5] : memref<128x64xf32, #tpu.memory_space<vmem>>, vector<128x64xf32>
    %cst_6 = arith.constant dense<0.000000e+00> : vector<128x64xf32>
    %8 = tpu.matmul %2, %7, %cst_6 {dimension_numbers = #tpu.dot_dimension_numbers<[1], [0], [0], [1], [0, 0, 1, 1], [], []>, precision = #tpu.contract_precision<fp32>} : vector<128x128xf32>, vector<128x64xf32>, vector<128x64xf32> -> vector<128x64xf32>
    %c0_7 = arith.constant 0 : index
    %c0_8 = arith.constant 0 : index
    %9 = vector.load %arg4[%c0_7, %c0_8] : memref<128x64xf32, #tpu.memory_space<vmem>>, vector<128x64xf32>
    %cst_9 = arith.constant dense<0.000000e+00> : vector<128x64xf32>
    %10 = tpu.matmul %6, %9, %cst_9 {dimension_numbers = #tpu.dot_dimension_numbers<[1], [0], [0], [1], [0, 0, 1, 1], [], []>, precision = #tpu.contract_precision<fp32>} : vector<128x128xf32>, vector<128x64xf32>, vector<128x64xf32> -> vector<128x64xf32>
    %11 = arith.addf %8, %10 : vector<128x64xf32>
    %c0_10 = arith.constant 0 : index
    %c0_11 = arith.constant 0 : index
    %12 = vector.load %arg5[%c0_10, %c0_11] : memref<1x64xf32, #tpu.memory_space<vmem>>, vector<1x64xf32>
    %13 = vector.broadcast %12 : vector<1x64xf32> to vector<128x64xf32>
    %14 = arith.addf %11, %13 : vector<128x64xf32>
    %c0_12 = arith.constant 0 : index
    %c0_13 = arith.constant 0 : index
    %15 = vector.load %arg6[%c0_12, %c0_13] : memref<128x64xf32, #tpu.memory_space<vmem>>, vector<128x64xf32>
    tpu.vector_store %arg6[%c0_12, %c0_13], %14 {strides = array<i32>} : memref<128x64xf32, #tpu.memory_space<vmem>>, vector<128x64xf32>,
    return
  }
  func.func @transform_0(%arg0: i32) -> (i32, i32) {
    %c0_i32 = arith.constant 0 : i32
    %c0_i32_0 = arith.constant 0 : i32
    return %arg0, %c0_i32 : i32, i32
  }
  func.func @transform_1(%arg0: i32) -> (i32, i32) {
    %c0_i32 = arith.constant 0 : i32
    %c0_i32_0 = arith.constant 0 : i32
    %c0_i32_1 = arith.constant 0 : i32
    return %c0_i32, %c0_i32_0 : i32, i32
  }
  func.func @transform_2(%arg0: i32) -> (i32, i32) {
    %c0_i32 = arith.constant 0 : i32
    %c0_i32_0 = arith.constant 0 : i32
    %c0_i32_1 = arith.constant 0 : i32
    return %c0_i32, %c0_i32_0 : i32, i32
  }
  func.func @transform_3(%arg0: i32) -> (i32, i32) {
    %c0_i32 = arith.constant 0 : i32
    %c0_i32_0 = arith.constant 0 : i32
    %c0_i32_1 = arith.constant 0 : i32
    return %c0_i32, %c0_i32_0 : i32, i32
  }
  func.func @transform_4(%arg0: i32) -> (i32, i32) {
    %c0_i32 = arith.constant 0 : i32
    %c0_i32_0 = arith.constant 0 : i32
    %c0_i32_1 = arith.constant 0 : i32
    return %c0_i32, %c0_i32_0 : i32, i32
  }
  func.func @transform_5(%arg0: i32) -> (i32, i32) {
    %c0_i32 = arith.constant 0 : i32
    %c0_i32_0 = arith.constant 0 : i32
    return %arg0, %c0_i32 : i32, i32
  }
}

</mosaic_0001>

<bundles_post_ra>
// kernel: sage_forward.4
= control target key start
LH: loop header
LB: loop body
LE: loop exit
PB: predicated region body
PF: predicated region fallthrough
CT: control target
= control target key end

     0   :  { %s7081_s18 = smov 0   ;;  %s9684_s0 = inlined_call_operand.vmem [shape: f32[256,256], index: 0, kind: input, shape index: {}]   ;;  %s9685_s1 = inlined_call_operand.vmem [shape: f32[256,128], index: 1, kind: input, shape index: {}]   ;;  %s9686_s2 = inlined_call_operand.vmem [shape: f32[128,128], index: 2, kind: input, shape index: {}]   ;;  %s9687_s3 = inlined_call_operand.vmem [shape: f32[128,128], index: 3, kind: input, shape index: {}]   ;;  %s9688_s4 = inlined_call_operand.vmem [shape: f32[1,128], index: 4, kind: input, shape index: {}]   ;;  %s9689_s5 = inlined_call_operand.vmem [shape: f32[256,128], index: 5, kind: output, shape index: {}]  }
   0x1 LB: > { %s4732_s19 = sadd.s32 4294967295, %s7049_s18   ;;  %p4736_p0 = scmp.ge.s32.totalorder %s7049_s18, 1  ;;  %s7049_s18 = sphi %s7081_s18, %s15_s18  }
   0x2   : > { %p189_p1 = scmp.lt.s32.totalorder %s7049_s18, 3 }
   0x4   : > { %p190_p2 = pnand %p4736_p0, %p189_p1 }
   0x6   : > { %193 = sbr.rel (%p190_p2) target bundleno = 1039 (0x40f), region = 40 }
   0xd   : > { %v279_v0 = vld [vmem:[%s9685_s1 + $0x80] sm:$0xff]  ;;  %v280_v1 = vld [vmem:[%s9685_s1 + $0x88] sm:$0xff]  ;;  %s7100_s26 = sshll.u32 %s4732_s19, 4  ;;  %v281_v7 = vld [vmem:[%s9685_s1 + $0x90] sm:$0xff]  ;;  %s4742_s24 = sshll.u32 %s4732_s19, 7 }
   0xe   : > { %v263_v2 = vld [vmem:[%s9685_s1] sm:$0xff]  ;;  %v344_v3 = vand.u32 4294901760, %v279_v0  ;;  %v347_v4 = vand.u32 4294901760, %v280_v1  ;;  %v264_v5 = vld [vmem:[%s9685_s1 + $0x8] sm:$0xff]  ;;  %v282_v8 = vld [vmem:[%s9685_s1 + $0x98] sm:$0xff]  ;;  %v350_v10 = vand.u32 4294901760, %v281_v7  ;;  %s8104_s6 = scalar_lea.vmem %s9685_s1, %s4742_s24 }
   0xf   : > { %v296_v6 = vand.u32 4294901760, %v263_v2  ;;  %v299_v9 = vand.u32 4294901760, %v264_v5  ;;  %v353_v11 = vand.u32 4294901760, %v282_v8  ;;  %v265_v12 = vld [vmem:[%s9685_s1 + $0x10] sm:$0xff]  ;;  %v266_v13 = vld [vmem:[%s9685_s1 + $0x18] sm:$0xff]  ;;  %v283_v14 = vld [vmem:[%s9685_s1 + $0xa0] sm:$0xff] }
  0x10   : > { %v7120_v15 = vpack.c.bf16 %v347_v4, %v344_v3  ;;  %v7122_v16 = vsub.f32 %v279_v0, %v344_v3  ;;  %v7124_v17 = vsub.f32 %v280_v1, %v347_v4  ;;  %v284_v19 = vld [vmem:[%s9685_s1 + $0xa8] sm:$0xff]  ;;  %v267_v20 = vld [vmem:[%s9685_s1 + $0x20] sm:$0xff]  ;;  %p219_p3 = scmp.lt.s32.totalorder %s7100_s26, 31  ;;  %v7144_v25 = vsub.f32 %v281_v7, %v350_v10  ;;  %v285_v26 = vld [vmem:[%s9685_s1 + $0xb0] sm:$0xff] }
  0x11   : > { %v7126_v18 = vsub.f32 %v263_v2, %v296_v6  ;;  %v268_v21 = vld [vmem:[%s9685_s1 + $0x28] sm:$0xff]  ;;  %v7138_v22 = vpack.c.bf16 %v299_v9, %v296_v6  ;;  %v7140_v23 = vsub.f32 %v264_v5, %v299_v9  ;;  %v7142_v24 = vpack.c.bf16 %v353_v11, %v350_v10  ;;  %v286_v31 = vld [vmem:[%s9685_s1 + $0xb8] sm:$0xff]  ;;  %v269_v36 = vld [vmem:[%s9685_s1 + $0x30] sm:$0xff] }
  0x12   : > { %10052 = vst [vmem:[#allocation2_spill] sm:$0xff] %v7120_v15  ;;  %6284 = vmatprep.subr.bf16.mxu1 %v7120_v15  ;;  %v7150_v27 = vsub.f32 %v282_v8, %v353_v11  ;;  %v302_v28 = vand.u32 4294901760, %v265_v12  ;;  %v305_v29 = vand.u32 4294901760, %v266_v13  ;;  %v356_v30 = vand.u32 4294901760, %v283_v14  ;;  %v270_v37 = vld [vmem:[%s9685_s1 + $0x38] sm:$0xff]  ;;  %v287_v42 = vld [vmem:[%s9685_s1 + $0xc0] sm:$0xff] }
  0x13   : > { %10053 = vst [vmem:[#allocation3_spill] sm:$0xff] %v7138_v22  ;;  %10054 = vst [vmem:[#allocation4_spill] sm:$0xff] %v7142_v24  ;;  %6286 = vmatpush3.bf16.msra.mxu1 %v7138_v22  ;;  %v359_v32 = vand.u32 4294901760, %v284_v19  ;;  %v308_v33 = vand.u32 4294901760, %v267_v20  ;;  %v311_v34 = vand.u32 4294901760, %v268_v21  ;;  %v362_v35 = vand.u32 4294901760, %v285_v26 }
  0x14   : > { %6288 = vmatprep.subr.bf16.mxu1 %v7142_v24  ;;  %v7163_v38 = vpack.c.bf16 %v305_v29, %v302_v28  ;;  %v7165_v39 = vsub.f32 %v265_v12, %v302_v28  ;;  %v7167_v40 = vsub.f32 %v266_v13, %v305_v29  ;;  %v7169_v41 = vsub.f32 %v283_v14, %v356_v30  ;;  %v288_v43 = vld [vmem:[%s9685_s1 + $0xc8] sm:$0xff]  ;;  %v271_v44 = vld [vmem:[%s9685_s1 + $0x40] sm:$0xff]  ;;  %s10557_s26 = smov (!%p219_p3, %s7100_s26), 31  ;;  %v289_v58 = vld [vmem:[%s9685_s1 + $0xd0] sm:$0xff] }
  0x15   : > { %v7185_v45 = vpack.c.bf16 %v359_v32, %v356_v30  ;;  %v7187_v46 = vsub.f32 %v284_v19, %v359_v32  ;;  %v7189_v47 = vpack.c.bf16 %v311_v34, %v308_v33  ;;  %v7191_v48 = vsub.f32 %v267_v20, %v308_v33  ;;  %v272_v49 = vld [vmem:[%s9685_s1 + $0x48] sm:$0xff]  ;;  %v290_v59 = vld [vmem:[%s9685_s1 + $0xd8] sm:$0xff]  ;;  %v273_v0 = vld [vmem:[%s9685_s1 + $0x50] sm:$0xff]  ;;  %s4746_s27 = sshll.u32 %s10557_s26, 4  ;;  %s4741_s24 = sshll.u32 %s10557_s26, 3 }
  0x16   : > { %10055 = vst [vmem:[#allocation5_spill] sm:$0xff] %v7163_v38  ;;  %v7196_v50 = vsub.f32 %v268_v21, %v311_v34  ;;  %v365_v51 = vand.u32 4294901760, %v286_v31  ;;  %v7198_v52 = vsub.f32 %v285_v26, %v362_v35  ;;  %v314_v53 = vand.u32 4294901760, %v269_v36  ;;  %v274_v1 = vld [vmem:[%s9685_s1 + $0x58] sm:$0xff]  ;;  %v291_v2 = vld [vmem:[%s9685_s1 + $0xe0] sm:$0xff]  ;;  %v292_v7 = vld [vmem:[%s9685_s1 + $0xe8] sm:$0xff]  ;;  %s7253_s11 = scalar_lea.vmem %s9684_s0, %s4746_s27  ;;  %s9663_s28 = scalar_lea.vmem %s9689_s5, %s4741_s24 }
  0x17   : > { %10056 = vst [vmem:[#allocation6_spill] sm:$0xff] %v7185_v45  ;;  %10057 = vst [vmem:[#allocation7_spill] sm:$0xff] %v7189_v47  ;;  %6290 = vmatpush3.bf16.msra.mxu1 %v7163_v38  ;;  %v317_v54 = vand.u32 4294901760, %v270_v37  ;;  %v368_v55 = vand.u32 4294901760, %v287_v42  ;;  %v371_v56 = vand.u32 4294901760, %v288_v43  ;;  %v320_v57 = vand.u32 4294901760, %v271_v44 }
  0x18   : > { %6292 = vmatprep.subr.bf16.mxu1 %v7185_v45  ;;  %v7208_v60 = vpack.c.bf16 %v365_v51, %v362_v35  ;;  %v7210_v61 = vsub.f32 %v286_v31, %v365_v51  ;;  %v7212_v62 = vsub.f32 %v269_v36, %v314_v53  ;;  %v323_v63 = vand.u32 4294901760, %v272_v49  ;;  %v275_v8 = vld [vmem:[%s9685_s1 + $0x60] sm:$0xff]  ;;  %v276_v9 = vld [vmem:[%s9685_s1 + $0x68] sm:$0xff]  ;;  %v293_v31 = vld [vmem:[%s9685_s1 + $0xf0] sm:$0xff] }
  0x19   : > { %v7224_v3 = vpack.c.bf16 %v317_v54, %v314_v53  ;;  %v7226_v4 = vsub.f32 %v270_v37, %v317_v54  ;;  %v7228_v5 = vpack.c.bf16 %v371_v56, %v368_v55  ;;  %v7230_v6 = vsub.f32 %v287_v42, %v368_v55  ;;  %v294_v36 = vld [vmem:[%s9685_s1 + $0xf8] sm:$0xff]  ;;  %v277_v37 = vld [vmem:[%s9685_s1 + $0x70] sm:$0xff]  ;;  %v232_v53 = vld [vmem:[%s7253_s11 + $0x8] sm:$0xff] }
  0x1a   : > { %10058 = vst [vmem:[#allocation8_spill] sm:$0xff] %v7208_v60  ;;  %v7241_v10 = vsub.f32 %v288_v43, %v371_v56  ;;  %v7243_v11 = vpack.c.bf16 %v323_v63, %v320_v57  ;;  %v7245_v12 = vsub.f32 %v271_v44, %v320_v57  ;;  %v7247_v13 = vsub.f32 %v272_v49, %v323_v63  ;;  %v278_v42 = vld [vmem:[%s9685_s1 + $0x78] sm:$0xff]  ;;  %v231_v54 = vld [vmem:[%s7253_s11] sm:$0xff] }
  0x1b   : > { %10059 = vst [vmem:[#allocation9_spill] sm:$0xff] %v7224_v3  ;;  %10060 = vst [vmem:[#allocation10_spill] sm:$0xff] %v7228_v5  ;;  %6294 = vmatpush3.bf16.msra.mxu1 %v7189_v47  ;;  %v374_v14 = vand.u32 4294901760, %v289_v58  ;;  %v377_v19 = vand.u32 4294901760, %v290_v59  ;;  %v326_v20 = vand.u32 4294901760, %v273_v0  ;;  %v329_v21 = vand.u32 4294901760, %v274_v1 }
  0x1c   : > { %10061 = vst [vmem:[#allocation11_spill] sm:$0xff] %v7243_v11  ;;  %6296 = vmatprep.subr.bf16.mxu1 %v7208_v60  ;;  %v380_v26 = vand.u32 4294901760, %v291_v2  ;;  %v383_v28 = vand.u32 4294901760, %v292_v7  ;;  %v332_v29 = vand.u32 4294901760, %v275_v8  ;;  %v335_v30 = vand.u32 4294901760, %v276_v9 }
  0x1d   : > { %v7259_v32 = vpack.c.bf16 %v377_v19, %v374_v14  ;;  %v7261_v33 = vsub.f32 %v289_v58, %v374_v14  ;;  %v7263_v34 = vsub.f32 %v290_v59, %v377_v19  ;;  %v7265_v35 = vpack.c.bf16 %v329_v21, %v326_v20 }
  0x1e   : > { %v7276_v43 = vsub.f32 %v273_v0, %v326_v20  ;;  %v7278_v44 = vsub.f32 %v274_v1, %v329_v21  ;;  %v7280_v49 = vpack.c.bf16 %v383_v28, %v380_v26  ;;  %v7282_v51 = vsub.f32 %v291_v2, %v380_v26  ;;  %v234_v26 = vld [vmem:[%s7253_s11 + $0x18] sm:$0xff] }
  0x1f   : > { %10062 = vst [vmem:[#allocation12_spill] sm:$0xff] %v7259_v32  ;;  %10063 = vst [vmem:[#allocation13_spill] sm:$0xff] %v7265_v35  ;;  %6298 = vmatpush3.bf16.msra.mxu1 %v7224_v3  ;;  %v7287_v55 = vsub.f32 %v292_v7, %v383_v28  ;;  %v7289_v56 = vpack.c.bf16 %v335_v30, %v332_v29  ;;  %v7291_v57 = vsub.f32 %v275_v8, %v332_v29  ;;  %v233_v28 = vld [vmem:[%s7253_s11 + $0x10] sm:$0xff] }
  0x20   : > { %10064 = vst [vmem:[#allocation14_spill] sm:$0xff] %v7280_v49  ;;  %v7293_v58 = vsub.f32 %v276_v9, %v335_v30  ;;  %6300 = vmatprep.subr.bf16.mxu1 %v7228_v5  ;;  %v386_v59 = vand.u32 4294901760, %v293_v31  ;;  %v389_v63 = vand.u32 4294901760, %v294_v36  ;;  %v338_v0 = vand.u32 4294901760, %v277_v37 }
  0x21   : > { %10065 = vst [vmem:[#allocation15_spill] sm:$0xff] %v7289_v56  ;;  %v341_v1 = vand.u32 4294901760, %v278_v42  ;;  %v7296_v2 = vand.u32 4294901760, %v232_v53  ;;  %v7298_v14 = vand.u32 4294901760, %v231_v54 }
  0x22   : > { %v7302_v20 = vpack.c.bf16 %v389_v63, %v386_v59  ;;  %v7304_v8 = vsub.f32 %v293_v31, %v386_v59  ;;  %v7306_v9 = vsub.f32 %v294_v36, %v389_v63  ;;  %v7313_v29 = vsub.f32 %v277_v37, %v338_v0 }
  0x23   : > { %10066 = vst [vmem:[#allocation16_spill] sm:$0xff] %v7296_v2  ;;  %10067 = vst [vmem:[#allocation17_spill] sm:$0xff] %v7298_v14  ;;  %v7308_v21 = vpack.c.bf16 %v341_v1, %v338_v0  ;;  %6302 = vmatpush3.bf16.msra.mxu1 %v7243_v11  ;;  %v7315_v30 = vsub.f32 %v278_v42, %v341_v1  ;;  %v7318_v7 = vsub.f32 %v232_v53, %v7296_v2 }
  0x24   : > { %10068 = vst [vmem:[#allocation18_spill] sm:$0xff] %v7302_v20  ;;  %v7321_v19 = vsub.f32 %v231_v54, %v7298_v14  ;;  %6304 = vmatprep.subr.bf16.mxu1 %v7259_v32  ;;  %v10072_v31 = vand.u32 4294901760, %v7122_v16  ;;  %v10073_v59 = vand.u32 4294901760, %v7124_v17  ;;  %v9700_v37 = vand.u32 4294901760, %v7126_v18  ;;  %v236_v32 = vld [vmem:[%s7253_s11 + $0x28] sm:$0xff] }
  0x25   : > { %10069 = vst [vmem:[#allocation19_spill] sm:$0xff] %v7308_v21  ;;  %10070 = vst [vmem:[#allocation20_spill] sm:$0xff] %v7318_v7  ;;  %v9701_v42 = vand.u32 4294901760, %v7140_v23  ;;  %v9710_v53 = vand.u32 4294901760, %v7318_v7  ;;  %v7334_v0 = vand.u32 4294901760, %v234_v26  ;;  %v7336_v1 = vand.u32 4294901760, %v233_v28 }
  0x26   : > { %10071 = vst [vmem:[#allocation21_spill] sm:$0xff] %v7321_v19  ;;  %v748_v36 = vsub.f32 %v7122_v16, %v10072_v31  ;;  %v755_v63 = vsub.f32 %v7124_v17, %v10073_v59  ;;  %v636_v59 = vsub.f32 %v7126_v18, %v9700_v37  ;;  %v10076_v3 = vand.u32 4294901760, %v7321_v19  ;;  %v235_v37 = vld [vmem:[%s7253_s11 + $0x20] sm:$0xff] }
  0x27   : > { %10074 = vst [vmem:[#allocation22_spill] sm:$0xff] %v7334_v0  ;;  %10075 = vst [vmem:[#allocation23_spill] sm:$0xff] %v7336_v1  ;;  %v643_v5 = vsub.f32 %v7140_v23, %v9701_v42  ;;  %6306 = vmatpush3.bf16.msra.mxu1 %v7265_v35  ;;  %v394_v54 = vsub.f32 %v7318_v7, %v9710_v53  ;;  %v7360_v45 = vand.u32 4294901760, %v236_v32  ;;  %v7367_v22 = vand.u32 4294901760, %v235_v37 }
  0x28   : > { %v749_v11 = vand.u32 4294901760, %v748_v36  ;;  %v756_v31 = vand.u32 4294901760, %v755_v63  ;;  %v400_v60 = vsub.f32 %v7321_v19, %v10076_v3  ;;  %v7353_v36 = vsub.f32 %v234_v26, %v7334_v0  ;;  %6308 = vmatprep.subr.bf16.mxu1 %v7280_v49 }
  0x29   : > { %v7356_v63 = vsub.f32 %v233_v28, %v7336_v1  ;;  %v637_v47 = vand.u32 4294901760, %v636_v59  ;;  %v644_v35 = vand.u32 4294901760, %v643_v5  ;;  %10079 = vst [vmem:[#allocation26_spill] sm:$0xff] %v7360_v45  ;;  %v395_v38 = vand.u32 4294901760, %v394_v54  ;;  %10081 = vst [vmem:[#allocation28_spill] sm:$0xff] %v7367_v22  ;;  %v238_v59 = vld [vmem:[%s7253_s11 + $0x38] sm:$0xff] }
  0x2a   : > { %10077 = vst [vmem:[#allocation24_spill] sm:$0xff] %v7353_v36  ;;  %v6315_v42 = vpack.c.bf16 %v756_v31, %v749_v11  ;;  %v401_v53 = vand.u32 4294901760, %v400_v60  ;;  %v9716_v24 = vand.u32 4294901760, %v7353_v36  ;;  %v7365_v28 = vsub.f32 %v236_v32, %v7360_v45 }
  0x2b   : > { %10078 = vst [vmem:[#allocation25_spill] sm:$0xff] %v7356_v63  ;;  %v9715_v3 = vand.u32 4294901760, %v7356_v63  ;;  %v6317_v26 = vpack.c.bf16 %v644_v35, %v637_v47  ;;  %v9725_v11 = vand.u32 4294901760, %v7144_v25  ;;  %6310 = vmatpush3.bf16.msra.mxu1 %v7289_v56  ;;  %396 = vmatprep.mubr.f32.mxu1 %v395_v38  ;;  %v7382_v38 = vsub.f32 %v235_v37, %v7367_v22  ;;  %v240_v37 = vld [vmem:[%s7253_s11 + $0x48] sm:$0xff] }
  0x2c   : > { %10080 = vst [vmem:[#allocation27_spill] sm:$0xff] %v7365_v28  ;;  %v409_v60 = vsub.f32 %v7353_v36, %v9716_v24  ;;  %6312 = vmatprep.subr.bf16.mxu1 %v7302_v20  ;;  %v10083_v32 = vand.u32 4294901760, %v7150_v27  ;;  %v10084_v56 = vand.u32 4294901760, %v7165_v39  ;;  %v10085_v49 = vand.u32 4294901760, %v7365_v28 }
  0x2d   : > { %v415_v47 = vsub.f32 %v7356_v63, %v9715_v3  ;;  %10082 = vst [vmem:[#allocation29_spill] sm:$0xff] %v7382_v38  ;;  %v762_v54 = vsub.f32 %v7144_v25, %v9725_v11  ;;  %v237_v3 = vld [vmem:[%s7253_s11 + $0x30] sm:$0xff]  ;;  %v9740_v11 = vand.u32 4294901760, %v7382_v38  ;;  %v10086_v36 = vand.u32 4294901760, %v7167_v40 }
  0x2e   : > { %v410_v24 = vand.u32 4294901760, %v409_v60  ;;  %v769_v20 = vsub.f32 %v7150_v27, %v10083_v32  ;;  %v650_v35 = vsub.f32 %v7165_v39, %v10084_v56  ;;  %v424_v63 = vsub.f32 %v7365_v28, %v10085_v49 }
  0x2f   : > { %v416_v5 = vand.u32 4294901760, %v415_v47  ;;  %v763_v31 = vand.u32 4294901760, %v762_v54  ;;  %v657_v60 = vsub.f32 %v7167_v40, %v10086_v36  ;;  %v239_v47 = vld [vmem:[%s7253_s11 + $0x40] sm:$0xff]  ;;  %6314 = vmatpush3.bf16.msra.mxu1 %v7308_v21  ;;  %v7406_v7 = vand.u32 4294901760, %v238_v59 }
  0x30   : > { %v770_v32 = vand.u32 4294901760, %v769_v20  ;;  %v651_v19 = vand.u32 4294901760, %v650_v35  ;;  %v7408_v56 = vand.u32 4294901760, %v237_v3  ;;  %6316 = vmatprep.subr.bf16.mxu1 %v6315_v42  ;;  %v425_v15 = vand.u32 4294901760, %v424_v63 }
  0x31   : > { %10087 = vst [vmem:[#allocation30_spill] sm:$0xff] %v7406_v7  ;;  %v430_v49 = vsub.f32 %v7382_v38, %v9740_v11  ;;  %v658_v54 = vand.u32 4294901760, %v657_v60  ;;  %v7413_v28 = vand.u32 4294901760, %v240_v37  ;;  %v7416_v36 = vsub.f32 %v238_v59, %v7406_v7 }
  0x32   : > { %10088 = vst [vmem:[#allocation31_spill] sm:$0xff] %v7408_v56  ;;  %v6319_v22 = vpack.c.bf16 %v770_v32, %v763_v31  ;;  %v7419_v20 = vsub.f32 %v237_v3, %v7408_v56  ;;  %v7421_v35 = vand.u32 4294901760, %v239_v47  ;;  %402 = vmatmul.mubr.f32.vlgmr.msra.gmra.mrb[0].mxu1 %v401_v53  ;;  %v9741_v11 = vand.u32 4294901760, %v7169_v41 }
  0x33   : > { %10089 = vst [vmem:[#allocation32_spill] sm:$0xff] %v7413_v28  ;;  %10090 = vst [vmem:[#allocation33_spill] sm:$0xff] %v7416_v36  ;;  %v431_v21 = vand.u32 4294901760, %v430_v49  ;;  %v6321_v42 = vpack.c.bf16 %v658_v54, %v651_v19  ;;  %v7424_v63 = vsub.f32 %v240_v37, %v7413_v28  ;;  %6318 = vmatpush3.bf16.msra.mxu1 %v6317_v26  ;;  %411 = vmatprep.mubr.f32.mxu1 %v410_v24  ;;  %v242_v49 = vld [vmem:[%s7253_s11 + $0x58] sm:$0xff] }
  0x34   : > { %10091 = vst [vmem:[#allocation34_spill] sm:$0xff] %v7419_v20  ;;  %10092 = vst [vmem:[#allocation35_spill] sm:$0xff] %v7421_v35  ;;  %v9742_v31 = vand.u32 4294901760, %v7416_v36  ;;  %v9743_v59 = vand.u32 4294901760, %v7419_v20  ;;  %v7430_v3 = vsub.f32 %v239_v47, %v7421_v35  ;;  %v9746_v60 = vand.u32 4294901760, %v7187_v46  ;;  %6320 = vmatprep.subr.bf16.mxu1 %v6319_v22  ;;  %v241_v22 = vld [vmem:[%s7253_s11 + $0x50] sm:$0xff] }
  0x35   : > { %10093 = vst [vmem:[#allocation36_spill] sm:$0xff] %v7424_v63  ;;  %v9751_v19 = vand.u32 4294901760, %v7424_v63  ;;  %v776_v53 = vsub.f32 %v7169_v41, %v9741_v11  ;;  %v9758_v24 = vand.u32 4294901760, %v7191_v48  ;;  %v9763_v26 = vand.u32 4294901760, %v7196_v50 }
  0x36   : > { %10094 = vst [vmem:[#allocation37_spill] sm:$0xff] %v7430_v3  ;;  %v439_v37 = vsub.f32 %v7416_v36, %v9742_v31  ;;  %v445_v47 = vsub.f32 %v7419_v20, %v9743_v59  ;;  %v783_v32 = vsub.f32 %v7187_v46, %v9746_v60  ;;  %417 = vmatmul.mubr.f32.gmra.mrb[2].mxu1 %v416_v5  ;;  %v244_v20 = vld [vmem:[%s7253_s11 + $0x68] sm:$0xff]  ;;  %v10095_v5 = vand.u32 4294901760, %v7430_v3 }
  0x37   : > { %v454_v54 = vsub.f32 %v7424_v63, %v9751_v19  ;;  %v777_v11 = vand.u32 4294901760, %v776_v53  ;;  %v664_v31 = vsub.f32 %v7191_v48, %v9758_v24  ;;  %v671_v59 = vsub.f32 %v7196_v50, %v9763_v26  ;;  %426 = vmatprep.mubr.f32.mxu1 %v425_v15  ;;  %6322 = vmatpush3.bf16.msra.mxu1 %v6321_v42  ;;  %v243_v53 = vld [vmem:[%s7253_s11 + $0x60] sm:$0xff] }
  0x38   : > { %v440_v60 = vand.u32 4294901760, %v439_v37  ;;  %v446_v36 = vand.u32 4294901760, %v445_v47  ;;  %v460_v38 = vsub.f32 %v7430_v3, %v10095_v5  ;;  %v784_v19 = vand.u32 4294901760, %v783_v32  ;;  %v246_v32 = vld [vmem:[%s7253_s11 + $0x78] sm:$0xff] }
  0x39   : > { %v455_v63 = vand.u32 4294901760, %v454_v54  ;;  %v665_v35 = vand.u32 4294901760, %v664_v31  ;;  %v672_v28 = vand.u32 4294901760, %v671_v59  ;;  %v7465_v24 = vand.u32 4294901760, %v242_v49 }
  0x3a   : > { %v461_v56 = vand.u32 4294901760, %v460_v38  ;;  %v6323_v7 = vpack.c.bf16 %v784_v19, %v777_v11  ;;  %v7467_v26 = vand.u32 4294901760, %v241_v22  ;;  %v7469_v45 = vand.u32 4294901760, %v244_v20  ;;  %432 = vmatmul.mubr.f32.gmra.mrb[4].mxu1 %v431_v21 }
  0x3b   : > { %10096 = vst [vmem:[#allocation38_spill] sm:$0xff] %v7465_v24  ;;  %v6325_v15 = vpack.c.bf16 %v672_v28, %v665_v35  ;;  %v7472_v42 = vsub.f32 %v242_v49, %v7465_v24  ;;  %v7474_v37 = vand.u32 4294901760, %v243_v53  ;;  %v9768_v47 = vand.u32 4294901760, %v7198_v52  ;;  %441 = vmatprep.mubr.f32.mxu1 %v440_v60 }
  0x3c   : > { %10097 = vst [vmem:[#allocation39_spill] sm:$0xff] %v7467_v26  ;;  %10098 = vst [vmem:[#allocation40_spill] sm:$0xff] %v7469_v45  ;;  %6324 = vmatprep.subr.bf16.mxu1 %v6323_v7  ;;  %v7478_v31 = vsub.f32 %v241_v22, %v7467_v26  ;;  %v7481_v11 = vsub.f32 %v244_v20, %v7469_v45  ;;  %v9767_v38 = vand.u32 4294901760, %v7210_v61  ;;  %v9766_v21 = vand.u32 4294901760, %v7212_v62 }
  0x3d   : > { %10099 = vst [vmem:[#allocation41_spill] sm:$0xff] %v7472_v42  ;;  %10100 = vst [vmem:[#allocation42_spill] sm:$0xff] %v7474_v37  ;;  %6326 = vmatpush3.bf16.msra.mxu1 %v6325_v15  ;;  %v9769_v28 = vand.u32 4294901760, %v7472_v42  ;;  %v7487_v35 = vsub.f32 %v243_v53, %v7474_v37  ;;  %v790_v7 = vsub.f32 %v7198_v52, %v9768_v47  ;;  %v9774_v59 = vand.u32 4294901760, %v7226_v4  ;;  %v245_v15 = vld [vmem:[%s7253_s11 + $0x70] sm:$0xff] }
  0x3e   : > { %10101 = vst [vmem:[#allocation43_spill] sm:$0xff] %v7478_v31  ;;  %10102 = vst [vmem:[#allocation44_spill] sm:$0xff] %v7481_v11  ;;  %v9781_v20 = vand.u32 4294901760, %v7478_v31  ;;  %v9784_v60 = vand.u32 4294901760, %v7481_v11  ;;  %v797_v19 = vsub.f32 %v7210_v61, %v9767_v38  ;;  %v678_v22 = vsub.f32 %v7212_v62, %v9766_v21  ;;  %447 = vmatmul.mubr.f32.gmra.mrb[6].mxu1 %v446_v36 }
  0x3f   : > { %10103 = vst [vmem:[#allocation45_spill] sm:$0xff] %v7487_v35  ;;  %v469_v49 = vsub.f32 %v7472_v42, %v9769_v28  ;;  %v9785_v54 = vand.u32 4294901760, %v7487_v35  ;;  %v791_v5 = vand.u32 4294901760, %v790_v7  ;;  %v685_v53 = vsub.f32 %v7226_v4, %v9774_v59  ;;  %456 = vmatprep.mubr.f32.mxu1 %v455_v63  ;;  %v248_v28 = vld [vmem:[%s7253_s11 + $0x88] sm:$0xff]  ;;  %v247_v63 = vld [vmem:[%s7253_s11 + $0x80] sm:$0xff] }
  0x40   : > { %v475_v21 = vsub.f32 %v7478_v31, %v9781_v20  ;;  %v484_v36 = vsub.f32 %v7481_v11, %v9784_v60  ;;  %v798_v38 = vand.u32 4294901760, %v797_v19  ;;  %v679_v47 = vand.u32 4294901760, %v678_v22 }
  0x41   : > { %v470_v42 = vand.u32 4294901760, %v469_v49  ;;  %v490_v7 = vsub.f32 %v7487_v35, %v9785_v54  ;;  %v686_v3 = vand.u32 4294901760, %v685_v53  ;;  %v7520_v59 = vand.u32 4294901760, %v246_v32 }
  0x42   : > { %v476_v37 = vand.u32 4294901760, %v475_v21  ;;  %v485_v45 = vand.u32 4294901760, %v484_v36  ;;  %v6327_v26 = vpack.c.bf16 %v798_v38, %v791_v5  ;;  %v7523_v20 = vand.u32 4294901760, %v245_v15  ;;  %462 = vmatmul.mubr.f32.gmra.mrb[8].mxu1 %v461_v56 }
  0x43   : > { %10104 = vst [vmem:[#allocation46_spill] sm:$0xff] %v7520_v59  ;;  %v491_v31 = vand.u32 4294901760, %v490_v7  ;;  %v6329_v60 = vpack.c.bf16 %v686_v3, %v679_v47  ;;  %v7526_v19 = vsub.f32 %v246_v32, %v7520_v59  ;;  %v7528_v22 = vand.u32 4294901760, %v248_v28  ;;  %471 = vmatprep.mubr.f32.mxu1 %v470_v42 }
  0x44   : > { %10105 = vst [vmem:[#allocation47_spill] sm:$0xff] %v7523_v20  ;;  %6328 = vmatprep.subr.bf16.mxu1 %v6327_v26  ;;  %v7531_v49 = vsub.f32 %v245_v15, %v7523_v20  ;;  %v7533_v53 = vand.u32 4294901760, %v247_v63  ;;  %v9788_v21 = vand.u32 4294901760, %v7230_v6  ;;  %v9787_v38 = vand.u32 4294901760, %v7241_v10  ;;  %v252_v15 = vld [vmem:[%s7253_s11 + $0xa8] sm:$0xff] }
  0x45   : > { %10106 = vst [vmem:[#allocation48_spill] sm:$0xff] %v7526_v19  ;;  %10107 = vst [vmem:[#allocation49_spill] sm:$0xff] %v7528_v22  ;;  %6330 = vmatpush3.bf16.msra.mxu1 %v6329_v60  ;;  %v9786_v56 = vand.u32 4294901760, %v7526_v19  ;;  %v7539_v3 = vsub.f32 %v248_v28, %v7528_v22  ;;  %v9793_v47 = vand.u32 4294901760, %v7245_v12  ;;  %v9798_v26 = vand.u32 4294901760, %v7247_v13 }
  0x46   : > { %10108 = vst [vmem:[#allocation50_spill] sm:$0xff] %v7531_v49  ;;  %10109 = vst [vmem:[#allocation51_spill] sm:$0xff] %v7533_v53  ;;  %v9801_v42 = vand.u32 4294901760, %v7531_v49  ;;  %v7545_v32 = vsub.f32 %v247_v63, %v7533_v53  ;;  %v804_v60 = vsub.f32 %v7230_v6, %v9788_v21  ;;  %v811_v28 = vsub.f32 %v7241_v10, %v9787_v38  ;;  %v250_v63 = vld [vmem:[%s7253_s11 + $0x98] sm:$0xff]  ;;  %v249_v21 = vld [vmem:[%s7253_s11 + $0x90] sm:$0xff] }
  0x47   : > { %10110 = vst [vmem:[#allocation52_spill] sm:$0xff] %v7539_v3  ;;  %477 = vmatmul.mubr.f32.gmra.mrb[10].mxu1 %v476_v37  ;;  %v499_v5 = vsub.f32 %v7526_v19, %v9786_v56  ;;  %v692_v36 = vsub.f32 %v7245_v12, %v9793_v47  ;;  %v699_v7 = vsub.f32 %v7247_v13, %v9798_v26  ;;  %v10112_v35 = vand.u32 4294901760, %v7539_v3  ;;  %v251_v26 = vld [vmem:[%s7253_s11 + $0xa0] sm:$0xff] }
  0x48   : > { %10111 = vst [vmem:[#allocation53_spill] sm:$0xff] %v7545_v32  ;;  %486 = vmatprep.mubr.f32.mxu1 %v485_v45  ;;  %v505_v37 = vsub.f32 %v7531_v49, %v9801_v42  ;;  %v9806_v54 = vand.u32 4294901760, %v7545_v32  ;;  %v805_v56 = vand.u32 4294901760, %v804_v60  ;;  %v812_v38 = vand.u32 4294901760, %v811_v28 }
  0x49   : > { %v500_v19 = vand.u32 4294901760, %v499_v5  ;;  %v514_v47 = vsub.f32 %v7539_v3, %v10112_v35  ;;  %v693_v11 = vand.u32 4294901760, %v692_v36  ;;  %v700_v53 = vand.u32 4294901760, %v699_v7 }
  0x4a   : > { %v506_v22 = vand.u32 4294901760, %v505_v37  ;;  %v520_v45 = vsub.f32 %v7545_v32, %v9806_v54  ;;  %v6331_v42 = vpack.c.bf16 %v812_v38, %v805_v56  ;;  %v7577_v49 = vand.u32 4294901760, %v250_v63 }
  0x4b   : > { %492 = vmatmul.mubr.f32.gmra.mrb[12].mxu1 %v491_v31  ;;  %v515_v60 = vand.u32 4294901760, %v514_v47  ;;  %v6333_v28 = vpack.c.bf16 %v700_v53, %v693_v11  ;;  %v7579_v20 = vand.u32 4294901760, %v249_v21  ;;  %v7581_v5 = vand.u32 4294901760, %v252_v15 }
  0x4c   : > { %10113 = vst [vmem:[#allocation54_spill] sm:$0xff] %v7577_v49  ;;  %501 = vmatprep.mubr.f32.mxu1 %v500_v19  ;;  %v521_v35 = vand.u32 4294901760, %v520_v45  ;;  %6332 = vmatprep.subr.bf16.mxu1 %v6331_v42  ;;  %v7584_v36 = vsub.f32 %v250_v63, %v7577_v49  ;;  %v7586_v7 = vand.u32 4294901760, %v251_v26  ;;  %v9807_v38 = vand.u32 4294901760, %v7261_v33  ;;  %v254_v45 = vld [vmem:[%s7253_s11 + $0xb8] sm:$0xff]  ;;  %v253_v63 = vld [vmem:[%s7253_s11 + $0xb0] sm:$0xff] }
  0x4d   : > { %10114 = vst [vmem:[#allocation55_spill] sm:$0xff] %v7579_v20  ;;  %10115 = vst [vmem:[#allocation56_spill] sm:$0xff] %v7581_v5  ;;  %6334 = vmatpush3.bf16.msra.mxu1 %v6333_v28  ;;  %v7590_v31 = vsub.f32 %v249_v21, %v7579_v20  ;;  %v7593_v11 = vsub.f32 %v252_v15, %v7581_v5  ;;  %v9808_v53 = vand.u32 4294901760, %v7263_v34  ;;  %v9809_v19 = vand.u32 4294901760, %v7276_v43 }
  0x4e   : > { %10116 = vst [vmem:[#allocation57_spill] sm:$0xff] %v7584_v36  ;;  %10117 = vst [vmem:[#allocation58_spill] sm:$0xff] %v7586_v7  ;;  %v9816_v56 = vand.u32 4294901760, %v7584_v36  ;;  %v7599_v47 = vsub.f32 %v251_v26, %v7586_v7  ;;  %v818_v42 = vsub.f32 %v7261_v33, %v9807_v38  ;;  %v9821_v21 = vand.u32 4294901760, %v7278_v44  ;;  %v256_v7 = vld [vmem:[%s7253_s11 + $0xc8] sm:$0xff] }
  0x4f   : > { %10118 = vst [vmem:[#allocation59_spill] sm:$0xff] %v7590_v31  ;;  %10119 = vst [vmem:[#allocation60_spill] sm:$0xff] %v7593_v11  ;;  %507 = vmatmul.mubr.f32.gmra.mrb[14].mxu1 %v506_v22  ;;  %v9826_v15 = vand.u32 4294901760, %v7590_v31  ;;  %v825_v37 = vsub.f32 %v7263_v34, %v9808_v53  ;;  %v706_v26 = vsub.f32 %v7276_v43, %v9809_v19  ;;  %v10121_v19 = vand.u32 4294901760, %v7593_v11 }
  0x50   : > { %10120 = vst [vmem:[#allocation61_spill] sm:$0xff] %v7599_v47  ;;  %516 = vmatprep.mubr.f32.mxu1 %v515_v60  ;;  %v529_v22 = vsub.f32 %v7584_v36, %v9816_v56  ;;  %v9829_v28 = vand.u32 4294901760, %v7599_v47  ;;  %v819_v54 = vand.u32 4294901760, %v818_v42  ;;  %v713_v38 = vsub.f32 %v7278_v44, %v9821_v21  ;;  %v255_v21 = vld [vmem:[%s7253_s11 + $0xc0] sm:$0xff] }
  0x51   : > { %v535_v53 = vsub.f32 %v7590_v31, %v9826_v15  ;;  %v544_v60 = vsub.f32 %v7593_v11, %v10121_v19  ;;  %v826_v32 = vand.u32 4294901760, %v825_v37  ;;  %v707_v3 = vand.u32 4294901760, %v706_v26 }
  0x52   : > { %v530_v56 = vand.u32 4294901760, %v529_v22  ;;  %v550_v42 = vsub.f32 %v7599_v47, %v9829_v28  ;;  %v714_v36 = vand.u32 4294901760, %v713_v38  ;;  %v7632_v5 = vand.u32 4294901760, %v254_v45 }
  0x53   : > { %522 = vmatmul.mubr.f32.gmra.mrb[16].mxu1 %v521_v35  ;;  %v536_v20 = vand.u32 4294901760, %v535_v53  ;;  %v545_v49 = vand.u32 4294901760, %v544_v60  ;;  %v6335_v15 = vpack.c.bf16 %v826_v32, %v819_v54  ;;  %v7635_v31 = vand.u32 4294901760, %v253_v63 }
  0x54   : > { %10122 = vst [vmem:[#allocation62_spill] sm:$0xff] %v7632_v5  ;;  %531 = vmatprep.mubr.f32.mxu1 %v530_v56  ;;  %v551_v19 = vand.u32 4294901760, %v550_v42  ;;  %v6337_v37 = vpack.c.bf16 %v714_v36, %v707_v3  ;;  %v7638_v26 = vsub.f32 %v254_v45, %v7632_v5  ;;  %v7640_v22 = vand.u32 4294901760, %v256_v7  ;;  %v258_v42 = vld [vmem:[%s7253_s11 + $0xd8] sm:$0xff] }
  0x55   : > { %10123 = vst [vmem:[#allocation63_spill] sm:$0xff] %v7635_v31  ;;  %6336 = vmatprep.subr.bf16.mxu1 %v6335_v15  ;;  %v7643_v38 = vsub.f32 %v253_v63, %v7635_v31  ;;  %v7645_v28 = vand.u32 4294901760, %v255_v21  ;;  %v9831_v35 = vand.u32 4294901760, %v7282_v51  ;;  %v9830_v54 = vand.u32 4294901760, %v7287_v55 }
  0x56   : > { %10124 = vst [vmem:[#allocation64_spill] sm:$0xff] %v7638_v26  ;;  %10125 = vst [vmem:[#allocation65_spill] sm:$0xff] %v7640_v22  ;;  %6338 = vmatpush3.bf16.msra.mxu1 %v6337_v37  ;;  %v9832_v32 = vand.u32 4294901760, %v7638_v26  ;;  %v7651_v3 = vsub.f32 %v256_v7, %v7640_v22  ;;  %v9837_v36 = vand.u32 4294901760, %v7291_v57  ;;  %v9844_v53 = vand.u32 4294901760, %v7293_v58  ;;  %v259_v22 = vld [vmem:[%s7253_s11 + $0xe0] sm:$0xff] }
  0x57   : > { %10126 = vst [vmem:[#allocation66_spill] sm:$0xff] %v7643_v38  ;;  %10127 = vst [vmem:[#allocation67_spill] sm:$0xff] %v7645_v28  ;;  %537 = vmatmul.mubr.f32.gmra.mrb[18].mxu1 %v536_v20  ;;  %v9845_v56 = vand.u32 4294901760, %v7643_v38  ;;  %v7657_v15 = vsub.f32 %v255_v21, %v7645_v28  ;;  %v832_v63 = vsub.f32 %v7282_v51, %v9831_v35  ;;  %v7689_v31 = vand.u32 4294901760, %v258_v42 }
  0x58   : > { %10128 = vst [vmem:[#allocation68_spill] sm:$0xff] %v7651_v3  ;;  %v839_v7 = vsub.f32 %v7287_v55, %v9830_v54  ;;  %546 = vmatprep.mubr.f32.mxu1 %v545_v49  ;;  %v559_v20 = vsub.f32 %v7638_v26, %v9832_v32  ;;  %v720_v21 = vsub.f32 %v7291_v57, %v9837_v36  ;;  %v257_v32 = vld [vmem:[%s7253_s11 + $0xd0] sm:$0xff]  ;;  %v260_v26 = vld [vmem:[%s7253_s11 + $0xe8] sm:$0xff]  ;;  %v10130_v47 = vand.u32 4294901760, %v7651_v3 }
  0x59   : > { %10129 = vst [vmem:[#allocation69_spill] sm:$0xff] %v7657_v15  ;;  %v727_v60 = vsub.f32 %v7293_v58, %v9844_v53  ;;  %v565_v49 = vsub.f32 %v7643_v38, %v9845_v56  ;;  %v9852_v37 = vand.u32 4294901760, %v7657_v15  ;;  %v833_v54 = vand.u32 4294901760, %v832_v63  ;;  %10131 = vst [vmem:[#allocation70_spill] sm:$0xff] %v7689_v31 }
  0x5a   : > { %v840_v35 = vand.u32 4294901760, %v839_v7  ;;  %v560_v45 = vand.u32 4294901760, %v559_v20  ;;  %v574_v36 = vsub.f32 %v7651_v3, %v10130_v47  ;;  %v721_v11 = vand.u32 4294901760, %v720_v21 }
  0x5b   : > { %v728_v28 = vand.u32 4294901760, %v727_v60  ;;  %552 = vmatmul.mubr.f32.gmra.mrb[20].mxu1 %v551_v19  ;;  %v566_v53 = vand.u32 4294901760, %v565_v49  ;;  %v580_v56 = vsub.f32 %v7657_v15, %v9852_v37  ;;  %v7691_v20 = vand.u32 4294901760, %v257_v32 }
  0x5c   : > { %v6339_v38 = vpack.c.bf16 %v840_v35, %v833_v54  ;;  %561 = vmatprep.mubr.f32.mxu1 %v560_v45  ;;  %v575_v63 = vand.u32 4294901760, %v574_v36  ;;  %v7693_v5 = vand.u32 4294901760, %v260_v26  ;;  %v7696_v21 = vsub.f32 %v258_v42, %v7689_v31  ;;  %v262_v42 = vld [vmem:[%s7253_s11 + $0xf8] sm:$0xff] }
  0x5d   : > { %v6341_v7 = vpack.c.bf16 %v728_v28, %v721_v11  ;;  %10132 = vst [vmem:[#allocation71_spill] sm:$0xff] %v7691_v20  ;;  %v581_v47 = vand.u32 4294901760, %v580_v56  ;;  %v7698_v19 = vand.u32 4294901760, %v259_v22  ;;  %v9853_v60 = vand.u32 4294901760, %v7304_v8 }
  0x5e   : > { %10133 = vst [vmem:[#allocation72_spill] sm:$0xff] %v7693_v5  ;;  %6340 = vmatprep.subr.bf16.mxu1 %v6339_v38  ;;  %10134 = vst [vmem:[#allocation73_spill] sm:$0xff] %v7696_v21  ;;  %v7702_v35 = vsub.f32 %v257_v32, %v7691_v20  ;;  %v7705_v11 = vsub.f32 %v260_v26, %v7693_v5  ;;  %v9854_v28 = vand.u32 4294901760, %v7306_v9  ;;  %v9855_v54 = vand.u32 4294901760, %v7313_v29 }
  0x5f   : > { %10135 = vst [vmem:[#allocation74_spill] sm:$0xff] %v7698_v19  ;;  %6342 = vmatpush3.bf16.msra.mxu1 %v6341_v7  ;;  %v9860_v38 = vand.u32 4294901760, %v7696_v21  ;;  %v7711_v36 = vsub.f32 %v259_v22, %v7698_v19  ;;  %v846_v56 = vsub.f32 %v7304_v8, %v9853_v60  ;;  %v9865_v32 = vand.u32 4294901760, %v7315_v30  ;;  %v261_v60 = vld [vmem:[%s7253_s11 + $0xf0] sm:$0xff] }
  0x60   : > { %10136 = vst [vmem:[#allocation75_spill] sm:$0xff] %v7702_v35  ;;  %10137 = vst [vmem:[#allocation76_spill] sm:$0xff] %v7705_v11  ;;  %567 = vmatmul.mubr.f32.gmra.mrb[22].mxu1 %v566_v53  ;;  %v9872_v26 = vand.u32 4294901760, %v7702_v35  ;;  %v9873_v45 = vand.u32 4294901760, %v7705_v11  ;;  %v853_v53 = vsub.f32 %v7306_v9, %v9854_v28  ;;  %v734_v22 = vsub.f32 %v7313_v29, %v9855_v54 }
  0x61   : > { %576 = vmatprep.mubr.f32.mxu1 %v575_v63  ;;  %v589_v49 = vsub.f32 %v7696_v21, %v9860_v38  ;;  %v9876_v7 = vand.u32 4294901760, %v7711_v36  ;;  %v847_v63 = vand.u32 4294901760, %v846_v56  ;;  %v741_v37 = vsub.f32 %v7315_v30, %v9865_v32 }
  0x62   : > { %v595_v28 = vsub.f32 %v7702_v35, %v9872_v26  ;;  %v604_v54 = vsub.f32 %v7705_v11, %v9873_v45  ;;  %v854_v15 = vand.u32 4294901760, %v853_v53  ;;  %v735_v3 = vand.u32 4294901760, %v734_v22 }
  0x63   : > { %v590_v38 = vand.u32 4294901760, %v589_v49  ;;  %v610_v56 = vsub.f32 %v7711_v36, %v9876_v7  ;;  %v742_v21 = vand.u32 4294901760, %v741_v37  ;;  %v7743_v19 = vand.u32 4294901760, %v262_v42  ;;  %v10156_v7 = vld [vmem:[#allocation56_spill] sm:$0xff] }
  0x64   : > { %582 = vmatmul.mubr.f32.gmra.mrb[24].mxu1 %v581_v47  ;;  %v596_v32 = vand.u32 4294901760, %v595_v28  ;;  %v605_v5 = vand.u32 4294901760, %v604_v54  ;;  %v6343_v20 = vpack.c.bf16 %v854_v15, %v847_v63  ;;  %v7745_v31 = vand.u32 4294901760, %v261_v60  ;;  %v10142_v63 = vld [vmem:[#allocation28_spill] sm:$0xff] }
  0x65   : > { %10138 = vst [vmem:[#allocation77_spill] sm:$0xff] %v7743_v19  ;;  %591 = vmatprep.mubr.f32.mxu1 %v590_v38  ;;  %v6345_v26 = vpack.c.bf16 %v742_v21, %v735_v3  ;;  %v7748_v45 = vsub.f32 %v262_v42, %v7743_v19  ;;  %v6347_v47 = vpack.c.bf16 %v7124_v17, %v7122_v16  ;;  %v611_v53 = vand.u32 4294901760, %v610_v56  ;;  %v10143_v56 = vld [vmem:[#allocation30_spill] sm:$0xff] }
  0x66   : > { %10139 = vst [vmem:[#allocation78_spill] sm:$0xff] %v7745_v31  ;;  %6344 = vmatprep.subr.bf16.mxu1 %v6343_v20  ;;  %v7753_v22 = vsub.f32 %v261_v60, %v7745_v31  ;;  %v6351_v37 = vpack.c.bf16 %v7150_v27, %v7144_v25  ;;  %v6353_v15 = vpack.c.bf16 %v7167_v40, %v7165_v39 }
  0x67   : > { %10140 = vst [vmem:[#allocation79_spill] sm:$0xff] %v7748_v45  ;;  %v9875_v3 = vand.u32 4294901760, %v7748_v45  ;;  %v6355_v21 = vpack.c.bf16 %v7187_v46, %v7169_v41  ;;  %v6357_v28 = vpack.c.bf16 %v7196_v50, %v7191_v48  ;;  %v6359_v20 = vpack.c.bf16 %v7210_v61, %v7198_v52  ;;  %6346 = vmatpush3.bf16.msra.mxu1 %v6345_v26  ;;  %v10141_v26 = vld [vmem:[#allocation26_spill] sm:$0xff] }
  0x68   : > { %597 = vmatmul.mubr.f32.gmra.mrb[26].mxu1 %v596_v32  ;;  %v9874_v60 = vand.u32 4294901760, %v7753_v22  ;;  %v6361_v54 = vpack.c.bf16 %v7226_v4, %v7212_v62  ;;  %6348 = vmatprep.subr.bf16.mxu1 %v6347_v47  ;;  %v6363_v47 = vpack.c.bf16 %v7241_v10, %v7230_v6 }
  0x69   : > { %606 = vmatprep.mubr.f32.mxu1 %v605_v5  ;;  %v619_v38 = vsub.f32 %v7748_v45, %v9875_v3  ;;  %v6349_v5 = vpack.c.bf16 %v7140_v23, %v7126_v18  ;;  %v10155_v3 = vld [vmem:[#allocation55_spill] sm:$0xff] }
  0x6a   : > { %v625_v32 = vsub.f32 %v7753_v22, %v9874_v60  ;;  %v10154_v60 = vld [vmem:[#allocation54_spill] sm:$0xff] }
  0x6b   : > { %v620_v42 = vand.u32 4294901760, %v619_v38  ;;  %v10145_v38 = vld [vmem:[#allocation32_spill] sm:$0xff] }
  0x6c   : > { %612 = vmatmul.mubr.f32.gmra.mrb[28].mxu1 %v611_v53  ;;  %v626_v49 = vand.u32 4294901760, %v625_v32  ;;  %v10144_v53 = vld [vmem:[#allocation31_spill] sm:$0xff]  ;;  %v10148_v32 = vld [vmem:[#allocation40_spill] sm:$0xff] }
  0x6d   : > { %621 = vmatprep.mubr.f32.mxu1 %v620_v42  ;;  %v6373_v42 = vpack.c.bf16 %v7293_v58, %v7291_v57 }
  0x70   : > { %627 = vmatmul.mubr.f32.gmra.mrb[30].mxu1 %v626_v49  ;;  %v6375_v49 = vpack.c.bf16 %v7306_v9, %v7304_v8 }
  0x71   : > { %857 = vmatprep.mubr.f32.mxu1 %v7296_v2  ;;  %v10202_v2 = vld [vmem:[#allocation59_spill] sm:$0xff] }
  0x74   : > { %859 = vmatmul.mubr.f32.vlgmr.msra.gmra.mrb[32].mxu1 %v7298_v14  ;;  %v10201_v14 = vld [vmem:[#allocation57_spill] sm:$0xff] }
  0x75   : > { %6350 = vmatpush3.bf16.msra.mxu1 %v6349_v5  ;;  %864 = vmatprep.mubr.f32.mxu1 %v7334_v0  ;;  %v10149_v5 = vld [vmem:[#allocation42_spill] sm:$0xff] }
  0x76   : > { %6352 = vmatprep.subr.bf16.mxu1 %v6351_v37  ;;  %v6365_v37 = vpack.c.bf16 %v7247_v13, %v7245_v12  ;;  %v10197_v0 = vld [vmem:[#allocation50_spill] sm:$0xff] }
  0x78   : > { %866 = vmatmul.mubr.f32.gmra.mrb[34].mxu1 %v7336_v1  ;;  %v10194_v1 = vld [vmem:[#allocation18_spill] sm:$0xff] }
  0x79   : > { %871 = vmatprep.mubr.f32.mxu1 %v10141_v26  ;;  %6354 = vmatpush3.bf16.msra.mxu1 %v6353_v15  ;;  %v6367_v15 = vpack.c.bf16 %v7263_v34, %v7261_v33  ;;  %v10191_v26 = vld [vmem:[#allocation45_spill] sm:$0xff] }
  0x7a   : > { %6356 = vmatprep.subr.bf16.mxu1 %v6355_v21  ;;  %v10146_v21 = vld [vmem:[#allocation35_spill] sm:$0xff] }
  0x7c   : > { %873 = vmatmul.mubr.f32.gmra.mrb[36].mxu1 %v10142_v63  ;;  %v10186_v63 = vld [vmem:[#allocation12_spill] sm:$0xff] }
  0x7d   : > { %878 = vmatprep.mubr.f32.mxu1 %v10143_v56  ;;  %6358 = vmatpush3.bf16.msra.mxu1 %v6357_v28  ;;  %v6369_v28 = vpack.c.bf16 %v7278_v44, %v7276_v43  ;;  %v10185_v56 = vld [vmem:[#allocation11_spill] sm:$0xff] }
  0x7e   : > { %6360 = vmatprep.subr.bf16.mxu1 %v6359_v20  ;;  %v6371_v20 = vpack.c.bf16 %v7287_v55, %v7282_v51 }
  0x80   : > { %880 = vmatmul.mubr.f32.gmra.mrb[38].mxu1 %v10144_v53  ;;  %v10184_v53 = vld [vmem:[#allocation41_spill] sm:$0xff] }
  0x81   : > { %885 = vmatprep.mubr.f32.mxu1 %v10145_v38  ;;  %6362 = vmatpush3.bf16.msra.mxu1 %v6361_v54  ;;  %v10147_v54 = vld [vmem:[#allocation39_spill] sm:$0xff]  ;;  %v10183_v38 = vld [vmem:[#allocation37_spill] sm:$0xff] }
  0x82   : > { %6364 = vmatprep.subr.bf16.mxu1 %v6363_v47  ;;  %v6377_v47 = vpack.c.bf16 %v7315_v30, %v7313_v29 }
  0x84   : > { %887 = vmatmul.mubr.f32.gmra.mrb[40].mxu1 %v10146_v21  ;;  %v10182_v21 = vld [vmem:[#allocation10_spill] sm:$0xff] }
  0x85   : > { %892 = vmatprep.mubr.f32.mxu1 %v7465_v24  ;;  %6366 = vmatpush3.bf16.msra.mxu1 %v6365_v37  ;;  %v10150_v37 = vld [vmem:[#allocation47_spill] sm:$0xff]  ;;  %v10181_v24 = vld [vmem:[#allocation9_spill] sm:$0xff] }
  0x86   : > { %6368 = vmatprep.subr.bf16.mxu1 %v6367_v15  ;;  %v10151_v15 = vld [vmem:[#allocation49_spill] sm:$0xff] }
  0x88   : > { %894 = vmatmul.mubr.f32.gmra.mrb[42].mxu1 %v10147_v54  ;;  %v10180_v54 = vld [vmem:[#allocation36_spill] sm:$0xff] }
  0x89   : > { %899 = vmatprep.mubr.f32.mxu1 %v10148_v32  ;;  %6370 = vmatpush3.bf16.msra.mxu1 %v6369_v28  ;;  %v10152_v28 = vld [vmem:[#allocation2_spill] sm:$0xff] }
  0x8a   : > { %6372 = vmatprep.subr.bf16.mxu1 %v6371_v20  ;;  %v10153_v20 = vld [vmem:[#allocation51_spill] sm:$0xff]  ;;  %v10179_v32 = vld [vmem:[#allocation34_spill] sm:$0xff] }
  0x8c   : > { %901 = vmatmul.mubr.f32.gmra.mrb[44].mxu1 %v10149_v5  ;;  %v10163_v5 = vld [vmem:[#allocation71_spill] sm:$0xff] }
  0x8d   : > { %906 = vmatprep.mubr.f32.mxu1 %v7520_v59  ;;  %6374 = vmatpush3.bf16.msra.mxu1 %v6373_v42  ;;  %v10157_v42 = vld [vmem:[#allocation58_spill] sm:$0xff] }
  0x8e   : > { %6376 = vmatprep.subr.bf16.mxu1 %v6375_v49  ;;  %v10158_v59 = vld [vmem:[#allocation62_spill] sm:$0xff]  ;;  %v10159_v49 = vld [vmem:[#allocation63_spill] sm:$0xff] }
  0x90   : > { %908 = vmatmul.mubr.f32.gmra.mrb[46].mxu1 %v10150_v37  ;;  %v10160_v37 = vld [vmem:[#allocation65_spill] sm:$0xff] }
  0x91   : > { %913 = vmatprep.mubr.f32.mxu1 %v10151_v15  ;;  %6378 = vmatpush3.bf16.msra.mxu1 %v6377_v47  ;;  %v10161_v15 = vld [vmem:[#allocation67_spill] sm:$0xff]  ;;  %v10162_v47 = vld [vmem:[#allocation70_spill] sm:$0xff] }
  0x92   : > { %6380 = vmatprep.subr.bf16.mxu1 %v10152_v28 }
  0x94   : > { %915 = vmatmul.mubr.f32.gmra.mrb[48].mxu1 %v10153_v20  ;;  %v10164_v20 = vld [vmem:[#allocation72_spill] sm:$0xff] }
  0x95   : > { %920 = vmatprep.mubr.f32.mxu1 %v10154_v60  ;;  %v10165_v60 = vld [vmem:[#allocation74_spill] sm:$0xff] }
  0x98   : > { %922 = vmatmul.mubr.f32.gmra.mrb[50].mxu1 %v10155_v3  ;;  %v10178_v3 = vld [vmem:[#allocation8_spill] sm:$0xff] }
  0x99   : > { %927 = vmatprep.mubr.f32.mxu1 %v10156_v7  ;;  %v10177_v7 = vld [vmem:[#allocation7_spill] sm:$0xff] }
  0x9c   : > { %929 = vmatmul.mubr.f32.gmra.mrb[52].mxu1 %v10157_v42  ;;  %v10166_v42 = vld [vmem:[#allocation20_spill] sm:$0xff] }
  0x9d   : > { %934 = vmatprep.mubr.f32.mxu1 %v10158_v59  ;;  %v10167_v59 = vld [vmem:[#allocation21_spill] sm:$0xff] }
  0xa0   : > { %936 = vmatmul.mubr.f32.gmra.mrb[54].mxu1 %v10159_v49  ;;  %v10168_v49 = vld [vmem:[#allocation3_spill] sm:$0xff] }
  0xa1   : > { %941 = vmatprep.mubr.f32.mxu1 %v10160_v37  ;;  %v10169_v37 = vld [vmem:[#allocation24_spill] sm:$0xff] }
  0xa4   : > { %943 = vmatmul.mubr.f32.gmra.mrb[56].mxu1 %v10161_v15  ;;  %v10170_v15 = vld [vmem:[#allocation4_spill] sm:$0xff] }
  0xa5   : > { %948 = vmatprep.mubr.f32.mxu1 %v10162_v47  ;;  %v10171_v47 = vld [vmem:[#allocation25_spill] sm:$0xff] }
  0xa8   : > { %950 = vmatmul.mubr.f32.gmra.mrb[58].mxu1 %v10163_v5  ;;  %v10172_v5 = vld [vmem:[#allocation27_spill] sm:$0xff] }
  0xa9   : > { %955 = vmatprep.mubr.f32.mxu1 %v10164_v20  ;;  %v10173_v20 = vld [vmem:[#allocation5_spill] sm:$0xff] }
  0xac   : > { %957 = vmatmul.mubr.f32.gmra.mrb[60].mxu1 %v10165_v60  ;;  %v10174_v60 = vld [vmem:[#allocation6_spill] sm:$0xff] }
  0xad   : > { %962 = vmatprep.mubr.f32.mxu1 %v7743_v19  ;;  %v10175_v19 = vld [vmem:[#allocation29_spill] sm:$0xff] }
  0xb0   : > { %964 = vmatmul.mubr.f32.gmra.mrb[62].mxu1 %v7745_v31  ;;  %v10176_v31 = vld [vmem:[#allocation33_spill] sm:$0xff] }
  0xb1   : > { %1099 = vmatprep.mubr.f32.mxu1 %v10166_v42 }
  0xb4   : > { %1102 = vmatmul.mubr.f32.vlgmr.msra.gmra.mrb[64].mxu1 %v10167_v59 }
  0xb5   : > { %6382 = vmatpush3.bf16.msra.mxu1 %v10168_v49  ;;  %1108 = vmatprep.mubr.f32.mxu1 %v10169_v37  ;;  %v10198_v49 = vld [vmem:[#allocation52_spill] sm:$0xff] }
  0xb6   : > { %6384 = vmatprep.subr.bf16.mxu1 %v10170_v15 }
  0xb8   : > { %1111 = vmatmul.mubr.f32.gmra.mrb[66].mxu1 %v10171_v47 }
  0xb9   : > { %1117 = vmatprep.mubr.f32.mxu1 %v10172_v5  ;;  %6386 = vmatpush3.bf16.msra.mxu1 %v10173_v20  ;;  %v10190_v20 = vld [vmem:[#allocation14_spill] sm:$0xff] }
  0xba   : > { %6388 = vmatprep.subr.bf16.mxu1 %v10174_v60  ;;  %v10187_v60 = vld [vmem:[#allocation43_spill] sm:$0xff] }
  0xbc   : > { %1120 = vmatmul.mubr.f32.gmra.mrb[68].mxu1 %v10175_v19 }
  0xbd   : > { %1126 = vmatprep.mubr.f32.mxu1 %v10176_v31  ;;  %6390 = vmatpush3.bf16.msra.mxu1 %v10177_v7  ;;  %v10188_v7 = vld [vmem:[#allocation44_spill] sm:$0xff] }
  0xbe   : > { %6392 = vmatprep.subr.bf16.mxu1 %v10178_v3  ;;  %v10189_v3 = vld [vmem:[#allocation13_spill] sm:$0xff] }
  0xc0   : > { %1129 = vmatmul.mubr.f32.gmra.mrb[70].mxu1 %v10179_v32 }
  0xc1   : > { %1135 = vmatprep.mubr.f32.mxu1 %v10180_v54  ;;  %6394 = vmatpush3.bf16.msra.mxu1 %v10181_v24  ;;  %v10192_v24 = vld [vmem:[#allocation48_spill] sm:$0xff] }
  0xc2   : > { %6396 = vmatprep.subr.bf16.mxu1 %v10182_v21  ;;  %v10193_v21 = vld [vmem:[#allocation15_spill] sm:$0xff] }
  0xc4   : > { %1138 = vmatmul.mubr.f32.gmra.mrb[72].mxu1 %v10183_v38 }
  0xc5   : > { %1144 = vmatprep.mubr.f32.mxu1 %v10184_v53  ;;  %6398 = vmatpush3.bf16.msra.mxu1 %v10185_v56  ;;  %v10195_v56 = vand.u32 4294901760, %v7122_v16  ;;  %v10205_v16 = vld [vmem:[#allocation64_spill] sm:$0xff] }
  0xc6   : > { %6400 = vmatprep.subr.bf16.mxu1 %v10186_v63  ;;  %v10196_v63 = vand.u32 4294901760, %v7124_v17  ;;  %v10206_v17 = vld [vmem:[#allocation66_spill] sm:$0xff] }
  0xc8   : > { %1147 = vmatmul.mubr.f32.gmra.mrb[74].mxu1 %v10187_v60  ;;  %v6411_v15 = vpack.c.bf16 %v10196_v63, %v10195_v56  ;;  %v10207_v63 = vld [vmem:[#allocation68_spill] sm:$0xff]  ;;  %v10208_v56 = vld [vmem:[#allocation69_spill] sm:$0xff] }
  0xc9   : > { %1153 = vmatprep.mubr.f32.mxu1 %v10188_v7  ;;  %6402 = vmatpush3.bf16.msra.mxu1 %v10189_v3  ;;  %v10199_v3 = vld [vmem:[#allocation19_spill] sm:$0xff] }
  0xca   : > { %6404 = vmatprep.subr.bf16.mxu1 %v10190_v20  ;;  %v10200_v20 = vld [vmem:[#allocation53_spill] sm:$0xff] }
  0xcc   : > { %1156 = vmatmul.mubr.f32.gmra.mrb[76].mxu1 %v10191_v26 }
  0xcd   : > { %1162 = vmatprep.mubr.f32.mxu1 %v10192_v24  ;;  %6406 = vmatpush3.bf16.msra.mxu1 %v10193_v21  ;;  %v10203_v21 = vld [vmem:[#allocation60_spill] sm:$0xff] }
  0xce   : > { %6408 = vmatprep.subr.bf16.mxu1 %v10194_v1  ;;  %v10204_v1 = vld [vmem:[#allocation61_spill] sm:$0xff] }
  0xd0   : > { %1165 = vmatmul.mubr.f32.gmra.mrb[78].mxu1 %v10197_v0 }
  0xd1   : > { %1171 = vmatprep.mubr.f32.mxu1 %v10198_v49  ;;  %6410 = vmatpush3.bf16.msra.mxu1 %v10199_v3  ;;  %v10209_v3 = vld [vmem:[#allocation73_spill] sm:$0xff] }
  0xd2   : > { %6412 = vmatprep.subr.bf16.mxu1 %v6411_v15  ;;  %v10210_v15 = vand.u32 4294901760, %v10166_v42  ;;  %v10217_v42 = vand.u32 4294901760, %v7165_v39 }
  0xd4   : > { %1174 = vmatmul.mubr.f32.gmra.mrb[80].mxu1 %v10200_v20 }
  0xd5   : > { %1180 = vmatprep.mubr.f32.mxu1 %v10201_v14 }
  0xd8   : > { %1183 = vmatmul.mubr.f32.gmra.mrb[82].mxu1 %v10202_v2 }
  0xd9   : > { %1189 = vmatprep.mubr.f32.mxu1 %v10203_v21 }
  0xdc   : > { %1192 = vmatmul.mubr.f32.gmra.mrb[84].mxu1 %v10204_v1 }
  0xdd   : > { %1198 = vmatprep.mubr.f32.mxu1 %v10205_v16 }
  0xe0   : > { %1201 = vmatmul.mubr.f32.gmra.mrb[86].mxu1 %v10206_v17  ;;  %v10211_v17 = vand.u32 4294901760, %v7126_v18 }
  0xe1   : > { %1207 = vmatprep.mubr.f32.mxu1 %v10207_v63  ;;  %v10212_v63 = vand.u32 4294901760, %v7140_v23  ;;  %v7898_v23 = vld [vmem:[%s9687_s3] sm:$0xff] }
  0xe2   : > { %v2048_v39 = vand.u32 4294901760, %v7898_v23 }
  0xe4   : > { %1210 = vmatmul.mubr.f32.gmra.mrb[88].mxu1 %v10208_v56  ;;  %v6413_v56 = vpack.c.bf16 %v10212_v63, %v10211_v17  ;;  %v10227_v17 = vand.u32 4294901760, %v7210_v61  ;;  %v10231_v61 = vand.u32 4294901760, %v7212_v62 }
  0xe5   : > { %1216 = vmatprep.mubr.f32.mxu1 %v10209_v3  ;;  %v10213_v3 = vand.u32 4294901760, %v7144_v25  ;;  %v7903_v25 = vld [vmem:[%s9687_s3 + $0x8] sm:$0xff] }
  0xe8   : > { %1219 = vmatmul.mubr.f32.gmra.mrb[90].mxu1 %v7702_v35  ;;  %v10214_v35 = vand.u32 4294901760, %v7150_v27  ;;  %v10219_v27 = vand.u32 4294901760, %v7169_v41  ;;  %v10224_v41 = vand.u32 4294901760, %v7191_v48 }
  0xe9   : > { %1225 = vmatprep.mubr.f32.mxu1 %v7705_v11  ;;  %v10215_v11 = vand.u32 4294901760, %v10167_v59  ;;  %v10220_v59 = vand.u32 4294901760, %v7187_v46  ;;  %v10225_v46 = vand.u32 4294901760, %v7196_v50 }
  0xea   : > { %v6415_v16 = vpack.c.bf16 %v10214_v35, %v10213_v3  ;;  %v10223_v3 = vand.u32 4294901760, %v10172_v5  ;;  %v10226_v5 = vand.u32 4294901760, %v7198_v52  ;;  %v10230_v52 = vand.u32 4294901760, %v10176_v31 }
  0xeb   : > { %v6419_v35 = vpack.c.bf16 %v10220_v59, %v10219_v27  ;;  %v7965_v27 = vld [vmem:[%s9687_s3 + $0x28] sm:$0xff]  ;;  %v10233_v31 = vand.u32 4294901760, %v7230_v6  ;;  %v10234_v59 = vand.u32 4294901760, %v7241_v10  ;;  %v10237_v6 = vand.u32 4294901760, %v10180_v54 }
  0xec   : > { %1228 = vmatmul.mubr.f32.gmra.mrb[92].mxu1 %v7711_v36  ;;  %v6423_v63 = vpack.c.bf16 %v10227_v17, %v10226_v5  ;;  %v10238_v10 = vand.u32 4294901760, %v7245_v12  ;;  %v10240_v54 = vand.u32 4294901760, %v7261_v33  ;;  %v10241_v5 = vand.u32 4294901760, %v7263_v34 }
  0xed   : > { %1234 = vmatprep.mubr.f32.mxu1 %v7748_v45  ;;  %v10216_v45 = vand.u32 4294901760, %v10169_v37  ;;  %v6421_v37 = vpack.c.bf16 %v10225_v46, %v10224_v41  ;;  %v10239_v41 = vand.u32 4294901760, %v7247_v13  ;;  %v10244_v33 = vand.u32 4294901760, %v10184_v53 }
  0xee   : > { %v6431_v17 = vpack.c.bf16 %v10241_v5, %v10240_v54  ;;  %v10245_v34 = vand.u32 4294901760, %v7276_v43  ;;  %v10247_v53 = vand.u32 4294901760, %v7282_v51  ;;  %v8063_v54 = vld [vmem:[%s9687_s3 + $0x58] sm:$0xff]  ;;  %v10255_v5 = vand.u32 4294901760, %v7306_v9 }
  0xef   : > { %v6429_v46 = vpack.c.bf16 %v10239_v41, %v10238_v10  ;;  %v10252_v10 = vand.u32 4294901760, %v7291_v57  ;;  %v10253_v41 = vand.u32 4294901760, %v7293_v58  ;;  %v9904_v58 = vand.u32 4294901760, %v8063_v54 }
  0xf0   : > { %1237 = vmatmul.mubr.f32.gmra.mrb[94].mxu1 %v7753_v22 }
  0xf1   : > { %1341 = vmatprep.mubr.f32.mxu1 %v10210_v15  ;;  %v10218_v15 = vand.u32 4294901760, %v7167_v40  ;;  %v2051_v40 = vand.u32 4294901760, %v7903_v25 }
  0xf3   : > { %v6417_v18 = vpack.c.bf16 %v10218_v15, %v10217_v42  ;;  %v10232_v15 = vand.u32 4294901760, %v7226_v4  ;;  %v2063_v4 = vand.u32 4294901760, %v7965_v27 }
  0xf4   : > { %1345 = vmatmul.mubr.f32.vlgmr.msra.gmra.mrb[96].mxu1 %v10215_v11  ;;  %v10221_v11 = vand.u32 4294901760, %v10171_v47  ;;  %v7928_v47 = vld [vmem:[%s9687_s3 + $0x10] sm:$0xff] }
  0xf5   : > { %6414 = vmatpush3.bf16.msra.mxu1 %v6413_v56  ;;  %1352 = vmatprep.mubr.f32.mxu1 %v10216_v45  ;;  %v7917_v45 = vpack.c.bf16 %v2051_v40, %v2048_v39  ;;  %v2054_v48 = vand.u32 4294901760, %v7928_v47  ;;  %v10228_v56 = vand.u32 4294901760, %v10175_v19  ;;  %v7960_v19 = vld [vmem:[%s9687_s3 + $0x20] sm:$0xff] }
  0xf6   : > { %6416 = vmatprep.subr.bf16.mxu1 %v6415_v16  ;;  %v7933_v16 = vld [vmem:[%s9687_s3 + $0x18] sm:$0xff]  ;;  %v2060_v62 = vand.u32 4294901760, %v7960_v19 }
  0xf7   : > { %10222 = vst [vmem:[#allocation2_spill] sm:$0xff] %v7917_v45  ;;  %6476 = vmatprep.subr.bf16.mxu0 %v7917_v45  ;;  %v2057_v50 = vand.u32 4294901760, %v7933_v16 }
  0xf8   : > { %1356 = vmatmul.mubr.f32.gmra.mrb[98].mxu1 %v10221_v11  ;;  %6478 = vmatpush3.bf16.msra.mxu0 %v7917_v45  ;;  %v10235_v11 = vand.u32 4294901760, %v10179_v32  ;;  %v7992_v32 = vld [vmem:[%s9687_s3 + $0x30] sm:$0xff] }
  0xf9   : > { %1363 = vmatprep.mubr.f32.mxu1 %v10223_v3  ;;  %6418 = vmatpush3.bf16.msra.mxu1 %v6417_v18  ;;  %v7949_v42 = vpack.c.bf16 %v2057_v50, %v2054_v48  ;;  %v6425_v18 = vpack.c.bf16 %v10232_v15, %v10231_v61  ;;  %v7981_v3 = vpack.c.bf16 %v2063_v4, %v2060_v62  ;;  %v2066_v12 = vand.u32 4294901760, %v7992_v32  ;;  %v8029_v15 = vld [vmem:[%s9687_s3 + $0x48] sm:$0xff] }
  0xfa   : > { %6420 = vmatprep.subr.bf16.mxu1 %v6419_v35  ;;  %v6427_v35 = vpack.c.bf16 %v10234_v59, %v10233_v31 }
  0xfb   : > { %10229 = vst [vmem:[#allocation20_spill] sm:$0xff] %v7949_v42  ;;  %6480 = vmatprep.subr.bf16.mxu0 %v7949_v42  ;;  %10236 = vst [vmem:[#allocation21_spill] sm:$0xff] %v7981_v3 }
  0xfc   : > { %1367 = vmatmul.mubr.f32.gmra.mrb[100].mxu1 %v10228_v56  ;;  %6482 = vmatpush3.bf16.msra.mxu0 %v7949_v42 }
  0xfd   : > { %1374 = vmatprep.mubr.f32.mxu1 %v10230_v52  ;;  %6422 = vmatpush3.bf16.msra.mxu1 %v6421_v37  ;;  %v7997_v37 = vld [vmem:[%s9687_s3 + $0x38] sm:$0xff]  ;;  %v10246_v52 = vand.u32 4294901760, %v7278_v44  ;;  %v9906_v44 = vand.u32 4294901760, %v8029_v15 }
  0xfe   : > { %6424 = vmatprep.subr.bf16.mxu1 %v6423_v63  ;;  %6484 = vmatprep.subr.bf16.mxu0 %v7981_v3  ;;  %v9912_v13 = vand.u32 4294901760, %v7997_v37  ;;  %v10242_v63 = vand.u32 4294901760, %v10183_v38  ;;  %v8024_v38 = vld [vmem:[%s9687_s3 + $0x40] sm:$0xff] }
  0xff   : > { %v6433_v61 = vpack.c.bf16 %v10246_v52, %v10245_v34  ;;  %v9911_v43 = vand.u32 4294901760, %v8024_v38  ;;  %v10256_v34 = vand.u32 4294901760, %v10191_v26  ;;  %v10258_v52 = vand.u32 4294901760, %v10192_v24  ;;  %v1999_v24 = vld [vmem:[%s8104_s6] sm:$0xff] }
 0x100   : > { %1378 = vmatmul.mubr.f32.gmra.mrb[102].mxu1 %v10235_v11  ;;  %6486 = vmatpush3.bf16.msra.mxu0 %v7981_v3  ;;  %v8013_v56 = vpack.c.bf16 %v9912_v13, %v2066_v12  ;;  %v10249_v11 = vand.u32 4294901760, %v10187_v60  ;;  %v8058_v60 = vld [vmem:[%s9687_s3 + $0x50] sm:$0xff] }
 0x101   : > { %1385 = vmatprep.mubr.f32.mxu1 %v10237_v6  ;;  %6426 = vmatpush3.bf16.msra.mxu1 %v6425_v18  ;;  %v10248_v18 = vand.u32 4294901760, %v7287_v55  ;;  %v8045_v51 = vpack.c.bf16 %v9906_v44, %v9911_v43  ;;  %v10251_v6 = vand.u32 4294901760, %v10188_v7  ;;  %v10254_v7 = vand.u32 4294901760, %v7304_v8  ;;  %v10307_v3 = vld [vmem:[#allocation76_spill] sm:$0xff] }
 0x102   : > { %6428 = vmatprep.subr.bf16.mxu1 %v6427_v35  ;;  %10243 = vst [vmem:[#allocation24_spill] sm:$0xff] %v8013_v56  ;;  %6488 = vmatprep.subr.bf16.mxu0 %v8013_v56  ;;  %v9905_v57 = vand.u32 4294901760, %v8058_v60 }
 0x103   : > { %v6435_v31 = vpack.c.bf16 %v10248_v18, %v10247_v53  ;;  %10250 = vst [vmem:[#allocation25_spill] sm:$0xff] %v8045_v51  ;;  %v10260_v53 = vand.u32 4294901760, %v7315_v30  ;;  %v8094_v18 = vld [vmem:[%s9687_s3 + $0x60] sm:$0xff] }
 0x104   : > { %1389 = vmatmul.mubr.f32.gmra.mrb[104].mxu1 %v10242_v63  ;;  %6490 = vmatpush3.bf16.msra.mxu0 %v8013_v56  ;;  %v8079_v8 = vpack.c.bf16 %v9904_v58, %v9905_v57  ;;  %v10272_v58 = vand.u32 4294901760, %v10202_v2 }
 0x105   : > { %1396 = vmatprep.mubr.f32.mxu1 %v10244_v33  ;;  %6430 = vmatpush3.bf16.msra.mxu1 %v6429_v46  ;;  %v4779_v59 = vpop.f32.mrb[0].mxu1  ;;  %v6437_v46 = vpack.c.bf16 %v10253_v41, %v10252_v10  ;;  %v10262_v10 = vand.u32 4294901760, %v10197_v0 }
 0x106   : > { %6432 = vmatprep.subr.bf16.mxu1 %v6431_v17  ;;  %v4780_v35 = vpop.f32.mrb[1].mxu1  ;;  %v6439_v17 = vpack.c.bf16 %v10255_v5, %v10254_v7  ;;  %6492 = vmatprep.subr.bf16.mxu0 %v8045_v51  ;;  %10257 = vst [vmem:[#allocation27_spill] sm:$0xff] %v8079_v8  ;;  %v8127_v7 = vsub.f32 %v7898_v23, %v2048_v39  ;;  %v8146_v23 = vld [vmem:[%s9687_s3 + $0x78] sm:$0xff] }
 0x107   : > { %v8047_v55 = vadd.f32 %v4780_v35, %v4779_v59  ;;  %v8111_v35 = vand.u32 4294901760, %v1999_v24  ;;  %v8132_v5 = vsub.f32 %v7903_v25, %v2051_v40  ;;  %v9897_v39 = vand.u32 4294901760, %v8146_v23 }
 0x108   : > { %1400 = vmatmul.mubr.f32.gmra.mrb[106].mxu1 %v10249_v11  ;;  %6494 = vmatpush3.bf16.msra.mxu0 %v8045_v51  ;;  %v2000_v11 = vld [vmem:[%s8104_s6 + $0x8] sm:$0xff]  ;;  %v2009_v51 = vld [vmem:[%s8104_s6 + $0x50] sm:$0xff] }
 0x109   : > { %1407 = vmatprep.mubr.f32.mxu1 %v10251_v6  ;;  %6434 = vmatpush3.bf16.msra.mxu1 %v6433_v61  ;;  %v4782_v63 = vpop.f32.mrb[2].mxu1  ;;  %v10259_v61 = vand.u32 4294901760, %v7313_v29  ;;  %v9902_v29 = vand.u32 4294901760, %v8094_v18  ;;  %10261 = vst [vmem:[#allocation29_spill] sm:$0xff] %v8111_v35  ;;  %v8149_v25 = vsub.f32 %v1999_v24, %v8111_v35 }
 0x10a   : > { %6436 = vmatprep.subr.bf16.mxu1 %v6435_v31  ;;  %v4783_v33 = vpop.f32.mrb[3].mxu1  ;;  %v8099_v31 = vld [vmem:[%s9687_s3 + $0x68] sm:$0xff]  ;;  %6496 = vmatprep.subr.bf16.mxu0 %v8079_v8 }
 0x10b   : > { %v8083_v9 = vadd.f32 %v4783_v33, %v4782_v63  ;;  %v6441_v26 = vpack.c.bf16 %v10260_v53, %v10259_v61  ;;  %v9896_v30 = vand.u32 4294901760, %v8099_v31  ;;  %v8141_v63 = vld [vmem:[%s9687_s3 + $0x70] sm:$0xff]  ;;  %v9901_v33 = vand.u32 4294901760, %v8127_v7 }
 0x10c   : > { %1411 = vmatmul.mubr.f32.gmra.mrb[108].mxu1 %v10256_v34  ;;  %6498 = vmatpush3.bf16.msra.mxu0 %v8079_v8  ;;  %v2001_v34 = vld [vmem:[%s8104_s6 + $0x10] sm:$0xff]  ;;  %v9899_v61 = vand.u32 4294901760, %v8149_v25  ;;  %v9900_v53 = vand.u32 4294901760, %v8132_v5  ;;  %v10289_v8 = vand.u32 4294901760, %v7997_v37 }
 0x10d   : > { %1418 = vmatprep.mubr.f32.mxu1 %v10258_v52  ;;  %6438 = vmatpush3.bf16.msra.mxu1 %v6437_v46  ;;  %v4785_v59 = vpop.f32.mrb[4].mxu1  ;;  %v8120_v41 = vpack.c.bf16 %v9896_v30, %v9902_v29  ;;  %v8122_v46 = vand.u32 4294901760, %v2000_v11 }
 0x10e   : > { %6440 = vmatprep.subr.bf16.mxu1 %v6439_v17  ;;  %v4786_v6 = vpop.f32.mrb[5].mxu1  ;;  %v10265_v17 = vand.u32 4294901760, %v10198_v49  ;;  %v9898_v49 = vand.u32 4294901760, %v8141_v63 }
 0x10f   : > { %10263 = vst [vmem:[#allocation33_spill] sm:$0xff] %v8120_v41  ;;  %10264 = vst [vmem:[#allocation34_spill] sm:$0xff] %v8122_v46  ;;  %v8134_v0 = vadd.f32 %v4786_v6, %v4785_v59  ;;  %6500 = vmatprep.subr.bf16.mxu0 %v8120_v41  ;;  %v8156_v40 = vsub.f32 %v2000_v11, %v8122_v46  ;;  %v10267_v59 = vand.u32 4294901760, %v10200_v20  ;;  %v10270_v20 = vand.u32 4294901760, %v10201_v14 }
 0x110   : > { %1422 = vmatmul.mubr.f32.gmra.mrb[110].mxu1 %v10262_v10  ;;  %6502 = vmatpush3.bf16.msra.mxu0 %v8120_v41  ;;  %v8172_v11 = vpack.c.bf16 %v9897_v39, %v9898_v49  ;;  %v2292_v10 = vsub.f32 %v8127_v7, %v9901_v33  ;;  %v2299_v39 = vsub.f32 %v8132_v5, %v9900_v53 }
 0x111   : > { %1429 = vmatprep.mubr.f32.mxu1 %v10265_v17  ;;  %6442 = vmatpush3.bf16.msra.mxu1 %v6441_v26  ;;  %v4788_v52 = vpop.f32.mrb[6].mxu1  ;;  %v2002_v26 = vld [vmem:[%s8104_s6 + $0x18] sm:$0xff]  ;;  %v9903_v6 = vand.u32 4294901760, %v8156_v40 }
 0x112   : > { %6444 = vmatprep.subr.bf16.mxu1 %v10152_v28  ;;  %v8163_v28 = vand.u32 4294901760, %v2001_v34  ;;  %v4789_v24 = vpop.f32.mrb[7].mxu1  ;;  %10268 = vst [vmem:[#allocation37_spill] sm:$0xff] %v8172_v11  ;;  %v8178_v17 = vand.u32 4294901760, %v2002_v26  ;;  %6504 = vmatprep.subr.bf16.mxu0 %v8172_v11  ;;  %v2293_v14 = vand.u32 4294901760, %v2292_v10  ;;  %v2300_v33 = vand.u32 4294901760, %v2299_v39 }
 0x113   : > { %v8180_v30 = vadd.f32 %v4789_v24, %v4788_v52  ;;  %v2141_v52 = vsub.f32 %v8156_v40, %v9903_v6  ;;  %v8211_v10 = vsub.f32 %v7933_v16, %v2057_v50 }
 0x114   : > { %10266 = vst [vmem:[#allocation36_spill] sm:$0xff] %v8163_v28  ;;  %1433 = vmatmul.mubr.f32.gmra.mrb[112].mxu1 %v10267_v59  ;;  %10269 = vst [vmem:[#allocation41_spill] sm:$0xff] %v8178_v17  ;;  %v2131_v59 = vsub.f32 %v8149_v25, %v9899_v61  ;;  %v8191_v49 = vsub.f32 %v2001_v34, %v8163_v28  ;;  %v8198_v24 = vsub.f32 %v2002_v26, %v8178_v17  ;;  %v2003_v61 = vld [vmem:[%s8104_s6 + $0x20] sm:$0xff]  ;;  %v2004_v26 = vld [vmem:[%s8104_s6 + $0x28] sm:$0xff] }
 0x115   : > { %1440 = vmatprep.mubr.f32.mxu1 %v10270_v20  ;;  %v8203_v20 = vsub.f32 %v7928_v47, %v2054_v48  ;;  %v4791_v53 = vpop.f32.mrb[8].mxu1  ;;  %6506 = vmatpush3.bf16.msra.mxu0 %v8172_v11  ;;  %v2142_v47 = vand.u32 4294901760, %v2141_v52  ;;  %v8218_v44 = vand.u32 4294901760, %v2003_v61  ;;  %v6507_v16 = vpack.c.bf16 %v2300_v33, %v2293_v14  ;;  %v2008_v11 = vld [vmem:[%s8104_s6 + $0x48] sm:$0xff] }
 0x116   : > { %10271 = vst [vmem:[#allocation43_spill] sm:$0xff] %v8198_v24  ;;  %v2132_v34 = vand.u32 4294901760, %v2131_v59  ;;  %v9908_v29 = vand.u32 4294901760, %v8191_v49  ;;  %v4792_v6 = vpop.f32.mrb[9].mxu1  ;;  %v9907_v48 = vand.u32 4294901760, %v8198_v24  ;;  %v10274_v59 = vand.u32 4294901760, %v10203_v21 }
 0x117   : > { %v9909_v57 = vand.u32 4294901760, %v8203_v20  ;;  %10273 = vst [vmem:[#allocation44_spill] sm:$0xff] %v8218_v44  ;;  %v8220_v39 = vadd.f32 %v4792_v6, %v4791_v53  ;;  %v9910_v50 = vand.u32 4294901760, %v8211_v10  ;;  %v8235_v53 = vsub.f32 %v2003_v61, %v8218_v44  ;;  %6508 = vmatprep.subr.bf16.mxu0 %v6507_v16  ;;  %v2005_v61 = vld [vmem:[%s8104_s6 + $0x30] sm:$0xff] }
 0x118   : > { %1444 = vmatmul.mubr.f32.gmra.mrb[114].mxu1 %v10272_v58  ;;  %5643 = vmatprep.mubr.f32.mxu0 %v2132_v34  ;;  %v2151_v2 = vsub.f32 %v8191_v49, %v9908_v29  ;;  %v2161_v58 = vsub.f32 %v8198_v24, %v9907_v48  ;;  %v8237_v6 = vand.u32 4294901760, %v2004_v26  ;;  %v8245_v34 = vsub.f32 %v7960_v19, %v2060_v62  ;;  %v10279_v62 = vld [vmem:[#allocation64_spill] sm:$0xff]  ;;  %v2011_v24 = vld [vmem:[%s8104_s6 + $0x60] sm:$0xff] }
 0x119   : > { %1451 = vmatprep.mubr.f32.mxu1 %v10274_v59  ;;  %5644 = vmatmul.mubr.f32.vlgmr.msra.gmra.mrb[0].mxu0 %v2142_v47  ;;  %v2306_v21 = vsub.f32 %v8203_v20, %v9909_v57  ;;  %10275 = vst [vmem:[#allocation45_spill] sm:$0xff] %v8235_v53  ;;  %v2313_v14 = vsub.f32 %v8211_v10, %v9910_v50  ;;  %v2006_v59 = vld [vmem:[%s8104_s6 + $0x38] sm:$0xff]  ;;  %v10277_v29 = vand.u32 4294901760, %v10204_v1  ;;  %v9913_v50 = vand.u32 4294901760, %v8235_v53 }
 0x11a   : > { %10276 = vst [vmem:[#allocation48_spill] sm:$0xff] %v8237_v6  ;;  %v4794_v33 = vpop.f32.mrb[10].mxu1  ;;  %v2152_v52 = vand.u32 4294901760, %v2151_v2  ;;  %v8250_v47 = vsub.f32 %v7965_v27, %v2063_v4  ;;  %6510 = vmatpush3.bf16.msra.mxu0 %v6507_v16  ;;  %v2162_v2 = vand.u32 4294901760, %v2161_v58  ;;  %v8258_v43 = vsub.f32 %v2004_v26, %v8237_v6 }
 0x11b   : > { %v4795_v48 = vpop.f32.mrb[11].mxu1  ;;  %v2307_v57 = vand.u32 4294901760, %v2306_v21  ;;  %v10280_v13 = vand.u32 4294901760, %v10279_v62  ;;  %v2314_v27 = vand.u32 4294901760, %v2313_v14  ;;  %v9914_v4 = vand.u32 4294901760, %v8245_v34 }
 0x11c   : > { %1455 = vmatmul.mubr.f32.gmra.mrb[116].mxu1 %v10277_v29  ;;  %10278 = vst [vmem:[#allocation50_spill] sm:$0xff] %v8258_v43  ;;  %v8260_v19 = vadd.f32 %v4795_v48, %v4794_v33  ;;  %5646 = vmatprep.mubr.f32.mxu0 %v2152_v52  ;;  %v9915_v1 = vand.u32 4294901760, %v8250_v47  ;;  %v2171_v29 = vsub.f32 %v8235_v53, %v9913_v50  ;;  %v9920_v26 = vand.u32 4294901760, %v8258_v43 }
 0x11d   : > { %1462 = vmatprep.mubr.f32.mxu1 %v10280_v13  ;;  %5647 = vmatmul.mubr.f32.gmra.mrb[2].mxu0 %v2162_v2  ;;  %v8270_v48 = vand.u32 4294901760, %v2005_v61  ;;  %v8272_v16 = vand.u32 4294901760, %v2006_v59  ;;  %v6511_v58 = vpack.c.bf16 %v2314_v27, %v2307_v57  ;;  %v2320_v21 = vsub.f32 %v8245_v34, %v9914_v4  ;;  %v10283_v2 = vld [vmem:[#allocation66_spill] sm:$0xff] }
 0x11e   : > { %v4797_v13 = vpop.f32.mrb[12].mxu1  ;;  %v2327_v33 = vsub.f32 %v8250_v47, %v9915_v1  ;;  %v8283_v52 = vsub.f32 %v7992_v32, %v2066_v12  ;;  %v10284_v62 = vand.u32 4294901760, %v10283_v2  ;;  %v2172_v50 = vand.u32 4294901760, %v2171_v29  ;;  %v2007_v1 = vld [vmem:[%s8104_s6 + $0x40] sm:$0xff]  ;;  %v10287_v32 = vld [vmem:[#allocation68_spill] sm:$0xff] }
 0x11f   : > { %10281 = vst [vmem:[#allocation52_spill] sm:$0xff] %v8270_v48  ;;  %10282 = vst [vmem:[#allocation53_spill] sm:$0xff] %v8272_v16  ;;  %v4798_v14 = vpop.f32.mrb[13].mxu1  ;;  %v2181_v57 = vsub.f32 %v8258_v43, %v9920_v26  ;;  %v8291_v27 = vsub.f32 %v2005_v61, %v8270_v48  ;;  %v8294_v4 = vsub.f32 %v2006_v59, %v8272_v16  ;;  %v10288_v12 = vand.u32 4294901760, %v10287_v32 }
 0x120   : > { %1466 = vmatmul.mubr.f32.gmra.mrb[118].mxu1 %v10284_v62  ;;  %v8298_v41 = vadd.f32 %v4798_v14, %v4797_v13  ;;  %6512 = vmatprep.subr.bf16.mxu0 %v6511_v58  ;;  %v2321_v2 = vand.u32 4294901760, %v2320_v21  ;;  %v2328_v29 = vand.u32 4294901760, %v2327_v33  ;;  %v9923_v62 = vand.u32 4294901760, %v8283_v52 }
 0x121   : > { %10285 = vst [vmem:[#allocation57_spill] sm:$0xff] %v8291_v27  ;;  %10286 = vst [vmem:[#allocation59_spill] sm:$0xff] %v8294_v4  ;;  %1473 = vmatprep.mubr.f32.mxu1 %v10288_v12  ;;  %6514 = vmatpush3.bf16.msra.mxu0 %v6511_v58  ;;  %v2182_v26 = vand.u32 4294901760, %v2181_v57  ;;  %v9928_v61 = vand.u32 4294901760, %v8291_v27  ;;  %v9929_v59 = vand.u32 4294901760, %v8294_v4  ;;  %v8308_v13 = vsub.f32 %v7997_v37, %v10289_v8  ;;  %v10292_v57 = vld [vmem:[#allocation69_spill] sm:$0xff] }
 0x122   : > { %5649 = vmatprep.mubr.f32.mxu0 %v2172_v50  ;;  %v4800_v14 = vpop.f32.mrb[14].mxu1  ;;  %v6515_v32 = vpack.c.bf16 %v2328_v29, %v2321_v2  ;;  %v2334_v21 = vsub.f32 %v8283_v52, %v9923_v62  ;;  %v8313_v33 = vand.u32 4294901760, %v2007_v1  ;;  %v8315_v50 = vand.u32 4294901760, %v2008_v11  ;;  %v2010_v2 = vld [vmem:[%s8104_s6 + $0x58] sm:$0xff] }
 0x123   : > { %v4801_v58 = vpop.f32.mrb[15].mxu1  ;;  %v10293_v12 = vand.u32 4294901760, %v10292_v57  ;;  %5650 = vmatmul.mubr.f32.gmra.mrb[4].mxu0 %v2182_v26  ;;  %v2191_v37 = vsub.f32 %v8291_v27, %v9928_v61  ;;  %v2201_v8 = vsub.f32 %v8294_v4, %v9929_v59  ;;  %v10294_v29 = vand.u32 4294901760, %v8024_v38  ;;  %v10295_v57 = vld [vmem:[#allocation73_spill] sm:$0xff] }
 0x124   : > { %10290 = vst [vmem:[#allocation60_spill] sm:$0xff] %v8313_v33  ;;  %10291 = vst [vmem:[#allocation61_spill] sm:$0xff] %v8315_v50  ;;  %v8332_v56 = vadd.f32 %v4801_v58, %v4800_v14  ;;  %v10296_v26 = vand.u32 4294901760, %v10295_v57  ;;  %6516 = vmatprep.subr.bf16.mxu0 %v6515_v32  ;;  %v8337_v61 = vsub.f32 %v2007_v1, %v8313_v33  ;;  %v10300_v1 = vand.u32 4294901760, %v8029_v15 }
 0x125   : > { %1477 = vmatmul.mubr.f32.gmra.mrb[120].mxu1 %v10293_v12  ;;  %v8329_v62 = vsub.f32 %v8024_v38, %v10294_v29  ;;  %v2335_v12 = vand.u32 4294901760, %v2334_v21  ;;  %v8340_v59 = vsub.f32 %v2008_v11, %v8315_v50  ;;  %6518 = vmatpush3.bf16.msra.mxu0 %v6515_v32  ;;  %v2192_v4 = vand.u32 4294901760, %v2191_v37 }
 0x126   : > { %1484 = vmatprep.mubr.f32.mxu1 %v10296_v26  ;;  %10297 = vst [vmem:[#allocation64_spill] sm:$0xff] %v8337_v61  ;;  %v2202_v27 = vand.u32 4294901760, %v2201_v8  ;;  %v10299_v38 = vand.u32 4294901760, %v8308_v13  ;;  %v4803_v29 = vpop.f32.mrb[16].mxu1  ;;  %v8352_v11 = vsub.f32 %v8029_v15, %v10300_v1  ;;  %v8354_v32 = vand.u32 4294901760, %v2009_v51  ;;  %v10302_v8 = vld [vmem:[#allocation75_spill] sm:$0xff] }
 0x127   : > { %10298 = vst [vmem:[#allocation66_spill] sm:$0xff] %v8340_v59  ;;  %v9940_v58 = vand.u32 4294901760, %v8329_v62  ;;  %v4804_v37 = vpop.f32.mrb[17].mxu1  ;;  %v10303_v26 = vand.u32 4294901760, %v10302_v8  ;;  %5652 = vmatprep.mubr.f32.mxu0 %v2192_v4  ;;  %v8361_v21 = vand.u32 4294901760, %v2010_v2  ;;  %v10305_v43 = vand.u32 4294901760, %v8058_v60 }
 0x128   : > { %v2341_v14 = vsub.f32 %v8308_v13, %v10299_v38  ;;  %10301 = vst [vmem:[#allocation68_spill] sm:$0xff] %v8354_v32  ;;  %v8368_v1 = vadd.f32 %v4804_v37, %v4803_v29  ;;  %v10308_v53 = vand.u32 4294901760, %v10307_v3  ;;  %5653 = vmatmul.mubr.f32.gmra.mrb[6].mxu0 %v2202_v27  ;;  %v10309_v4 = vand.u32 4294901760, %v8337_v61 }
 0x129   : > { %1488 = vmatmul.mubr.f32.gmra.mrb[122].mxu1 %v10303_v26  ;;  %v2348_v57 = vsub.f32 %v8329_v62, %v9940_v58  ;;  %10304 = vst [vmem:[#allocation69_spill] sm:$0xff] %v8361_v21  ;;  %v8366_v15 = vsub.f32 %v8058_v60, %v10305_v43  ;;  %v10310_v8 = vand.u32 4294901760, %v8340_v59  ;;  %v9947_v58 = vand.u32 4294901760, %v8352_v11 }
 0x12a   : > { %v2342_v38 = vand.u32 4294901760, %v2341_v14  ;;  %10306 = vst [vmem:[#allocation73_spill] sm:$0xff] %v8368_v1  ;;  %1495 = vmatprep.mubr.f32.mxu1 %v10308_v53  ;;  %v2211_v14 = vsub.f32 %v8337_v61, %v10309_v4  ;;  %v8381_v60 = vsub.f32 %v2009_v51, %v8354_v32  ;;  %v8384_v3 = vsub.f32 %v2010_v2, %v8361_v21  ;;  %v2012_v53 = vld [vmem:[%s8104_s6 + $0x68] sm:$0xff]  ;;  %v4806_v27 = vpop.f32.mrb[18].mxu1 }
 0x12b   : > { %v2221_v26 = vsub.f32 %v8340_v59, %v10310_v8  ;;  %v2349_v43 = vand.u32 4294901760, %v2348_v57  ;;  %v2355_v4 = vsub.f32 %v8352_v11, %v9947_v58  ;;  %v4807_v59 = vpop.f32.mrb[19].mxu1  ;;  %v10314_v57 = vand.u32 4294901760, %v8063_v54  ;;  %v10317_v58 = vld [vmem:[#allocation79_spill] sm:$0xff] }
 0x12c   : > { %v6519_v42 = vpack.c.bf16 %v2342_v38, %v2335_v12  ;;  %10311 = vst [vmem:[#allocation75_spill] sm:$0xff] %v8381_v60  ;;  %10312 = vst [vmem:[#allocation76_spill] sm:$0xff] %v8384_v3  ;;  %v2212_v29 = vand.u32 4294901760, %v2211_v14  ;;  %v10313_v12 = vand.u32 4294901760, %v7711_v36  ;;  %v8400_v14 = vand.u32 4294901760, %v2011_v24 }
 0x12d   : > { %v2222_v37 = vand.u32 4294901760, %v2221_v26  ;;  %v8398_v38 = vsub.f32 %v8063_v54, %v10314_v57  ;;  %v8402_v26 = vadd.f32 %v4807_v59, %v4806_v27  ;;  %v10318_v8 = vand.u32 4294901760, %v10317_v58 }
 0x12e   : > { %1499 = vmatmul.mubr.f32.gmra.mrb[124].mxu1 %v10313_v12  ;;  %6520 = vmatprep.subr.bf16.mxu0 %v6519_v42  ;;  %10315 = vst [vmem:[#allocation80_spill] sm:$0xff] %v8400_v14  ;;  %v2356_v36 = vand.u32 4294901760, %v2355_v4  ;;  %v10319_v12 = vand.u32 4294901760, %v8366_v15  ;;  %v8409_v51 = vand.u32 4294901760, %v2012_v53  ;;  %v10321_v54 = vand.u32 4294901760, %v8381_v60  ;;  %v4809_v4 = vpop.f32.mrb[20].mxu1 }
 0x12f   : > { %10316 = vst [vmem:[#allocation81_spill] sm:$0xff] %v8402_v26  ;;  %1506 = vmatprep.mubr.f32.mxu1 %v10318_v8  ;;  %6522 = vmatpush3.bf16.msra.mxu0 %v6519_v42  ;;  %v10322_v59 = vand.u32 4294901760, %v8384_v3  ;;  %v8419_v42 = vsub.f32 %v2011_v24, %v8400_v14  ;;  %v2014_v26 = vld [vmem:[%s8104_s6 + $0x78] sm:$0xff]  ;;  %v10326_v27 = vand.u32 4294901760, %v7753_v22  ;;  %v10330_v22 = vand.u32 4294901760, %v8099_v31 }
 0x130   : > { %v2362_v2 = vsub.f32 %v8366_v15, %v10319_v12  ;;  %10320 = vst [vmem:[#allocation79_spill] sm:$0xff] %v8409_v51  ;;  %5655 = vmatprep.mubr.f32.mxu0 %v2212_v29  ;;  %v2231_v57 = vsub.f32 %v8381_v60, %v10321_v54  ;;  %v6523_v8 = vpack.c.bf16 %v2356_v36, %v2349_v43  ;;  %v10325_v29 = vand.u32 4294901760, %v8094_v18  ;;  %v2013_v60 = vld [vmem:[%s8104_s6 + $0x70] sm:$0xff] }
 0x131   : > { %v2241_v58 = vsub.f32 %v8384_v3, %v10322_v59  ;;  %10323 = vst [vmem:[#allocation82_spill] sm:$0xff] %v8419_v42  ;;  %5656 = vmatmul.mubr.f32.gmra.mrb[8].mxu0 %v2222_v37  ;;  %v8422_v61 = vsub.f32 %v2012_v53, %v8409_v51  ;;  %v4810_v59 = vpop.f32.mrb[21].mxu1  ;;  %v10327_v37 = vand.u32 4294901760, %v8398_v38  ;;  %v9954_v53 = vand.u32 4294901760, %v8419_v42  ;;  %v10329_v36 = vld [vmem:[#allocation16_spill] sm:$0xff] }
 0x132   : > { %v2363_v12 = vand.u32 4294901760, %v2362_v2  ;;  %v8427_v54 = vsub.f32 %v8094_v18, %v10325_v29  ;;  %1510 = vmatmul.mubr.f32.gmra.mrb[126].mxu1 %v10326_v27  ;;  %v2232_v24 = vand.u32 4294901760, %v2231_v57  ;;  %v8437_v2 = vadd.f32 %v4810_v59, %v4809_v4  ;;  %6524 = vmatprep.subr.bf16.mxu0 %v6523_v8 }
 0x133   : > { %10324 = vst [vmem:[#allocation83_spill] sm:$0xff] %v8422_v61  ;;  %v2242_v3 = vand.u32 4294901760, %v2241_v58  ;;  %v2369_v43 = vsub.f32 %v8398_v38, %v10327_v37  ;;  %1676 = vmatprep.mubr.f32.mxu1 %v10329_v36  ;;  %v9957_v18 = vand.u32 4294901760, %v8422_v61  ;;  %v8445_v57 = vsub.f32 %v8099_v31, %v10330_v22  ;;  %6526 = vmatpush3.bf16.msra.mxu0 %v6523_v8  ;;  %v4812_v37 = vpop.f32.mrb[22].mxu1 }
 0x134   : > { %10328 = vst [vmem:[#allocation84_spill] sm:$0xff] %v8437_v2  ;;  %5658 = vmatprep.mubr.f32.mxu0 %v2232_v24  ;;  %v2251_v27 = vsub.f32 %v8419_v42, %v9954_v53  ;;  %v8450_v4 = vand.u32 4294901760, %v2013_v60  ;;  %v8452_v59 = vand.u32 4294901760, %v2014_v26  ;;  %v10333_v31 = vand.u32 4294901760, %v8427_v54  ;;  %v4813_v53 = vpop.f32.mrb[23].mxu1  ;;  %v10335_v42 = vld [vmem:[#allocation17_spill] sm:$0xff] }
 0x135   : > { %v2370_v58 = vand.u32 4294901760, %v2369_v43  ;;  %5659 = vmatmul.mubr.f32.gmra.mrb[10].mxu0 %v2242_v3  ;;  %v2261_v29 = vsub.f32 %v8422_v61, %v9957_v18  ;;  %v10334_v43 = vand.u32 4294901760, %v8141_v63  ;;  %v8473_v61 = vadd.f32 %v4813_v53, %v4812_v37  ;;  %v10340_v24 = vld [vmem:[#allocation22_spill] sm:$0xff] }
 0x136   : > { %10331 = vst [vmem:[#allocation85_spill] sm:$0xff] %v8450_v4  ;;  %10332 = vst [vmem:[#allocation86_spill] sm:$0xff] %v8452_v59  ;;  %v2376_v8 = vsub.f32 %v8427_v54, %v10333_v31  ;;  %1678 = vmatmul.mubr.f32.vlgmr.msra.gmra.mrb[128].mxu1 %v10335_v42  ;;  %v2252_v3 = vand.u32 4294901760, %v2251_v27  ;;  %v8468_v36 = vsub.f32 %v2013_v60, %v8450_v4  ;;  %v10339_v31 = vld [vmem:[#allocation3_spill] sm:$0xff] }
 0x137   : > { %v8464_v22 = vsub.f32 %v8141_v63, %v10334_v43  ;;  %v6527_v2 = vpack.c.bf16 %v2370_v58, %v2363_v12  ;;  %v8471_v18 = vsub.f32 %v2014_v26, %v8452_v59  ;;  %10338 = vst [vmem:[#allocation89_spill] sm:$0xff] %v8473_v61  ;;  %6446 = vmatpush3.bf16.msra.mxu1 %v10339_v31  ;;  %v2262_v1 = vand.u32 4294901760, %v2261_v29  ;;  %v10342_v12 = vld [vmem:[#allocation4_spill] sm:$0xff]  ;;  %v4815_v29 = vpop.f32.mrb[24].mxu1  ;;  %v10345_v31 = vld [vmem:[#allocation23_spill] sm:$0xff] }
 0x138   : > { %10336 = vst [vmem:[#allocation87_spill] sm:$0xff] %v8468_v36  ;;  %1683 = vmatprep.mubr.f32.mxu1 %v10340_v24  ;;  %v2377_v63 = vand.u32 4294901760, %v2376_v8  ;;  %v10341_v43 = vand.u32 4294901760, %v8445_v57  ;;  %6448 = vmatprep.subr.bf16.mxu1 %v10342_v12  ;;  %v9960_v60 = vand.u32 4294901760, %v8468_v36  ;;  %v10343_v58 = vand.u32 4294901760, %v8146_v23  ;;  %v4816_v8 = vpop.f32.mrb[25].mxu1 }
 0x139   : > { %10337 = vst [vmem:[#allocation88_spill] sm:$0xff] %v8471_v18  ;;  %6528 = vmatprep.subr.bf16.mxu0 %v6527_v2  ;;  %v9963_v26 = vand.u32 4294901760, %v8471_v18  ;;  %v9966_v53 = vand.u32 4294901760, %v8464_v22  ;;  %5661 = vmatprep.mubr.f32.mxu0 %v2252_v3  ;;  %v8500_v3 = vadd.f32 %v4816_v8, %v4815_v29  ;;  %v10349_v24 = vld [vmem:[#allocation28_spill] sm:$0xff] }
 0x13a   : > { %v2383_v42 = vsub.f32 %v8445_v57, %v10341_v43  ;;  %v8487_v27 = vsub.f32 %v8146_v23, %v10343_v58  ;;  %6530 = vmatpush3.bf16.msra.mxu0 %v6527_v2  ;;  %1685 = vmatmul.mubr.f32.gmra.mrb[130].mxu1 %v10345_v31  ;;  %v2271_v43 = vsub.f32 %v8468_v36, %v9960_v60  ;;  %v10347_v58 = vld [vmem:[#allocation5_spill] sm:$0xff]  ;;  %v10348_v31 = vld [vmem:[#allocation6_spill] sm:$0xff] }
 0x13b   : > { %5662 = vmatmul.mubr.f32.gmra.mrb[12].mxu0 %v2262_v1  ;;  %v2281_v12 = vsub.f32 %v8471_v18, %v9963_v26  ;;  %v2390_v23 = vsub.f32 %v8464_v22, %v9966_v53  ;;  %6450 = vmatpush3.bf16.msra.mxu1 %v10347_v58  ;;  %v4818_v18 = vpop.f32.mrb[26].mxu1  ;;  %v10350_v58 = vld [vmem:[#allocation30_spill] sm:$0xff] }
 0x13c   : > { %10344 = vst [vmem:[#allocation3_spill] sm:$0xff] %v8487_v27  ;;  %v2384_v37 = vand.u32 4294901760, %v2383_v42  ;;  %v9967_v2 = vand.u32 4294901760, %v8487_v27  ;;  %v10346_v42 = vld [vmem:[#allocation26_spill] sm:$0xff]  ;;  %6452 = vmatprep.subr.bf16.mxu1 %v10348_v31  ;;  %v2272_v60 = vand.u32 4294901760, %v2271_v43  ;;  %v4819_v61 = vpop.f32.mrb[27].mxu1 }
 0x13d   : > { %1690 = vmatprep.mubr.f32.mxu1 %v10346_v42  ;;  %v2391_v36 = vand.u32 4294901760, %v2390_v23  ;;  %v2282_v53 = vand.u32 4294901760, %v2281_v12  ;;  %v8509_v8 = vadd.f32 %v4819_v61, %v4818_v18  ;;  %v6539_v12 = vpack.c.bf16 %v8132_v5, %v8127_v7  ;;  %v10354_v61 = vld [vmem:[#allocation32_spill] sm:$0xff]  ;;  %v10355_v18 = vld [vmem:[#allocation9_spill] sm:$0xff] }
 0x13e   : > { %v6531_v1 = vpack.c.bf16 %v2384_v37, %v2377_v63  ;;  %v2397_v26 = vsub.f32 %v8487_v27, %v9967_v2  ;;  %1692 = vmatmul.mubr.f32.gmra.mrb[132].mxu1 %v10349_v24  ;;  %v10351_v63 = vld [vmem:[#allocation7_spill] sm:$0xff]  ;;  %v10352_v37 = vld [vmem:[#allocation8_spill] sm:$0xff]  ;;  %5664 = vmatprep.mubr.f32.mxu0 %v2272_v60 }
 0x13f   : > { %1697 = vmatprep.mubr.f32.mxu1 %v10350_v58  ;;  %6454 = vmatpush3.bf16.msra.mxu1 %v10351_v63  ;;  %v4821_v43 = vpop.f32.mrb[28].mxu1  ;;  %v10353_v2 = vld [vmem:[#allocation31_spill] sm:$0xff] }
 0x140   : > { %6532 = vmatprep.subr.bf16.mxu0 %v6531_v1  ;;  %v2398_v29 = vand.u32 4294901760, %v2397_v26  ;;  %6456 = vmatprep.subr.bf16.mxu1 %v10352_v37  ;;  %v4822_v23 = vpop.f32.mrb[29].mxu1  ;;  %v10359_v37 = vld [vmem:[#allocation38_spill] sm:$0xff] }
 0x141   : > { %6534 = vmatpush3.bf16.msra.mxu0 %v6531_v1  ;;  %v8517_v26 = vadd.f32 %v4822_v23, %v4821_v43  ;;  %v10356_v1 = vld [vmem:[#allocation10_spill] sm:$0xff]  ;;  %v10360_v43 = vld [vmem:[#allocation11_spill] sm:$0xff]  ;;  %v10361_v23 = vld [vmem:[#allocation12_spill] sm:$0xff] }
 0x142   : > { %v6535_v31 = vpack.c.bf16 %v2398_v29, %v2391_v36  ;;  %5665 = vmatmul.mubr.f32.gmra.mrb[14].mxu0 %v2282_v53  ;;  %1699 = vmatmul.mubr.f32.gmra.mrb[134].mxu1 %v10353_v2  ;;  %v10357_v53 = vld [vmem:[#allocation35_spill] sm:$0xff]  ;;  %v6543_v29 = vpack.c.bf16 %v8211_v10, %v8203_v20 }
 0x143   : > { %1704 = vmatprep.mubr.f32.mxu1 %v10354_v61  ;;  %6458 = vmatpush3.bf16.msra.mxu1 %v10355_v18  ;;  %v4824_v60 = vpop.f32.mrb[30].mxu1 }
 0x144   : > { %6536 = vmatprep.subr.bf16.mxu0 %v6535_v31  ;;  %6460 = vmatprep.subr.bf16.mxu1 %v10356_v1  ;;  %v4825_v36 = vpop.f32.mrb[31].mxu1  ;;  %v10362_v1 = vld [vmem:[#allocation39_spill] sm:$0xff] }
 0x145   : > { %6538 = vmatpush3.bf16.msra.mxu0 %v6535_v31  ;;  %5699 = vmatprep.mubr.f32.mxu0 %v8111_v35  ;;  %v8526_v63 = vadd.f32 %v4825_v36, %v4824_v60  ;;  %v6547_v60 = vpack.c.bf16 %v8250_v47, %v8245_v34  ;;  %v10363_v35 = vld [vmem:[#allocation40_spill] sm:$0xff] }
 0x146   : > { %6540 = vmatprep.subr.bf16.mxu0 %v6539_v12  ;;  %1706 = vmatmul.mubr.f32.gmra.mrb[136].mxu1 %v10357_v53 }
 0x147   : > { %10358 = vst [vmem:[#allocation4_spill] sm:$0xff] %v8526_v63  ;;  %1711 = vmatprep.mubr.f32.mxu1 %v10359_v37  ;;  %6462 = vmatpush3.bf16.msra.mxu1 %v10360_v43  ;;  %v4859_v31 = vpop.f32.mrb[32].mxu1  ;;  %v10364_v63 = vld [vmem:[#allocation13_spill] sm:$0xff]  ;;  %v10365_v43 = vld [vmem:[#allocation14_spill] sm:$0xff] }
 0x148   : > { %6464 = vmatprep.subr.bf16.mxu1 %v10361_v23  ;;  %5700 = vmatmul.mubr.f32.vlgmr.msra.gmra.mrb[0].mxu0 %v8122_v46  ;;  %v4860_v18 = vpop.f32.mrb[33].mxu1  ;;  %v10366_v46 = vld [vmem:[#allocation42_spill] sm:$0xff] }
 0x149   : > { %6542 = vmatpush3.bf16.msra.mxu0 %v6539_v12  ;;  %5702 = vmatprep.mubr.f32.mxu0 %v8163_v28  ;;  %v4861_v36 = vadd.f32 %v4860_v18, %v4859_v31  ;;  %v6551_v31 = vpack.c.bf16 %v8308_v13, %v8283_v52 }
 0x14a   : > { %1713 = vmatmul.mubr.f32.gmra.mrb[138].mxu1 %v10362_v1  ;;  %6544 = vmatprep.subr.bf16.mxu0 %v6543_v29 }
 0x14b   : > { %1718 = vmatprep.mubr.f32.mxu1 %v10363_v35  ;;  %6466 = vmatpush3.bf16.msra.mxu1 %v10364_v63  ;;  %v8541_v12 = vadd.f32 %v4861_v36, %v8047_v55  ;;  %v4862_v23 = vpop.f32.mrb[34].mxu1  ;;  %v10367_v63 = vld [vmem:[#allocation46_spill] sm:$0xff] }
 0x14c   : > { %6468 = vmatprep.subr.bf16.mxu1 %v10365_v43  ;;  %5703 = vmatmul.mubr.f32.gmra.mrb[2].mxu0 %v8178_v17  ;;  %v4863_v28 = vpop.f32.mrb[35].mxu1  ;;  %v10368_v43 = vld [vmem:[#allocation15_spill] sm:$0xff]  ;;  %v10369_v17 = vld [vmem:[#allocation18_spill] sm:$0xff] }
 0x14d   : > { %6546 = vmatpush3.bf16.msra.mxu0 %v6543_v29  ;;  %5705 = vmatprep.mubr.f32.mxu0 %v8218_v44  ;;  %v4864_v18 = vadd.f32 %v4863_v28, %v4862_v23  ;;  %v10370_v44 = vld [vmem:[#allocation47_spill] sm:$0xff]  ;;  %v6555_v28 = vpack.c.bf16 %v8352_v11, %v8329_v62 }
 0x14e   : > { %1720 = vmatmul.mubr.f32.gmra.mrb[140].mxu1 %v10366_v46  ;;  %6548 = vmatprep.subr.bf16.mxu0 %v6547_v60 }
 0x14f   : > { %1725 = vmatprep.mubr.f32.mxu1 %v10367_v63  ;;  %6470 = vmatpush3.bf16.msra.mxu1 %v10368_v43  ;;  %v8552_v55 = vadd.f32 %v4864_v18, %v8083_v9  ;;  %v4865_v29 = vpop.f32.mrb[36].mxu1  ;;  %v10371_v43 = vld [vmem:[#allocation49_spill] sm:$0xff] }
 0x150   : > { %6472 = vmatprep.subr.bf16.mxu1 %v10369_v17  ;;  %5706 = vmatmul.mubr.f32.gmra.mrb[4].mxu0 %v8237_v6  ;;  %v4866_v36 = vpop.f32.mrb[37].mxu1  ;;  %v10372_v17 = vld [vmem:[#allocation19_spill] sm:$0xff]  ;;  %v10374_v6 = vld [vmem:[#allocation54_spill] sm:$0xff] }
 0x151   : > { %6550 = vmatpush3.bf16.msra.mxu0 %v6547_v60  ;;  %5708 = vmatprep.mubr.f32.mxu0 %v8270_v48  ;;  %v4867_v23 = vadd.f32 %v4866_v36, %v4865_v29  ;;  %v10373_v48 = vld [vmem:[#allocation51_spill] sm:$0xff]  ;;  %v6559_v29 = vpack.c.bf16 %v8398_v38, %v8366_v15 }
 0x152   : > { %1727 = vmatmul.mubr.f32.gmra.mrb[142].mxu1 %v10370_v44  ;;  %6552 = vmatprep.subr.bf16.mxu0 %v6551_v31 }
 0x153   : > { %1732 = vmatprep.mubr.f32.mxu1 %v10371_v43  ;;  %6474 = vmatpush3.bf16.msra.mxu1 %v10372_v17  ;;  %v8562_v9 = vadd.f32 %v4867_v23, %v8134_v0  ;;  %v4868_v60 = vpop.f32.mrb[38].mxu1  ;;  %v10375_v23 = vld [vmem:[#allocation55_spill] sm:$0xff] }
 0x154   : > { %5709 = vmatmul.mubr.f32.gmra.mrb[6].mxu0 %v8272_v16  ;;  %v4869_v18 = vpop.f32.mrb[39].mxu1 }
 0x155   : > { %6554 = vmatpush3.bf16.msra.mxu0 %v6551_v31  ;;  %5711 = vmatprep.mubr.f32.mxu0 %v8313_v33  ;;  %v4870_v36 = vadd.f32 %v4869_v18, %v4868_v60  ;;  %v6563_v33 = vpack.c.bf16 %v8445_v57, %v8427_v54  ;;  %v10376_v60 = vld [vmem:[#allocation56_spill] sm:$0xff] }
 0x156   : > { %1734 = vmatmul.mubr.f32.gmra.mrb[144].mxu1 %v10373_v48  ;;  %6556 = vmatprep.subr.bf16.mxu0 %v6555_v28 }
 0x157   : > { %1739 = vmatprep.mubr.f32.mxu1 %v10374_v6  ;;  %v8571_v17 = vadd.f32 %v4870_v36, %v8180_v30  ;;  %v4871_v0 = vpop.f32.mrb[40].mxu1  ;;  %v10377_v36 = vld [vmem:[#allocation58_spill] sm:$0xff] }
 0x158   : > { %5712 = vmatmul.mubr.f32.gmra.mrb[8].mxu0 %v8315_v50  ;;  %v4872_v31 = vpop.f32.mrb[41].mxu1 }
 0x159   : > { %6558 = vmatpush3.bf16.msra.mxu0 %v6555_v28  ;;  %5714 = vmatprep.mubr.f32.mxu0 %v8354_v32  ;;  %v4873_v16 = vadd.f32 %v4872_v31, %v4871_v0  ;;  %v6567_v32 = vpack.c.bf16 %v8487_v27, %v8464_v22  ;;  %v10378_v0 = vld [vmem:[#allocation62_spill] sm:$0xff]  ;;  %v10415_v27 = vld [vmem:[#allocation27_spill] sm:$0xff] }
 0x15a   : > { %1741 = vmatmul.mubr.f32.gmra.mrb[146].mxu1 %v10375_v23  ;;  %6560 = vmatprep.subr.bf16.mxu0 %v6559_v29 }
 0x15b   : > { %1746 = vmatprep.mubr.f32.mxu1 %v10376_v60  ;;  %v8580_v18 = vadd.f32 %v4873_v16, %v8220_v39  ;;  %v4874_v30 = vpop.f32.mrb[42].mxu1 }
 0x15c   : > { %5715 = vmatmul.mubr.f32.gmra.mrb[10].mxu0 %v8361_v21  ;;  %v4875_v28 = vpop.f32.mrb[43].mxu1  ;;  %v10381_v21 = vld [vmem:[#allocation65_spill] sm:$0xff] }
 0x15d   : > { %6562 = vmatpush3.bf16.msra.mxu0 %v6559_v29  ;;  %5717 = vmatprep.mubr.f32.mxu0 %v8400_v14  ;;  %v4876_v50 = vadd.f32 %v4875_v28, %v4874_v30  ;;  %v10380_v29 = vld [vmem:[#allocation63_spill] sm:$0xff] }
 0x15e   : > { %1748 = vmatmul.mubr.f32.gmra.mrb[148].mxu1 %v10377_v36  ;;  %6564 = vmatprep.subr.bf16.mxu0 %v6563_v33 }
 0x15f   : > { %1753 = vmatprep.mubr.f32.mxu1 %v10378_v0  ;;  %v8589_v31 = vadd.f32 %v4876_v50, %v8260_v19  ;;  %v4877_v39 = vpop.f32.mrb[44].mxu1  ;;  %v10409_v0 = vld [vmem:[#allocation22_spill] sm:$0xff] }
 0x160   : > { %5718 = vmatmul.mubr.f32.gmra.mrb[12].mxu0 %v8409_v51  ;;  %v4878_v16 = vpop.f32.mrb[45].mxu1  ;;  %v10388_v51 = vld [vmem:[#allocation72_spill] sm:$0xff] }
 0x161   : > { %10379 = vst [vmem:[#allocation26_spill] sm:$0xff] %v8589_v31  ;;  %6566 = vmatpush3.bf16.msra.mxu0 %v6563_v33  ;;  %5720 = vmatprep.mubr.f32.mxu0 %v8450_v4  ;;  %v4879_v14 = vadd.f32 %v4878_v16, %v4877_v39  ;;  %v10383_v33 = vld [vmem:[#allocation67_spill] sm:$0xff]  ;;  %v10384_v4 = vld [vmem:[#allocation70_spill] sm:$0xff]  ;;  %v10408_v31 = vld [vmem:[#allocation25_spill] sm:$0xff] }
 0x162   : > { %1755 = vmatmul.mubr.f32.gmra.mrb[150].mxu1 %v10380_v29  ;;  %6568 = vmatprep.subr.bf16.mxu0 %v6567_v32  ;;  %v10402_v29 = vld [vmem:[#allocation16_spill] sm:$0xff] }
 0x163   : > { %1760 = vmatprep.mubr.f32.mxu1 %v10381_v21  ;;  %v8596_v30 = vadd.f32 %v4879_v14, %v8298_v41  ;;  %v4880_v28 = vpop.f32.mrb[46].mxu1  ;;  %v10387_v14 = vld [vmem:[#allocation20_spill] sm:$0xff] }
 0x164   : > { %5721 = vmatmul.mubr.f32.gmra.mrb[14].mxu0 %v8452_v59  ;;  %v4881_v19 = vpop.f32.mrb[47].mxu1  ;;  %v10401_v21 = vld [vmem:[#allocation24_spill] sm:$0xff] }
 0x165   : > { %10382 = vst [vmem:[#allocation5_spill] sm:$0xff] %v8596_v30  ;;  %6570 = vmatpush3.bf16.msra.mxu0 %v6567_v32  ;;  %5755 = vmatprep.mubr.f32.mxu0 %v8149_v25  ;;  %v4882_v50 = vadd.f32 %v4881_v19, %v4880_v28  ;;  %v10386_v32 = vld [vmem:[#allocation71_spill] sm:$0xff]  ;;  %v10390_v19 = vld [vmem:[#allocation73_spill] sm:$0xff] }
 0x166   : > { %1762 = vmatmul.mubr.f32.gmra.mrb[152].mxu1 %v10383_v33  ;;  %6572 = vmatprep.subr.bf16.mxu0 %v7917_v45  ;;  %v10389_v28 = vld [vmem:[#allocation43_spill] sm:$0xff]  ;;  %v10394_v33 = vld [vmem:[#allocation21_spill] sm:$0xff] }
 0x167   : > { %1767 = vmatprep.mubr.f32.mxu1 %v10384_v4  ;;  %v8604_v39 = vadd.f32 %v4882_v50, %v8332_v56  ;;  %v4883_v16 = vpop.f32.mrb[48].mxu1  ;;  %v10392_v50 = vld [vmem:[#allocation45_spill] sm:$0xff] }
 0x168   : > { %5756 = vmatmul.mubr.f32.vlgmr.msra.gmra.mrb[0].mxu0 %v8156_v40  ;;  %v4884_v41 = vpop.f32.mrb[49].mxu1  ;;  %v10395_v30 = vld [vmem:[#allocation77_spill] sm:$0xff] }
 0x169   : > { %10385 = vst [vmem:[#allocation6_spill] sm:$0xff] %v8604_v39  ;;  %6574 = vmatpush3.bf16.msra.mxu0 %v7917_v45  ;;  %5758 = vmatprep.mubr.f32.mxu0 %v8191_v49  ;;  %v4885_v59 = vadd.f32 %v4884_v41, %v4883_v16  ;;  %v10393_v45 = vld [vmem:[#allocation74_spill] sm:$0xff]  ;;  %v10397_v41 = vld [vmem:[#allocation81_spill] sm:$0xff] }
 0x16a   : > { %1769 = vmatmul.mubr.f32.gmra.mrb[154].mxu1 %v10386_v32  ;;  %6576 = vmatprep.subr.bf16.mxu0 %v10387_v14  ;;  %v10396_v16 = vld [vmem:[#allocation50_spill] sm:$0xff] }
 0x16b   : > { %1774 = vmatprep.mubr.f32.mxu1 %v10388_v51  ;;  %v8613_v4 = vadd.f32 %v4885_v59, %v10390_v19  ;;  %v4886_v56 = vpop.f32.mrb[50].mxu1  ;;  %v10399_v19 = vld [vmem:[#allocation57_spill] sm:$0xff] }
 0x16c   : > { %5759 = vmatmul.mubr.f32.gmra.mrb[2].mxu0 %v10389_v28  ;;  %v4887_v39 = vpop.f32.mrb[51].mxu1 }
 0x16d   : > { %10391 = vst [vmem:[#allocation28_spill] sm:$0xff] %v8613_v4  ;;  %6578 = vmatpush3.bf16.msra.mxu0 %v10387_v14  ;;  %5761 = vmatprep.mubr.f32.mxu0 %v10392_v50  ;;  %v4888_v32 = vadd.f32 %v4887_v39, %v4886_v56  ;;  %v10400_v14 = vld [vmem:[#allocation78_spill] sm:$0xff]  ;;  %v10403_v39 = vld [vmem:[#allocation59_spill] sm:$0xff]  ;;  %v10404_v56 = vld [vmem:[#allocation84_spill] sm:$0xff] }
 0x16e   : > { %1776 = vmatmul.mubr.f32.gmra.mrb[156].mxu1 %v10393_v45  ;;  %6580 = vmatprep.subr.bf16.mxu0 %v10394_v33 }
 0x16f   : > { %1781 = vmatprep.mubr.f32.mxu1 %v10395_v30  ;;  %v8622_v51 = vadd.f32 %v4888_v32, %v10397_v41  ;;  %v4889_v59 = vpop.f32.mrb[52].mxu1  ;;  %v10406_v41 = vld [vmem:[#allocation64_spill] sm:$0xff] }
 0x170   : > { %5762 = vmatmul.mubr.f32.gmra.mrb[4].mxu0 %v10396_v16  ;;  %v4890_v4 = vpop.f32.mrb[53].mxu1 }
 0x171   : > { %10398 = vst [vmem:[#allocation30_spill] sm:$0xff] %v8622_v51  ;;  %6582 = vmatpush3.bf16.msra.mxu0 %v10394_v33  ;;  %5764 = vmatprep.mubr.f32.mxu0 %v10399_v19  ;;  %v4891_v45 = vadd.f32 %v4890_v4, %v4889_v59  ;;  %v10407_v33 = vld [vmem:[#allocation17_spill] sm:$0xff]  ;;  %v10410_v4 = vld [vmem:[#allocation66_spill] sm:$0xff] }
 0x172   : > { %1783 = vmatmul.mubr.f32.gmra.mrb[158].mxu1 %v10400_v14  ;;  %6584 = vmatprep.subr.bf16.mxu0 %v10401_v21 }
 0x173   : > { %1885 = vmatprep.mubr.f32.mxu1 %v10402_v29  ;;  %v8631_v30 = vadd.f32 %v4891_v45, %v10404_v56  ;;  %v4892_v32 = vpop.f32.mrb[54].mxu1  ;;  %v10411_v29 = vld [vmem:[#allocation89_spill] sm:$0xff]  ;;  %v10413_v56 = vld [vmem:[#allocation75_spill] sm:$0xff] }
 0x174   : > { %5765 = vmatmul.mubr.f32.gmra.mrb[6].mxu0 %v10403_v39  ;;  %v4893_v51 = vpop.f32.mrb[55].mxu1 }
 0x175   : > { %10405 = vst [vmem:[#allocation7_spill] sm:$0xff] %v8631_v30  ;;  %6586 = vmatpush3.bf16.msra.mxu0 %v10401_v21  ;;  %5767 = vmatprep.mubr.f32.mxu0 %v10406_v41  ;;  %v4894_v14 = vadd.f32 %v4893_v51, %v4892_v32  ;;  %v10414_v21 = vld [vmem:[#allocation23_spill] sm:$0xff]  ;;  %v10416_v51 = vld [vmem:[#allocation76_spill] sm:$0xff]  ;;  %v10418_v32 = vld [vmem:[#allocation82_spill] sm:$0xff] }
 0x176   : > { %1887 = vmatmul.mubr.f32.vlgmr.msra.gmra.mrb[160].mxu1 %v10407_v33  ;;  %6588 = vmatprep.subr.bf16.mxu0 %v10408_v31 }
 0x177   : > { %1892 = vmatprep.mubr.f32.mxu1 %v10409_v0  ;;  %v8640_v59 = vadd.f32 %v4894_v14, %v10411_v29  ;;  %v4895_v45 = vpop.f32.mrb[56].mxu1 }
 0x178   : > { %5768 = vmatmul.mubr.f32.gmra.mrb[8].mxu0 %v10410_v4  ;;  %v4896_v30 = vpop.f32.mrb[57].mxu1 }
 0x179   : > { %10412 = vst [vmem:[#allocation8_spill] sm:$0xff] %v8640_v59  ;;  %6590 = vmatpush3.bf16.msra.mxu0 %v10408_v31  ;;  %5770 = vmatprep.mubr.f32.mxu0 %v10413_v56  ;;  %v4897_v33 = vadd.f32 %v4896_v30, %v4895_v45  ;;  %v10419_v59 = vld [vmem:[#allocation33_spill] sm:$0xff]  ;;  %v10420_v30 = vld [vmem:[#allocation83_spill] sm:$0xff] }
 0x17a   : > { %1894 = vmatmul.mubr.f32.gmra.mrb[162].mxu1 %v10414_v21  ;;  %6592 = vmatprep.subr.bf16.mxu0 %v10415_v27  ;;  %v10422_v45 = vld [vmem:[#allocation87_spill] sm:$0xff] }
 0x17b   : > { %1899 = vmatprep.mubr.f32.mxu1 %v10346_v42  ;;  %v8649_v0 = vadd.f32 %v4897_v33, %v8500_v3  ;;  %v4898_v14 = vpop.f32.mrb[58].mxu1 }
 0x17c   : > { %5771 = vmatmul.mubr.f32.gmra.mrb[10].mxu0 %v10416_v51  ;;  %v4899_v29 = vpop.f32.mrb[59].mxu1 }
 0x17d   : > { %10417 = vst [vmem:[#allocation31_spill] sm:$0xff] %v8649_v0  ;;  %6594 = vmatpush3.bf16.msra.mxu0 %v10415_v27  ;;  %5773 = vmatprep.mubr.f32.mxu0 %v10418_v32  ;;  %v4900_v21 = vadd.f32 %v4899_v29, %v4898_v14  ;;  %v10423_v0 = vld [vmem:[#allocation37_spill] sm:$0xff]  ;;  %v10425_v14 = vand.u32 4294901760, %v8132_v5  ;;  %v10429_v5 = vand.u32 4294901760, %v8211_v10  ;;  %v10434_v10 = vand.u32 4294901760, %v8250_v47 }
 0x17e   : > { %1901 = vmatmul.mubr.f32.gmra.mrb[164].mxu1 %v10349_v24  ;;  %6596 = vmatprep.subr.bf16.mxu0 %v10419_v59  ;;  %v10424_v24 = vand.u32 4294901760, %v8127_v7  ;;  %v10428_v7 = vand.u32 4294901760, %v8203_v20  ;;  %v10433_v20 = vand.u32 4294901760, %v8245_v34  ;;  %v10437_v34 = vand.u32 4294901760, %v8283_v52 }
 0x17f   : > { %1906 = vmatprep.mubr.f32.mxu1 %v10350_v58  ;;  %v8658_v42 = vadd.f32 %v4900_v21, %v8509_v8  ;;  %v4901_v3 = vpop.f32.mrb[60].mxu1  ;;  %v10426_v8 = vld [vmem:[#allocation88_spill] sm:$0xff]  ;;  %v10438_v47 = vand.u32 4294901760, %v8308_v13  ;;  %v10441_v52 = vand.u32 4294901760, %v8329_v62  ;;  %v10442_v13 = vand.u32 4294901760, %v8352_v11 }
 0x180   : > { %5774 = vmatmul.mubr.f32.gmra.mrb[12].mxu0 %v10420_v30  ;;  %v4902_v33 = vpop.f32.mrb[61].mxu1  ;;  %v6603_v58 = vpack.c.bf16 %v10425_v14, %v10424_v24  ;;  %v10432_v14 = vand.u32 4294901760, %v8191_v49  ;;  %v10445_v62 = vand.u32 4294901760, %v8366_v15  ;;  %v10446_v11 = vand.u32 4294901760, %v8398_v38 }
 0x181   : > { %10421 = vst [vmem:[#allocation32_spill] sm:$0xff] %v8658_v42  ;;  %6598 = vmatpush3.bf16.msra.mxu0 %v10419_v59  ;;  %5776 = vmatprep.mubr.f32.mxu0 %v10422_v45  ;;  %v4903_v29 = vadd.f32 %v4902_v33, %v4901_v3  ;;  %v10431_v33 = vld [vmem:[#allocation4_spill] sm:$0xff]  ;;  %v10449_v15 = vand.u32 4294901760, %v8427_v54  ;;  %v10450_v38 = vand.u32 4294901760, %v8445_v57  ;;  %v10453_v54 = vand.u32 4294901760, %v8464_v22  ;;  %v10454_v57 = vld [vmem:[#allocation3_spill] sm:$0xff] }
 0x182   : > { %1908 = vmatmul.mubr.f32.gmra.mrb[166].mxu1 %v10353_v2  ;;  %6600 = vmatprep.subr.bf16.mxu0 %v10423_v0  ;;  %v10427_v2 = vand.u32 4294901760, %v8149_v25 }
 0x183   : > { %1913 = vmatprep.mubr.f32.mxu1 %v10354_v61  ;;  %v8671_v21 = vadd.f32 %v4903_v29, %v8517_v26  ;;  %v4904_v42 = vpop.f32.mrb[62].mxu1  ;;  %v6607_v61 = vpack.c.bf16 %v10429_v5, %v10428_v7  ;;  %v10430_v26 = vand.u32 4294901760, %v8156_v40  ;;  %v10435_v40 = vand.u32 4294901760, %v10389_v28 }
 0x184   : > { %5777 = vmatmul.mubr.f32.gmra.mrb[14].mxu0 %v10426_v8  ;;  %v4905_v59 = vpop.f32.mrb[63].mxu1  ;;  %v10444_v5 = vand.u32 4294901760, %v10406_v41 }
 0x185   : > { %6602 = vmatpush3.bf16.msra.mxu0 %v10423_v0  ;;  %5811 = vmatprep.mubr.f32.mxu0 %v10427_v2  ;;  %v4906_v3 = vadd.f32 %v4905_v59, %v4904_v42  ;;  %v10440_v2 = vand.u32 4294901760, %v10399_v19 }
 0x186   : > { %1915 = vmatmul.mubr.f32.gmra.mrb[168].mxu1 %v10357_v53  ;;  %6604 = vmatprep.subr.bf16.mxu0 %v6603_v58 }
 0x187   : > { %1920 = vmatprep.mubr.f32.mxu1 %v10359_v37  ;;  %v8685_v24 = vadd.f32 %v4906_v3, %v10431_v33  ;;  %v4939_v25 = vpop.f32.mrb[64].mxu1  ;;  %v6611_v37 = vpack.c.bf16 %v10434_v10, %v10433_v20  ;;  %v10448_v3 = vand.u32 4294901760, %v10413_v56  ;;  %v10452_v33 = vand.u32 4294901760, %v10418_v32 }
 0x188   : > { %5812 = vmatmul.mubr.f32.vlgmr.msra.gmra.mrb[0].mxu0 %v10430_v26  ;;  %v4940_v53 = vpop.f32.mrb[65].mxu1  ;;  %v10459_v10 = vand.u32 4294901760, %v10422_v45  ;;  %v10465_v45 = vld [vmem:[#allocation67_spill] sm:$0xff] }
 0x189   : > { %6606 = vmatpush3.bf16.msra.mxu0 %v6603_v58  ;;  %5814 = vmatprep.mubr.f32.mxu0 %v10432_v14  ;;  %v4941_v59 = vadd.f32 %v4940_v53, %v4939_v25  ;;  %v10436_v58 = vand.u32 4294901760, %v10392_v50  ;;  %v10455_v25 = vand.u32 4294901760, %v10454_v57  ;;  %v10458_v53 = vld [vmem:[#allocation26_spill] sm:$0xff]  ;;  %v10486_v57 = vld [vmem:[#allocation7_spill] sm:$0xff] }
 0x18a   : > { %1922 = vmatmul.mubr.f32.gmra.mrb[170].mxu1 %v10362_v1  ;;  %6608 = vmatprep.subr.bf16.mxu0 %v6607_v61 }
 0x18b   : > { %1927 = vmatprep.mubr.f32.mxu1 %v10363_v35  ;;  %v8698_v42 = vadd.f32 %v4941_v59, %v8541_v12  ;;  %v4942_v49 = vpop.f32.mrb[66].mxu1  ;;  %v6615_v35 = vpack.c.bf16 %v10438_v47, %v10437_v34  ;;  %v10439_v12 = vand.u32 4294901760, %v10396_v16  ;;  %v10461_v59 = vld [vmem:[#allocation65_spill] sm:$0xff]  ;;  %v10466_v47 = vld [vmem:[#allocation2_spill] sm:$0xff] }
 0x18c   : > { %5815 = vmatmul.mubr.f32.gmra.mrb[2].mxu0 %v10435_v40  ;;  %v4943_v1 = vpop.f32.mrb[67].mxu1  ;;  %v10462_v40 = vand.u32 4294901760, %v10426_v8 }
 0x18d   : > { %6610 = vmatpush3.bf16.msra.mxu0 %v6607_v61  ;;  %5817 = vmatprep.mubr.f32.mxu0 %v10436_v58  ;;  %v4944_v29 = vadd.f32 %v4943_v1, %v4942_v49  ;;  %v10464_v1 = vld [vmem:[#allocation29_spill] sm:$0xff] }
 0x18e   : > { %1929 = vmatmul.mubr.f32.gmra.mrb[172].mxu1 %v10366_v46  ;;  %6612 = vmatprep.subr.bf16.mxu0 %v6611_v37 }
 0x18f   : > { %1934 = vmatprep.mubr.f32.mxu1 %v10367_v63  ;;  %v8711_v28 = vadd.f32 %v4944_v29, %v8552_v55  ;;  %v4945_v50 = vpop.f32.mrb[68].mxu1  ;;  %v6619_v63 = vpack.c.bf16 %v10442_v13, %v10441_v52  ;;  %v10443_v55 = vand.u32 4294901760, %v10403_v39  ;;  %v10467_v29 = vld [vmem:[#allocation70_spill] sm:$0xff]  ;;  %v10471_v13 = vld [vmem:[#allocation71_spill] sm:$0xff] }
 0x190   : > { %5818 = vmatmul.mubr.f32.gmra.mrb[4].mxu0 %v10439_v12  ;;  %v4946_v46 = vpop.f32.mrb[69].mxu1  ;;  %v10468_v12 = vld [vmem:[#allocation34_spill] sm:$0xff] }
 0x191   : > { %6614 = vmatpush3.bf16.msra.mxu0 %v6611_v37  ;;  %5820 = vmatprep.mubr.f32.mxu0 %v10440_v2  ;;  %v4947_v7 = vadd.f32 %v4946_v46, %v4945_v50  ;;  %v10460_v37 = vld [vmem:[#allocation63_spill] sm:$0xff]  ;;  %v10469_v50 = vld [vmem:[#allocation6_spill] sm:$0xff]  ;;  %v10470_v46 = vld [vmem:[#allocation36_spill] sm:$0xff] }
 0x192   : > { %1936 = vmatmul.mubr.f32.gmra.mrb[174].mxu1 %v10370_v44  ;;  %6616 = vmatprep.subr.bf16.mxu0 %v6615_v35 }
 0x193   : > { %1941 = vmatprep.mubr.f32.mxu1 %v10371_v43  ;;  %v8724_v16 = vadd.f32 %v4947_v7, %v8562_v9  ;;  %v4948_v19 = vpop.f32.mrb[70].mxu1  ;;  %v6623_v43 = vpack.c.bf16 %v10446_v11, %v10445_v62  ;;  %v10447_v9 = vand.u32 4294901760, %v10410_v4  ;;  %v10476_v11 = vld [vmem:[#allocation44_spill] sm:$0xff] }
 0x194   : > { %5821 = vmatmul.mubr.f32.gmra.mrb[6].mxu0 %v10443_v55  ;;  %v4949_v44 = vpop.f32.mrb[71].mxu1  ;;  %v10473_v55 = vld [vmem:[#allocation72_spill] sm:$0xff] }
 0x195   : > { %6618 = vmatpush3.bf16.msra.mxu0 %v6615_v35  ;;  %5823 = vmatprep.mubr.f32.mxu0 %v10444_v5  ;;  %v4950_v61 = vadd.f32 %v4949_v44, %v4948_v19  ;;  %v10474_v19 = vld [vmem:[#allocation41_spill] sm:$0xff]  ;;  %v10475_v5 = vld [vmem:[#allocation28_spill] sm:$0xff] }
 0x196   : > { %1943 = vmatmul.mubr.f32.gmra.mrb[176].mxu1 %v10373_v48  ;;  %6620 = vmatprep.subr.bf16.mxu0 %v6619_v63 }
 0x197   : > { %1948 = vmatprep.mubr.f32.mxu1 %v10374_v6  ;;  %v8737_v39 = vadd.f32 %v4950_v61, %v8571_v17  ;;  %v4951_v41 = vpop.f32.mrb[72].mxu1  ;;  %v6627_v6 = vpack.c.bf16 %v10450_v38, %v10449_v15  ;;  %v10451_v17 = vand.u32 4294901760, %v10416_v51  ;;  %v10456_v51 = vld [vmem:[#allocation62_spill] sm:$0xff] }
 0x198   : > { %5824 = vmatmul.mubr.f32.gmra.mrb[8].mxu0 %v10447_v9  ;;  %v4952_v48 = vpop.f32.mrb[73].mxu1  ;;  %v10477_v61 = vld [vmem:[#allocation74_spill] sm:$0xff]  ;;  %v10478_v9 = vld [vmem:[#allocation21_spill] sm:$0xff] }
 0x199   : > { %6622 = vmatpush3.bf16.msra.mxu0 %v6619_v63  ;;  %5826 = vmatprep.mubr.f32.mxu0 %v10448_v3  ;;  %v4953_v26 = vadd.f32 %v4952_v48, %v4951_v41  ;;  %v10472_v63 = vld [vmem:[#allocation20_spill] sm:$0xff]  ;;  %v10479_v3 = vld [vmem:[#allocation77_spill] sm:$0xff]  ;;  %v10481_v15 = vld [vmem:[#allocation30_spill] sm:$0xff] }
 0x19a   : > { %1950 = vmatmul.mubr.f32.gmra.mrb[178].mxu1 %v10375_v23  ;;  %6624 = vmatprep.subr.bf16.mxu0 %v6623_v43  ;;  %v10480_v48 = vld [vmem:[#allocation48_spill] sm:$0xff] }
 0x19b   : > { %1955 = vmatprep.mubr.f32.mxu1 %v10376_v60  ;;  %v8750_v4 = vadd.f32 %v4953_v26, %v8580_v18  ;;  %v4954_v56 = vpop.f32.mrb[74].mxu1  ;;  %v6631_v60 = vpack.c.bf16 %v10455_v25, %v10453_v54  ;;  %v10457_v18 = vand.u32 4294901760, %v10420_v30  ;;  %v10463_v30 = vld [vmem:[#allocation5_spill] sm:$0xff]  ;;  %v10482_v26 = vld [vmem:[#allocation52_spill] sm:$0xff] }
 0x19c   : > { %5827 = vmatmul.mubr.f32.gmra.mrb[10].mxu0 %v10451_v17  ;;  %v4955_v23 = vpop.f32.mrb[75].mxu1  ;;  %v10485_v54 = vld [vmem:[#allocation53_spill] sm:$0xff] }
 0x19d   : > { %6626 = vmatpush3.bf16.msra.mxu0 %v6623_v43  ;;  %5829 = vmatprep.mubr.f32.mxu0 %v10452_v33  ;;  %v4956_v14 = vadd.f32 %v4955_v23, %v4954_v56  ;;  %v10483_v56 = vld [vmem:[#allocation78_spill] sm:$0xff]  ;;  %v10484_v33 = vld [vmem:[#allocation24_spill] sm:$0xff] }
 0x19e   : > { %1957 = vmatmul.mubr.f32.gmra.mrb[180].mxu1 %v10377_v36  ;;  %6628 = vmatprep.subr.bf16.mxu0 %v6627_v6 }
 0x19f   : > { %1962 = vmatprep.mubr.f32.mxu1 %v10456_v51  ;;  %v8763_v20 = vadd.f32 %v4956_v14, %v10458_v53  ;;  %v4957_v32 = vpop.f32.mrb[76].mxu1  ;;  %v10487_v14 = vld [vmem:[#allocation60_spill] sm:$0xff]  ;;  %v10488_v53 = vld [vmem:[#allocation61_spill] sm:$0xff] }
 0x1a0   : > { %5830 = vmatmul.mubr.f32.gmra.mrb[12].mxu0 %v10457_v18  ;;  %v4958_v36 = vpop.f32.mrb[77].mxu1 }
 0x1a1   : > { %6630 = vmatpush3.bf16.msra.mxu0 %v6627_v6  ;;  %5832 = vmatprep.mubr.f32.mxu0 %v10459_v10  ;;  %v4959_v22 = vadd.f32 %v4958_v36, %v4957_v32  ;;  %v10489_v32 = vld [vmem:[#allocation8_spill] sm:$0xff] }
 0x1a2   : > { %1964 = vmatmul.mubr.f32.gmra.mrb[182].mxu1 %v10460_v37  ;;  %6632 = vmatprep.subr.bf16.mxu0 %v6631_v60  ;;  %v10490_v37 = vld [vmem:[#allocation68_spill] sm:$0xff] }
 0x1a3   : > { %1969 = vmatprep.mubr.f32.mxu1 %v10461_v59  ;;  %v8772_v49 = vadd.f32 %v4959_v22, %v10463_v30  ;;  %v4960_v58 = vpop.f32.mrb[78].mxu1  ;;  %v8826_v30 = vld [vmem:[%s9686_s2 + $0x8] sm:$0xff] }
 0x1a4   : > { %5833 = vmatmul.mubr.f32.gmra.mrb[14].mxu0 %v10462_v40  ;;  %v4961_v34 = vpop.f32.mrb[79].mxu1  ;;  %v8821_v40 = vld [vmem:[%s9686_s2] sm:$0xff] }
 0x1a5   : > { %6634 = vmatpush3.bf16.msra.mxu0 %v6631_v60  ;;  %5867 = vmatprep.mubr.f32.mxu0 %v10464_v1  ;;  %v4962_v35 = vadd.f32 %v4961_v34, %v4960_v58  ;;  %v10491_v58 = vld [vmem:[#allocation69_spill] sm:$0xff]  ;;  %v10492_v34 = vld [vmem:[#allocation31_spill] sm:$0xff] }
 0x1a6   : > { %1971 = vmatmul.mubr.f32.gmra.mrb[184].mxu1 %v10465_v45  ;;  %6636 = vmatprep.subr.bf16.mxu0 %v10466_v47 }
 0x1a7   : > { %1976 = vmatprep.mubr.f32.mxu1 %v10467_v29  ;;  %v8780_v8 = vadd.f32 %v4962_v35, %v10469_v50  ;;  %v4963_v2 = vpop.f32.mrb[80].mxu1  ;;  %v10494_v29 = vld [vmem:[#allocation33_spill] sm:$0xff]  ;;  %v3334_v50 = vand.u32 4294901760, %v8821_v40 }
 0x1a8   : > { %5868 = vmatmul.mubr.f32.vlgmr.msra.gmra.mrb[0].mxu0 %v10468_v12  ;;  %v4964_v52 = vpop.f32.mrb[81].mxu1 }
 0x1a9   : > { %6638 = vmatpush3.bf16.msra.mxu0 %v10466_v47  ;;  %5870 = vmatprep.mubr.f32.mxu0 %v10470_v46  ;;  %v4965_v7 = vadd.f32 %v4964_v52, %v4963_v2  ;;  %v10493_v47 = vld [vmem:[#allocation80_spill] sm:$0xff]  ;;  %v3337_v2 = vand.u32 4294901760, %v8826_v30 }
 0x1aa   : > { %1978 = vmatmul.mubr.f32.gmra.mrb[186].mxu1 %v10471_v13  ;;  %6640 = vmatprep.subr.bf16.mxu0 %v10472_v63  ;;  %v8840_v13 = vld [vmem:[%s9686_s2 + $0x10] sm:$0xff] }
 0x1ab   : > { %1983 = vmatprep.mubr.f32.mxu1 %v10473_v55  ;;  %v8789_v44 = vadd.f32 %v4965_v7, %v10475_v5  ;;  %v4966_v62 = vpop.f32.mrb[82].mxu1  ;;  %v10496_v7 = vld [vmem:[#allocation32_spill] sm:$0xff] }
 0x1ac   : > { %5871 = vmatmul.mubr.f32.gmra.mrb[2].mxu0 %v10474_v19  ;;  %v4967_v43 = vpop.f32.mrb[83].mxu1 }
 0x1ad   : > { %6642 = vmatpush3.bf16.msra.mxu0 %v10472_v63  ;;  %5873 = vmatprep.mubr.f32.mxu0 %v10476_v11  ;;  %v4968_v41 = vadd.f32 %v4967_v43, %v4966_v62  ;;  %v8845_v63 = vld [vmem:[%s9686_s2 + $0x18] sm:$0xff] }
 0x1ae   : > { %1985 = vmatmul.mubr.f32.gmra.mrb[188].mxu1 %v10477_v61  ;;  %6644 = vmatprep.subr.bf16.mxu0 %v10478_v9  ;;  %v10497_v62 = vld [vmem:[#allocation85_spill] sm:$0xff]  ;;  %v8858_v61 = vpack.c.bf16 %v3337_v2, %v3334_v50 }
 0x1af   : > { %1990 = vmatprep.mubr.f32.mxu1 %v10479_v3  ;;  %v8798_v38 = vadd.f32 %v4968_v41, %v10481_v15  ;;  %v4969_v6 = vpop.f32.mrb[84].mxu1  ;;  %v3343_v41 = vand.u32 4294901760, %v8845_v63  ;;  %v8865_v15 = vld [vmem:[%s9686_s2 + $0x20] sm:$0xff] }
 0x1b0   : > { %5874 = vmatmul.mubr.f32.gmra.mrb[4].mxu0 %v10480_v48  ;;  %v4970_v17 = vpop.f32.mrb[85].mxu1 }
 0x1b1   : > { %6646 = vmatpush3.bf16.msra.mxu0 %v10478_v9  ;;  %5876 = vmatprep.mubr.f32.mxu0 %v10482_v26  ;;  %v4971_v23 = vadd.f32 %v4970_v17, %v4969_v6  ;;  %v3340_v9 = vand.u32 4294901760, %v8840_v13  ;;  %v8870_v6 = vld [vmem:[%s9686_s2 + $0x28] sm:$0xff]  ;;  %v10498_v17 = vld [vmem:[#allocation86_spill] sm:$0xff] }
 0x1b2   : > { %1992 = vmatmul.mubr.f32.gmra.mrb[190].mxu1 %v10483_v56  ;;  %6648 = vmatprep.subr.bf16.mxu0 %v10484_v33 }
 0x1b3   : > { %v8806_v25 = vadd.f32 %v4971_v23, %v10486_v57  ;;  %v4972_v60 = vpop.f32.mrb[86].mxu1  ;;  %v8883_v57 = vpack.c.bf16 %v3343_v41, %v3340_v9 }
 0x1b4   : > { %5877 = vmatmul.mubr.f32.gmra.mrb[6].mxu0 %v10485_v54  ;;  %v4973_v51 = vpop.f32.mrb[87].mxu1 }
 0x1b5   : > { %6650 = vmatpush3.bf16.msra.mxu0 %v10484_v33  ;;  %5879 = vmatprep.mubr.f32.mxu0 %v10487_v14  ;;  %v4974_v18 = vadd.f32 %v4973_v51, %v4972_v60  ;;  %v3346_v60 = vand.u32 4294901760, %v8865_v15  ;;  %v3349_v51 = vand.u32 4294901760, %v8870_v6 }
 0x1b6   : > { %6652 = vmatprep.subr.bf16.mxu0 %v10408_v31 }
 0x1b7   : > { %v8813_v10 = vadd.f32 %v4974_v18, %v10489_v32  ;;  %v4975_v36 = vpop.f32.mrb[88].mxu1 }
 0x1b8   : > { %5880 = vmatmul.mubr.f32.gmra.mrb[8].mxu0 %v10488_v53  ;;  %v4976_v22 = vpop.f32.mrb[89].mxu1 }
 0x1b9   : > { %6654 = vmatpush3.bf16.msra.mxu0 %v10408_v31  ;;  %5882 = vmatprep.mubr.f32.mxu0 %v10490_v37  ;;  %v4977_v59 = vadd.f32 %v4976_v22, %v4975_v36  ;;  %v8908_v22 = vpack.c.bf16 %v3349_v51, %v3346_v60 }
 0x1ba   : > { %6656 = vmatprep.subr.bf16.mxu0 %v10415_v27 }
 0x1bb   : > { %v8830_v31 = vadd.f32 %v4977_v59, %v10492_v34  ;;  %v4978_v45 = vpop.f32.mrb[90].mxu1  ;;  %v8915_v34 = vld [vmem:[%s9686_s2 + $0x40] sm:$0xff] }
 0x1bc   : > { %5883 = vmatmul.mubr.f32.gmra.mrb[10].mxu0 %v10491_v58  ;;  %v4979_v35 = vpop.f32.mrb[91].mxu1 }
 0x1bd   : > { %6658 = vmatpush3.bf16.msra.mxu0 %v10415_v27  ;;  %5885 = vmatprep.mubr.f32.mxu0 %v10493_v47  ;;  %v4980_v52 = vadd.f32 %v4979_v35, %v4978_v45  ;;  %v10495_v27 = vld [vmem:[#allocation79_spill] sm:$0xff] }
 0x1be   : > { %6660 = vmatprep.subr.bf16.mxu0 %v10494_v29 }
 0x1bf   : > { %v8849_v55 = vadd.f32 %v4980_v52, %v10496_v7  ;;  %v4981_v5 = vpop.f32.mrb[92].mxu1  ;;  %v3358_v7 = vand.u32 4294901760, %v8915_v34 }
 0x1c0   : > { %5886 = vmatmul.mubr.f32.gmra.mrb[12].mxu0 %v10495_v27  ;;  %v4982_v43 = vpop.f32.mrb[93].mxu1 }
 0x1c1   : > { %6662 = vmatpush3.bf16.msra.mxu0 %v10494_v29  ;;  %5888 = vmatprep.mubr.f32.mxu0 %v10497_v62  ;;  %v4983_v3 = vadd.f32 %v4982_v43, %v4981_v5  ;;  %v8940_v5 = vld [vmem:[%s9686_s2 + $0x50] sm:$0xff] }
 0x1c2   : > { %6664 = vmatprep.subr.bf16.mxu0 %v10423_v0 }
 0x1c3   : > { %v8874_v56 = vadd.f32 %v4983_v3, %v8671_v21  ;;  %v4984_v33 = vpop.f32.mrb[94].mxu1 }
 0x1c4   : > { %5889 = vmatmul.mubr.f32.gmra.mrb[14].mxu0 %v10498_v17  ;;  %v4985_v23 = vpop.f32.mrb[95].mxu1 }
 0x1c5   : > { %6666 = vmatpush3.bf16.msra.mxu0 %v10423_v0  ;;  %5923 = vmatprep.mubr.f32.mxu0 %v10464_v1  ;;  %v4986_v21 = vadd.f32 %v4985_v23, %v4984_v33  ;;  %v8890_v0 = vld [vmem:[%s9686_s2 + $0x30] sm:$0xff]  ;;  %v8895_v1 = vld [vmem:[%s9686_s2 + $0x38] sm:$0xff] }
 0x1c6   : > { %6668 = vmatprep.subr.bf16.mxu0 %v8858_v61  ;;  %v3352_v59 = vand.u32 4294901760, %v8890_v0 }
 0x1c7   : > { %v8899_v18 = vadd.f32 %v4986_v21, %v8685_v24  ;;  %v5019_v32 = vpop.f32.mrb[96].mxu1  ;;  %v10008_v21 = vand.u32 4294901760, %v8940_v5 }
 0x1c8   : > { %5924 = vmatmul.mubr.f32.vlgmr.msra.gmra.mrb[0].mxu0 %v10468_v12  ;;  %v5020_v36 = vpop.f32.mrb[97].mxu1  ;;  %v3355_v12 = vand.u32 4294901760, %v8895_v1 }
 0x1c9   : > { %6670 = vmatpush3.bf16.msra.mxu0 %v8858_v61  ;;  %5926 = vmatprep.mubr.f32.mxu0 %v10470_v46  ;;  %v5021_v24 = vadd.f32 %v5020_v36, %v5019_v32  ;;  %v8920_v46 = vld [vmem:[%s9686_s2 + $0x48] sm:$0xff]  ;;  %v8965_v32 = vld [vmem:[%s9686_s2 + $0x60] sm:$0xff] }
 0x1ca   : > { %6672 = vmatprep.subr.bf16.mxu0 %v8883_v57  ;;  %v8933_v52 = vpack.c.bf16 %v3355_v12, %v3352_v59 }
 0x1cb   : > { %v8924_v45 = vadd.f32 %v5021_v24, %v8698_v42  ;;  %v5022_v35 = vpop.f32.mrb[98].mxu1 }
 0x1cc   : > { %5927 = vmatmul.mubr.f32.gmra.mrb[2].mxu0 %v10474_v19  ;;  %v5023_v29 = vpop.f32.mrb[99].mxu1  ;;  %v3361_v19 = vand.u32 4294901760, %v8920_v46 }
 0x1cd   : > { %6674 = vmatpush3.bf16.msra.mxu0 %v8883_v57  ;;  %5929 = vmatprep.mubr.f32.mxu0 %v10476_v11  ;;  %v5024_v42 = vadd.f32 %v5023_v29, %v5022_v35  ;;  %v8945_v11 = vld [vmem:[%s9686_s2 + $0x58] sm:$0xff] }
 0x1ce   : > { %6676 = vmatprep.subr.bf16.mxu0 %v8908_v22  ;;  %v8958_v23 = vpack.c.bf16 %v3361_v19, %v3358_v7 }
 0x1cf   : > { %v8949_v43 = vadd.f32 %v5024_v42, %v8711_v28  ;;  %v5025_v3 = vpop.f32.mrb[100].mxu1  ;;  %v3370_v42 = vand.u32 4294901760, %v8965_v32 }
 0x1d0   : > { %5930 = vmatmul.mubr.f32.gmra.mrb[4].mxu0 %v10480_v48  ;;  %v5026_v33 = vpop.f32.mrb[101].mxu1  ;;  %v10007_v48 = vand.u32 4294901760, %v8945_v11 }
 0x1d1   : > { %6678 = vmatpush3.bf16.msra.mxu0 %v8908_v22  ;;  %5932 = vmatprep.mubr.f32.mxu0 %v10482_v26  ;;  %v5027_v28 = vadd.f32 %v5026_v33, %v5025_v3  ;;  %v8970_v26 = vld [vmem:[%s9686_s2 + $0x68] sm:$0xff]  ;;  %v8990_v3 = vld [vmem:[%s9686_s2 + $0x70] sm:$0xff] }
 0x1d2   : > { %6680 = vmatprep.subr.bf16.mxu0 %v8933_v52  ;;  %v8983_v29 = vpack.c.bf16 %v10007_v48, %v10008_v21  ;;  %v10011_v48 = vand.u32 4294901760, %v8990_v3 }
 0x1d3   : > { %v8974_v36 = vadd.f32 %v5027_v28, %v8724_v16  ;;  %v5028_v24 = vpop.f32.mrb[102].mxu1 }
 0x1d4   : > { %5933 = vmatmul.mubr.f32.gmra.mrb[6].mxu0 %v10485_v54  ;;  %v5029_v35 = vpop.f32.mrb[103].mxu1  ;;  %v10009_v54 = vand.u32 4294901760, %v8970_v26 }
 0x1d5   : > { %6682 = vmatpush3.bf16.msra.mxu0 %v8933_v52  ;;  %5935 = vmatprep.mubr.f32.mxu0 %v10487_v14  ;;  %v5030_v16 = vadd.f32 %v5029_v35, %v5028_v24  ;;  %v8995_v14 = vld [vmem:[%s9686_s2 + $0x78] sm:$0xff] }
 0x1d6   : > { %6684 = vmatprep.subr.bf16.mxu0 %v8958_v23  ;;  %v9008_v35 = vpack.c.bf16 %v10009_v54, %v3370_v42 }
 0x1d7   : > { %v8999_v33 = vadd.f32 %v5030_v16, %v8737_v39  ;;  %v5031_v28 = vpop.f32.mrb[104].mxu1 }
 0x1d8   : > { %5936 = vmatmul.mubr.f32.gmra.mrb[8].mxu0 %v10488_v53  ;;  %v5032_v24 = vpop.f32.mrb[105].mxu1  ;;  %v10010_v53 = vand.u32 4294901760, %v8995_v14 }
 0x1d9   : > { %6686 = vmatpush3.bf16.msra.mxu0 %v8958_v23  ;;  %5938 = vmatprep.mubr.f32.mxu0 %v10490_v37  ;;  %v5033_v39 = vadd.f32 %v5032_v24, %v5031_v28 }
 0x1da   : > { %6688 = vmatprep.subr.bf16.mxu0 %v8983_v29  ;;  %v9023_v54 = vpack.c.bf16 %v10010_v53, %v10011_v48 }
 0x1db   : > { %v9014_v16 = vadd.f32 %v5033_v39, %v8750_v4  ;;  %v5034_v37 = vpop.f32.mrb[106].mxu1 }
 0x1dc   : > { %5939 = vmatmul.mubr.f32.gmra.mrb[10].mxu0 %v10491_v58  ;;  %v5035_v21 = vpop.f32.mrb[107].mxu1 }
 0x1dd   : > { %6690 = vmatpush3.bf16.msra.mxu0 %v8983_v29  ;;  %5941 = vmatprep.mubr.f32.mxu0 %v10493_v47  ;;  %v5036_v28 = vadd.f32 %v5035_v21, %v5034_v37 }
 0x1de   : > { %6692 = vmatprep.subr.bf16.mxu0 %v9008_v35 }
 0x1df   : > { %v9027_v4 = vadd.f32 %v5036_v28, %v8763_v20  ;;  %v5037_v58 = vpop.f32.mrb[108].mxu1 }
 0x1e0   : > { %5942 = vmatmul.mubr.f32.gmra.mrb[12].mxu0 %v10495_v27  ;;  %v5038_v47 = vpop.f32.mrb[109].mxu1 }
 0x1e1   : > { %6694 = vmatpush3.bf16.msra.mxu0 %v9008_v35  ;;  %5944 = vmatprep.mubr.f32.mxu0 %v10497_v62  ;;  %v5039_v24 = vadd.f32 %v5038_v47, %v5037_v58 }
 0x1e2   : > { %6696 = vmatprep.subr.bf16.mxu0 %v9023_v54 }
 0x1e3   : > { %v9034_v39 = vadd.f32 %v5039_v24, %v8772_v49  ;;  %v5040_v21 = vpop.f32.mrb[110].mxu1  ;;  %v9046_v49 = vsub.f32 %v8821_v40, %v3334_v50  ;;  %v9051_v24 = vsub.f32 %v8826_v30, %v3337_v2  ;;  %v9072_v30 = vsub.f32 %v8845_v63, %v3343_v41 }
 0x1e4   : > { %5945 = vmatmul.mubr.f32.gmra.mrb[14].mxu0 %v10498_v17  ;;  %v5041_v27 = vpop.f32.mrb[111].mxu1 }
 0x1e5   : > { %6698 = vmatpush3.bf16.msra.mxu0 %v9023_v54  ;;  %v5042_v20 = vadd.f32 %v5041_v27, %v5040_v21  ;;  %v10012_v21 = vand.u32 4294901760, %v9051_v24 }
 0x1e7   : > { %v9038_v37 = vadd.f32 %v5042_v20, %v8780_v8  ;;  %v5043_v28 = vpop.f32.mrb[112].mxu1  ;;  %v3585_v50 = vsub.f32 %v9051_v24, %v10012_v21 }
 0x1e8   : > { %v5044_v53 = vpop.f32.mrb[113].mxu1 }
 0x1e9   : > { %v5045_v62 = vadd.f32 %v5044_v53, %v5043_v28 }
 0x1eb   : > { %v9041_v48 = vadd.f32 %v5045_v62, %v8789_v44  ;;  %v5046_v58 = vpop.f32.mrb[114].mxu1  ;;  %v10027_v44 = vand.u32 4294901760, %v9046_v49 }
 0x1ec   : > { %v5047_v47 = vpop.f32.mrb[115].mxu1 }
 0x1ed   : > { %v5048_v17 = vadd.f32 %v5047_v47, %v5046_v58  ;;  %v3578_v40 = vsub.f32 %v9046_v49, %v10027_v44  ;;  %v3586_v58 = vand.u32 4294901760, %v3585_v50 }
 0x1ef   : > { %v9054_v8 = vadd.f32 %v5048_v17, %v8798_v38  ;;  %v5049_v53 = vpop.f32.mrb[116].mxu1  ;;  %v9067_v38 = vsub.f32 %v8840_v13, %v3340_v9  ;;  %v3579_v62 = vand.u32 4294901760, %v3578_v40  ;;  %v9095_v9 = vsub.f32 %v8870_v6, %v3349_v51 }
 0x1f0   : > { %v5050_v27 = vpop.f32.mrb[117].mxu1  ;;  %v9114_v6 = vsub.f32 %v8895_v1, %v3355_v12 }
 0x1f1   : > { %v5051_v20 = vadd.f32 %v5050_v27, %v5049_v53  ;;  %v10024_v47 = vand.u32 4294901760, %v9067_v38  ;;  %v10023_v53 = vand.u32 4294901760, %v9072_v30  ;;  %v9079_v21 = vpack.c.bf16 %v3586_v58, %v3579_v62  ;;  %10500 = vst [vmem:[#allocation10_spill] sm:$0xff] %v9095_v9 }
 0x1f2   : > { %10502 = vst [vmem:[#allocation38_spill] sm:$0xff] %v9114_v6 }
 0x1f3   : > { %v9075_v2 = vadd.f32 %v5051_v20, %v8806_v25  ;;  %v5052_v28 = vpop.f32.mrb[118].mxu1  ;;  %v3592_v13 = vsub.f32 %v9067_v38, %v10024_v47  ;;  %v9087_v25 = vsub.f32 %v8865_v15, %v3346_v60  ;;  %v3599_v63 = vsub.f32 %v9072_v30, %v10023_v53  ;;  %6700 = vmatprep.subr.bf16.mxu0 %v9079_v21 }
 0x1f4   : > { %v5053_v17 = vpop.f32.mrb[119].mxu1 }
 0x1f5   : > { %v5054_v27 = vadd.f32 %v5053_v17, %v5052_v28  ;;  %10499 = vst [vmem:[#allocation9_spill] sm:$0xff] %v9087_v25  ;;  %v3593_v40 = vand.u32 4294901760, %v3592_v13  ;;  %v10013_v50 = vand.u32 4294901760, %v9087_v25  ;;  %v3600_v60 = vand.u32 4294901760, %v3599_v63 }
 0x1f6   : > { %v10019_v28 = vand.u32 4294901760, %v9095_v9 }
 0x1f7   : > { %v9098_v41 = vadd.f32 %v5054_v27, %v8813_v10  ;;  %v3606_v58 = vsub.f32 %v9087_v25, %v10013_v50  ;;  %v9109_v10 = vsub.f32 %v8890_v0, %v3352_v59  ;;  %v9116_v51 = vpack.c.bf16 %v3600_v60, %v3593_v40 }
 0x1f8   : > { %v5055_v20 = vpop.f32.mrb[120].mxu1  ;;  %v3613_v17 = vsub.f32 %v9095_v9, %v10019_v28  ;;  %v10014_v0 = vand.u32 4294901760, %v9114_v6  ;;  %v9142_v60 = vsub.f32 %v8920_v46, %v3361_v19  ;;  %v10505_v46 = vand.u32 4294901760, %v8940_v5 }
 0x1f9   : > { %v5056_v15 = vpop.f32.mrb[121].mxu1  ;;  %10501 = vst [vmem:[#allocation35_spill] sm:$0xff] %v9109_v10  ;;  %v3607_v63 = vand.u32 4294901760, %v3606_v58 }
 0x1fa   : > { %v5057_v62 = vadd.f32 %v5056_v15, %v5055_v20  ;;  %v10015_v20 = vand.u32 4294901760, %v9109_v10  ;;  %v3614_v15 = vand.u32 4294901760, %v3613_v17  ;;  %v3627_v12 = vsub.f32 %v9114_v6, %v10014_v0  ;;  %10504 = vst [vmem:[#allocation12_spill] sm:$0xff] %v9142_v60 }
 0x1fc   : > { %v9122_v27 = vadd.f32 %v5057_v62, %v8830_v31  ;;  %v5058_v13 = vpop.f32.mrb[122].mxu1  ;;  %v3620_v1 = vsub.f32 %v9109_v10, %v10015_v20  ;;  %v9135_v31 = vsub.f32 %v8915_v34, %v3358_v7  ;;  %v9137_v40 = vpack.c.bf16 %v3614_v15, %v3607_v63 }
 0x1fd   : > { %v5059_v59 = vpop.f32.mrb[123].mxu1  ;;  %v10016_v20 = vand.u32 4294901760, %v9142_v60 }
 0x1fe   : > { %v5060_v50 = vadd.f32 %v5059_v59, %v5058_v13  ;;  %10503 = vst [vmem:[#allocation11_spill] sm:$0xff] %v9135_v31  ;;  %v3621_v17 = vand.u32 4294901760, %v3620_v1  ;;  %v3628_v13 = vand.u32 4294901760, %v3627_v12  ;;  %v10018_v59 = vand.u32 4294901760, %v9135_v31 }
 0x1ff   : > { %v3641_v19 = vsub.f32 %v9142_v60, %v10016_v20 }
 0x200   : > { %v9145_v62 = vadd.f32 %v5060_v50, %v8849_v55  ;;  %v9149_v7 = vpack.c.bf16 %v3628_v13, %v3621_v17  ;;  %v3634_v63 = vsub.f32 %v9135_v31, %v10018_v59  ;;  %v9157_v55 = vsub.f32 %v8940_v5, %v10505_v46 }
 0x201   : > { %v5061_v58 = vpop.f32.mrb[124].mxu1  ;;  %v10507_v50 = vand.u32 4294901760, %v8945_v11  ;;  %v3642_v13 = vand.u32 4294901760, %v3641_v19 }
 0x202   : > { %v5062_v0 = vpop.f32.mrb[125].mxu1  ;;  %10506 = vst [vmem:[#allocation39_spill] sm:$0xff] %v9157_v55  ;;  %v3635_v12 = vand.u32 4294901760, %v3634_v63 }
 0x203   : > { %v5063_v34 = vadd.f32 %v5062_v0, %v5061_v58  ;;  %v9165_v15 = vsub.f32 %v8945_v11, %v10507_v50  ;;  %v10017_v58 = vand.u32 4294901760, %v9157_v55  ;;  %v9178_v11 = vsub.f32 %v8965_v32, %v3370_v42 }
 0x204   : > { %v9185_v63 = vpack.c.bf16 %v3642_v13, %v3635_v12 }
 0x205   : > { %10508 = vst [vmem:[#allocation40_spill] sm:$0xff] %v9165_v15  ;;  %v9168_v0 = vadd.f32 %v5063_v34, %v8874_v56  ;;  %v5064_v1 = vpop.f32.mrb[126].mxu1  ;;  %v10022_v5 = vand.u32 4294901760, %v9165_v15  ;;  %v3648_v20 = vsub.f32 %v9157_v55, %v10017_v58  ;;  %10509 = vst [vmem:[#allocation13_spill] sm:$0xff] %v9178_v11  ;;  %v10510_v56 = vand.u32 4294901760, %v8970_v26 }
 0x206   : > { %v5065_v17 = vpop.f32.mrb[127].mxu1  ;;  %v10020_v58 = vand.u32 4294901760, %v9178_v11 }
 0x207   : > { %v5066_v46 = vadd.f32 %v5065_v17, %v5064_v1  ;;  %v9183_v34 = vsub.f32 %v8970_v26, %v10510_v56  ;;  %v3655_v19 = vsub.f32 %v9165_v15, %v10022_v5  ;;  %v3649_v17 = vand.u32 4294901760, %v3648_v20 }
 0x208   : > { %v3662_v26 = vsub.f32 %v9178_v11, %v10020_v58 }
 0x209   : > { %10511 = vst [vmem:[#allocation14_spill] sm:$0xff] %v9183_v34  ;;  %v9191_v50 = vadd.f32 %v5066_v46, %v8899_v18  ;;  %v5099_v1 = vpop.f32.mrb[128].mxu1  ;;  %v10021_v32 = vand.u32 4294901760, %v9183_v34  ;;  %v3656_v59 = vand.u32 4294901760, %v3655_v19  ;;  %v10512_v18 = vand.u32 4294901760, %v8990_v3 }
 0x20a   : > { %v5100_v42 = vpop.f32.mrb[129].mxu1  ;;  %v10514_v46 = vand.u32 4294901760, %v8995_v14 }
 0x20b   : > { %v5101_v28 = vadd.f32 %v5100_v42, %v5099_v1  ;;  %v3669_v12 = vsub.f32 %v9183_v34, %v10021_v32  ;;  %v9204_v13 = vsub.f32 %v8990_v3, %v10512_v18  ;;  %v9206_v20 = vpack.c.bf16 %v3656_v59, %v3649_v17 }
 0x20c   : > { %v9211_v56 = vsub.f32 %v8995_v14, %v10514_v46  ;;  %v3663_v42 = vand.u32 4294901760, %v3662_v26 }
 0x20d   : > { %10513 = vst [vmem:[#allocation42_spill] sm:$0xff] %v9204_v13  ;;  %v9214_v19 = vadd.f32 %v5101_v28, %v8924_v45  ;;  %v5102_v1 = vpop.f32.mrb[130].mxu1  ;;  %v3670_v58 = vand.u32 4294901760, %v3669_v12  ;;  %v10025_v32 = vand.u32 4294901760, %v9204_v13 }
 0x20e   : > { %10515 = vst [vmem:[#allocation46_spill] sm:$0xff] %v9211_v56  ;;  %v5103_v5 = vpop.f32.mrb[131].mxu1  ;;  %v10026_v53 = vand.u32 4294901760, %v9211_v56 }
 0x20f   : > { %v5104_v3 = vadd.f32 %v5103_v5, %v5102_v1  ;;  %v9218_v18 = vpack.c.bf16 %v3670_v58, %v3663_v42  ;;  %v3676_v59 = vsub.f32 %v9204_v13, %v10025_v32  ;;  %v9236_v32 = vpack.c.bf16 %v9051_v24, %v9046_v49 }
 0x210   : > { %v3683_v45 = vsub.f32 %v9211_v56, %v10026_v53 }
 0x211   : > { %v9227_v14 = vadd.f32 %v5104_v3, %v8949_v43  ;;  %v5105_v28 = vpop.f32.mrb[132].mxu1  ;;  %v3677_v17 = vand.u32 4294901760, %v3676_v59 }
 0x212   : > { %v5106_v26 = vpop.f32.mrb[133].mxu1  ;;  %v3684_v12 = vand.u32 4294901760, %v3683_v45  ;;  %v9243_v45 = vpack.c.bf16 %v9072_v30, %v9067_v38 }
 0x213   : > { %v5107_v46 = vadd.f32 %v5106_v26, %v5105_v28 }
 0x214   : > { %v9229_v47 = vpack.c.bf16 %v3684_v12, %v3677_v17  ;;  %v9250_v12 = vpack.c.bf16 %v9095_v9, %v9087_v25 }
 0x215   : > { %v9232_v58 = vadd.f32 %v5107_v46, %v8974_v36  ;;  %v5108_v5 = vpop.f32.mrb[134].mxu1 }
 0x216   : > { %v5109_v1 = vpop.f32.mrb[135].mxu1 }
 0x217   : > { %v5110_v42 = vadd.f32 %v5109_v1, %v5108_v5 }
 0x219   : > { %v9239_v43 = vadd.f32 %v5110_v42, %v8999_v33  ;;  %v5111_v3 = vpop.f32.mrb[136].mxu1  ;;  %v9257_v42 = vpack.c.bf16 %v9114_v6, %v9109_v10 }
 0x21a   : > { %v5112_v59 = vpop.f32.mrb[137].mxu1 }
 0x21b   : > { %v5113_v53 = vadd.f32 %v5112_v59, %v5111_v3 }
 0x21d   : > { %v9246_v36 = vadd.f32 %v5113_v53, %v9014_v16  ;;  %v5114_v28 = vpop.f32.mrb[138].mxu1 }
 0x21e   : > { %v5115_v17 = vpop.f32.mrb[139].mxu1 }
 0x21f   : > { %v5116_v26 = vadd.f32 %v5115_v17, %v5114_v28  ;;  %v9264_v28 = vpack.c.bf16 %v9142_v60, %v9135_v31 }
 0x221   : > { %v9253_v33 = vadd.f32 %v5116_v26, %v9027_v4  ;;  %v5117_v46 = vpop.f32.mrb[140].mxu1 }
 0x222   : > { %v5118_v5 = vpop.f32.mrb[141].mxu1 }
 0x223   : > { %v5119_v1 = vadd.f32 %v5118_v5, %v5117_v46  ;;  %v9271_v5 = vpack.c.bf16 %v9165_v15, %v9157_v55 }
 0x225   : > { %v9260_v16 = vadd.f32 %v5119_v1, %v9034_v39  ;;  %v5120_v53 = vpop.f32.mrb[142].mxu1 }
 0x226   : > { %v5121_v3 = vpop.f32.mrb[143].mxu1 }
 0x227   : > { %v5122_v59 = vadd.f32 %v5121_v3, %v5120_v53  ;;  %v9278_v3 = vpack.c.bf16 %v9183_v34, %v9178_v11 }
 0x229   : > { %v9267_v4 = vadd.f32 %v5122_v59, %v9038_v37  ;;  %v5123_v17 = vpop.f32.mrb[144].mxu1 }
 0x22a   : > { %v5124_v26 = vpop.f32.mrb[145].mxu1 }
 0x22b   : > { %v5125_v46 = vadd.f32 %v5124_v26, %v5123_v17  ;;  %v9285_v26 = vpack.c.bf16 %v9211_v56, %v9204_v13 }
 0x22d   : > { %v9274_v39 = vadd.f32 %v5125_v46, %v9041_v48  ;;  %v5126_v1 = vpop.f32.mrb[146].mxu1 }
 0x22e   : > { %v5127_v44 = vpop.f32.mrb[147].mxu1 }
 0x22f   : > { %v5128_v53 = vadd.f32 %v5127_v44, %v5126_v1 }
 0x231   : > { %v9281_v37 = vadd.f32 %v5128_v53, %v9054_v8  ;;  %v5129_v59 = vpop.f32.mrb[148].mxu1 }
 0x232   : > { %v5130_v60 = vpop.f32.mrb[149].mxu1 }
 0x233   : > { %v5131_v17 = vadd.f32 %v5130_v60, %v5129_v59 }
 0x235   : > { %v9288_v48 = vadd.f32 %v5131_v17, %v9075_v2  ;;  %v5132_v46 = vpop.f32.mrb[150].mxu1 }
 0x236   : > { %v5133_v15 = vpop.f32.mrb[151].mxu1 }
 0x237   : > { %v5134_v44 = vadd.f32 %v5133_v15, %v5132_v46 }
 0x239   : > { %v9291_v1 = vadd.f32 %v5134_v44, %v9098_v41  ;;  %v5135_v34 = vpop.f32.mrb[152].mxu1 }
 0x23a   : > { %v5136_v11 = vpop.f32.mrb[153].mxu1 }
 0x23b   : > { %v5137_v8 = vadd.f32 %v5136_v11, %v5135_v34 }
 0x23d   : > { %v9294_v53 = vadd.f32 %v5137_v8, %v9122_v27  ;;  %v5138_v60 = vpop.f32.mrb[154].mxu1 }
 0x23e   : > { %v5139_v59 = vpop.f32.mrb[155].mxu1 }
 0x23f   : > { %v5140_v55 = vadd.f32 %v5139_v59, %v5138_v60 }
 0x241   : > { %v9297_v56 = vadd.f32 %v5140_v55, %v9145_v62  ;;  %v5141_v2 = vpop.f32.mrb[156].mxu1 }
 0x242   : > { %v5142_v17 = vpop.f32.mrb[157].mxu1 }
 0x243   : > { %v5143_v13 = vadd.f32 %v5142_v17, %v5141_v2 }
 0x245   : > { %v9300_v15 = vadd.f32 %v5143_v13, %v9168_v0  ;;  %v5144_v41 = vpop.f32.mrb[158].mxu1 }
 0x246   : > { %v5145_v46 = vpop.f32.mrb[159].mxu1 }
 0x247   : > { %v5146_v44 = vadd.f32 %v5145_v46, %v5144_v41 }
 0x249   : > { %v9303_v11 = vadd.f32 %v5146_v44, %v9191_v50  ;;  %v5179_v27 = vpop.f32.mrb[160].mxu1 }
 0x24a   : > { %v5180_v34 = vpop.f32.mrb[161].mxu1 }
 0x24b   : > { %v5181_v8 = vadd.f32 %v5180_v34, %v5179_v27 }
 0x24d   : > { %v1889_v60 = vadd.f32 %v5181_v8, %v9214_v19  ;;  %v5182_v59 = vpop.f32.mrb[162].mxu1 }
 0x24e   : > { %v5183_v62 = vpop.f32.mrb[163].mxu1 }
 0x24f   : > { %v9306_v55 = vand.u32 4294901760, %v1889_v60  ;;  %v5184_v31 = vadd.f32 %v5183_v62, %v5182_v59 }
 0x251   : > { %v9309_v2 = vsub.f32 %v1889_v60, %v9306_v55  ;;  %v1896_v0 = vadd.f32 %v5184_v31, %v9227_v14  ;;  %v5185_v13 = vpop.f32.mrb[164].mxu1 }
 0x252   : > { %v5186_v17 = vpop.f32.mrb[165].mxu1 }
 0x253   : > { %v9312_v41 = vand.u32 4294901760, %v1896_v0  ;;  %v5187_v50 = vadd.f32 %v5186_v17, %v5185_v13  ;;  %v10036_v46 = vand.u32 4294901760, %v9309_v2 }
 0x255   : > { %v9316_v44 = vsub.f32 %v1896_v0, %v9312_v41  ;;  %v1903_v19 = vadd.f32 %v5187_v50, %v9232_v58  ;;  %v5188_v27 = vpop.f32.mrb[166].mxu1  ;;  %v3417_v34 = vsub.f32 %v9309_v2, %v10036_v46 }
 0x256   : > { %v5189_v8 = vpop.f32.mrb[167].mxu1 }
 0x257   : > { %v10047_v31 = vand.u32 4294901760, %v9316_v44  ;;  %v9323_v14 = vand.u32 4294901760, %v1903_v19  ;;  %v5190_v60 = vadd.f32 %v5189_v8, %v5188_v27  ;;  %v3418_v59 = vand.u32 4294901760, %v3417_v34 }
 0x259   : > { %v3427_v62 = vsub.f32 %v9316_v44, %v10047_v31  ;;  %v9329_v0 = vsub.f32 %v1903_v19, %v9323_v14  ;;  %v1910_v58 = vadd.f32 %v5190_v60, %v9239_v43  ;;  %v5191_v13 = vpop.f32.mrb[168].mxu1  ;;  %5979 = vmatprep.mubr.f32.mxu0 %v3418_v59 }
 0x25a   : > { %v5192_v17 = vpop.f32.mrb[169].mxu1 }
 0x25b   : > { %v3428_v50 = vand.u32 4294901760, %v3427_v62  ;;  %v9332_v46 = vand.u32 4294901760, %v1910_v58  ;;  %v5193_v6 = vadd.f32 %v5192_v17, %v5191_v13  ;;  %v10046_v10 = vand.u32 4294901760, %v9329_v0 }
 0x25d   : > { %v9336_v27 = vsub.f32 %v1910_v58, %v9332_v46  ;;  %v1917_v34 = vadd.f32 %v5193_v6, %v9246_v36  ;;  %v5194_v8 = vpop.f32.mrb[170].mxu1  ;;  %5980 = vmatmul.mubr.f32.vlgmr.msra.gmra.mrb[0].mxu0 %v3428_v50  ;;  %v3437_v43 = vsub.f32 %v9329_v0, %v10046_v10 }
 0x25e   : > { %v5195_v19 = vpop.f32.mrb[171].mxu1  ;;  %6702 = vmatpush3.bf16.msra.mxu0 %v9079_v21 }
 0x25f   : > { %v9343_v60 = vand.u32 4294901760, %v1917_v34  ;;  %v5196_v59 = vadd.f32 %v5195_v19, %v5194_v8  ;;  %v3438_v62 = vand.u32 4294901760, %v3437_v43  ;;  %v10039_v13 = vand.u32 4294901760, %v9336_v27  ;;  %6704 = vmatprep.subr.bf16.mxu0 %v9116_v51 }
 0x261   : > { %v9348_v58 = vsub.f32 %v1917_v34, %v9343_v60  ;;  %v1924_v6 = vadd.f32 %v5196_v59, %v9253_v33  ;;  %v5197_v36 = vpop.f32.mrb[172].mxu1  ;;  %5982 = vmatprep.mubr.f32.mxu0 %v3438_v62  ;;  %v3447_v17 = vsub.f32 %v9336_v27, %v10039_v13 }
 0x262   : > { %v5198_v21 = vpop.f32.mrb[173].mxu1  ;;  %6706 = vmatpush3.bf16.msra.mxu0 %v9116_v51 }
 0x263   : > { %v9355_v50 = vand.u32 4294901760, %v1924_v6  ;;  %v5199_v8 = vadd.f32 %v5198_v21, %v5197_v36  ;;  %v3448_v43 = vand.u32 4294901760, %v3447_v17  ;;  %v10040_v19 = vand.u32 4294901760, %v9348_v58  ;;  %6708 = vmatprep.subr.bf16.mxu0 %v9137_v40 }
 0x265   : > { %v9360_v34 = vsub.f32 %v1924_v6, %v9355_v50  ;;  %v1931_v33 = vadd.f32 %v5199_v8, %v9260_v16  ;;  %v5200_v59 = vpop.f32.mrb[174].mxu1  ;;  %5983 = vmatmul.mubr.f32.gmra.mrb[2].mxu0 %v3448_v43  ;;  %v3457_v62 = vsub.f32 %v9348_v58, %v10040_v19 }
 0x266   : > { %v5201_v51 = vpop.f32.mrb[175].mxu1  ;;  %6710 = vmatpush3.bf16.msra.mxu0 %v9137_v40 }
 0x267   : > { %v9367_v36 = vand.u32 4294901760, %v1931_v33  ;;  %v5202_v17 = vadd.f32 %v5201_v51, %v5200_v59  ;;  %v3458_v21 = vand.u32 4294901760, %v3457_v62  ;;  %v10041_v13 = vand.u32 4294901760, %v9360_v34  ;;  %6712 = vmatprep.subr.bf16.mxu0 %v9149_v7 }
 0x269   : > { %v9372_v6 = vsub.f32 %v1931_v33, %v9367_v36  ;;  %v1938_v16 = vadd.f32 %v5202_v17, %v9267_v4  ;;  %v5203_v8 = vpop.f32.mrb[176].mxu1  ;;  %5985 = vmatprep.mubr.f32.mxu0 %v3458_v21  ;;  %v3467_v43 = vsub.f32 %v9360_v34, %v10041_v13 }
 0x26a   : > { %v5204_v40 = vpop.f32.mrb[177].mxu1  ;;  %6714 = vmatpush3.bf16.msra.mxu0 %v9149_v7 }
 0x26b   : > { %v9379_v59 = vand.u32 4294901760, %v1938_v16  ;;  %v5205_v62 = vadd.f32 %v5204_v40, %v5203_v8  ;;  %v3468_v51 = vand.u32 4294901760, %v3467_v43  ;;  %v10042_v19 = vand.u32 4294901760, %v9372_v6  ;;  %6716 = vmatprep.subr.bf16.mxu0 %v9185_v63 }
 0x26d   : > { %v9384_v33 = vsub.f32 %v1938_v16, %v9379_v59  ;;  %v1945_v4 = vadd.f32 %v5205_v62, %v9274_v39  ;;  %v5206_v17 = vpop.f32.mrb[178].mxu1  ;;  %5986 = vmatmul.mubr.f32.gmra.mrb[4].mxu0 %v3468_v51  ;;  %v3477_v21 = vsub.f32 %v9372_v6, %v10042_v19 }
 0x26e   : > { %v5207_v7 = vpop.f32.mrb[179].mxu1  ;;  %6718 = vmatpush3.bf16.msra.mxu0 %v9185_v63 }
 0x26f   : > { %v9391_v8 = vand.u32 4294901760, %v1945_v4  ;;  %v5208_v43 = vadd.f32 %v5207_v7, %v5206_v17  ;;  %v3478_v40 = vand.u32 4294901760, %v3477_v21  ;;  %v10043_v13 = vand.u32 4294901760, %v9384_v33  ;;  %6720 = vmatprep.subr.bf16.mxu0 %v9206_v20 }
 0x271   : > { %v9396_v16 = vsub.f32 %v1945_v4, %v9391_v8  ;;  %v1952_v39 = vadd.f32 %v5208_v43, %v9281_v37  ;;  %v5209_v62 = vpop.f32.mrb[180].mxu1  ;;  %5988 = vmatprep.mubr.f32.mxu0 %v3478_v40  ;;  %v3487_v51 = vsub.f32 %v9384_v33, %v10043_v13 }
 0x272   : > { %v5210_v63 = vpop.f32.mrb[181].mxu1  ;;  %6722 = vmatpush3.bf16.msra.mxu0 %v9206_v20 }
 0x273   : > { %v9403_v17 = vand.u32 4294901760, %v1952_v39  ;;  %v5211_v21 = vadd.f32 %v5210_v63, %v5209_v62  ;;  %v3488_v7 = vand.u32 4294901760, %v3487_v51  ;;  %v10044_v19 = vand.u32 4294901760, %v9396_v16  ;;  %6724 = vmatprep.subr.bf16.mxu0 %v9218_v18 }
 0x275   : > { %v9408_v4 = vsub.f32 %v1952_v39, %v9403_v17  ;;  %v1959_v37 = vadd.f32 %v5211_v21, %v9288_v48  ;;  %v5212_v43 = vpop.f32.mrb[182].mxu1  ;;  %5989 = vmatmul.mubr.f32.gmra.mrb[6].mxu0 %v3488_v7  ;;  %v3497_v40 = vsub.f32 %v9396_v16, %v10044_v19 }
 0x276   : > { %v5213_v20 = vpop.f32.mrb[183].mxu1  ;;  %6726 = vmatpush3.bf16.msra.mxu0 %v9218_v18 }
 0x277   : > { %v9415_v62 = vand.u32 4294901760, %v1959_v37  ;;  %v5214_v51 = vadd.f32 %v5213_v20, %v5212_v43  ;;  %v3498_v63 = vand.u32 4294901760, %v3497_v40  ;;  %v10045_v13 = vand.u32 4294901760, %v9408_v4  ;;  %6728 = vmatprep.subr.bf16.mxu0 %v9229_v47 }
 0x279   : > { %v9420_v39 = vsub.f32 %v1959_v37, %v9415_v62  ;;  %v1966_v48 = vadd.f32 %v5214_v51, %v9291_v1  ;;  %v5215_v21 = vpop.f32.mrb[184].mxu1  ;;  %5991 = vmatprep.mubr.f32.mxu0 %v3498_v63  ;;  %v3507_v7 = vsub.f32 %v9408_v4, %v10045_v13 }
 0x27a   : > { %v5216_v18 = vpop.f32.mrb[185].mxu1  ;;  %6730 = vmatpush3.bf16.msra.mxu0 %v9229_v47 }
 0x27b   : > { %v9427_v43 = vand.u32 4294901760, %v1966_v48  ;;  %v5217_v40 = vadd.f32 %v5216_v18, %v5215_v21  ;;  %v3508_v20 = vand.u32 4294901760, %v3507_v7  ;;  %v10048_v19 = vand.u32 4294901760, %v9420_v39  ;;  %6732 = vmatprep.subr.bf16.mxu0 %v9236_v32 }
 0x27d   : > { %v9432_v37 = vsub.f32 %v1966_v48, %v9427_v43  ;;  %v1973_v1 = vadd.f32 %v5217_v40, %v9294_v53  ;;  %v5218_v51 = vpop.f32.mrb[186].mxu1  ;;  %5992 = vmatmul.mubr.f32.gmra.mrb[8].mxu0 %v3508_v20  ;;  %v3517_v63 = vsub.f32 %v9420_v39, %v10048_v19 }
 0x27e   : > { %v5219_v47 = vpop.f32.mrb[187].mxu1 }
 0x27f   : > { %v9438_v13 = vand.u32 4294901760, %v1973_v1  ;;  %v5220_v21 = vadd.f32 %v5219_v47, %v5218_v51  ;;  %v3518_v7 = vand.u32 4294901760, %v3517_v63  ;;  %v10050_v18 = vand.u32 4294901760, %v9432_v37 }
 0x281   : > { %v9442_v10 = vsub.f32 %v1973_v1, %v9438_v13  ;;  %v1980_v48 = vadd.f32 %v5220_v21, %v9297_v56  ;;  %v5221_v31 = vpop.f32.mrb[188].mxu1  ;;  %5994 = vmatprep.mubr.f32.mxu0 %v3518_v7  ;;  %v3527_v53 = vsub.f32 %v9432_v37, %v10050_v18 }
 0x282   : > { %v5222_v40 = vpop.f32.mrb[189].mxu1 }
 0x283   : > { %v9448_v20 = vand.u32 4294901760, %v1980_v48  ;;  %v5223_v19 = vadd.f32 %v5222_v40, %v5221_v31  ;;  %v3528_v9 = vand.u32 4294901760, %v3527_v53  ;;  %v3536_v51 = vand.u32 4294901760, %v9442_v10 }
 0x285   : > { %v9452_v63 = vsub.f32 %v1980_v48, %v9448_v20  ;;  %v1987_v1 = vadd.f32 %v5223_v19, %v9300_v15  ;;  %v5224_v47 = vpop.f32.mrb[190].mxu1  ;;  %5995 = vmatmul.mubr.f32.gmra.mrb[10].mxu0 %v3528_v9  ;;  %v3537_v56 = vsub.f32 %v9442_v10, %v3536_v51 }
 0x286   : > { %v5225_v21 = vpop.f32.mrb[191].mxu1 }
 0x287   : > { %v9458_v7 = vand.u32 4294901760, %v1987_v1  ;;  %v5226_v18 = vadd.f32 %v5225_v21, %v5224_v47  ;;  %v3538_v25 = vand.u32 4294901760, %v3537_v56  ;;  %v3546_v31 = vand.u32 4294901760, %v9452_v63 }
 0x289   : > { %v9462_v53 = vsub.f32 %v1987_v1, %v9458_v7  ;;  %v1994_v48 = vadd.f32 %v5226_v18, %v9303_v11  ;;  %5997 = vmatprep.mubr.f32.mxu0 %v3538_v25  ;;  %v3547_v9 = vsub.f32 %v9452_v63, %v3546_v31 }
 0x28b   : > { %v9468_v15 = vand.u32 4294901760, %v1994_v48  ;;  %v3548_v19 = vand.u32 4294901760, %v3547_v9  ;;  %v3556_v40 = vand.u32 4294901760, %v9462_v53 }
 0x28d   : > { %v9472_v47 = vsub.f32 %v1994_v48, %v9468_v15  ;;  %5998 = vmatmul.mubr.f32.gmra.mrb[12].mxu0 %v3548_v19  ;;  %v3557_v1 = vsub.f32 %v9462_v53, %v3556_v40  ;;  %v10525_v48 = vld [vmem:[#allocation10_spill] sm:$0xff]  ;;  %v10527_v19 = vand.u32 4294901760, %v9336_v27 }
 0x28e   : > { %v10526_v9 = vand.u32 4294901760, %v10525_v48  ;;  %v10549_v48 = vld [vmem:[#allocation14_spill] sm:$0xff] }
 0x28f   : > { %v3558_v56 = vand.u32 4294901760, %v3557_v1  ;;  %v3566_v25 = vand.u32 4294901760, %v9472_v47  ;;  %v10531_v1 = vld [vmem:[#allocation38_spill] sm:$0xff] }
 0x291   : > { %6000 = vmatprep.mubr.f32.mxu0 %v3558_v56  ;;  %v3567_v11 = vsub.f32 %v9472_v47, %v3566_v25 }
 0x293   : > { %v3568_v18 = vand.u32 4294901760, %v3567_v11  ;;  %v10533_v11 = vand.u32 4294901760, %v9360_v34 }
 0x295   : > { %6001 = vmatmul.mubr.f32.gmra.mrb[14].mxu0 %v3568_v18  ;;  %v10534_v18 = vand.u32 4294901760, %v9372_v6 }
 0x296   : > { %6035 = vmatprep.mubr.f32.mxu0 %v9306_v55 }
 0x299   : > { %6036 = vmatmul.mubr.f32.vlgmr.msra.gmra.mrb[0].mxu0 %v9312_v41 }
 0x29a   : > { %6038 = vmatprep.mubr.f32.mxu0 %v9323_v14  ;;  %6734 = vmatpush3.bf16.msra.mxu0 %v9236_v32  ;;  %v10516_v32 = vand.u32 4294901760, %v9046_v49  ;;  %v10522_v49 = vand.u32 4294901760, %v9329_v0 }
 0x29b   : > { %6736 = vmatprep.subr.bf16.mxu0 %v9243_v45 }
 0x29d   : > { %6039 = vmatmul.mubr.f32.gmra.mrb[2].mxu0 %v9332_v46 }
 0x29e   : > { %6041 = vmatprep.mubr.f32.mxu0 %v9343_v60  ;;  %6738 = vmatpush3.bf16.msra.mxu0 %v9243_v45  ;;  %v10517_v45 = vand.u32 4294901760, %v9051_v24  ;;  %v10523_v24 = vld [vmem:[#allocation9_spill] sm:$0xff] }
 0x29f   : > { %6740 = vmatprep.subr.bf16.mxu0 %v9250_v12  ;;  %v10524_v21 = vand.u32 4294901760, %v10523_v24  ;;  %v10546_v24 = vand.u32 4294901760, %v9420_v39 }
 0x2a1   : > { %6042 = vmatmul.mubr.f32.gmra.mrb[4].mxu0 %v9355_v50 }
 0x2a2   : > { %6044 = vmatprep.mubr.f32.mxu0 %v9367_v36  ;;  %6742 = vmatpush3.bf16.msra.mxu0 %v9250_v12  ;;  %v6795_v12 = vpack.c.bf16 %v10517_v45, %v10516_v32  ;;  %v10537_v45 = vld [vmem:[#allocation12_spill] sm:$0xff] }
 0x2a3   : > { %6744 = vmatprep.subr.bf16.mxu0 %v9257_v42 }
 0x2a5   : > { %6045 = vmatmul.mubr.f32.gmra.mrb[6].mxu0 %v9379_v59 }
 0x2a6   : > { %6047 = vmatprep.mubr.f32.mxu0 %v9391_v8  ;;  %6746 = vmatpush3.bf16.msra.mxu0 %v9257_v42  ;;  %v10518_v42 = vand.u32 4294901760, %v9309_v2 }
 0x2a7   : > { %6748 = vmatprep.subr.bf16.mxu0 %v9264_v28 }
 0x2a9   : > { %6048 = vmatmul.mubr.f32.gmra.mrb[8].mxu0 %v9403_v17 }
 0x2aa   : > { %6050 = vmatprep.mubr.f32.mxu0 %v9415_v62  ;;  %6750 = vmatpush3.bf16.msra.mxu0 %v9264_v28  ;;  %v10519_v28 = vand.u32 4294901760, %v9067_v38  ;;  %v10528_v38 = vand.u32 4294901760, %v9348_v58 }
 0x2ab   : > { %6752 = vmatprep.subr.bf16.mxu0 %v9271_v5 }
 0x2ad   : > { %6051 = vmatmul.mubr.f32.gmra.mrb[10].mxu0 %v9427_v43 }
 0x2ae   : > { %6053 = vmatprep.mubr.f32.mxu0 %v9438_v13  ;;  %6754 = vmatpush3.bf16.msra.mxu0 %v9271_v5  ;;  %v10520_v5 = vand.u32 4294901760, %v9072_v30  ;;  %v10529_v30 = vld [vmem:[#allocation35_spill] sm:$0xff] }
 0x2af   : > { %6756 = vmatprep.subr.bf16.mxu0 %v9278_v3 }
 0x2b1   : > { %6054 = vmatmul.mubr.f32.gmra.mrb[12].mxu0 %v9448_v20 }
 0x2b2   : > { %6056 = vmatprep.mubr.f32.mxu0 %v9458_v7  ;;  %6758 = vmatpush3.bf16.msra.mxu0 %v9278_v3  ;;  %v6799_v3 = vpack.c.bf16 %v10520_v5, %v10519_v28  ;;  %v10540_v28 = vand.u32 4294901760, %v9396_v16 }
 0x2b3   : > { %6760 = vmatprep.subr.bf16.mxu0 %v9285_v26 }
 0x2b5   : > { %6057 = vmatmul.mubr.f32.gmra.mrb[14].mxu0 %v9468_v15 }
 0x2b6   : > { %6762 = vmatpush3.bf16.msra.mxu0 %v9285_v26  ;;  %6091 = vmatprep.mubr.f32.mxu0 %v9309_v2  ;;  %v10521_v26 = vand.u32 4294901760, %v9316_v44  ;;  %v6803_v2 = vpack.c.bf16 %v10526_v9, %v10524_v21 }
 0x2b7   : > { %6764 = vmatprep.subr.bf16.mxu0 %v8858_v61 }
 0x2b9   : > { %6092 = vmatmul.mubr.f32.vlgmr.msra.gmra.mrb[0].mxu0 %v9316_v44  ;;  %v10530_v44 = vand.u32 4294901760, %v10529_v30 }
 0x2ba   : > { %6094 = vmatprep.mubr.f32.mxu0 %v9329_v0  ;;  %6766 = vmatpush3.bf16.msra.mxu0 %v8858_v61  ;;  %v10532_v0 = vand.u32 4294901760, %v10531_v1 }
 0x2bb   : > { %6768 = vmatprep.subr.bf16.mxu0 %v8883_v57 }
 0x2bc   : > { %v6807_v56 = vpack.c.bf16 %v10532_v0, %v10530_v44 }
 0x2bd   : > { %6095 = vmatmul.mubr.f32.gmra.mrb[2].mxu0 %v9336_v27  ;;  %v10535_v27 = vld [vmem:[#allocation11_spill] sm:$0xff] }
 0x2be   : > { %6097 = vmatprep.mubr.f32.mxu0 %v9348_v58  ;;  %6770 = vmatpush3.bf16.msra.mxu0 %v8883_v57  ;;  %v10536_v32 = vand.u32 4294901760, %v10535_v27  ;;  %v10538_v58 = vand.u32 4294901760, %v10537_v45 }
 0x2bf   : > { %6772 = vmatprep.subr.bf16.mxu0 %v8908_v22 }
 0x2c1   : > { %6098 = vmatmul.mubr.f32.gmra.mrb[4].mxu0 %v9360_v34  ;;  %v10541_v34 = vld [vmem:[#allocation39_spill] sm:$0xff] }
 0x2c2   : > { %6100 = vmatprep.mubr.f32.mxu0 %v9372_v6  ;;  %6774 = vmatpush3.bf16.msra.mxu0 %v8908_v22  ;;  %v10542_v5 = vand.u32 4294901760, %v10541_v34 }
 0x2c3   : > { %6776 = vmatprep.subr.bf16.mxu0 %v8933_v52 }
 0x2c5   : > { %6101 = vmatmul.mubr.f32.gmra.mrb[6].mxu0 %v9384_v33 }
 0x2c6   : > { %6103 = vmatprep.mubr.f32.mxu0 %v9396_v16  ;;  %6778 = vmatpush3.bf16.msra.mxu0 %v8933_v52  ;;  %v10550_v16 = vand.u32 4294901760, %v10549_v48 }
 0x2c7   : > { %6780 = vmatprep.subr.bf16.mxu0 %v8958_v23 }
 0x2c9   : > { %6104 = vmatmul.mubr.f32.gmra.mrb[8].mxu0 %v9408_v4 }
 0x2ca   : > { %6106 = vmatprep.mubr.f32.mxu0 %v9420_v39  ;;  %6782 = vmatpush3.bf16.msra.mxu0 %v8958_v23 }
 0x2cb   : > { %6784 = vmatprep.subr.bf16.mxu0 %v8983_v29 }
 0x2cd   : > { %6107 = vmatmul.mubr.f32.gmra.mrb[10].mxu0 %v9432_v37 }
 0x2ce   : > { %6109 = vmatprep.mubr.f32.mxu0 %v9442_v10  ;;  %6786 = vmatpush3.bf16.msra.mxu0 %v8983_v29 }
 0x2cf   : > { %6788 = vmatprep.subr.bf16.mxu0 %v9008_v35 }
 0x2d1   : > { %6110 = vmatmul.mubr.f32.gmra.mrb[12].mxu0 %v9452_v63 }
 0x2d2   : > { %6112 = vmatprep.mubr.f32.mxu0 %v9462_v53  ;;  %6790 = vmatpush3.bf16.msra.mxu0 %v9008_v35 }
 0x2d3   : > { %6792 = vmatprep.subr.bf16.mxu0 %v9023_v54 }
 0x2d5   : > { %6113 = vmatmul.mubr.f32.gmra.mrb[14].mxu0 %v9472_v47 }
 0x2d6   : > { %6794 = vmatpush3.bf16.msra.mxu0 %v9023_v54  ;;  %6147 = vmatprep.mubr.f32.mxu0 %v10518_v42  ;;  %v10539_v42 = vand.u32 4294901760, %v9384_v33  ;;  %v10547_v33 = vld [vmem:[#allocation13_spill] sm:$0xff] }
 0x2d7   : > { %6796 = vmatprep.subr.bf16.mxu0 %v6795_v12  ;;  %v10548_v21 = vand.u32 4294901760, %v10547_v33 }
 0x2d9   : > { %6148 = vmatmul.mubr.f32.vlgmr.msra.gmra.mrb[0].mxu0 %v10521_v26  ;;  %v6819_v9 = vpack.c.bf16 %v10550_v16, %v10548_v21 }
 0x2da   : > { %6150 = vmatprep.mubr.f32.mxu0 %v10522_v49  ;;  %6798 = vmatpush3.bf16.msra.mxu0 %v6795_v12  ;;  %v6811_v12 = vpack.c.bf16 %v10538_v58, %v10536_v32  ;;  %v10545_v49 = vand.u32 4294901760, %v9408_v4  ;;  %v10552_v4 = vld [vmem:[#allocation42_spill] sm:$0xff] }
 0x2db   : > { %6800 = vmatprep.subr.bf16.mxu0 %v6799_v3 }
 0x2dd   : > { %6151 = vmatmul.mubr.f32.gmra.mrb[2].mxu0 %v10527_v19  ;;  %v10553_v19 = vand.u32 4294901760, %v10552_v4 }
 0x2de   : > { %6153 = vmatprep.mubr.f32.mxu0 %v10528_v38  ;;  %6802 = vmatpush3.bf16.msra.mxu0 %v6799_v3  ;;  %v10543_v3 = vld [vmem:[#allocation40_spill] sm:$0xff]  ;;  %v10554_v38 = vld [vmem:[#allocation46_spill] sm:$0xff] }
 0x2df   : > { %6804 = vmatprep.subr.bf16.mxu0 %v6803_v2  ;;  %v10544_v6 = vand.u32 4294901760, %v10543_v3  ;;  %v10555_v39 = vand.u32 4294901760, %v10554_v38 }
 0x2e1   : > { %6154 = vmatmul.mubr.f32.gmra.mrb[4].mxu0 %v10533_v11  ;;  %v6815_v26 = vpack.c.bf16 %v10544_v6, %v10542_v5  ;;  %v6823_v30 = vpack.c.bf16 %v10555_v39, %v10553_v19 }
 0x2e2   : > { %6156 = vmatprep.mubr.f32.mxu0 %v10534_v18  ;;  %6806 = vmatpush3.bf16.msra.mxu0 %v6803_v2  ;;  %v10551_v2 = vand.u32 4294901760, %v9432_v37 }
 0x2e3   : > { %6808 = vmatprep.subr.bf16.mxu0 %v6807_v56 }
 0x2e5   : > { %6157 = vmatmul.mubr.f32.gmra.mrb[6].mxu0 %v10539_v42 }
 0x2e6   : > { %6159 = vmatprep.mubr.f32.mxu0 %v10540_v28  ;;  %6810 = vmatpush3.bf16.msra.mxu0 %v6807_v56 }
 0x2e7   : > { %6812 = vmatprep.subr.bf16.mxu0 %v6811_v12 }
 0x2e9   : > { %6160 = vmatmul.mubr.f32.gmra.mrb[8].mxu0 %v10545_v49 }
 0x2ea   : > { %6162 = vmatprep.mubr.f32.mxu0 %v10546_v24  ;;  %6814 = vmatpush3.bf16.msra.mxu0 %v6811_v12 }
 0x2eb   : > { %6816 = vmatprep.subr.bf16.mxu0 %v6815_v26 }
 0x2ed   : > { %6163 = vmatmul.mubr.f32.gmra.mrb[10].mxu0 %v10551_v2 }
 0x2ee   : > { %6165 = vmatprep.mubr.f32.mxu0 %v3536_v51  ;;  %6818 = vmatpush3.bf16.msra.mxu0 %v6815_v26 }
 0x2ef   : > { %6820 = vmatprep.subr.bf16.mxu0 %v6819_v9 }
 0x2f1   : > { %6166 = vmatmul.mubr.f32.gmra.mrb[12].mxu0 %v3546_v31 }
 0x2f2   : > { %6168 = vmatprep.mubr.f32.mxu0 %v3556_v40  ;;  %6822 = vmatpush3.bf16.msra.mxu0 %v6819_v9 }
 0x2f3   : > { %6824 = vmatprep.subr.bf16.mxu0 %v6823_v30 }
 0x2f5   : > { %6169 = vmatmul.mubr.f32.gmra.mrb[14].mxu0 %v3566_v25 }
 0x2f6   : > { %6826 = vmatpush3.bf16.msra.mxu0 %v6823_v30  ;;  %6203 = vmatprep.mubr.f32.mxu0 %v9306_v55 }
 0x2f7   : > { %6828 = vmatprep.subr.bf16.mxu0 %v8858_v61 }
 0x2f9   : > { %6204 = vmatmul.mubr.f32.vlgmr.msra.gmra.mrb[0].mxu0 %v9312_v41 }
 0x2fa   : > { %6206 = vmatprep.mubr.f32.mxu0 %v9323_v14  ;;  %6830 = vmatpush3.bf16.msra.mxu0 %v8858_v61  ;;  %v4743_v61 = vld [vmem:[%s9688_s4] ss:$0 sm:$0xff] }
 0x2fb   : > { %6832 = vmatprep.subr.bf16.mxu0 %v8883_v57 }
 0x2fd   : > { %6207 = vmatmul.mubr.f32.gmra.mrb[2].mxu0 %v9332_v46 }
 0x2fe   : > { %6209 = vmatprep.mubr.f32.mxu0 %v9343_v60  ;;  %6834 = vmatpush3.bf16.msra.mxu0 %v8883_v57 }
 0x2ff   : > { %6836 = vmatprep.subr.bf16.mxu0 %v8908_v22 }
 0x301   : > { %6210 = vmatmul.mubr.f32.gmra.mrb[4].mxu0 %v9355_v50 }
 0x302   : > { %6212 = vmatprep.mubr.f32.mxu0 %v9367_v36  ;;  %6838 = vmatpush3.bf16.msra.mxu0 %v8908_v22 }
 0x303   : > { %6840 = vmatprep.subr.bf16.mxu0 %v8933_v52 }
 0x305   : > { %6213 = vmatmul.mubr.f32.gmra.mrb[6].mxu0 %v9379_v59 }
 0x306   : > { %6215 = vmatprep.mubr.f32.mxu0 %v9391_v8  ;;  %6842 = vmatpush3.bf16.msra.mxu0 %v8933_v52 }
 0x307   : > { %6844 = vmatprep.subr.bf16.mxu0 %v8958_v23 }
 0x309   : > { %6216 = vmatmul.mubr.f32.gmra.mrb[8].mxu0 %v9403_v17 }
 0x30a   : > { %6218 = vmatprep.mubr.f32.mxu0 %v9415_v62  ;;  %6846 = vmatpush3.bf16.msra.mxu0 %v8958_v23 }
 0x30b   : > { %6848 = vmatprep.subr.bf16.mxu0 %v8983_v29 }
 0x30d   : > { %6219 = vmatmul.mubr.f32.gmra.mrb[10].mxu0 %v9427_v43 }
 0x30e   : > { %6221 = vmatprep.mubr.f32.mxu0 %v9438_v13  ;;  %6850 = vmatpush3.bf16.msra.mxu0 %v8983_v29 }
 0x30f   : > { %6852 = vmatprep.subr.bf16.mxu0 %v9008_v35 }
 0x311   : > { %6222 = vmatmul.mubr.f32.gmra.mrb[12].mxu0 %v9448_v20 }
 0x312   : > { %6224 = vmatprep.mubr.f32.mxu0 %v9458_v7  ;;  %6854 = vmatpush3.bf16.msra.mxu0 %v9008_v35 }
 0x313   : > { %6856 = vmatprep.subr.bf16.mxu0 %v9023_v54 }
 0x315   : > { %6225 = vmatmul.mubr.f32.gmra.mrb[14].mxu0 %v9468_v15 }
 0x316   : > { %6858 = vmatpush3.bf16.msra.mxu0 %v9023_v54  ;;  %6259 = vmatprep.mubr.f32.mxu0 %v9306_v55 }
 0x319   : > { %6260 = vmatmul.mubr.f32.vlgmr.msra.gmra.mrb[0].mxu0 %v9312_v41 }
 0x31a   : > { %6262 = vmatprep.mubr.f32.mxu0 %v9323_v14 }
 0x31d   : > { %6263 = vmatmul.mubr.f32.gmra.mrb[2].mxu0 %v9332_v46 }
 0x31e   : > { %6265 = vmatprep.mubr.f32.mxu0 %v9343_v60 }
 0x321   : > { %6266 = vmatmul.mubr.f32.gmra.mrb[4].mxu0 %v9355_v50 }
 0x322   : > { %6268 = vmatprep.mubr.f32.mxu0 %v9367_v36 }
 0x325   : > { %6269 = vmatmul.mubr.f32.gmra.mrb[6].mxu0 %v9379_v59 }
 0x326   : > { %6271 = vmatprep.mubr.f32.mxu0 %v9391_v8 }
 0x329   : > { %6272 = vmatmul.mubr.f32.gmra.mrb[8].mxu0 %v9403_v17 }
 0x32a   : > { %6274 = vmatprep.mubr.f32.mxu0 %v9415_v62 }
 0x32d   : > { %6275 = vmatmul.mubr.f32.gmra.mrb[10].mxu0 %v9427_v43 }
 0x32e   : > { %6277 = vmatprep.mubr.f32.mxu0 %v9438_v13 }
 0x331   : > { %6278 = vmatmul.mubr.f32.gmra.mrb[12].mxu0 %v9448_v20 }
 0x332   : > { %6280 = vmatprep.mubr.f32.mxu0 %v9458_v7 }
 0x335   : > { %6281 = vmatmul.mubr.f32.gmra.mrb[14].mxu0 %v9468_v15 }
 0x3ec   : > { %v6261_v57 = vpop.f32.mrb[0].mxu0 }
 0x3ed   : > { %v4627_v22 = vadd.f32 %v6261_v57, %v4743_v61  ;;  %v4525_v52 = vpop.f32.mrb[1].mxu0 }
 0x3ee   : > { %v4626_v23 = vadd.f32 %v4743_v61, %v4525_v52 }
 0x3ef   : > { %v4643_v29 = vmax.f32 %v4627_v22, 0.0 }
 0x3f0   : > { %v4642_v54 = vmax.f32 %v4626_v23, 0.0  ;;  %v6264_v35 = vpop.f32.mrb[2].mxu0 }
 0x3f1   : > { %4659 = vst [vmem:[%s9663_s28 + $0x8] sm:$0xff] %v4643_v29  ;;  %v4629_v10 = vadd.f32 %v6264_v35, %v4743_v61  ;;  %v4537_v55 = vpop.f32.mrb[3].mxu0 }
 0x3f2   : > { %4658 = vst [vmem:[%s9663_s28] sm:$0xff] %v4642_v54  ;;  %v4628_v41 = vadd.f32 %v4743_v61, %v4537_v55 }
 0x3f3   : > { %v4645_v46 = vmax.f32 %v4629_v10, 0.0 }
 0x3f4   : > { %v4644_v14 = vmax.f32 %v4628_v41, 0.0  ;;  %v6267_v60 = vpop.f32.mrb[4].mxu0 }
 0x3f5   : > { %4661 = vst [vmem:[%s9663_s28 + $0x18] sm:$0xff] %v4645_v46  ;;  %v4631_v13 = vadd.f32 %v6267_v60, %v4743_v61  ;;  %v4549_v50 = vpop.f32.mrb[5].mxu0 }
 0x3f6   : > { %4660 = vst [vmem:[%s9663_s28 + $0x10] sm:$0xff] %v4644_v14  ;;  %v4630_v36 = vadd.f32 %v4743_v61, %v4549_v50 }
 0x3f7   : > { %v4647_v59 = vmax.f32 %v4631_v13, 0.0 }
 0x3f8   : > { %v4646_v8 = vmax.f32 %v4630_v36, 0.0  ;;  %v6270_v17 = vpop.f32.mrb[6].mxu0 }
 0x3f9   : > { %4663 = vst [vmem:[%s9663_s28 + $0x28] sm:$0xff] %v4647_v59  ;;  %v4633_v62 = vadd.f32 %v6270_v17, %v4743_v61  ;;  %v4561_v43 = vpop.f32.mrb[7].mxu0 }
 0x3fa   : > { %4662 = vst [vmem:[%s9663_s28 + $0x20] sm:$0xff] %v4646_v8  ;;  %v4632_v37 = vadd.f32 %v4743_v61, %v4561_v43 }
 0x3fb   : > { %v4649_v20 = vmax.f32 %v4633_v62, 0.0 }
 0x3fc   : > { %v4648_v51 = vmax.f32 %v4632_v37, 0.0  ;;  %v6273_v63 = vpop.f32.mrb[8].mxu0 }
 0x3fd   : > { %4665 = vst [vmem:[%s9663_s28 + $0x38] sm:$0xff] %v4649_v20  ;;  %v4635_v7 = vadd.f32 %v6273_v63, %v4743_v61  ;;  %v4573_v31 = vpop.f32.mrb[9].mxu0 }
 0x3fe   : > { %4664 = vst [vmem:[%s9663_s28 + $0x30] sm:$0xff] %v4648_v51  ;;  %v4634_v53 = vadd.f32 %v4743_v61, %v4573_v31 }
 0x3ff   : > { %v4651_v15 = vmax.f32 %v4635_v7, 0.0 }
 0x400   : > { %v4650_v40 = vmax.f32 %v4634_v53, 0.0  ;;  %v6276_v47 = vpop.f32.mrb[10].mxu0 }
 0x401   : > { %4667 = vst [vmem:[%s9663_s28 + $0x48] sm:$0xff] %v4651_v15  ;;  %v4637_v25 = vadd.f32 %v6276_v47, %v4743_v61  ;;  %v4585_v44 = vpop.f32.mrb[11].mxu0 }
 0x402   : > { %4666 = vst [vmem:[%s9663_s28 + $0x40] sm:$0xff] %v4650_v40  ;;  %v4636_v1 = vadd.f32 %v4743_v61, %v4585_v44 }
 0x403   : > { %v4653_v0 = vmax.f32 %v4637_v25, 0.0 }
 0x404   : > { %v4652_v56 = vmax.f32 %v4636_v1, 0.0  ;;  %v6279_v11 = vpop.f32.mrb[12].mxu0 }
 0x405   : > { %4669 = vst [vmem:[%s9663_s28 + $0x58] sm:$0xff] %v4653_v0  ;;  %v4639_v18 = vadd.f32 %v6279_v11, %v4743_v61  ;;  %v4597_v27 = vpop.f32.mrb[13].mxu0 }
 0x406   : > { %4668 = vst [vmem:[%s9663_s28 + $0x50] sm:$0xff] %v4652_v56  ;;  %v4638_v32 = vadd.f32 %v4743_v61, %v4597_v27 }
 0x407   : > { %v4655_v45 = vmax.f32 %v4639_v18, 0.0 }
 0x408   : > { %v4654_v58 = vmax.f32 %v4638_v32, 0.0  ;;  %v6282_v12 = vpop.f32.mrb[14].mxu0 }
 0x409   : > { %4671 = vst [vmem:[%s9663_s28 + $0x68] sm:$0xff] %v4655_v45  ;;  %v4641_v42 = vadd.f32 %v6282_v12, %v4743_v61  ;;  %v4609_v28 = vpop.f32.mrb[15].mxu0 }
 0x40a   : > { %4670 = vst [vmem:[%s9663_s28 + $0x60] sm:$0xff] %v4654_v58  ;;  %v4640_v34 = vadd.f32 %v4743_v61, %v4609_v28 }
 0x40b   : > { %v4657_v5 = vmax.f32 %v4641_v42, 0.0 }
 0x40c   : > { %v4656_v3 = vmax.f32 %v4640_v34, 0.0 }
 0x40d   : > { %4673 = vst [vmem:[%s9663_s28 + $0x78] sm:$0xff] %v4657_v5 }
 0x40e   : > { %4672 = vst [vmem:[%s9663_s28 + $0x70] sm:$0xff] %v4656_v3 }
 0x40f PF: > { %s15_s18 = sadd.s32 1, %s7049_s18  }
 0x410   : > { %p12_p4 = scmp.ge.s32.totalorder %s15_s18, 4  }
 0x412   :  { %14 = sbr.rel (!%p12_p4) target bundleno = 1 (0x1), region = 71 }

// kernel: sage_forward.3
= control target key start
LH: loop header
LB: loop body
LE: loop exit
PB: predicated region body
PF: predicated region fallthrough
CT: control target
= control target key end

     0   :  { %s6474_s18 = smov 0   ;;  %s8693_s0 = inlined_call_operand.vmem [shape: f32[256,256], index: 0, kind: input, shape index: {}]   ;;  %s8694_s1 = inlined_call_operand.vmem [shape: f32[256,64], index: 1, kind: input, shape index: {}]   ;;  %s8695_s2 = inlined_call_operand.vmem [shape: f32[64,128], index: 2, kind: input, shape index: {}]   ;;  %s8696_s3 = inlined_call_operand.vmem [shape: f32[64,128], index: 3, kind: input, shape index: {}]   ;;  %s8697_s4 = inlined_call_operand.vmem [shape: f32[1,128], index: 4, kind: input, shape index: {}]   ;;  %s8698_s5 = inlined_call_operand.vmem [shape: f32[256,128], index: 5, kind: output, shape index: {}]  }
   0x1 LB: > { %s4605_s19 = sadd.s32 4294967295, %s6442_s18   ;;  %p4609_p0 = scmp.ge.s32.totalorder %s6442_s18, 1  ;;  %s6442_s18 = sphi %s6474_s18, %s15_s18  }
   0x2   : > { %p189_p1 = scmp.lt.s32.totalorder %s6442_s18, 3 }
   0x4   : > { %p190_p2 = pnand %p4609_p0, %p189_p1 }
   0x6   : > { %193 = sbr.rel (%p190_p2) target bundleno = 1038 (0x40e), region = 40 }
   0xd   : > { %v279_v0 = vld [vmem:[%s8694_s1 + $0x80] sm:$0xff]  ;;  %v280_v1 = vld [vmem:[%s8694_s1 + $0x88] sm:$0xff]  ;;  %s6493_s26 = sshll.u32 %s4605_s19, 4  ;;  %v281_v7 = vld [vmem:[%s8694_s1 + $0x90] sm:$0xff]  ;;  %s4615_s6 = sshll.u32 %s4605_s19, 7  ;;  %vm2031_vm0 = vcmask 523264  }
   0xe   : > { %v263_v2 = vld [vmem:[%s8694_s1] sm:$0xff]  ;;  %v344_v3 = vand.u32 4294901760, %v279_v0  ;;  %v347_v4 = vand.u32 4294901760, %v280_v1  ;;  %v264_v5 = vld [vmem:[%s8694_s1 + $0x8] sm:$0xff]  ;;  %v282_v8 = vld [vmem:[%s8694_s1 + $0x98] sm:$0xff]  ;;  %v350_v10 = vand.u32 4294901760, %v281_v7  ;;  %s7407_s19 = scalar_lea.vmem %s8694_s1, %s4615_s6 }
   0xf   : > { %v296_v6 = vand.u32 4294901760, %v263_v2  ;;  %v299_v9 = vand.u32 4294901760, %v264_v5  ;;  %v353_v11 = vand.u32 4294901760, %v282_v8  ;;  %v265_v12 = vld [vmem:[%s8694_s1 + $0x10] sm:$0xff]  ;;  %v266_v13 = vld [vmem:[%s8694_s1 + $0x18] sm:$0xff]  ;;  %v283_v14 = vld [vmem:[%s8694_s1 + $0xa0] sm:$0xff] }
  0x10   : > { %v6513_v15 = vpack.c.bf16 %v347_v4, %v344_v3  ;;  %v6515_v16 = vsub.f32 %v279_v0, %v344_v3  ;;  %v6517_v17 = vsub.f32 %v280_v1, %v347_v4  ;;  %v284_v19 = vld [vmem:[%s8694_s1 + $0xa8] sm:$0xff]  ;;  %v267_v20 = vld [vmem:[%s8694_s1 + $0x20] sm:$0xff]  ;;  %p219_p3 = scmp.lt.s32.totalorder %s6493_s26, 31  ;;  %v6537_v25 = vsub.f32 %v281_v7, %v350_v10  ;;  %v285_v26 = vld [vmem:[%s8694_s1 + $0xb0] sm:$0xff] }
  0x11   : > { %v6519_v18 = vsub.f32 %v263_v2, %v296_v6  ;;  %v268_v21 = vld [vmem:[%s8694_s1 + $0x28] sm:$0xff]  ;;  %v6531_v22 = vpack.c.bf16 %v299_v9, %v296_v6  ;;  %v6533_v23 = vsub.f32 %v264_v5, %v299_v9  ;;  %v6535_v24 = vpack.c.bf16 %v353_v11, %v350_v10  ;;  %v286_v31 = vld [vmem:[%s8694_s1 + $0xb8] sm:$0xff]  ;;  %v269_v36 = vld [vmem:[%s8694_s1 + $0x30] sm:$0xff] }
  0x12   : > { %9002 = vst [vmem:[#allocation2_spill] sm:$0xff] %v6513_v15  ;;  %5869 = vmatprep.subr.bf16.mxu1 %v6513_v15  ;;  %v6543_v27 = vsub.f32 %v282_v8, %v353_v11  ;;  %v302_v28 = vand.u32 4294901760, %v265_v12  ;;  %v305_v29 = vand.u32 4294901760, %v266_v13  ;;  %v356_v30 = vand.u32 4294901760, %v283_v14  ;;  %v270_v37 = vld [vmem:[%s8694_s1 + $0x38] sm:$0xff]  ;;  %v287_v42 = vld [vmem:[%s8694_s1 + $0xc0] sm:$0xff] }
  0x13   : > { %9003 = vst [vmem:[#allocation3_spill] sm:$0xff] %v6531_v22  ;;  %9004 = vst [vmem:[#allocation4_spill] sm:$0xff] %v6535_v24  ;;  %5871 = vmatpush3.bf16.msra.mxu1 %v6531_v22  ;;  %v359_v32 = vand.u32 4294901760, %v284_v19  ;;  %v308_v33 = vand.u32 4294901760, %v267_v20  ;;  %v311_v34 = vand.u32 4294901760, %v268_v21  ;;  %v362_v35 = vand.u32 4294901760, %v285_v26 }
  0x14   : > { %5873 = vmatprep.subr.bf16.mxu1 %v6535_v24  ;;  %v6556_v38 = vpack.c.bf16 %v305_v29, %v302_v28  ;;  %v6558_v39 = vsub.f32 %v265_v12, %v302_v28  ;;  %v6560_v40 = vsub.f32 %v266_v13, %v305_v29  ;;  %v6562_v41 = vsub.f32 %v283_v14, %v356_v30  ;;  %v288_v43 = vld [vmem:[%s8694_s1 + $0xc8] sm:$0xff]  ;;  %v271_v44 = vld [vmem:[%s8694_s1 + $0x40] sm:$0xff]  ;;  %s9406_s26 = smov (!%p219_p3, %s6493_s26), 31  ;;  %v289_v58 = vld [vmem:[%s8694_s1 + $0xd0] sm:$0xff] }
  0x15   : > { %v6578_v45 = vpack.c.bf16 %v359_v32, %v356_v30  ;;  %v6580_v46 = vsub.f32 %v284_v19, %v359_v32  ;;  %v6582_v47 = vpack.c.bf16 %v311_v34, %v308_v33  ;;  %v6584_v48 = vsub.f32 %v267_v20, %v308_v33  ;;  %v272_v49 = vld [vmem:[%s8694_s1 + $0x48] sm:$0xff]  ;;  %v290_v59 = vld [vmem:[%s8694_s1 + $0xd8] sm:$0xff]  ;;  %v273_v0 = vld [vmem:[%s8694_s1 + $0x50] sm:$0xff]  ;;  %s4619_s27 = sshll.u32 %s9406_s26, 4  ;;  %s4614_s12 = sshll.u32 %s9406_s26, 3 }
  0x16   : > { %9005 = vst [vmem:[#allocation5_spill] sm:$0xff] %v6556_v38  ;;  %v6589_v50 = vsub.f32 %v268_v21, %v311_v34  ;;  %v365_v51 = vand.u32 4294901760, %v286_v31  ;;  %v6591_v52 = vsub.f32 %v285_v26, %v362_v35  ;;  %v314_v53 = vand.u32 4294901760, %v269_v36  ;;  %v274_v1 = vld [vmem:[%s8694_s1 + $0x58] sm:$0xff]  ;;  %v291_v2 = vld [vmem:[%s8694_s1 + $0xe0] sm:$0xff]  ;;  %v292_v7 = vld [vmem:[%s8694_s1 + $0xe8] sm:$0xff]  ;;  %s6646_s11 = scalar_lea.vmem %s8693_s0, %s4619_s27  ;;  %s8672_s15 = scalar_lea.vmem %s8698_s5, %s4614_s12 }
  0x17   : > { %9006 = vst [vmem:[#allocation6_spill] sm:$0xff] %v6578_v45  ;;  %9007 = vst [vmem:[#allocation7_spill] sm:$0xff] %v6582_v47  ;;  %5875 = vmatpush3.bf16.msra.mxu1 %v6556_v38  ;;  %v317_v54 = vand.u32 4294901760, %v270_v37  ;;  %v368_v55 = vand.u32 4294901760, %v287_v42  ;;  %v371_v56 = vand.u32 4294901760, %v288_v43  ;;  %v320_v57 = vand.u32 4294901760, %v271_v44 }
  0x18   : > { %5877 = vmatprep.subr.bf16.mxu1 %v6578_v45  ;;  %v6601_v60 = vpack.c.bf16 %v365_v51, %v362_v35  ;;  %v6603_v61 = vsub.f32 %v286_v31, %v365_v51  ;;  %v6605_v62 = vsub.f32 %v269_v36, %v314_v53  ;;  %v323_v63 = vand.u32 4294901760, %v272_v49  ;;  %v275_v8 = vld [vmem:[%s8694_s1 + $0x60] sm:$0xff]  ;;  %v276_v9 = vld [vmem:[%s8694_s1 + $0x68] sm:$0xff]  ;;  %v293_v31 = vld [vmem:[%s8694_s1 + $0xf0] sm:$0xff] }
  0x19   : > { %v6617_v3 = vpack.c.bf16 %v317_v54, %v314_v53  ;;  %v6619_v4 = vsub.f32 %v270_v37, %v317_v54  ;;  %v6621_v5 = vpack.c.bf16 %v371_v56, %v368_v55  ;;  %v6623_v6 = vsub.f32 %v287_v42, %v368_v55  ;;  %v294_v36 = vld [vmem:[%s8694_s1 + $0xf8] sm:$0xff]  ;;  %v277_v37 = vld [vmem:[%s8694_s1 + $0x70] sm:$0xff]  ;;  %v232_v53 = vld [vmem:[%s6646_s11 + $0x8] sm:$0xff] }
  0x1a   : > { %9008 = vst [vmem:[#allocation8_spill] sm:$0xff] %v6601_v60  ;;  %v6634_v10 = vsub.f32 %v288_v43, %v371_v56  ;;  %v6636_v11 = vpack.c.bf16 %v323_v63, %v320_v57  ;;  %v6638_v12 = vsub.f32 %v271_v44, %v320_v57  ;;  %v6640_v13 = vsub.f32 %v272_v49, %v323_v63  ;;  %v278_v42 = vld [vmem:[%s8694_s1 + $0x78] sm:$0xff]  ;;  %v231_v54 = vld [vmem:[%s6646_s11] sm:$0xff] }
  0x1b   : > { %9009 = vst [vmem:[#allocation9_spill] sm:$0xff] %v6617_v3  ;;  %9010 = vst [vmem:[#allocation10_spill] sm:$0xff] %v6621_v5  ;;  %5879 = vmatpush3.bf16.msra.mxu1 %v6582_v47  ;;  %v374_v14 = vand.u32 4294901760, %v289_v58  ;;  %v377_v19 = vand.u32 4294901760, %v290_v59  ;;  %v326_v20 = vand.u32 4294901760, %v273_v0  ;;  %v329_v21 = vand.u32 4294901760, %v274_v1 }
  0x1c   : > { %9011 = vst [vmem:[#allocation11_spill] sm:$0xff] %v6636_v11  ;;  %5881 = vmatprep.subr.bf16.mxu1 %v6601_v60  ;;  %v380_v26 = vand.u32 4294901760, %v291_v2  ;;  %v383_v28 = vand.u32 4294901760, %v292_v7  ;;  %v332_v29 = vand.u32 4294901760, %v275_v8  ;;  %v335_v30 = vand.u32 4294901760, %v276_v9 }
  0x1d   : > { %v6652_v32 = vpack.c.bf16 %v377_v19, %v374_v14  ;;  %v6654_v33 = vsub.f32 %v289_v58, %v374_v14  ;;  %v6656_v34 = vsub.f32 %v290_v59, %v377_v19  ;;  %v6658_v35 = vpack.c.bf16 %v329_v21, %v326_v20 }
  0x1e   : > { %v6669_v43 = vsub.f32 %v273_v0, %v326_v20  ;;  %v6671_v44 = vsub.f32 %v274_v1, %v329_v21  ;;  %v6673_v49 = vpack.c.bf16 %v383_v28, %v380_v26  ;;  %v6675_v51 = vsub.f32 %v291_v2, %v380_v26  ;;  %v234_v26 = vld [vmem:[%s6646_s11 + $0x18] sm:$0xff] }
  0x1f   : > { %9012 = vst [vmem:[#allocation12_spill] sm:$0xff] %v6652_v32  ;;  %9013 = vst [vmem:[#allocation13_spill] sm:$0xff] %v6658_v35  ;;  %5883 = vmatpush3.bf16.msra.mxu1 %v6617_v3  ;;  %v6680_v55 = vsub.f32 %v292_v7, %v383_v28  ;;  %v6682_v56 = vpack.c.bf16 %v335_v30, %v332_v29  ;;  %v6684_v57 = vsub.f32 %v275_v8, %v332_v29  ;;  %v233_v28 = vld [vmem:[%s6646_s11 + $0x10] sm:$0xff] }
  0x20   : > { %9014 = vst [vmem:[#allocation14_spill] sm:$0xff] %v6673_v49  ;;  %v6686_v58 = vsub.f32 %v276_v9, %v335_v30  ;;  %5885 = vmatprep.subr.bf16.mxu1 %v6621_v5  ;;  %v386_v59 = vand.u32 4294901760, %v293_v31  ;;  %v389_v63 = vand.u32 4294901760, %v294_v36  ;;  %v338_v0 = vand.u32 4294901760, %v277_v37 }
  0x21   : > { %9015 = vst [vmem:[#allocation15_spill] sm:$0xff] %v6682_v56  ;;  %v341_v1 = vand.u32 4294901760, %v278_v42  ;;  %v6689_v2 = vand.u32 4294901760, %v232_v53  ;;  %v6691_v14 = vand.u32 4294901760, %v231_v54 }
  0x22   : > { %v6695_v20 = vpack.c.bf16 %v389_v63, %v386_v59  ;;  %v6697_v8 = vsub.f32 %v293_v31, %v386_v59  ;;  %v6699_v9 = vsub.f32 %v294_v36, %v389_v63  ;;  %v6706_v29 = vsub.f32 %v277_v37, %v338_v0 }
  0x23   : > { %9016 = vst [vmem:[#allocation16_spill] sm:$0xff] %v6689_v2  ;;  %9017 = vst [vmem:[#allocation17_spill] sm:$0xff] %v6691_v14  ;;  %v6701_v21 = vpack.c.bf16 %v341_v1, %v338_v0  ;;  %5887 = vmatpush3.bf16.msra.mxu1 %v6636_v11  ;;  %v6708_v30 = vsub.f32 %v278_v42, %v341_v1  ;;  %v6711_v7 = vsub.f32 %v232_v53, %v6689_v2 }
  0x24   : > { %9018 = vst [vmem:[#allocation18_spill] sm:$0xff] %v6695_v20  ;;  %v6714_v19 = vsub.f32 %v231_v54, %v6691_v14  ;;  %5889 = vmatprep.subr.bf16.mxu1 %v6652_v32  ;;  %v9022_v31 = vand.u32 4294901760, %v6515_v16  ;;  %v9023_v59 = vand.u32 4294901760, %v6517_v17  ;;  %v8709_v37 = vand.u32 4294901760, %v6519_v18  ;;  %v236_v32 = vld [vmem:[%s6646_s11 + $0x28] sm:$0xff] }
  0x25   : > { %9019 = vst [vmem:[#allocation19_spill] sm:$0xff] %v6701_v21  ;;  %9020 = vst [vmem:[#allocation20_spill] sm:$0xff] %v6711_v7  ;;  %v8710_v42 = vand.u32 4294901760, %v6533_v23  ;;  %v8719_v53 = vand.u32 4294901760, %v6711_v7  ;;  %v6727_v0 = vand.u32 4294901760, %v234_v26  ;;  %v6729_v1 = vand.u32 4294901760, %v233_v28 }
  0x26   : > { %9021 = vst [vmem:[#allocation21_spill] sm:$0xff] %v6714_v19  ;;  %v748_v36 = vsub.f32 %v6515_v16, %v9022_v31  ;;  %v755_v63 = vsub.f32 %v6517_v17, %v9023_v59  ;;  %v636_v59 = vsub.f32 %v6519_v18, %v8709_v37  ;;  %v9026_v3 = vand.u32 4294901760, %v6714_v19  ;;  %v235_v37 = vld [vmem:[%s6646_s11 + $0x20] sm:$0xff] }
  0x27   : > { %9024 = vst [vmem:[#allocation22_spill] sm:$0xff] %v6727_v0  ;;  %9025 = vst [vmem:[#allocation23_spill] sm:$0xff] %v6729_v1  ;;  %v643_v5 = vsub.f32 %v6533_v23, %v8710_v42  ;;  %5891 = vmatpush3.bf16.msra.mxu1 %v6658_v35  ;;  %v394_v54 = vsub.f32 %v6711_v7, %v8719_v53  ;;  %v6753_v45 = vand.u32 4294901760, %v236_v32  ;;  %v6760_v22 = vand.u32 4294901760, %v235_v37 }
  0x28   : > { %v749_v11 = vand.u32 4294901760, %v748_v36  ;;  %v756_v31 = vand.u32 4294901760, %v755_v63  ;;  %v400_v60 = vsub.f32 %v6714_v19, %v9026_v3  ;;  %v6746_v36 = vsub.f32 %v234_v26, %v6727_v0  ;;  %5893 = vmatprep.subr.bf16.mxu1 %v6673_v49 }
  0x29   : > { %v6749_v63 = vsub.f32 %v233_v28, %v6729_v1  ;;  %v637_v47 = vand.u32 4294901760, %v636_v59  ;;  %v644_v35 = vand.u32 4294901760, %v643_v5  ;;  %9029 = vst [vmem:[#allocation26_spill] sm:$0xff] %v6753_v45  ;;  %v395_v38 = vand.u32 4294901760, %v394_v54  ;;  %9031 = vst [vmem:[#allocation28_spill] sm:$0xff] %v6760_v22  ;;  %v238_v59 = vld [vmem:[%s6646_s11 + $0x38] sm:$0xff] }
  0x2a   : > { %9027 = vst [vmem:[#allocation24_spill] sm:$0xff] %v6746_v36  ;;  %v5900_v42 = vpack.c.bf16 %v756_v31, %v749_v11  ;;  %v401_v53 = vand.u32 4294901760, %v400_v60  ;;  %v8725_v24 = vand.u32 4294901760, %v6746_v36  ;;  %v6758_v28 = vsub.f32 %v236_v32, %v6753_v45 }
  0x2b   : > { %9028 = vst [vmem:[#allocation25_spill] sm:$0xff] %v6749_v63  ;;  %v8724_v3 = vand.u32 4294901760, %v6749_v63  ;;  %v5902_v26 = vpack.c.bf16 %v644_v35, %v637_v47  ;;  %v8734_v11 = vand.u32 4294901760, %v6537_v25  ;;  %5895 = vmatpush3.bf16.msra.mxu1 %v6682_v56  ;;  %396 = vmatprep.mubr.f32.mxu1 %v395_v38  ;;  %v6775_v38 = vsub.f32 %v235_v37, %v6760_v22  ;;  %v240_v37 = vld [vmem:[%s6646_s11 + $0x48] sm:$0xff] }
  0x2c   : > { %9030 = vst [vmem:[#allocation27_spill] sm:$0xff] %v6758_v28  ;;  %v409_v60 = vsub.f32 %v6746_v36, %v8725_v24  ;;  %5897 = vmatprep.subr.bf16.mxu1 %v6695_v20  ;;  %v9033_v32 = vand.u32 4294901760, %v6543_v27  ;;  %v9034_v56 = vand.u32 4294901760, %v6558_v39  ;;  %v9035_v49 = vand.u32 4294901760, %v6758_v28 }
  0x2d   : > { %v415_v47 = vsub.f32 %v6749_v63, %v8724_v3  ;;  %9032 = vst [vmem:[#allocation29_spill] sm:$0xff] %v6775_v38  ;;  %v762_v54 = vsub.f32 %v6537_v25, %v8734_v11  ;;  %v237_v3 = vld [vmem:[%s6646_s11 + $0x30] sm:$0xff]  ;;  %v8749_v11 = vand.u32 4294901760, %v6775_v38  ;;  %v9036_v36 = vand.u32 4294901760, %v6560_v40 }
  0x2e   : > { %v410_v24 = vand.u32 4294901760, %v409_v60  ;;  %v769_v20 = vsub.f32 %v6543_v27, %v9033_v32  ;;  %v650_v35 = vsub.f32 %v6558_v39, %v9034_v56  ;;  %v424_v63 = vsub.f32 %v6758_v28, %v9035_v49 }
  0x2f   : > { %v416_v5 = vand.u32 4294901760, %v415_v47  ;;  %v763_v31 = vand.u32 4294901760, %v762_v54  ;;  %v657_v60 = vsub.f32 %v6560_v40, %v9036_v36  ;;  %v239_v47 = vld [vmem:[%s6646_s11 + $0x40] sm:$0xff]  ;;  %5899 = vmatpush3.bf16.msra.mxu1 %v6701_v21  ;;  %v6799_v7 = vand.u32 4294901760, %v238_v59 }
  0x30   : > { %v770_v32 = vand.u32 4294901760, %v769_v20  ;;  %v651_v19 = vand.u32 4294901760, %v650_v35  ;;  %v6801_v56 = vand.u32 4294901760, %v237_v3  ;;  %5901 = vmatprep.subr.bf16.mxu1 %v5900_v42  ;;  %v425_v15 = vand.u32 4294901760, %v424_v63 }
  0x31   : > { %9037 = vst [vmem:[#allocation30_spill] sm:$0xff] %v6799_v7  ;;  %v430_v49 = vsub.f32 %v6775_v38, %v8749_v11  ;;  %v658_v54 = vand.u32 4294901760, %v657_v60  ;;  %v6806_v28 = vand.u32 4294901760, %v240_v37  ;;  %v6809_v36 = vsub.f32 %v238_v59, %v6799_v7 }
  0x32   : > { %9038 = vst [vmem:[#allocation31_spill] sm:$0xff] %v6801_v56  ;;  %v5904_v22 = vpack.c.bf16 %v770_v32, %v763_v31  ;;  %v6812_v20 = vsub.f32 %v237_v3, %v6801_v56  ;;  %v6814_v35 = vand.u32 4294901760, %v239_v47  ;;  %402 = vmatmul.mubr.f32.vlgmr.msra.gmra.mrb[0].mxu1 %v401_v53  ;;  %v8750_v11 = vand.u32 4294901760, %v6562_v41 }
  0x33   : > { %9039 = vst [vmem:[#allocation32_spill] sm:$0xff] %v6806_v28  ;;  %9040 = vst [vmem:[#allocation33_spill] sm:$0xff] %v6809_v36  ;;  %v431_v21 = vand.u32 4294901760, %v430_v49  ;;  %v5906_v42 = vpack.c.bf16 %v658_v54, %v651_v19  ;;  %v6817_v63 = vsub.f32 %v240_v37, %v6806_v28  ;;  %5903 = vmatpush3.bf16.msra.mxu1 %v5902_v26  ;;  %411 = vmatprep.mubr.f32.mxu1 %v410_v24  ;;  %v242_v49 = vld [vmem:[%s6646_s11 + $0x58] sm:$0xff] }
  0x34   : > { %9041 = vst [vmem:[#allocation34_spill] sm:$0xff] %v6812_v20  ;;  %9042 = vst [vmem:[#allocation35_spill] sm:$0xff] %v6814_v35  ;;  %v8751_v31 = vand.u32 4294901760, %v6809_v36  ;;  %v8752_v59 = vand.u32 4294901760, %v6812_v20  ;;  %v6823_v3 = vsub.f32 %v239_v47, %v6814_v35  ;;  %v8755_v60 = vand.u32 4294901760, %v6580_v46  ;;  %5905 = vmatprep.subr.bf16.mxu1 %v5904_v22  ;;  %v241_v22 = vld [vmem:[%s6646_s11 + $0x50] sm:$0xff] }
  0x35   : > { %9043 = vst [vmem:[#allocation36_spill] sm:$0xff] %v6817_v63  ;;  %v8760_v19 = vand.u32 4294901760, %v6817_v63  ;;  %v776_v53 = vsub.f32 %v6562_v41, %v8750_v11  ;;  %v8767_v24 = vand.u32 4294901760, %v6584_v48  ;;  %v8772_v26 = vand.u32 4294901760, %v6589_v50 }
  0x36   : > { %9044 = vst [vmem:[#allocation37_spill] sm:$0xff] %v6823_v3  ;;  %v439_v37 = vsub.f32 %v6809_v36, %v8751_v31  ;;  %v445_v47 = vsub.f32 %v6812_v20, %v8752_v59  ;;  %v783_v32 = vsub.f32 %v6580_v46, %v8755_v60  ;;  %417 = vmatmul.mubr.f32.gmra.mrb[2].mxu1 %v416_v5  ;;  %v244_v20 = vld [vmem:[%s6646_s11 + $0x68] sm:$0xff]  ;;  %v9045_v5 = vand.u32 4294901760, %v6823_v3 }
  0x37   : > { %v454_v54 = vsub.f32 %v6817_v63, %v8760_v19  ;;  %v777_v11 = vand.u32 4294901760, %v776_v53  ;;  %v664_v31 = vsub.f32 %v6584_v48, %v8767_v24  ;;  %v671_v59 = vsub.f32 %v6589_v50, %v8772_v26  ;;  %426 = vmatprep.mubr.f32.mxu1 %v425_v15  ;;  %5907 = vmatpush3.bf16.msra.mxu1 %v5906_v42  ;;  %v243_v53 = vld [vmem:[%s6646_s11 + $0x60] sm:$0xff] }
  0x38   : > { %v440_v60 = vand.u32 4294901760, %v439_v37  ;;  %v446_v36 = vand.u32 4294901760, %v445_v47  ;;  %v460_v38 = vsub.f32 %v6823_v3, %v9045_v5  ;;  %v784_v19 = vand.u32 4294901760, %v783_v32  ;;  %v246_v32 = vld [vmem:[%s6646_s11 + $0x78] sm:$0xff] }
  0x39   : > { %v455_v63 = vand.u32 4294901760, %v454_v54  ;;  %v665_v35 = vand.u32 4294901760, %v664_v31  ;;  %v672_v28 = vand.u32 4294901760, %v671_v59  ;;  %v6858_v24 = vand.u32 4294901760, %v242_v49 }
  0x3a   : > { %v461_v56 = vand.u32 4294901760, %v460_v38  ;;  %v5908_v7 = vpack.c.bf16 %v784_v19, %v777_v11  ;;  %v6860_v26 = vand.u32 4294901760, %v241_v22  ;;  %v6862_v45 = vand.u32 4294901760, %v244_v20  ;;  %432 = vmatmul.mubr.f32.gmra.mrb[4].mxu1 %v431_v21 }
  0x3b   : > { %9046 = vst [vmem:[#allocation38_spill] sm:$0xff] %v6858_v24  ;;  %v5910_v15 = vpack.c.bf16 %v672_v28, %v665_v35  ;;  %v6865_v42 = vsub.f32 %v242_v49, %v6858_v24  ;;  %v6867_v37 = vand.u32 4294901760, %v243_v53  ;;  %v8777_v47 = vand.u32 4294901760, %v6591_v52  ;;  %441 = vmatprep.mubr.f32.mxu1 %v440_v60 }
  0x3c   : > { %9047 = vst [vmem:[#allocation39_spill] sm:$0xff] %v6860_v26  ;;  %9048 = vst [vmem:[#allocation40_spill] sm:$0xff] %v6862_v45  ;;  %5909 = vmatprep.subr.bf16.mxu1 %v5908_v7  ;;  %v6871_v31 = vsub.f32 %v241_v22, %v6860_v26  ;;  %v6874_v11 = vsub.f32 %v244_v20, %v6862_v45  ;;  %v8776_v38 = vand.u32 4294901760, %v6603_v61  ;;  %v8775_v21 = vand.u32 4294901760, %v6605_v62 }
  0x3d   : > { %9049 = vst [vmem:[#allocation41_spill] sm:$0xff] %v6865_v42  ;;  %9050 = vst [vmem:[#allocation42_spill] sm:$0xff] %v6867_v37  ;;  %5911 = vmatpush3.bf16.msra.mxu1 %v5910_v15  ;;  %v8778_v28 = vand.u32 4294901760, %v6865_v42  ;;  %v6880_v35 = vsub.f32 %v243_v53, %v6867_v37  ;;  %v790_v7 = vsub.f32 %v6591_v52, %v8777_v47  ;;  %v8783_v59 = vand.u32 4294901760, %v6619_v4  ;;  %v245_v15 = vld [vmem:[%s6646_s11 + $0x70] sm:$0xff] }
  0x3e   : > { %9051 = vst [vmem:[#allocation43_spill] sm:$0xff] %v6871_v31  ;;  %9052 = vst [vmem:[#allocation44_spill] sm:$0xff] %v6874_v11  ;;  %v8790_v20 = vand.u32 4294901760, %v6871_v31  ;;  %v8793_v60 = vand.u32 4294901760, %v6874_v11  ;;  %v797_v19 = vsub.f32 %v6603_v61, %v8776_v38  ;;  %v678_v22 = vsub.f32 %v6605_v62, %v8775_v21  ;;  %447 = vmatmul.mubr.f32.gmra.mrb[6].mxu1 %v446_v36 }
  0x3f   : > { %9053 = vst [vmem:[#allocation45_spill] sm:$0xff] %v6880_v35  ;;  %v469_v49 = vsub.f32 %v6865_v42, %v8778_v28  ;;  %v8794_v54 = vand.u32 4294901760, %v6880_v35  ;;  %v791_v5 = vand.u32 4294901760, %v790_v7  ;;  %v685_v53 = vsub.f32 %v6619_v4, %v8783_v59  ;;  %456 = vmatprep.mubr.f32.mxu1 %v455_v63  ;;  %v248_v28 = vld [vmem:[%s6646_s11 + $0x88] sm:$0xff]  ;;  %v247_v63 = vld [vmem:[%s6646_s11 + $0x80] sm:$0xff] }
  0x40   : > { %v475_v21 = vsub.f32 %v6871_v31, %v8790_v20  ;;  %v484_v36 = vsub.f32 %v6874_v11, %v8793_v60  ;;  %v798_v38 = vand.u32 4294901760, %v797_v19  ;;  %v679_v47 = vand.u32 4294901760, %v678_v22 }
  0x41   : > { %v470_v42 = vand.u32 4294901760, %v469_v49  ;;  %v490_v7 = vsub.f32 %v6880_v35, %v8794_v54  ;;  %v686_v3 = vand.u32 4294901760, %v685_v53  ;;  %v6913_v59 = vand.u32 4294901760, %v246_v32 }
  0x42   : > { %v476_v37 = vand.u32 4294901760, %v475_v21  ;;  %v485_v45 = vand.u32 4294901760, %v484_v36  ;;  %v5912_v26 = vpack.c.bf16 %v798_v38, %v791_v5  ;;  %v6916_v20 = vand.u32 4294901760, %v245_v15  ;;  %462 = vmatmul.mubr.f32.gmra.mrb[8].mxu1 %v461_v56 }
  0x43   : > { %9054 = vst [vmem:[#allocation46_spill] sm:$0xff] %v6913_v59  ;;  %v491_v31 = vand.u32 4294901760, %v490_v7  ;;  %v5914_v60 = vpack.c.bf16 %v686_v3, %v679_v47  ;;  %v6919_v19 = vsub.f32 %v246_v32, %v6913_v59  ;;  %v6921_v22 = vand.u32 4294901760, %v248_v28  ;;  %471 = vmatprep.mubr.f32.mxu1 %v470_v42 }
  0x44   : > { %9055 = vst [vmem:[#allocation47_spill] sm:$0xff] %v6916_v20  ;;  %5913 = vmatprep.subr.bf16.mxu1 %v5912_v26  ;;  %v6924_v49 = vsub.f32 %v245_v15, %v6916_v20  ;;  %v6926_v53 = vand.u32 4294901760, %v247_v63  ;;  %v8797_v21 = vand.u32 4294901760, %v6623_v6  ;;  %v8796_v38 = vand.u32 4294901760, %v6634_v10  ;;  %v252_v15 = vld [vmem:[%s6646_s11 + $0xa8] sm:$0xff] }
  0x45   : > { %9056 = vst [vmem:[#allocation48_spill] sm:$0xff] %v6919_v19  ;;  %9057 = vst [vmem:[#allocation49_spill] sm:$0xff] %v6921_v22  ;;  %5915 = vmatpush3.bf16.msra.mxu1 %v5914_v60  ;;  %v8795_v56 = vand.u32 4294901760, %v6919_v19  ;;  %v6932_v3 = vsub.f32 %v248_v28, %v6921_v22  ;;  %v8802_v47 = vand.u32 4294901760, %v6638_v12  ;;  %v8807_v26 = vand.u32 4294901760, %v6640_v13 }
  0x46   : > { %9058 = vst [vmem:[#allocation50_spill] sm:$0xff] %v6924_v49  ;;  %9059 = vst [vmem:[#allocation51_spill] sm:$0xff] %v6926_v53  ;;  %v8810_v42 = vand.u32 4294901760, %v6924_v49  ;;  %v6938_v32 = vsub.f32 %v247_v63, %v6926_v53  ;;  %v804_v60 = vsub.f32 %v6623_v6, %v8797_v21  ;;  %v811_v28 = vsub.f32 %v6634_v10, %v8796_v38  ;;  %v250_v63 = vld [vmem:[%s6646_s11 + $0x98] sm:$0xff]  ;;  %v249_v21 = vld [vmem:[%s6646_s11 + $0x90] sm:$0xff] }
  0x47   : > { %9060 = vst [vmem:[#allocation52_spill] sm:$0xff] %v6932_v3  ;;  %477 = vmatmul.mubr.f32.gmra.mrb[10].mxu1 %v476_v37  ;;  %v499_v5 = vsub.f32 %v6919_v19, %v8795_v56  ;;  %v692_v36 = vsub.f32 %v6638_v12, %v8802_v47  ;;  %v699_v7 = vsub.f32 %v6640_v13, %v8807_v26  ;;  %v9062_v35 = vand.u32 4294901760, %v6932_v3  ;;  %v251_v26 = vld [vmem:[%s6646_s11 + $0xa0] sm:$0xff] }
  0x48   : > { %9061 = vst [vmem:[#allocation53_spill] sm:$0xff] %v6938_v32  ;;  %486 = vmatprep.mubr.f32.mxu1 %v485_v45  ;;  %v505_v37 = vsub.f32 %v6924_v49, %v8810_v42  ;;  %v8815_v54 = vand.u32 4294901760, %v6938_v32  ;;  %v805_v56 = vand.u32 4294901760, %v804_v60  ;;  %v812_v38 = vand.u32 4294901760, %v811_v28 }
  0x49   : > { %v500_v19 = vand.u32 4294901760, %v499_v5  ;;  %v514_v47 = vsub.f32 %v6932_v3, %v9062_v35  ;;  %v693_v11 = vand.u32 4294901760, %v692_v36  ;;  %v700_v53 = vand.u32 4294901760, %v699_v7 }
  0x4a   : > { %v506_v22 = vand.u32 4294901760, %v505_v37  ;;  %v520_v45 = vsub.f32 %v6938_v32, %v8815_v54  ;;  %v5916_v42 = vpack.c.bf16 %v812_v38, %v805_v56  ;;  %v6970_v49 = vand.u32 4294901760, %v250_v63 }
  0x4b   : > { %492 = vmatmul.mubr.f32.gmra.mrb[12].mxu1 %v491_v31  ;;  %v515_v60 = vand.u32 4294901760, %v514_v47  ;;  %v5918_v28 = vpack.c.bf16 %v700_v53, %v693_v11  ;;  %v6972_v20 = vand.u32 4294901760, %v249_v21  ;;  %v6974_v5 = vand.u32 4294901760, %v252_v15 }
  0x4c   : > { %9063 = vst [vmem:[#allocation54_spill] sm:$0xff] %v6970_v49  ;;  %501 = vmatprep.mubr.f32.mxu1 %v500_v19  ;;  %v521_v35 = vand.u32 4294901760, %v520_v45  ;;  %5917 = vmatprep.subr.bf16.mxu1 %v5916_v42  ;;  %v6977_v36 = vsub.f32 %v250_v63, %v6970_v49  ;;  %v6979_v7 = vand.u32 4294901760, %v251_v26  ;;  %v8816_v38 = vand.u32 4294901760, %v6654_v33  ;;  %v254_v45 = vld [vmem:[%s6646_s11 + $0xb8] sm:$0xff]  ;;  %v253_v63 = vld [vmem:[%s6646_s11 + $0xb0] sm:$0xff] }
  0x4d   : > { %9064 = vst [vmem:[#allocation55_spill] sm:$0xff] %v6972_v20  ;;  %9065 = vst [vmem:[#allocation56_spill] sm:$0xff] %v6974_v5  ;;  %5919 = vmatpush3.bf16.msra.mxu1 %v5918_v28  ;;  %v6983_v31 = vsub.f32 %v249_v21, %v6972_v20  ;;  %v6986_v11 = vsub.f32 %v252_v15, %v6974_v5  ;;  %v8817_v53 = vand.u32 4294901760, %v6656_v34  ;;  %v8818_v19 = vand.u32 4294901760, %v6669_v43 }
  0x4e   : > { %9066 = vst [vmem:[#allocation57_spill] sm:$0xff] %v6977_v36  ;;  %9067 = vst [vmem:[#allocation58_spill] sm:$0xff] %v6979_v7  ;;  %v8825_v56 = vand.u32 4294901760, %v6977_v36  ;;  %v6992_v47 = vsub.f32 %v251_v26, %v6979_v7  ;;  %v818_v42 = vsub.f32 %v6654_v33, %v8816_v38  ;;  %v8830_v21 = vand.u32 4294901760, %v6671_v44  ;;  %v256_v7 = vld [vmem:[%s6646_s11 + $0xc8] sm:$0xff] }
  0x4f   : > { %9068 = vst [vmem:[#allocation59_spill] sm:$0xff] %v6983_v31  ;;  %9069 = vst [vmem:[#allocation60_spill] sm:$0xff] %v6986_v11  ;;  %507 = vmatmul.mubr.f32.gmra.mrb[14].mxu1 %v506_v22  ;;  %v8835_v15 = vand.u32 4294901760, %v6983_v31  ;;  %v825_v37 = vsub.f32 %v6656_v34, %v8817_v53  ;;  %v706_v26 = vsub.f32 %v6669_v43, %v8818_v19  ;;  %v9071_v19 = vand.u32 4294901760, %v6986_v11 }
  0x50   : > { %9070 = vst [vmem:[#allocation61_spill] sm:$0xff] %v6992_v47  ;;  %516 = vmatprep.mubr.f32.mxu1 %v515_v60  ;;  %v529_v22 = vsub.f32 %v6977_v36, %v8825_v56  ;;  %v8838_v28 = vand.u32 4294901760, %v6992_v47  ;;  %v819_v54 = vand.u32 4294901760, %v818_v42  ;;  %v713_v38 = vsub.f32 %v6671_v44, %v8830_v21  ;;  %v255_v21 = vld [vmem:[%s6646_s11 + $0xc0] sm:$0xff] }
  0x51   : > { %v535_v53 = vsub.f32 %v6983_v31, %v8835_v15  ;;  %v544_v60 = vsub.f32 %v6986_v11, %v9071_v19  ;;  %v826_v32 = vand.u32 4294901760, %v825_v37  ;;  %v707_v3 = vand.u32 4294901760, %v706_v26 }
  0x52   : > { %v530_v56 = vand.u32 4294901760, %v529_v22  ;;  %v550_v42 = vsub.f32 %v6992_v47, %v8838_v28  ;;  %v714_v36 = vand.u32 4294901760, %v713_v38  ;;  %v7025_v5 = vand.u32 4294901760, %v254_v45 }
  0x53   : > { %522 = vmatmul.mubr.f32.gmra.mrb[16].mxu1 %v521_v35  ;;  %v536_v20 = vand.u32 4294901760, %v535_v53  ;;  %v545_v49 = vand.u32 4294901760, %v544_v60  ;;  %v5920_v15 = vpack.c.bf16 %v826_v32, %v819_v54  ;;  %v7028_v31 = vand.u32 4294901760, %v253_v63 }
  0x54   : > { %9072 = vst [vmem:[#allocation62_spill] sm:$0xff] %v7025_v5  ;;  %531 = vmatprep.mubr.f32.mxu1 %v530_v56  ;;  %v551_v19 = vand.u32 4294901760, %v550_v42  ;;  %v5922_v37 = vpack.c.bf16 %v714_v36, %v707_v3  ;;  %v7031_v26 = vsub.f32 %v254_v45, %v7025_v5  ;;  %v7033_v22 = vand.u32 4294901760, %v256_v7  ;;  %v258_v42 = vld [vmem:[%s6646_s11 + $0xd8] sm:$0xff] }
  0x55   : > { %9073 = vst [vmem:[#allocation63_spill] sm:$0xff] %v7028_v31  ;;  %5921 = vmatprep.subr.bf16.mxu1 %v5920_v15  ;;  %v7036_v38 = vsub.f32 %v253_v63, %v7028_v31  ;;  %v7038_v28 = vand.u32 4294901760, %v255_v21  ;;  %v8840_v35 = vand.u32 4294901760, %v6675_v51  ;;  %v8839_v54 = vand.u32 4294901760, %v6680_v55 }
  0x56   : > { %9074 = vst [vmem:[#allocation64_spill] sm:$0xff] %v7031_v26  ;;  %9075 = vst [vmem:[#allocation65_spill] sm:$0xff] %v7033_v22  ;;  %5923 = vmatpush3.bf16.msra.mxu1 %v5922_v37  ;;  %v8841_v32 = vand.u32 4294901760, %v7031_v26  ;;  %v7044_v3 = vsub.f32 %v256_v7, %v7033_v22  ;;  %v8846_v36 = vand.u32 4294901760, %v6684_v57  ;;  %v8853_v53 = vand.u32 4294901760, %v6686_v58  ;;  %v259_v22 = vld [vmem:[%s6646_s11 + $0xe0] sm:$0xff] }
  0x57   : > { %9076 = vst [vmem:[#allocation66_spill] sm:$0xff] %v7036_v38  ;;  %9077 = vst [vmem:[#allocation67_spill] sm:$0xff] %v7038_v28  ;;  %537 = vmatmul.mubr.f32.gmra.mrb[18].mxu1 %v536_v20  ;;  %v8854_v56 = vand.u32 4294901760, %v7036_v38  ;;  %v7050_v15 = vsub.f32 %v255_v21, %v7038_v28  ;;  %v832_v63 = vsub.f32 %v6675_v51, %v8840_v35  ;;  %v7082_v31 = vand.u32 4294901760, %v258_v42 }
  0x58   : > { %9078 = vst [vmem:[#allocation68_spill] sm:$0xff] %v7044_v3  ;;  %v839_v7 = vsub.f32 %v6680_v55, %v8839_v54  ;;  %546 = vmatprep.mubr.f32.mxu1 %v545_v49  ;;  %v559_v20 = vsub.f32 %v7031_v26, %v8841_v32  ;;  %v720_v21 = vsub.f32 %v6684_v57, %v8846_v36  ;;  %v257_v32 = vld [vmem:[%s6646_s11 + $0xd0] sm:$0xff]  ;;  %v260_v26 = vld [vmem:[%s6646_s11 + $0xe8] sm:$0xff]  ;;  %v9080_v47 = vand.u32 4294901760, %v7044_v3 }
  0x59   : > { %9079 = vst [vmem:[#allocation69_spill] sm:$0xff] %v7050_v15  ;;  %v727_v60 = vsub.f32 %v6686_v58, %v8853_v53  ;;  %v565_v49 = vsub.f32 %v7036_v38, %v8854_v56  ;;  %v8861_v37 = vand.u32 4294901760, %v7050_v15  ;;  %v833_v54 = vand.u32 4294901760, %v832_v63  ;;  %9081 = vst [vmem:[#allocation70_spill] sm:$0xff] %v7082_v31 }
  0x5a   : > { %v840_v35 = vand.u32 4294901760, %v839_v7  ;;  %v560_v45 = vand.u32 4294901760, %v559_v20  ;;  %v574_v36 = vsub.f32 %v7044_v3, %v9080_v47  ;;  %v721_v11 = vand.u32 4294901760, %v720_v21 }
  0x5b   : > { %v728_v28 = vand.u32 4294901760, %v727_v60  ;;  %552 = vmatmul.mubr.f32.gmra.mrb[20].mxu1 %v551_v19  ;;  %v566_v53 = vand.u32 4294901760, %v565_v49  ;;  %v580_v56 = vsub.f32 %v7050_v15, %v8861_v37  ;;  %v7084_v20 = vand.u32 4294901760, %v257_v32 }
  0x5c   : > { %v5924_v38 = vpack.c.bf16 %v840_v35, %v833_v54  ;;  %561 = vmatprep.mubr.f32.mxu1 %v560_v45  ;;  %v575_v63 = vand.u32 4294901760, %v574_v36  ;;  %v7086_v5 = vand.u32 4294901760, %v260_v26  ;;  %v7089_v21 = vsub.f32 %v258_v42, %v7082_v31  ;;  %v262_v42 = vld [vmem:[%s6646_s11 + $0xf8] sm:$0xff] }
  0x5d   : > { %v5926_v7 = vpack.c.bf16 %v728_v28, %v721_v11  ;;  %9082 = vst [vmem:[#allocation71_spill] sm:$0xff] %v7084_v20  ;;  %v581_v47 = vand.u32 4294901760, %v580_v56  ;;  %v7091_v19 = vand.u32 4294901760, %v259_v22  ;;  %v8862_v60 = vand.u32 4294901760, %v6697_v8 }
  0x5e   : > { %9083 = vst [vmem:[#allocation72_spill] sm:$0xff] %v7086_v5  ;;  %5925 = vmatprep.subr.bf16.mxu1 %v5924_v38  ;;  %9084 = vst [vmem:[#allocation73_spill] sm:$0xff] %v7089_v21  ;;  %v7095_v35 = vsub.f32 %v257_v32, %v7084_v20  ;;  %v7098_v11 = vsub.f32 %v260_v26, %v7086_v5  ;;  %v8863_v28 = vand.u32 4294901760, %v6699_v9  ;;  %v8864_v54 = vand.u32 4294901760, %v6706_v29 }
  0x5f   : > { %9085 = vst [vmem:[#allocation74_spill] sm:$0xff] %v7091_v19  ;;  %5927 = vmatpush3.bf16.msra.mxu1 %v5926_v7  ;;  %v8869_v38 = vand.u32 4294901760, %v7089_v21  ;;  %v7104_v36 = vsub.f32 %v259_v22, %v7091_v19  ;;  %v846_v56 = vsub.f32 %v6697_v8, %v8862_v60  ;;  %v8874_v32 = vand.u32 4294901760, %v6708_v30  ;;  %v261_v60 = vld [vmem:[%s6646_s11 + $0xf0] sm:$0xff] }
  0x60   : > { %9086 = vst [vmem:[#allocation75_spill] sm:$0xff] %v7095_v35  ;;  %9087 = vst [vmem:[#allocation76_spill] sm:$0xff] %v7098_v11  ;;  %567 = vmatmul.mubr.f32.gmra.mrb[22].mxu1 %v566_v53  ;;  %v8881_v26 = vand.u32 4294901760, %v7095_v35  ;;  %v8882_v45 = vand.u32 4294901760, %v7098_v11  ;;  %v853_v53 = vsub.f32 %v6699_v9, %v8863_v28  ;;  %v734_v22 = vsub.f32 %v6706_v29, %v8864_v54 }
  0x61   : > { %576 = vmatprep.mubr.f32.mxu1 %v575_v63  ;;  %v589_v49 = vsub.f32 %v7089_v21, %v8869_v38  ;;  %v8885_v7 = vand.u32 4294901760, %v7104_v36  ;;  %v847_v63 = vand.u32 4294901760, %v846_v56  ;;  %v741_v37 = vsub.f32 %v6708_v30, %v8874_v32 }
  0x62   : > { %v595_v28 = vsub.f32 %v7095_v35, %v8881_v26  ;;  %v604_v54 = vsub.f32 %v7098_v11, %v8882_v45  ;;  %v854_v15 = vand.u32 4294901760, %v853_v53  ;;  %v735_v3 = vand.u32 4294901760, %v734_v22 }
  0x63   : > { %v590_v38 = vand.u32 4294901760, %v589_v49  ;;  %v610_v56 = vsub.f32 %v7104_v36, %v8885_v7  ;;  %v742_v21 = vand.u32 4294901760, %v741_v37  ;;  %v7136_v19 = vand.u32 4294901760, %v262_v42  ;;  %v9106_v7 = vld [vmem:[#allocation56_spill] sm:$0xff] }
  0x64   : > { %582 = vmatmul.mubr.f32.gmra.mrb[24].mxu1 %v581_v47  ;;  %v596_v32 = vand.u32 4294901760, %v595_v28  ;;  %v605_v5 = vand.u32 4294901760, %v604_v54  ;;  %v5928_v20 = vpack.c.bf16 %v854_v15, %v847_v63  ;;  %v7138_v31 = vand.u32 4294901760, %v261_v60  ;;  %v9092_v63 = vld [vmem:[#allocation28_spill] sm:$0xff] }
  0x65   : > { %9088 = vst [vmem:[#allocation77_spill] sm:$0xff] %v7136_v19  ;;  %591 = vmatprep.mubr.f32.mxu1 %v590_v38  ;;  %v5930_v26 = vpack.c.bf16 %v742_v21, %v735_v3  ;;  %v7141_v45 = vsub.f32 %v262_v42, %v7136_v19  ;;  %v5932_v47 = vpack.c.bf16 %v6517_v17, %v6515_v16  ;;  %v611_v53 = vand.u32 4294901760, %v610_v56  ;;  %v9093_v56 = vld [vmem:[#allocation30_spill] sm:$0xff] }
  0x66   : > { %9089 = vst [vmem:[#allocation78_spill] sm:$0xff] %v7138_v31  ;;  %5929 = vmatprep.subr.bf16.mxu1 %v5928_v20  ;;  %v7146_v22 = vsub.f32 %v261_v60, %v7138_v31  ;;  %v5936_v37 = vpack.c.bf16 %v6543_v27, %v6537_v25  ;;  %v5938_v15 = vpack.c.bf16 %v6560_v40, %v6558_v39 }
  0x67   : > { %9090 = vst [vmem:[#allocation79_spill] sm:$0xff] %v7141_v45  ;;  %v8884_v3 = vand.u32 4294901760, %v7141_v45  ;;  %v5940_v21 = vpack.c.bf16 %v6580_v46, %v6562_v41  ;;  %v5942_v28 = vpack.c.bf16 %v6589_v50, %v6584_v48  ;;  %v5944_v20 = vpack.c.bf16 %v6603_v61, %v6591_v52  ;;  %5931 = vmatpush3.bf16.msra.mxu1 %v5930_v26  ;;  %v9091_v26 = vld [vmem:[#allocation26_spill] sm:$0xff] }
  0x68   : > { %597 = vmatmul.mubr.f32.gmra.mrb[26].mxu1 %v596_v32  ;;  %v8883_v60 = vand.u32 4294901760, %v7146_v22  ;;  %v5946_v54 = vpack.c.bf16 %v6619_v4, %v6605_v62  ;;  %5933 = vmatprep.subr.bf16.mxu1 %v5932_v47  ;;  %v5948_v47 = vpack.c.bf16 %v6634_v10, %v6623_v6 }
  0x69   : > { %606 = vmatprep.mubr.f32.mxu1 %v605_v5  ;;  %v619_v38 = vsub.f32 %v7141_v45, %v8884_v3  ;;  %v5934_v5 = vpack.c.bf16 %v6533_v23, %v6519_v18  ;;  %v9105_v3 = vld [vmem:[#allocation55_spill] sm:$0xff] }
  0x6a   : > { %v625_v32 = vsub.f32 %v7146_v22, %v8883_v60  ;;  %v9104_v60 = vld [vmem:[#allocation54_spill] sm:$0xff] }
  0x6b   : > { %v620_v42 = vand.u32 4294901760, %v619_v38  ;;  %v9095_v38 = vld [vmem:[#allocation32_spill] sm:$0xff] }
  0x6c   : > { %612 = vmatmul.mubr.f32.gmra.mrb[28].mxu1 %v611_v53  ;;  %v626_v49 = vand.u32 4294901760, %v625_v32  ;;  %v9094_v53 = vld [vmem:[#allocation31_spill] sm:$0xff]  ;;  %v9098_v32 = vld [vmem:[#allocation40_spill] sm:$0xff] }
  0x6d   : > { %621 = vmatprep.mubr.f32.mxu1 %v620_v42  ;;  %v5958_v42 = vpack.c.bf16 %v6686_v58, %v6684_v57 }
  0x70   : > { %627 = vmatmul.mubr.f32.gmra.mrb[30].mxu1 %v626_v49  ;;  %v5960_v49 = vpack.c.bf16 %v6699_v9, %v6697_v8 }
  0x71   : > { %857 = vmatprep.mubr.f32.mxu1 %v6689_v2  ;;  %v9152_v2 = vld [vmem:[#allocation59_spill] sm:$0xff] }
  0x74   : > { %859 = vmatmul.mubr.f32.vlgmr.msra.gmra.mrb[32].mxu1 %v6691_v14  ;;  %v9151_v14 = vld [vmem:[#allocation57_spill] sm:$0xff] }
  0x75   : > { %5935 = vmatpush3.bf16.msra.mxu1 %v5934_v5  ;;  %864 = vmatprep.mubr.f32.mxu1 %v6727_v0  ;;  %v9099_v5 = vld [vmem:[#allocation42_spill] sm:$0xff] }
  0x76   : > { %5937 = vmatprep.subr.bf16.mxu1 %v5936_v37  ;;  %v5950_v37 = vpack.c.bf16 %v6640_v13, %v6638_v12  ;;  %v9147_v0 = vld [vmem:[#allocation50_spill] sm:$0xff] }
  0x78   : > { %866 = vmatmul.mubr.f32.gmra.mrb[34].mxu1 %v6729_v1  ;;  %v9144_v1 = vld [vmem:[#allocation18_spill] sm:$0xff] }
  0x79   : > { %871 = vmatprep.mubr.f32.mxu1 %v9091_v26  ;;  %5939 = vmatpush3.bf16.msra.mxu1 %v5938_v15  ;;  %v5952_v15 = vpack.c.bf16 %v6656_v34, %v6654_v33  ;;  %v9141_v26 = vld [vmem:[#allocation45_spill] sm:$0xff] }
  0x7a   : > { %5941 = vmatprep.subr.bf16.mxu1 %v5940_v21  ;;  %v9096_v21 = vld [vmem:[#allocation35_spill] sm:$0xff] }
  0x7c   : > { %873 = vmatmul.mubr.f32.gmra.mrb[36].mxu1 %v9092_v63  ;;  %v9136_v63 = vld [vmem:[#allocation12_spill] sm:$0xff] }
  0x7d   : > { %878 = vmatprep.mubr.f32.mxu1 %v9093_v56  ;;  %5943 = vmatpush3.bf16.msra.mxu1 %v5942_v28  ;;  %v5954_v28 = vpack.c.bf16 %v6671_v44, %v6669_v43  ;;  %v9135_v56 = vld [vmem:[#allocation11_spill] sm:$0xff] }
  0x7e   : > { %5945 = vmatprep.subr.bf16.mxu1 %v5944_v20  ;;  %v5956_v20 = vpack.c.bf16 %v6680_v55, %v6675_v51 }
  0x80   : > { %880 = vmatmul.mubr.f32.gmra.mrb[38].mxu1 %v9094_v53  ;;  %v9134_v53 = vld [vmem:[#allocation41_spill] sm:$0xff] }
  0x81   : > { %885 = vmatprep.mubr.f32.mxu1 %v9095_v38  ;;  %5947 = vmatpush3.bf16.msra.mxu1 %v5946_v54  ;;  %v9097_v54 = vld [vmem:[#allocation39_spill] sm:$0xff]  ;;  %v9133_v38 = vld [vmem:[#allocation37_spill] sm:$0xff] }
  0x82   : > { %5949 = vmatprep.subr.bf16.mxu1 %v5948_v47  ;;  %v5962_v47 = vpack.c.bf16 %v6708_v30, %v6706_v29 }
  0x84   : > { %887 = vmatmul.mubr.f32.gmra.mrb[40].mxu1 %v9096_v21  ;;  %v9132_v21 = vld [vmem:[#allocation10_spill] sm:$0xff] }
  0x85   : > { %892 = vmatprep.mubr.f32.mxu1 %v6858_v24  ;;  %5951 = vmatpush3.bf16.msra.mxu1 %v5950_v37  ;;  %v9100_v37 = vld [vmem:[#allocation47_spill] sm:$0xff]  ;;  %v9131_v24 = vld [vmem:[#allocation9_spill] sm:$0xff] }
  0x86   : > { %5953 = vmatprep.subr.bf16.mxu1 %v5952_v15  ;;  %v9101_v15 = vld [vmem:[#allocation49_spill] sm:$0xff] }
  0x88   : > { %894 = vmatmul.mubr.f32.gmra.mrb[42].mxu1 %v9097_v54  ;;  %v9130_v54 = vld [vmem:[#allocation36_spill] sm:$0xff] }
  0x89   : > { %899 = vmatprep.mubr.f32.mxu1 %v9098_v32  ;;  %5955 = vmatpush3.bf16.msra.mxu1 %v5954_v28  ;;  %v9102_v28 = vld [vmem:[#allocation2_spill] sm:$0xff] }
  0x8a   : > { %5957 = vmatprep.subr.bf16.mxu1 %v5956_v20  ;;  %v9103_v20 = vld [vmem:[#allocation51_spill] sm:$0xff]  ;;  %v9129_v32 = vld [vmem:[#allocation34_spill] sm:$0xff] }
  0x8c   : > { %901 = vmatmul.mubr.f32.gmra.mrb[44].mxu1 %v9099_v5  ;;  %v9113_v5 = vld [vmem:[#allocation71_spill] sm:$0xff] }
  0x8d   : > { %906 = vmatprep.mubr.f32.mxu1 %v6913_v59  ;;  %5959 = vmatpush3.bf16.msra.mxu1 %v5958_v42  ;;  %v9107_v42 = vld [vmem:[#allocation58_spill] sm:$0xff] }
  0x8e   : > { %5961 = vmatprep.subr.bf16.mxu1 %v5960_v49  ;;  %v9108_v59 = vld [vmem:[#allocation62_spill] sm:$0xff]  ;;  %v9109_v49 = vld [vmem:[#allocation63_spill] sm:$0xff] }
  0x90   : > { %908 = vmatmul.mubr.f32.gmra.mrb[46].mxu1 %v9100_v37  ;;  %v9110_v37 = vld [vmem:[#allocation65_spill] sm:$0xff] }
  0x91   : > { %913 = vmatprep.mubr.f32.mxu1 %v9101_v15  ;;  %5963 = vmatpush3.bf16.msra.mxu1 %v5962_v47  ;;  %v9111_v15 = vld [vmem:[#allocation67_spill] sm:$0xff]  ;;  %v9112_v47 = vld [vmem:[#allocation70_spill] sm:$0xff] }
  0x92   : > { %5965 = vmatprep.subr.bf16.mxu1 %v9102_v28 }
  0x94   : > { %915 = vmatmul.mubr.f32.gmra.mrb[48].mxu1 %v9103_v20  ;;  %v9114_v20 = vld [vmem:[#allocation72_spill] sm:$0xff] }
  0x95   : > { %920 = vmatprep.mubr.f32.mxu1 %v9104_v60  ;;  %v9115_v60 = vld [vmem:[#allocation74_spill] sm:$0xff] }
  0x98   : > { %922 = vmatmul.mubr.f32.gmra.mrb[50].mxu1 %v9105_v3  ;;  %v9128_v3 = vld [vmem:[#allocation8_spill] sm:$0xff] }
  0x99   : > { %927 = vmatprep.mubr.f32.mxu1 %v9106_v7  ;;  %v9127_v7 = vld [vmem:[#allocation7_spill] sm:$0xff] }
  0x9c   : > { %929 = vmatmul.mubr.f32.gmra.mrb[52].mxu1 %v9107_v42  ;;  %v9116_v42 = vld [vmem:[#allocation20_spill] sm:$0xff] }
  0x9d   : > { %934 = vmatprep.mubr.f32.mxu1 %v9108_v59  ;;  %v9117_v59 = vld [vmem:[#allocation21_spill] sm:$0xff] }
  0xa0   : > { %936 = vmatmul.mubr.f32.gmra.mrb[54].mxu1 %v9109_v49  ;;  %v9118_v49 = vld [vmem:[#allocation3_spill] sm:$0xff] }
  0xa1   : > { %941 = vmatprep.mubr.f32.mxu1 %v9110_v37  ;;  %v9119_v37 = vld [vmem:[#allocation24_spill] sm:$0xff] }
  0xa4   : > { %943 = vmatmul.mubr.f32.gmra.mrb[56].mxu1 %v9111_v15  ;;  %v9120_v15 = vld [vmem:[#allocation4_spill] sm:$0xff] }
  0xa5   : > { %948 = vmatprep.mubr.f32.mxu1 %v9112_v47  ;;  %v9121_v47 = vld [vmem:[#allocation25_spill] sm:$0xff] }
  0xa8   : > { %950 = vmatmul.mubr.f32.gmra.mrb[58].mxu1 %v9113_v5  ;;  %v9122_v5 = vld [vmem:[#allocation27_spill] sm:$0xff] }
  0xa9   : > { %955 = vmatprep.mubr.f32.mxu1 %v9114_v20  ;;  %v9123_v20 = vld [vmem:[#allocation5_spill] sm:$0xff] }
  0xac   : > { %957 = vmatmul.mubr.f32.gmra.mrb[60].mxu1 %v9115_v60  ;;  %v9124_v60 = vld [vmem:[#allocation6_spill] sm:$0xff] }
  0xad   : > { %962 = vmatprep.mubr.f32.mxu1 %v7136_v19  ;;  %v9125_v19 = vld [vmem:[#allocation29_spill] sm:$0xff] }
  0xb0   : > { %964 = vmatmul.mubr.f32.gmra.mrb[62].mxu1 %v7138_v31  ;;  %v9126_v31 = vld [vmem:[#allocation33_spill] sm:$0xff] }
  0xb1   : > { %1099 = vmatprep.mubr.f32.mxu1 %v9116_v42 }
  0xb4   : > { %1102 = vmatmul.mubr.f32.vlgmr.msra.gmra.mrb[64].mxu1 %v9117_v59 }
  0xb5   : > { %5967 = vmatpush3.bf16.msra.mxu1 %v9118_v49  ;;  %1108 = vmatprep.mubr.f32.mxu1 %v9119_v37  ;;  %v9148_v49 = vld [vmem:[#allocation52_spill] sm:$0xff] }
  0xb6   : > { %5969 = vmatprep.subr.bf16.mxu1 %v9120_v15 }
  0xb8   : > { %1111 = vmatmul.mubr.f32.gmra.mrb[66].mxu1 %v9121_v47 }
  0xb9   : > { %1117 = vmatprep.mubr.f32.mxu1 %v9122_v5  ;;  %5971 = vmatpush3.bf16.msra.mxu1 %v9123_v20  ;;  %v9140_v20 = vld [vmem:[#allocation14_spill] sm:$0xff] }
  0xba   : > { %5973 = vmatprep.subr.bf16.mxu1 %v9124_v60  ;;  %v9137_v60 = vld [vmem:[#allocation43_spill] sm:$0xff] }
  0xbc   : > { %1120 = vmatmul.mubr.f32.gmra.mrb[68].mxu1 %v9125_v19 }
  0xbd   : > { %1126 = vmatprep.mubr.f32.mxu1 %v9126_v31  ;;  %5975 = vmatpush3.bf16.msra.mxu1 %v9127_v7  ;;  %v9138_v7 = vld [vmem:[#allocation44_spill] sm:$0xff] }
  0xbe   : > { %5977 = vmatprep.subr.bf16.mxu1 %v9128_v3  ;;  %v9139_v3 = vld [vmem:[#allocation13_spill] sm:$0xff] }
  0xc0   : > { %1129 = vmatmul.mubr.f32.gmra.mrb[70].mxu1 %v9129_v32 }
  0xc1   : > { %1135 = vmatprep.mubr.f32.mxu1 %v9130_v54  ;;  %5979 = vmatpush3.bf16.msra.mxu1 %v9131_v24  ;;  %v9142_v24 = vld [vmem:[#allocation48_spill] sm:$0xff] }
  0xc2   : > { %5981 = vmatprep.subr.bf16.mxu1 %v9132_v21  ;;  %v9143_v21 = vld [vmem:[#allocation15_spill] sm:$0xff] }
  0xc4   : > { %1138 = vmatmul.mubr.f32.gmra.mrb[72].mxu1 %v9133_v38 }
  0xc5   : > { %1144 = vmatprep.mubr.f32.mxu1 %v9134_v53  ;;  %5983 = vmatpush3.bf16.msra.mxu1 %v9135_v56  ;;  %v9145_v56 = vand.u32 4294901760, %v6515_v16  ;;  %v9155_v16 = vld [vmem:[#allocation64_spill] sm:$0xff] }
  0xc6   : > { %5985 = vmatprep.subr.bf16.mxu1 %v9136_v63  ;;  %v9146_v63 = vand.u32 4294901760, %v6517_v17  ;;  %v9156_v17 = vld [vmem:[#allocation66_spill] sm:$0xff] }
  0xc8   : > { %1147 = vmatmul.mubr.f32.gmra.mrb[74].mxu1 %v9137_v60  ;;  %v5996_v15 = vpack.c.bf16 %v9146_v63, %v9145_v56  ;;  %v9157_v63 = vld [vmem:[#allocation68_spill] sm:$0xff]  ;;  %v9158_v56 = vld [vmem:[#allocation69_spill] sm:$0xff] }
  0xc9   : > { %1153 = vmatprep.mubr.f32.mxu1 %v9138_v7  ;;  %5987 = vmatpush3.bf16.msra.mxu1 %v9139_v3  ;;  %v9149_v3 = vld [vmem:[#allocation19_spill] sm:$0xff] }
  0xca   : > { %5989 = vmatprep.subr.bf16.mxu1 %v9140_v20  ;;  %v9150_v20 = vld [vmem:[#allocation53_spill] sm:$0xff] }
  0xcc   : > { %1156 = vmatmul.mubr.f32.gmra.mrb[76].mxu1 %v9141_v26 }
  0xcd   : > { %1162 = vmatprep.mubr.f32.mxu1 %v9142_v24  ;;  %5991 = vmatpush3.bf16.msra.mxu1 %v9143_v21  ;;  %v9153_v21 = vld [vmem:[#allocation60_spill] sm:$0xff] }
  0xce   : > { %5993 = vmatprep.subr.bf16.mxu1 %v9144_v1  ;;  %v9154_v1 = vld [vmem:[#allocation61_spill] sm:$0xff] }
  0xd0   : > { %1165 = vmatmul.mubr.f32.gmra.mrb[78].mxu1 %v9147_v0 }
  0xd1   : > { %1171 = vmatprep.mubr.f32.mxu1 %v9148_v49  ;;  %5995 = vmatpush3.bf16.msra.mxu1 %v9149_v3  ;;  %v9159_v3 = vld [vmem:[#allocation73_spill] sm:$0xff] }
  0xd2   : > { %5997 = vmatprep.subr.bf16.mxu1 %v5996_v15  ;;  %v9160_v15 = vand.u32 4294901760, %v9116_v42  ;;  %v9167_v42 = vand.u32 4294901760, %v6558_v39  ;;  %v9174_v39 = vand.u32 4294901760, %v6589_v50  ;;  %v9181_v50 = vand.u32 4294901760, %v6623_v6 }
  0xd3   : > { %v9188_v6 = vand.u32 4294901760, %v6656_v34  ;;  %v7343_v34 = vld [vmem:[%s8696_s3] sm:$0xff] }
  0xd4   : > { %1174 = vmatmul.mubr.f32.gmra.mrb[80].mxu1 %v9150_v20 }
  0xd5   : > { %1180 = vmatprep.mubr.f32.mxu1 %v9151_v14 }
  0xd8   : > { %1183 = vmatmul.mubr.f32.gmra.mrb[82].mxu1 %v9152_v2 }
  0xd9   : > { %1189 = vmatprep.mubr.f32.mxu1 %v9153_v21 }
  0xdc   : > { %1192 = vmatmul.mubr.f32.gmra.mrb[84].mxu1 %v9154_v1 }
  0xdd   : > { %1198 = vmatprep.mubr.f32.mxu1 %v9155_v16 }
  0xe0   : > { %1201 = vmatmul.mubr.f32.gmra.mrb[86].mxu1 %v9156_v17  ;;  %v9161_v17 = vand.u32 4294901760, %v6519_v18 }
  0xe1   : > { %1207 = vmatprep.mubr.f32.mxu1 %v9157_v63  ;;  %v9162_v63 = vand.u32 4294901760, %v6533_v23  ;;  %v9169_v23 = vand.u32 4294901760, %v6562_v41  ;;  %v9176_v41 = vand.u32 4294901760, %v6603_v61  ;;  %v9183_v61 = vand.u32 4294901760, %v9129_v32 }
  0xe2   : > { %v9190_v32 = vand.u32 4294901760, %v9134_v53  ;;  %v7348_v53 = vld [vmem:[%s8696_s3 + $0x8] sm:$0xff] }
  0xe4   : > { %1210 = vmatmul.mubr.f32.gmra.mrb[88].mxu1 %v9158_v56  ;;  %v5998_v56 = vpack.c.bf16 %v9162_v63, %v9161_v17 }
  0xe5   : > { %1216 = vmatprep.mubr.f32.mxu1 %v9159_v3  ;;  %v9163_v3 = vand.u32 4294901760, %v6537_v25  ;;  %v9170_v25 = vand.u32 4294901760, %v6580_v46  ;;  %v9177_v46 = vand.u32 4294901760, %v9125_v19  ;;  %v9184_v19 = vand.u32 4294901760, %v9130_v54 }
  0xe6   : > { %v9191_v54 = vand.u32 4294901760, %v6669_v43 }
  0xe7   : > { %v6004_v17 = vpack.c.bf16 %v9170_v25, %v9169_v23  ;;  %v9197_v23 = vand.u32 4294901760, %v6684_v57  ;;  %v9198_v25 = vand.u32 4294901760, %v6686_v58  ;;  %v7380_v57 = vld [vmem:[%s8696_s3 + $0x18] sm:$0xff] }
  0xe8   : > { %1219 = vmatmul.mubr.f32.gmra.mrb[90].mxu1 %v7095_v35  ;;  %v9164_v35 = vand.u32 4294901760, %v6543_v27  ;;  %v9171_v27 = vand.u32 4294901760, %v9121_v47 }
  0xe9   : > { %1225 = vmatprep.mubr.f32.mxu1 %v7098_v11  ;;  %v9165_v11 = vand.u32 4294901760, %v9117_v59  ;;  %v9172_v59 = vand.u32 4294901760, %v9122_v5  ;;  %v9179_v5 = vand.u32 4294901760, %v6605_v62  ;;  %v9186_v62 = vand.u32 4294901760, %v6640_v13 }
  0xea   : > { %v6000_v16 = vpack.c.bf16 %v9164_v35, %v9163_v3  ;;  %v9173_v35 = vand.u32 4294901760, %v6584_v48  ;;  %v9178_v3 = vand.u32 4294901760, %v9126_v31  ;;  %v9180_v48 = vand.u32 4294901760, %v6619_v4 }
  0xeb   : > { %v9185_v31 = vand.u32 4294901760, %v6638_v12  ;;  %v9187_v4 = vand.u32 4294901760, %v6654_v33  ;;  %v9192_v12 = vand.u32 4294901760, %v6671_v44  ;;  %v9193_v13 = vand.u32 4294901760, %v6675_v51 }
  0xec   : > { %1228 = vmatmul.mubr.f32.gmra.mrb[92].mxu1 %v7104_v36  ;;  %v9194_v33 = vand.u32 4294901760, %v6680_v55  ;;  %v2081_v44 = vand.u32 4294901760, %v7343_v34  ;;  %v9195_v51 = vand.u32 4294901760, %v9137_v60  ;;  %v9199_v60 = vand.u32 4294901760, %v6697_v8 }
  0xed   : > { %1234 = vmatprep.mubr.f32.mxu1 %v7141_v45  ;;  %v9166_v45 = vand.u32 4294901760, %v9119_v37  ;;  %v6010_v37 = vpack.c.bf16 %v9180_v48, %v9179_v5  ;;  %v6016_v63 = vpack.c.bf16 %v9188_v6, %v9187_v4  ;;  %v2090_v8 = vand.u32 4294901760, %v7380_v57  ;;  %v7447_v6 = vld [vmem:[%s8696_s3 + $0x30] sm:$0xff] }
  0xf0   : > { %1237 = vmatmul.mubr.f32.gmra.mrb[94].mxu1 %v7146_v22 }
  0xf1   : > { %1341 = vmatprep.mubr.f32.mxu1 %v9160_v15  ;;  %v9168_v15 = vand.u32 4294901760, %v6560_v40  ;;  %v9175_v40 = vand.u32 4294901760, %v6591_v52  ;;  %v9182_v52 = vand.u32 4294901760, %v6634_v10  ;;  %v9189_v10 = vand.u32 4294901760, %v9133_v38 }
  0xf2   : > { %v2084_v38 = vand.u32 4294901760, %v7348_v53 }
  0xf3   : > { %v6002_v18 = vpack.c.bf16 %v9168_v15, %v9167_v42  ;;  %v6012_v47 = vpack.c.bf16 %v9182_v52, %v9181_v50  ;;  %v6020_v42 = vpack.c.bf16 %v9194_v33, %v9193_v13  ;;  %v2000_v52 = vld [vmem:[%s7407_s19 + $0x8] sm:$0xff]  ;;  %v2002_v13 = vld [vmem:[%s7407_s19 + $0x18] sm:$0xff] }
  0xf4   : > { %1345 = vmatmul.mubr.f32.vlgmr.msra.gmra.mrb[96].mxu1 %v9165_v11  ;;  %v6006_v11 = vpack.c.bf16 %v9174_v39, %v9173_v35  ;;  %v7375_v35 = vld [vmem:[%s8696_s3 + $0x10] sm:$0xff] }
  0xf5   : > { %5999 = vmatpush3.bf16.msra.mxu1 %v5998_v56  ;;  %1352 = vmatprep.mubr.f32.mxu1 %v9166_v45  ;;  %v6008_v45 = vpack.c.bf16 %v9176_v41, %v9175_v40  ;;  %v6018_v56 = vpack.c.bf16 %v9192_v12, %v9191_v54  ;;  %v2087_v39 = vand.u32 4294901760, %v7375_v35  ;;  %v9202_v41 = vand.u32 4294901760, %v9142_v24  ;;  %v1999_v24 = vld [vmem:[%s7407_s19] sm:$0xff] }
  0xf6   : > { %6001 = vmatprep.subr.bf16.mxu1 %v6000_v16  ;;  %v6014_v16 = vpack.c.bf16 %v9186_v62, %v9185_v31  ;;  %v2033_v50 = vsel %vm2031_vm0, %v1999_v24, 0  ;;  %v2036_v31 = vsel %vm2031_vm0, %v2000_v52, 0  ;;  %v8917_v54 = vand.u32 4294901760, %v7447_v6 }
  0xf8   : > { %1356 = vmatmul.mubr.f32.gmra.mrb[98].mxu1 %v9171_v27  ;;  %v7366_v27 = vpack.c.bf16 %v2084_v38, %v2081_v44 }
  0xf9   : > { %1363 = vmatprep.mubr.f32.mxu1 %v9172_v59  ;;  %6003 = vmatpush3.bf16.msra.mxu1 %v6002_v18  ;;  %v9196_v18 = vand.u32 4294901760, %v9138_v7  ;;  %v9200_v59 = vand.u32 4294901760, %v6699_v9  ;;  %v9201_v9 = vand.u32 4294901760, %v9141_v26  ;;  %v7402_v26 = vpack.c.bf16 %v2090_v8, %v2087_v39 }
  0xfa   : > { %6005 = vmatprep.subr.bf16.mxu1 %v6004_v17  ;;  %v6022_v17 = vpack.c.bf16 %v9198_v25, %v9197_v23  ;;  %6061 = vmatprep.subr.bf16.mxu0 %v7366_v27  ;;  %v9213_v23 = vand.u32 4294901760, %v9151_v14 }
  0xfb   : > { %v6024_v7 = vpack.c.bf16 %v9200_v59, %v9199_v60  ;;  %6063 = vmatpush3.bf16.msra.mxu0 %v7366_v27  ;;  %9205 = vst [vmem:[#allocation2_spill] sm:$0xff] %v7402_v26 }
  0xfc   : > { %1367 = vmatmul.mubr.f32.gmra.mrb[100].mxu1 %v9177_v46  ;;  %v9204_v46 = vand.u32 4294901760, %v6708_v30  ;;  %v7417_v30 = vld [vmem:[%s8696_s3 + $0x28] sm:$0xff]  ;;  %6065 = vmatprep.subr.bf16.mxu0 %v7402_v26 }
  0xfd   : > { %1374 = vmatprep.mubr.f32.mxu1 %v9178_v3  ;;  %6007 = vmatpush3.bf16.msra.mxu1 %v6006_v11 }
  0xfe   : > { %6009 = vmatprep.subr.bf16.mxu1 %v6008_v45  ;;  %v9203_v45 = vand.u32 4294901760, %v6706_v29  ;;  %v7412_v29 = vld [vmem:[%s8696_s3 + $0x20] sm:$0xff] }
  0xff   : > { %v8920_v48 = vand.u32 4294901760, %v7412_v29  ;;  %6067 = vmatpush3.bf16.msra.mxu0 %v7402_v26 }
 0x100   : > { %1378 = vmatmul.mubr.f32.gmra.mrb[102].mxu1 %v9183_v61  ;;  %v6026_v3 = vpack.c.bf16 %v9204_v46, %v9203_v45  ;;  %v9206_v61 = vand.u32 4294901760, %v9147_v0  ;;  %v7441_v0 = vand.u32 4294901760, %v2036_v31  ;;  %v9216_v46 = vand.u32 4294901760, %v9152_v2 }
 0x101   : > { %1385 = vmatprep.mubr.f32.mxu1 %v9184_v19  ;;  %6011 = vmatpush3.bf16.msra.mxu1 %v6010_v37  ;;  %v8918_v37 = vand.u32 4294901760, %v7417_v30  ;;  %v7428_v19 = vand.u32 4294901760, %v2033_v50 }
 0x102   : > { %6013 = vmatprep.subr.bf16.mxu1 %v6012_v47  ;;  %9210 = vst [vmem:[#allocation24_spill] sm:$0xff] %v7441_v0  ;;  %v7462_v12 = vsub.f32 %v2036_v31, %v7441_v0 }
 0x103   : > { %9207 = vst [vmem:[#allocation20_spill] sm:$0xff] %v7428_v19  ;;  %v7439_v4 = vpack.c.bf16 %v8918_v37, %v8920_v48 }
 0x104   : > { %1389 = vmatmul.mubr.f32.gmra.mrb[104].mxu1 %v9189_v10  ;;  %v2001_v10 = vld [vmem:[%s7407_s19 + $0x10] sm:$0xff]  ;;  %v8910_v25 = vand.u32 4294901760, %v7462_v12 }
 0x105   : > { %1396 = vmatprep.mubr.f32.mxu1 %v9190_v32  ;;  %6015 = vmatpush3.bf16.msra.mxu1 %v6014_v16  ;;  %v4652_v43 = vpop.f32.mrb[0].mxu1  ;;  %v9208_v16 = vand.u32 4294901760, %v9148_v49  ;;  %9209 = vst [vmem:[#allocation21_spill] sm:$0xff] %v7439_v4  ;;  %v7452_v49 = vld [vmem:[%s8696_s3 + $0x38] sm:$0xff] }
 0x106   : > { %6017 = vmatprep.subr.bf16.mxu1 %v6016_v63  ;;  %v4653_v15 = vpop.f32.mrb[1].mxu1  ;;  %v7455_v63 = vsub.f32 %v2033_v50, %v7428_v19  ;;  %6069 = vmatprep.subr.bf16.mxu0 %v7439_v4 }
 0x107   : > { %v7354_v55 = vadd.f32 %v4653_v15, %v4652_v43  ;;  %6071 = vmatpush3.bf16.msra.mxu0 %v7439_v4 }
 0x108   : > { %1400 = vmatmul.mubr.f32.gmra.mrb[106].mxu1 %v9195_v51  ;;  %v8912_v43 = vand.u32 4294901760, %v7455_v63  ;;  %v2042_v51 = vsel %vm2031_vm0, %v2002_v13, 0 }
 0x109   : > { %1407 = vmatprep.mubr.f32.mxu1 %v9196_v18  ;;  %6019 = vmatpush3.bf16.msra.mxu1 %v6018_v56  ;;  %v4655_v58 = vpop.f32.mrb[2].mxu1  ;;  %v2039_v56 = vsel %vm2031_vm0, %v2001_v10, 0 }
 0x10a   : > { %6021 = vmatprep.subr.bf16.mxu1 %v6020_v42  ;;  %v4656_v11 = vpop.f32.mrb[3].mxu1  ;;  %v9211_v42 = vand.u32 4294901760, %v9150_v20  ;;  %v7470_v15 = vand.u32 4294901760, %v2039_v56  ;;  %v2156_v60 = vsub.f32 %v7455_v63, %v8912_v43 }
 0x10b   : > { %v7390_v40 = vadd.f32 %v4656_v11, %v4655_v58  ;;  %v2166_v58 = vsub.f32 %v7462_v12, %v8910_v25 }
 0x10c   : > { %1411 = vmatmul.mubr.f32.gmra.mrb[108].mxu1 %v9201_v9  ;;  %9212 = vst [vmem:[#allocation25_spill] sm:$0xff] %v7470_v15  ;;  %v7490_v59 = vsub.f32 %v2039_v56, %v7470_v15 }
 0x10d   : > { %1418 = vmatprep.mubr.f32.mxu1 %v9202_v41  ;;  %6023 = vmatpush3.bf16.msra.mxu1 %v6022_v17  ;;  %v4658_v5 = vpop.f32.mrb[4].mxu1  ;;  %v7484_v17 = vand.u32 4294901760, %v2042_v51  ;;  %v2004_v41 = vld [vmem:[%s7407_s19 + $0x28] sm:$0xff] }
 0x10e   : > { %6025 = vmatprep.subr.bf16.mxu1 %v6024_v7  ;;  %v4659_v47 = vpop.f32.mrb[5].mxu1  ;;  %v2003_v7 = vld [vmem:[%s7407_s19 + $0x20] sm:$0xff]  ;;  %v8908_v24 = vand.u32 4294901760, %v7490_v59  ;;  %v2048_v50 = vsel %vm2031_vm0, %v2004_v41, 0  ;;  %v9222_v41 = vld [vmem:[#allocation64_spill] sm:$0xff] }
 0x10f   : > { %v7431_v62 = vadd.f32 %v4659_v47, %v4658_v5  ;;  %9215 = vst [vmem:[#allocation29_spill] sm:$0xff] %v7484_v17  ;;  %v7498_v11 = vsub.f32 %v2042_v51, %v7484_v17  ;;  %v2045_v9 = vsel %vm2031_vm0, %v2003_v7, 0  ;;  %v9218_v47 = vand.u32 4294901760, %v9153_v21 }
 0x110   : > { %1422 = vmatmul.mubr.f32.gmra.mrb[110].mxu1 %v9206_v61  ;;  %v7506_v5 = vand.u32 4294901760, %v2045_v9  ;;  %v2167_v61 = vand.u32 4294901760, %v2166_v58  ;;  %v7514_v2 = vand.u32 4294901760, %v2048_v50 }
 0x111   : > { %1429 = vmatprep.mubr.f32.mxu1 %v9208_v16  ;;  %6027 = vmatpush3.bf16.msra.mxu1 %v6026_v3  ;;  %v4661_v32 = vpop.f32.mrb[6].mxu1  ;;  %v2157_v3 = vand.u32 4294901760, %v2156_v60  ;;  %v8907_v31 = vand.u32 4294901760, %v7498_v11  ;;  %v2176_v16 = vsub.f32 %v7490_v59, %v8908_v24 }
 0x112   : > { %6029 = vmatprep.subr.bf16.mxu1 %v9102_v28  ;;  %v8913_v28 = vand.u32 4294901760, %v7452_v49  ;;  %v4662_v33 = vpop.f32.mrb[7].mxu1  ;;  %9217 = vst [vmem:[#allocation33_spill] sm:$0xff] %v7506_v5  ;;  %9219 = vst [vmem:[#allocation34_spill] sm:$0xff] %v7514_v2  ;;  %v7520_v10 = vsub.f32 %v2045_v9, %v7506_v5  ;;  %v7527_v13 = vsub.f32 %v2048_v50, %v7514_v2 }
 0x113   : > { %v7473_v18 = vadd.f32 %v4662_v33, %v4661_v32  ;;  %5404 = vmatprep.mubr.f32.mxu0 %v2157_v3  ;;  %v2005_v32 = vld [vmem:[%s7407_s19 + $0x30] sm:$0xff]  ;;  %v2186_v21 = vsub.f32 %v7498_v11, %v8907_v31  ;;  %v2177_v60 = vand.u32 4294901760, %v2176_v16 }
 0x114   : > { %1433 = vmatmul.mubr.f32.gmra.mrb[112].mxu1 %v9211_v42  ;;  %v7481_v20 = vpack.c.bf16 %v8913_v28, %v8917_v54  ;;  %v2051_v33 = vsel %vm2031_vm0, %v2005_v32, 0  ;;  %v2006_v42 = vld [vmem:[%s7407_s19 + $0x38] sm:$0xff]  ;;  %v8905_v7 = vand.u32 4294901760, %v7520_v10  ;;  %v8906_v3 = vand.u32 4294901760, %v7527_v13 }
 0x115   : > { %1440 = vmatprep.mubr.f32.mxu1 %v9213_v23  ;;  %v4664_v14 = vpop.f32.mrb[8].mxu1  ;;  %v9220_v23 = vand.u32 4294901760, %v9154_v1  ;;  %v2054_v58 = vsel %vm2031_vm0, %v2006_v42, 0  ;;  %v2008_v42 = vld [vmem:[%s7407_s19 + $0x48] sm:$0xff] }
 0x116   : > { %9214 = vst [vmem:[#allocation27_spill] sm:$0xff] %v7481_v20  ;;  %6073 = vmatprep.subr.bf16.mxu0 %v7481_v20  ;;  %v4665_v45 = vpop.f32.mrb[9].mxu1  ;;  %v7542_v50 = vand.u32 4294901760, %v2054_v58  ;;  %v2196_v1 = vsub.f32 %v7520_v10, %v8905_v7  ;;  %v2206_v32 = vsub.f32 %v7527_v13, %v8906_v3  ;;  %v9229_v3 = vld [vmem:[#allocation68_spill] sm:$0xff] }
 0x117   : > { %6075 = vmatpush3.bf16.msra.mxu0 %v7481_v20  ;;  %v7509_v52 = vadd.f32 %v4665_v45, %v4664_v14  ;;  %v7534_v14 = vand.u32 4294901760, %v2051_v33  ;;  %v9223_v45 = vand.u32 4294901760, %v9222_v41 }
 0x118   : > { %1444 = vmatmul.mubr.f32.gmra.mrb[114].mxu1 %v9216_v46  ;;  %v2187_v46 = vand.u32 4294901760, %v2186_v21  ;;  %9224 = vst [vmem:[#allocation37_spill] sm:$0xff] %v7542_v50 }
 0x119   : > { %1451 = vmatprep.mubr.f32.mxu1 %v9218_v47  ;;  %9221 = vst [vmem:[#allocation36_spill] sm:$0xff] %v7534_v14  ;;  %v7548_v47 = vsub.f32 %v2051_v33, %v7534_v14  ;;  %v2197_v33 = vand.u32 4294901760, %v2196_v1 }
 0x11a   : > { %v4667_v56 = vpop.f32.mrb[10].mxu1  ;;  %5405 = vmatmul.mubr.f32.vlgmr.msra.gmra.mrb[0].mxu0 %v2167_v61  ;;  %v2007_v61 = vld [vmem:[%s7407_s19 + $0x40] sm:$0xff] }
 0x11b   : > { %v4668_v51 = vpop.f32.mrb[11].mxu1  ;;  %5407 = vmatprep.mubr.f32.mxu0 %v2177_v60  ;;  %v2057_v21 = vsel %vm2031_vm0, %v2007_v61, 0  ;;  %v8909_v41 = vand.u32 4294901760, %v7548_v47  ;;  %v2207_v61 = vand.u32 4294901760, %v2206_v32  ;;  %v2009_v32 = vld [vmem:[%s7407_s19 + $0x50] sm:$0xff] }
 0x11c   : > { %1455 = vmatmul.mubr.f32.gmra.mrb[116].mxu1 %v9220_v23  ;;  %v7537_v9 = vadd.f32 %v4668_v51, %v4667_v56  ;;  %v7555_v56 = vsub.f32 %v2054_v58, %v7542_v50  ;;  %v9226_v23 = vld [vmem:[#allocation66_spill] sm:$0xff]  ;;  %v9230_v58 = vand.u32 4294901760, %v9229_v3  ;;  %v7586_v3 = vsub.f32 %v7348_v53, %v2084_v38 }
 0x11d   : > { %1462 = vmatprep.mubr.f32.mxu1 %v9223_v45  ;;  %v9227_v60 = vand.u32 4294901760, %v9226_v23  ;;  %v7562_v45 = vand.u32 4294901760, %v2057_v21  ;;  %v2216_v1 = vsub.f32 %v7548_v47, %v8909_v41 }
 0x11e   : > { %v4670_v16 = vpop.f32.mrb[12].mxu1  ;;  %5408 = vmatmul.mubr.f32.gmra.mrb[2].mxu0 %v2187_v46  ;;  %9225 = vst [vmem:[#allocation41_spill] sm:$0xff] %v7555_v56  ;;  %v2060_v46 = vsel %vm2031_vm0, %v2008_v42, 0  ;;  %v8911_v31 = vand.u32 4294901760, %v7555_v56 }
 0x11f   : > { %v4671_v51 = vpop.f32.mrb[13].mxu1  ;;  %9228 = vst [vmem:[#allocation43_spill] sm:$0xff] %v7562_v45  ;;  %v7570_v24 = vand.u32 4294901760, %v2060_v46  ;;  %5410 = vmatprep.mubr.f32.mxu0 %v2197_v33  ;;  %v7576_v23 = vsub.f32 %v2057_v21, %v7562_v45  ;;  %v2010_v33 = vld [vmem:[%s7407_s19 + $0x58] sm:$0xff]  ;;  %v2217_v41 = vand.u32 4294901760, %v2216_v1 }
 0x120   : > { %1466 = vmatmul.mubr.f32.gmra.mrb[118].mxu1 %v9227_v60  ;;  %v7565_v7 = vadd.f32 %v4671_v51, %v4670_v16  ;;  %v7581_v16 = vsub.f32 %v7343_v34, %v2081_v44  ;;  %v2226_v51 = vsub.f32 %v7555_v56, %v8911_v31  ;;  %v2063_v60 = vsel %vm2031_vm0, %v2009_v32, 0  ;;  %v9234_v44 = vld [vmem:[#allocation69_spill] sm:$0xff] }
 0x121   : > { %1473 = vmatprep.mubr.f32.mxu1 %v9230_v58  ;;  %9231 = vst [vmem:[#allocation44_spill] sm:$0xff] %v7570_v24  ;;  %9232 = vst [vmem:[#allocation45_spill] sm:$0xff] %v7576_v23  ;;  %v7593_v21 = vsub.f32 %v2060_v46, %v7570_v24  ;;  %v9235_v58 = vand.u32 4294901760, %v9234_v44  ;;  %v8914_v53 = vand.u32 4294901760, %v7576_v23  ;;  %v9236_v31 = vld [vmem:[#allocation73_spill] sm:$0xff]  ;;  %v7607_v28 = vand.u32 4294901760, %v2063_v60 }
 0x122   : > { %v4673_v42 = vpop.f32.mrb[14].mxu1  ;;  %5411 = vmatmul.mubr.f32.gmra.mrb[4].mxu0 %v2207_v61  ;;  %v8916_v38 = vand.u32 4294901760, %v7581_v16  ;;  %v8915_v61 = vand.u32 4294901760, %v7586_v3  ;;  %v9237_v43 = vand.u32 4294901760, %v9236_v31  ;;  %v2227_v46 = vand.u32 4294901760, %v2226_v51 }
 0x123   : > { %9233 = vst [vmem:[#allocation48_spill] sm:$0xff] %v7593_v21  ;;  %v4674_v34 = vpop.f32.mrb[15].mxu1  ;;  %v8919_v32 = vand.u32 4294901760, %v7593_v21  ;;  %9238 = vst [vmem:[#allocation50_spill] sm:$0xff] %v7607_v28  ;;  %5413 = vmatprep.mubr.f32.mxu0 %v2217_v41  ;;  %v2236_v1 = vsub.f32 %v7576_v23, %v8914_v53  ;;  %v7623_v51 = vsub.f32 %v2063_v60, %v7607_v28  ;;  %v2011_v53 = vld [vmem:[%s7407_s19 + $0x60] sm:$0xff] }
 0x124   : > { %1477 = vmatmul.mubr.f32.gmra.mrb[120].mxu1 %v9235_v58  ;;  %v7602_v25 = vadd.f32 %v4674_v34, %v4673_v42  ;;  %v2317_v44 = vsub.f32 %v7581_v16, %v8916_v38  ;;  %v2324_v31 = vsub.f32 %v7586_v3, %v8915_v61  ;;  %v7630_v58 = vsub.f32 %v7375_v35, %v2087_v39  ;;  %v9241_v38 = vld [vmem:[#allocation75_spill] sm:$0xff] }
 0x125   : > { %1484 = vmatprep.mubr.f32.mxu1 %v9237_v43  ;;  %v2066_v43 = vsel %vm2031_vm0, %v2010_v33, 0  ;;  %v2246_v41 = vsub.f32 %v7593_v21, %v8919_v32  ;;  %9239 = vst [vmem:[#allocation52_spill] sm:$0xff] %v7623_v51  ;;  %v9242_v33 = vand.u32 4294901760, %v9241_v38  ;;  %v7638_v60 = vsub.f32 %v7380_v57, %v2090_v8  ;;  %v2012_v32 = vld [vmem:[%s7407_s19 + $0x68] sm:$0xff]  ;;  %v9243_v21 = vld [vmem:[#allocation76_spill] sm:$0xff] }
 0x126   : > { %v4676_v42 = vpop.f32.mrb[16].mxu1  ;;  %5414 = vmatmul.mubr.f32.gmra.mrb[6].mxu0 %v2227_v46  ;;  %v7625_v34 = vand.u32 4294901760, %v2066_v43  ;;  %v2237_v46 = vand.u32 4294901760, %v2236_v1  ;;  %v2318_v54 = vand.u32 4294901760, %v2317_v44  ;;  %v2325_v37 = vand.u32 4294901760, %v2324_v31 }
 0x127   : > { %v4677_v61 = vpop.f32.mrb[17].mxu1  ;;  %v9244_v23 = vand.u32 4294901760, %v9243_v21  ;;  %v2247_v35 = vand.u32 4294901760, %v2246_v41  ;;  %v8925_v39 = vand.u32 4294901760, %v7623_v51  ;;  %v8926_v44 = vand.u32 4294901760, %v7630_v58 }
 0x128   : > { %9240 = vst [vmem:[#allocation53_spill] sm:$0xff] %v7625_v34  ;;  %1488 = vmatmul.mubr.f32.gmra.mrb[122].mxu1 %v9242_v33  ;;  %v7641_v48 = vadd.f32 %v4677_v61, %v4676_v42  ;;  %v7647_v38 = vsub.f32 %v2066_v43, %v7625_v34  ;;  %5416 = vmatprep.mubr.f32.mxu0 %v2237_v46  ;;  %v8927_v57 = vand.u32 4294901760, %v7638_v60  ;;  %v2069_v8 = vsel %vm2031_vm0, %v2011_v53, 0  ;;  %v2013_v46 = vld [vmem:[%s7407_s19 + $0x70] sm:$0xff] }
 0x129   : > { %1495 = vmatprep.mubr.f32.mxu1 %v9244_v23  ;;  %v6076_v1 = vpack.c.bf16 %v2325_v37, %v2318_v54  ;;  %v2256_v23 = vsub.f32 %v7623_v51, %v8925_v39  ;;  %v7656_v31 = vand.u32 4294901760, %v2069_v8  ;;  %v2072_v43 = vsel %vm2031_vm0, %v2012_v32, 0 }
 0x12a   : > { %9245 = vst [vmem:[#allocation57_spill] sm:$0xff] %v7647_v38  ;;  %v4679_v61 = vpop.f32.mrb[18].mxu1  ;;  %5417 = vmatmul.mubr.f32.gmra.mrb[8].mxu0 %v2247_v35  ;;  %v8932_v21 = vand.u32 4294901760, %v7647_v38  ;;  %v9247_v54 = vand.u32 4294901760, %v7104_v36  ;;  %v2331_v53 = vsub.f32 %v7630_v58, %v8926_v44  ;;  %v2338_v42 = vsub.f32 %v7638_v60, %v8927_v57  ;;  %v9251_v35 = vld [vmem:[#allocation79_spill] sm:$0xff] }
 0x12b   : > { %9246 = vst [vmem:[#allocation59_spill] sm:$0xff] %v7656_v31  ;;  %v4680_v37 = vpop.f32.mrb[19].mxu1  ;;  %6077 = vmatprep.subr.bf16.mxu0 %v6076_v1  ;;  %v7667_v41 = vand.u32 4294901760, %v2072_v43  ;;  %v9249_v33 = vand.u32 4294901760, %v7412_v29  ;;  %v2257_v39 = vand.u32 4294901760, %v2256_v23  ;;  %v7683_v57 = vsub.f32 %v2069_v8, %v7656_v31 }
 0x12c   : > { %1499 = vmatmul.mubr.f32.gmra.mrb[124].mxu1 %v9247_v54  ;;  %v7675_v36 = vadd.f32 %v4680_v37, %v4679_v61  ;;  %v9252_v54 = vand.u32 4294901760, %v9251_v35  ;;  %6079 = vmatpush3.bf16.msra.mxu0 %v6076_v1  ;;  %v2266_v44 = vsub.f32 %v7647_v38, %v8932_v21  ;;  %v2332_v51 = vand.u32 4294901760, %v2331_v53  ;;  %v2014_v37 = vld [vmem:[%s7407_s19 + $0x78] sm:$0xff]  ;;  %v9259_v38 = vld [vmem:[#allocation16_spill] sm:$0xff] }
 0x12d   : > { %9248 = vst [vmem:[#allocation60_spill] sm:$0xff] %v7667_v41  ;;  %v7672_v32 = vsub.f32 %v7412_v29, %v9249_v33  ;;  %9253 = vst [vmem:[#allocation64_spill] sm:$0xff] %v7683_v57  ;;  %v2339_v56 = vand.u32 4294901760, %v2338_v42  ;;  %v7686_v29 = vsub.f32 %v2072_v43, %v7667_v41  ;;  %5419 = vmatprep.mubr.f32.mxu0 %v2257_v39  ;;  %v9255_v23 = vand.u32 4294901760, %v7417_v30 }
 0x12e   : > { %9250 = vst [vmem:[#allocation61_spill] sm:$0xff] %v7675_v36  ;;  %1506 = vmatprep.mubr.f32.mxu1 %v9252_v54  ;;  %v4682_v33 = vpop.f32.mrb[20].mxu1  ;;  %v2267_v35 = vand.u32 4294901760, %v2266_v44  ;;  %v2075_v8 = vsel %vm2031_vm0, %v2013_v46, 0  ;;  %v9256_v42 = vand.u32 4294901760, %v7146_v22  ;;  %v9274_v36 = vld [vmem:[#allocation28_spill] sm:$0xff] }
 0x12f   : > { %9254 = vst [vmem:[#allocation66_spill] sm:$0xff] %v7686_v29  ;;  %v8935_v61 = vand.u32 4294901760, %v7672_v32  ;;  %v7694_v54 = vsub.f32 %v7417_v30, %v9255_v23  ;;  %v4683_v53 = vpop.f32.mrb[21].mxu1  ;;  %v6080_v43 = vpack.c.bf16 %v2339_v56, %v2332_v51  ;;  %v8936_v21 = vand.u32 4294901760, %v7686_v29 }
 0x130   : > { %1510 = vmatmul.mubr.f32.gmra.mrb[126].mxu1 %v9256_v42  ;;  %v7703_v44 = vand.u32 4294901760, %v2075_v8  ;;  %v7705_v1 = vadd.f32 %v4683_v53, %v4682_v33  ;;  %5420 = vmatmul.mubr.f32.gmra.mrb[10].mxu0 %v2267_v35  ;;  %v9260_v30 = vand.u32 4294901760, %v7683_v57  ;;  %v2078_v56 = vsel %vm2031_vm0, %v2014_v37, 0 }
 0x131   : > { %v2345_v39 = vsub.f32 %v7672_v32, %v8935_v61  ;;  %1676 = vmatprep.mubr.f32.mxu1 %v9259_v38  ;;  %v8941_v22 = vand.u32 4294901760, %v7694_v54  ;;  %6081 = vmatprep.subr.bf16.mxu0 %v6080_v43  ;;  %v2286_v51 = vsub.f32 %v7686_v29, %v8936_v21  ;;  %v7719_v53 = vand.u32 4294901760, %v2078_v56  ;;  %v9265_v29 = vld [vmem:[#allocation17_spill] sm:$0xff] }
 0x132   : > { %9257 = vst [vmem:[#allocation68_spill] sm:$0xff] %v7703_v44  ;;  %9258 = vst [vmem:[#allocation69_spill] sm:$0xff] %v7705_v1  ;;  %v2276_v46 = vsub.f32 %v7683_v57, %v9260_v30  ;;  %v7717_v33 = vsub.f32 %v2075_v8, %v7703_v44  ;;  %6083 = vmatpush3.bf16.msra.mxu0 %v6080_v43  ;;  %v9263_v37 = vand.u32 4294901760, %v7447_v6  ;;  %v9264_v21 = vand.u32 4294901760, %v7452_v49  ;;  %v9267_v1 = vld [vmem:[#allocation3_spill] sm:$0xff] }
 0x133   : > { %v2346_v23 = vand.u32 4294901760, %v2345_v39  ;;  %9262 = vst [vmem:[#allocation75_spill] sm:$0xff] %v7719_v53  ;;  %v4685_v35 = vpop.f32.mrb[22].mxu1  ;;  %v2352_v30 = vsub.f32 %v7694_v54, %v8941_v22  ;;  %v2287_v57 = vand.u32 4294901760, %v2286_v51 }
 0x134   : > { %9261 = vst [vmem:[#allocation73_spill] sm:$0xff] %v7717_v33  ;;  %v2277_v42 = vand.u32 4294901760, %v2276_v46  ;;  %v7727_v61 = vsub.f32 %v7447_v6, %v9263_v37  ;;  %v7732_v39 = vsub.f32 %v7452_v49, %v9264_v21  ;;  %v4686_v8 = vpop.f32.mrb[23].mxu1  ;;  %1678 = vmatmul.mubr.f32.vlgmr.msra.gmra.mrb[128].mxu1 %v9265_v29  ;;  %v8942_v43 = vand.u32 4294901760, %v7717_v33  ;;  %v9268_v6 = vld [vmem:[#allocation22_spill] sm:$0xff]  ;;  %v9269_v21 = vld [vmem:[#allocation4_spill] sm:$0xff] }
 0x135   : > { %v7737_v46 = vsub.f32 %v2078_v56, %v7719_v53  ;;  %v7739_v22 = vadd.f32 %v4686_v8, %v4685_v35  ;;  %6031 = vmatpush3.bf16.msra.mxu1 %v9267_v1  ;;  %1683 = vmatprep.mubr.f32.mxu1 %v9268_v6  ;;  %v2353_v37 = vand.u32 4294901760, %v2352_v30  ;;  %v9273_v6 = vld [vmem:[#allocation6_spill] sm:$0xff] }
 0x136   : > { %v8945_v38 = vand.u32 4294901760, %v7727_v61  ;;  %v8946_v49 = vand.u32 4294901760, %v7732_v39  ;;  %6033 = vmatprep.subr.bf16.mxu1 %v9269_v21  ;;  %5422 = vmatprep.mubr.f32.mxu0 %v2277_v42  ;;  %v2296_v51 = vsub.f32 %v7717_v33, %v8942_v43  ;;  %v9270_v21 = vld [vmem:[#allocation23_spill] sm:$0xff] }
 0x137   : > { %9266 = vst [vmem:[#allocation76_spill] sm:$0xff] %v7739_v22  ;;  %v8947_v56 = vand.u32 4294901760, %v7737_v46  ;;  %v4688_v35 = vpop.f32.mrb[24].mxu1  ;;  %5423 = vmatmul.mubr.f32.gmra.mrb[12].mxu0 %v2287_v57  ;;  %v6084_v8 = vpack.c.bf16 %v2353_v37, %v2346_v23  ;;  %v9271_v57 = vld [vmem:[#allocation26_spill] sm:$0xff]  ;;  %v9272_v23 = vld [vmem:[#allocation5_spill] sm:$0xff] }
 0x138   : > { %v2359_v1 = vsub.f32 %v7727_v61, %v8945_v38  ;;  %v2366_v30 = vsub.f32 %v7732_v39, %v8946_v49  ;;  %v4689_v22 = vpop.f32.mrb[25].mxu1  ;;  %1685 = vmatmul.mubr.f32.gmra.mrb[130].mxu1 %v9270_v21  ;;  %v2297_v42 = vand.u32 4294901760, %v2296_v51 }
 0x139   : > { %v2306_v43 = vsub.f32 %v7737_v46, %v8947_v56  ;;  %v7760_v33 = vadd.f32 %v4689_v22, %v4688_v35  ;;  %1690 = vmatprep.mubr.f32.mxu1 %v9271_v57  ;;  %6035 = vmatpush3.bf16.msra.mxu1 %v9272_v23  ;;  %v9275_v35 = vld [vmem:[#allocation30_spill] sm:$0xff]  ;;  %v9276_v56 = vld [vmem:[#allocation7_spill] sm:$0xff] }
 0x13a   : > { %v2360_v37 = vand.u32 4294901760, %v2359_v1  ;;  %v2367_v38 = vand.u32 4294901760, %v2366_v30  ;;  %6037 = vmatprep.subr.bf16.mxu1 %v9273_v6  ;;  %6085 = vmatprep.subr.bf16.mxu0 %v6084_v8  ;;  %v9277_v1 = vld [vmem:[#allocation8_spill] sm:$0xff] }
 0x13b   : > { %v2307_v49 = vand.u32 4294901760, %v2306_v43  ;;  %v4691_v29 = vpop.f32.mrb[26].mxu1  ;;  %6087 = vmatpush3.bf16.msra.mxu0 %v6084_v8  ;;  %5425 = vmatprep.mubr.f32.mxu0 %v2297_v42  ;;  %v9278_v8 = vld [vmem:[#allocation31_spill] sm:$0xff]  ;;  %v9279_v30 = vld [vmem:[#allocation32_spill] sm:$0xff] }
 0x13c   : > { %v6088_v51 = vpack.c.bf16 %v2367_v38, %v2360_v37  ;;  %v4692_v21 = vpop.f32.mrb[27].mxu1  ;;  %1692 = vmatmul.mubr.f32.gmra.mrb[132].mxu1 %v9274_v36  ;;  %v9282_v42 = vld [vmem:[#allocation35_spill] sm:$0xff]  ;;  %v9283_v37 = vld [vmem:[#allocation38_spill] sm:$0xff] }
 0x13d   : > { %5426 = vmatmul.mubr.f32.gmra.mrb[14].mxu0 %v2307_v49  ;;  %v7766_v22 = vadd.f32 %v4692_v21, %v4691_v29  ;;  %1697 = vmatprep.mubr.f32.mxu1 %v9275_v35  ;;  %v9280_v29 = vld [vmem:[#allocation9_spill] sm:$0xff]  ;;  %v9281_v49 = vld [vmem:[#allocation10_spill] sm:$0xff] }
 0x13e   : > { %6039 = vmatpush3.bf16.msra.mxu1 %v9276_v56  ;;  %6089 = vmatprep.subr.bf16.mxu0 %v6088_v51 }
 0x13f   : > { %6041 = vmatprep.subr.bf16.mxu1 %v9277_v1  ;;  %v4694_v6 = vpop.f32.mrb[28].mxu1  ;;  %6091 = vmatpush3.bf16.msra.mxu0 %v6088_v51  ;;  %v9284_v51 = vld [vmem:[#allocation11_spill] sm:$0xff]  ;;  %v9285_v1 = vld [vmem:[#allocation12_spill] sm:$0xff] }
 0x140   : > { %5444 = vmatprep.mubr.f32.mxu0 %v7428_v19  ;;  %v4695_v43 = vpop.f32.mrb[29].mxu1  ;;  %1699 = vmatmul.mubr.f32.gmra.mrb[134].mxu1 %v9278_v8 }
 0x141   : > { %v7773_v38 = vadd.f32 %v4695_v43, %v4694_v6  ;;  %1704 = vmatprep.mubr.f32.mxu1 %v9279_v30 }
 0x142   : > { %6043 = vmatpush3.bf16.msra.mxu1 %v9280_v29  ;;  %5445 = vmatmul.mubr.f32.vlgmr.msra.gmra.mrb[0].mxu0 %v7441_v0  ;;  %v9286_v29 = vld [vmem:[#allocation39_spill] sm:$0xff]  ;;  %v9288_v0 = vld [vmem:[#allocation13_spill] sm:$0xff] }
 0x143   : > { %6045 = vmatprep.subr.bf16.mxu1 %v9281_v49  ;;  %v4697_v56 = vpop.f32.mrb[30].mxu1  ;;  %5447 = vmatprep.mubr.f32.mxu0 %v7470_v15  ;;  %v9287_v15 = vld [vmem:[#allocation40_spill] sm:$0xff] }
 0x144   : > { %v4698_v21 = vpop.f32.mrb[31].mxu1  ;;  %1706 = vmatmul.mubr.f32.gmra.mrb[136].mxu1 %v9282_v42 }
 0x145   : > { %v7781_v23 = vadd.f32 %v4698_v21, %v4697_v56  ;;  %1711 = vmatprep.mubr.f32.mxu1 %v9283_v37  ;;  %v6092_v56 = vpack.c.bf16 %v7586_v3, %v7581_v16  ;;  %v9289_v21 = vld [vmem:[#allocation14_spill] sm:$0xff] }
 0x146   : > { %6047 = vmatpush3.bf16.msra.mxu1 %v9284_v51  ;;  %5448 = vmatmul.mubr.f32.gmra.mrb[2].mxu0 %v7484_v17  ;;  %v9292_v17 = vld [vmem:[#allocation15_spill] sm:$0xff] }
 0x147   : > { %6049 = vmatprep.subr.bf16.mxu1 %v9285_v1  ;;  %v4732_v6 = vpop.f32.mrb[32].mxu1  ;;  %5450 = vmatprep.mubr.f32.mxu0 %v7506_v5 }
 0x148   : > { %v4733_v43 = vpop.f32.mrb[33].mxu1  ;;  %1713 = vmatmul.mubr.f32.gmra.mrb[138].mxu1 %v9286_v29  ;;  %6093 = vmatprep.subr.bf16.mxu0 %v6092_v56 }
 0x149   : > { %v4734_v49 = vadd.f32 %v4733_v43, %v4732_v6  ;;  %1718 = vmatprep.mubr.f32.mxu1 %v9287_v15  ;;  %v9290_v6 = vld [vmem:[#allocation42_spill] sm:$0xff]  ;;  %6095 = vmatpush3.bf16.msra.mxu0 %v6092_v56 }
 0x14a   : > { %6051 = vmatpush3.bf16.msra.mxu1 %v9288_v0  ;;  %5451 = vmatmul.mubr.f32.gmra.mrb[4].mxu0 %v7514_v2  ;;  %v9291_v0 = vld [vmem:[#allocation46_spill] sm:$0xff] }
 0x14b   : > { %6053 = vmatprep.subr.bf16.mxu1 %v9289_v21  ;;  %v7796_v51 = vadd.f32 %v4734_v49, %v7354_v55  ;;  %v4735_v1 = vpop.f32.mrb[34].mxu1  ;;  %5453 = vmatprep.mubr.f32.mxu0 %v7534_v14  ;;  %v6096_v21 = vpack.c.bf16 %v7638_v60, %v7630_v58  ;;  %v9293_v2 = vld [vmem:[#allocation18_spill] sm:$0xff]  ;;  %v9296_v14 = vld [vmem:[#allocation19_spill] sm:$0xff] }
 0x14c   : > { %v4736_v5 = vpop.f32.mrb[35].mxu1  ;;  %1720 = vmatmul.mubr.f32.gmra.mrb[140].mxu1 %v9290_v6 }
 0x14d   : > { %v4737_v43 = vadd.f32 %v4736_v5, %v4735_v1  ;;  %1725 = vmatprep.mubr.f32.mxu1 %v9291_v0  ;;  %6097 = vmatprep.subr.bf16.mxu0 %v6096_v21  ;;  %v9294_v5 = vld [vmem:[#allocation47_spill] sm:$0xff] }
 0x14e   : > { %6055 = vmatpush3.bf16.msra.mxu1 %v9292_v17  ;;  %5454 = vmatmul.mubr.f32.gmra.mrb[6].mxu0 %v7542_v50  ;;  %v9295_v17 = vld [vmem:[#allocation49_spill] sm:$0xff]  ;;  %v9297_v50 = vld [vmem:[#allocation51_spill] sm:$0xff] }
 0x14f   : > { %6057 = vmatprep.subr.bf16.mxu1 %v9293_v2  ;;  %v7807_v55 = vadd.f32 %v4737_v43, %v7390_v40  ;;  %v4738_v49 = vpop.f32.mrb[36].mxu1  ;;  %5456 = vmatprep.mubr.f32.mxu0 %v7562_v45  ;;  %v6100_v2 = vpack.c.bf16 %v7694_v54, %v7672_v32 }
 0x150   : > { %v4739_v56 = vpop.f32.mrb[37].mxu1  ;;  %1727 = vmatmul.mubr.f32.gmra.mrb[142].mxu1 %v9294_v5  ;;  %6099 = vmatpush3.bf16.msra.mxu0 %v6096_v21 }
 0x151   : > { %v4740_v1 = vadd.f32 %v4739_v56, %v4738_v49  ;;  %1732 = vmatprep.mubr.f32.mxu1 %v9295_v17  ;;  %6101 = vmatprep.subr.bf16.mxu0 %v6100_v2  ;;  %v9298_v49 = vld [vmem:[#allocation54_spill] sm:$0xff] }
 0x152   : > { %6059 = vmatpush3.bf16.msra.mxu1 %v9296_v14  ;;  %5457 = vmatmul.mubr.f32.gmra.mrb[8].mxu0 %v7570_v24  ;;  %v6104_v14 = vpack.c.bf16 %v7732_v39, %v7727_v61  ;;  %v9302_v24 = vld [vmem:[#allocation62_spill] sm:$0xff] }
 0x153   : > { %v7817_v40 = vadd.f32 %v4740_v1, %v7431_v62  ;;  %v4741_v43 = vpop.f32.mrb[38].mxu1  ;;  %5459 = vmatprep.mubr.f32.mxu0 %v7607_v28  ;;  %v9299_v28 = vld [vmem:[#allocation55_spill] sm:$0xff] }
 0x154   : > { %v4742_v45 = vpop.f32.mrb[39].mxu1  ;;  %1734 = vmatmul.mubr.f32.gmra.mrb[144].mxu1 %v9297_v50  ;;  %6103 = vmatpush3.bf16.msra.mxu0 %v6100_v2 }
 0x155   : > { %v4743_v21 = vadd.f32 %v4742_v45, %v4741_v43  ;;  %1739 = vmatprep.mubr.f32.mxu1 %v9298_v49  ;;  %6105 = vmatprep.subr.bf16.mxu0 %v6104_v14  ;;  %v9300_v45 = vld [vmem:[#allocation56_spill] sm:$0xff] }
 0x156   : > { %5460 = vmatmul.mubr.f32.gmra.mrb[10].mxu0 %v7625_v34 }
 0x157   : > { %v7826_v56 = vadd.f32 %v4743_v21, %v7473_v18  ;;  %v4744_v62 = vpop.f32.mrb[40].mxu1  ;;  %5462 = vmatprep.mubr.f32.mxu0 %v7656_v31  ;;  %v9301_v31 = vld [vmem:[#allocation58_spill] sm:$0xff] }
 0x158   : > { %v4745_v1 = vpop.f32.mrb[41].mxu1  ;;  %1741 = vmatmul.mubr.f32.gmra.mrb[146].mxu1 %v9299_v28  ;;  %6107 = vmatpush3.bf16.msra.mxu0 %v6104_v14 }
 0x159   : > { %v4746_v2 = vadd.f32 %v4745_v1, %v4744_v62  ;;  %1746 = vmatprep.mubr.f32.mxu1 %v9300_v45  ;;  %6109 = vmatprep.subr.bf16.mxu0 %v7366_v27 }
 0x15a   : > { %5463 = vmatmul.mubr.f32.gmra.mrb[12].mxu0 %v7667_v41  ;;  %v9304_v41 = vld [vmem:[#allocation65_spill] sm:$0xff] }
 0x15b   : > { %v7834_v43 = vadd.f32 %v4746_v2, %v7509_v52  ;;  %v4747_v18 = vpop.f32.mrb[42].mxu1  ;;  %5465 = vmatprep.mubr.f32.mxu0 %v7703_v44  ;;  %v9303_v52 = vld [vmem:[#allocation63_spill] sm:$0xff]  ;;  %v9307_v44 = vld [vmem:[#allocation70_spill] sm:$0xff] }
 0x15c   : > { %v4748_v21 = vpop.f32.mrb[43].mxu1  ;;  %1748 = vmatmul.mubr.f32.gmra.mrb[148].mxu1 %v9301_v31 }
 0x15d   : > { %v4749_v34 = vadd.f32 %v4748_v21, %v4747_v18  ;;  %1753 = vmatprep.mubr.f32.mxu1 %v9302_v24 }
 0x15e   : > { %5466 = vmatmul.mubr.f32.gmra.mrb[14].mxu0 %v7719_v53 }
 0x15f   : > { %v7841_v14 = vadd.f32 %v4749_v34, %v7537_v9  ;;  %v4750_v62 = vpop.f32.mrb[44].mxu1  ;;  %5484 = vmatprep.mubr.f32.mxu0 %v7455_v63  ;;  %v9306_v34 = vld [vmem:[#allocation67_spill] sm:$0xff] }
 0x160   : > { %v4751_v1 = vpop.f32.mrb[45].mxu1  ;;  %1755 = vmatmul.mubr.f32.gmra.mrb[150].mxu1 %v9303_v52  ;;  %v9325_v52 = vld [vmem:[#allocation22_spill] sm:$0xff] }
 0x161   : > { %v4752_v2 = vadd.f32 %v4751_v1, %v4750_v62  ;;  %1760 = vmatprep.mubr.f32.mxu1 %v9304_v41  ;;  %v9323_v41 = vld [vmem:[#allocation52_spill] sm:$0xff] }
 0x162   : > { %5485 = vmatmul.mubr.f32.vlgmr.msra.gmra.mrb[0].mxu0 %v7462_v12 }
 0x163   : > { %v7848_v18 = vadd.f32 %v4752_v2, %v7565_v7  ;;  %v4753_v21 = vpop.f32.mrb[46].mxu1  ;;  %5487 = vmatprep.mubr.f32.mxu0 %v7490_v59  ;;  %6111 = vmatpush3.bf16.msra.mxu0 %v7366_v27  ;;  %v9309_v2 = vld [vmem:[#allocation71_spill] sm:$0xff] }
 0x164   : > { %v4754_v9 = vpop.f32.mrb[47].mxu1  ;;  %1762 = vmatmul.mubr.f32.gmra.mrb[152].mxu1 %v9306_v34  ;;  %6113 = vmatprep.subr.bf16.mxu0 %v7402_v26 }
 0x165   : > { %9305 = vst [vmem:[#allocation79_spill] sm:$0xff] %v7848_v18  ;;  %v4755_v53 = vadd.f32 %v4754_v9, %v4753_v21  ;;  %1767 = vmatprep.mubr.f32.mxu1 %v9307_v44  ;;  %v9310_v18 = vld [vmem:[#allocation72_spill] sm:$0xff]  ;;  %v9312_v9 = vld [vmem:[#allocation74_spill] sm:$0xff] }
 0x166   : > { %5488 = vmatmul.mubr.f32.gmra.mrb[2].mxu0 %v7498_v11 }
 0x167   : > { %v7857_v62 = vadd.f32 %v4755_v53, %v7602_v25  ;;  %v4756_v7 = vpop.f32.mrb[48].mxu1  ;;  %5490 = vmatprep.mubr.f32.mxu0 %v7520_v10  ;;  %6115 = vmatpush3.bf16.msra.mxu0 %v7402_v26  ;;  %v9320_v26 = vld [vmem:[#allocation48_spill] sm:$0xff] }
 0x168   : > { %v4757_v1 = vpop.f32.mrb[49].mxu1  ;;  %1769 = vmatmul.mubr.f32.gmra.mrb[154].mxu1 %v9309_v2  ;;  %6117 = vmatprep.subr.bf16.mxu0 %v7439_v4 }
 0x169   : > { %9308 = vst [vmem:[#allocation3_spill] sm:$0xff] %v7857_v62  ;;  %v4758_v34 = vadd.f32 %v4757_v1, %v4756_v7  ;;  %1774 = vmatprep.mubr.f32.mxu1 %v9310_v18  ;;  %v9313_v62 = vld [vmem:[#allocation77_spill] sm:$0xff] }
 0x16a   : > { %5491 = vmatmul.mubr.f32.gmra.mrb[4].mxu0 %v7527_v13  ;;  %v9314_v7 = vld [vmem:[#allocation41_spill] sm:$0xff] }
 0x16b   : > { %v7866_v21 = vadd.f32 %v4758_v34, %v7641_v48  ;;  %v4759_v25 = vpop.f32.mrb[50].mxu1  ;;  %5493 = vmatprep.mubr.f32.mxu0 %v7548_v47  ;;  %6119 = vmatpush3.bf16.msra.mxu0 %v7439_v4  ;;  %v9315_v1 = vld [vmem:[#allocation61_spill] sm:$0xff]  ;;  %v9318_v4 = vld [vmem:[#allocation78_spill] sm:$0xff] }
 0x16c   : > { %v4760_v53 = vpop.f32.mrb[51].mxu1  ;;  %1776 = vmatmul.mubr.f32.gmra.mrb[156].mxu1 %v9312_v9  ;;  %6121 = vmatprep.subr.bf16.mxu0 %v7481_v20  ;;  %v9317_v34 = vld [vmem:[#allocation45_spill] sm:$0xff]  ;;  %v9319_v9 = vld [vmem:[#allocation16_spill] sm:$0xff] }
 0x16d   : > { %9311 = vst [vmem:[#allocation4_spill] sm:$0xff] %v7866_v21  ;;  %v4761_v2 = vadd.f32 %v4760_v53, %v4759_v25  ;;  %1781 = vmatprep.mubr.f32.mxu1 %v9313_v62  ;;  %v9321_v25 = vld [vmem:[#allocation69_spill] sm:$0xff] }
 0x16e   : > { %5494 = vmatmul.mubr.f32.gmra.mrb[6].mxu0 %v9314_v7 }
 0x16f   : > { %v7875_v18 = vadd.f32 %v4761_v2, %v9315_v1  ;;  %v4762_v48 = vpop.f32.mrb[52].mxu1  ;;  %5496 = vmatprep.mubr.f32.mxu0 %v9317_v34  ;;  %6123 = vmatpush3.bf16.msra.mxu0 %v7481_v20  ;;  %v9324_v1 = vld [vmem:[#allocation17_spill] sm:$0xff] }
 0x170   : > { %v4763_v21 = vpop.f32.mrb[53].mxu1  ;;  %1783 = vmatmul.mubr.f32.gmra.mrb[158].mxu1 %v9318_v4  ;;  %v9326_v20 = vld [vmem:[#allocation57_spill] sm:$0xff]  ;;  %v9327_v4 = vld [vmem:[#allocation76_spill] sm:$0xff] }
 0x171   : > { %9316 = vst [vmem:[#allocation26_spill] sm:$0xff] %v7875_v18  ;;  %v4764_v44 = vadd.f32 %v4763_v21, %v4762_v48  ;;  %1885 = vmatprep.mubr.f32.mxu1 %v9319_v9  ;;  %v9328_v48 = vld [vmem:[#allocation64_spill] sm:$0xff] }
 0x172   : > { %5497 = vmatmul.mubr.f32.gmra.mrb[8].mxu0 %v9320_v26 }
 0x173   : > { %v7883_v53 = vadd.f32 %v4764_v44, %v9321_v25  ;;  %v4765_v62 = vpop.f32.mrb[54].mxu1  ;;  %5499 = vmatprep.mubr.f32.mxu0 %v9323_v41  ;;  %v9329_v44 = vld [vmem:[#allocation23_spill] sm:$0xff] }
 0x174   : > { %v4766_v2 = vpop.f32.mrb[55].mxu1  ;;  %1887 = vmatmul.mubr.f32.vlgmr.msra.gmra.mrb[160].mxu1 %v9324_v1 }
 0x175   : > { %9322 = vst [vmem:[#allocation5_spill] sm:$0xff] %v7883_v53  ;;  %v4767_v18 = vadd.f32 %v4766_v2, %v4765_v62  ;;  %1892 = vmatprep.mubr.f32.mxu1 %v9325_v52  ;;  %v9330_v53 = vld [vmem:[#allocation66_spill] sm:$0xff]  ;;  %v9331_v2 = vld [vmem:[#allocation73_spill] sm:$0xff] }
 0x176   : > { %5500 = vmatmul.mubr.f32.gmra.mrb[10].mxu0 %v9326_v20 }
 0x177   : > { %v7890_v21 = vadd.f32 %v4767_v18, %v9327_v4  ;;  %v4768_v9 = vpop.f32.mrb[56].mxu1  ;;  %5502 = vmatprep.mubr.f32.mxu0 %v9328_v48  ;;  %v9332_v18 = vand.u32 4294901760, %v7455_v63 }
 0x178   : > { %v4769_v19 = vpop.f32.mrb[57].mxu1  ;;  %1894 = vmatmul.mubr.f32.gmra.mrb[162].mxu1 %v9329_v44 }
 0x179   : > { %v4770_v25 = vadd.f32 %v4769_v19, %v4768_v9  ;;  %1899 = vmatprep.mubr.f32.mxu1 %v9271_v57 }
 0x17a   : > { %5503 = vmatmul.mubr.f32.gmra.mrb[12].mxu0 %v9330_v53 }
 0x17b   : > { %v7897_v62 = vadd.f32 %v4770_v25, %v7760_v33  ;;  %v4771_v52 = vpop.f32.mrb[58].mxu1  ;;  %5505 = vmatprep.mubr.f32.mxu0 %v9331_v2 }
 0x17c   : > { %v4772_v1 = vpop.f32.mrb[59].mxu1  ;;  %1901 = vmatmul.mubr.f32.gmra.mrb[164].mxu1 %v9274_v36  ;;  %v9333_v36 = vand.u32 4294901760, %v7462_v12 }
 0x17d   : > { %v4773_v4 = vadd.f32 %v4772_v1, %v4771_v52  ;;  %1906 = vmatprep.mubr.f32.mxu1 %v9275_v35 }
 0x17e   : > { %5506 = vmatmul.mubr.f32.gmra.mrb[14].mxu0 %v7737_v46 }
 0x17f   : > { %v7904_v19 = vadd.f32 %v4773_v4, %v7766_v22  ;;  %v4774_v57 = vpop.f32.mrb[60].mxu1  ;;  %5524 = vmatprep.mubr.f32.mxu0 %v9332_v18  ;;  %v9334_v22 = vand.u32 4294901760, %v7490_v59  ;;  %v9344_v18 = vand.u32 4294901760, %v9317_v34 }
 0x180   : > { %v4775_v33 = vpop.f32.mrb[61].mxu1  ;;  %1908 = vmatmul.mubr.f32.gmra.mrb[166].mxu1 %v9278_v8  ;;  %v9335_v8 = vand.u32 4294901760, %v7498_v11  ;;  %v9339_v11 = vand.u32 4294901760, %v7527_v13  ;;  %v9342_v13 = vand.u32 4294901760, %v7638_v60  ;;  %v9346_v60 = vand.u32 4294901760, %v7694_v54 }
 0x181   : > { %v4776_v9 = vadd.f32 %v4775_v33, %v4774_v57  ;;  %1913 = vmatprep.mubr.f32.mxu1 %v9279_v30 }
 0x182   : > { %5525 = vmatmul.mubr.f32.vlgmr.msra.gmra.mrb[0].mxu0 %v9333_v36 }
 0x183   : > { %v7913_v35 = vadd.f32 %v4776_v9, %v7773_v38  ;;  %v4777_v44 = vpop.f32.mrb[62].mxu1  ;;  %5527 = vmatprep.mubr.f32.mxu0 %v9334_v22  ;;  %v9336_v38 = vand.u32 4294901760, %v7520_v10  ;;  %v9340_v10 = vand.u32 4294901760, %v7548_v47  ;;  %v9348_v9 = vand.u32 4294901760, %v9323_v41 }
 0x184   : > { %v4778_v25 = vpop.f32.mrb[63].mxu1  ;;  %1915 = vmatmul.mubr.f32.gmra.mrb[168].mxu1 %v9282_v42  ;;  %v9337_v42 = vand.u32 4294901760, %v7581_v16  ;;  %v9341_v16 = vand.u32 4294901760, %v7630_v58  ;;  %v9345_v58 = vand.u32 4294901760, %v7672_v32  ;;  %v9349_v32 = vand.u32 4294901760, %v7727_v61 }
 0x185   : > { %v4779_v63 = vadd.f32 %v4778_v25, %v4777_v44  ;;  %1920 = vmatprep.mubr.f32.mxu1 %v9283_v37  ;;  %v9338_v37 = vand.u32 4294901760, %v7586_v3  ;;  %v9352_v44 = vand.u32 4294901760, %v9328_v48  ;;  %v9356_v25 = vld [vmem:[#allocation20_spill] sm:$0xff] }
 0x186   : > { %5528 = vmatmul.mubr.f32.gmra.mrb[2].mxu0 %v9335_v8  ;;  %v6128_v3 = vpack.c.bf16 %v9342_v13, %v9341_v16  ;;  %v9358_v8 = vld [vmem:[#allocation65_spill] sm:$0xff] }
 0x187   : > { %v7922_v30 = vadd.f32 %v4779_v63, %v7781_v23  ;;  %v4812_v12 = vpop.f32.mrb[64].mxu1  ;;  %5530 = vmatprep.mubr.f32.mxu0 %v9336_v38  ;;  %v6124_v1 = vpack.c.bf16 %v9338_v37, %v9337_v42  ;;  %v9357_v63 = vld [vmem:[#allocation63_spill] sm:$0xff]  ;;  %v9364_v37 = vld [vmem:[#allocation70_spill] sm:$0xff]  ;;  %v9369_v16 = vld [vmem:[#allocation21_spill] sm:$0xff] }
 0x188   : > { %v4813_v52 = vpop.f32.mrb[65].mxu1  ;;  %1922 = vmatmul.mubr.f32.gmra.mrb[170].mxu1 %v9286_v29 }
 0x189   : > { %v4814_v59 = vadd.f32 %v4813_v52, %v4812_v12  ;;  %1927 = vmatprep.mubr.f32.mxu1 %v9287_v15  ;;  %6125 = vmatprep.subr.bf16.mxu0 %v6124_v1  ;;  %v9359_v12 = vld [vmem:[#allocation24_spill] sm:$0xff]  ;;  %v9362_v52 = vld [vmem:[#allocation67_spill] sm:$0xff] }
 0x18a   : > { %5531 = vmatmul.mubr.f32.gmra.mrb[4].mxu0 %v9339_v11  ;;  %v9366_v11 = vld [vmem:[#allocation3_spill] sm:$0xff] }
 0x18b   : > { %v7935_v23 = vadd.f32 %v4814_v59, %v7796_v51  ;;  %v4815_v4 = vpop.f32.mrb[66].mxu1  ;;  %5533 = vmatprep.mubr.f32.mxu0 %v9340_v10  ;;  %6127 = vmatpush3.bf16.msra.mxu0 %v6124_v1  ;;  %v9343_v51 = vand.u32 4294901760, %v9314_v7  ;;  %v6132_v7 = vpack.c.bf16 %v9346_v60, %v9345_v58  ;;  %v9363_v59 = vld [vmem:[#allocation2_spill] sm:$0xff]  ;;  %v9365_v1 = vld [vmem:[#allocation29_spill] sm:$0xff] }
 0x18c   : > { %v4816_v29 = vpop.f32.mrb[67].mxu1  ;;  %1929 = vmatmul.mubr.f32.gmra.mrb[172].mxu1 %v9290_v6  ;;  %6129 = vmatprep.subr.bf16.mxu0 %v6128_v3  ;;  %v9374_v60 = vld [vmem:[#allocation74_spill] sm:$0xff] }
 0x18d   : > { %v4817_v15 = vadd.f32 %v4816_v29, %v4815_v4  ;;  %1934 = vmatprep.mubr.f32.mxu1 %v9291_v0  ;;  %v9367_v29 = vld [vmem:[#allocation33_spill] sm:$0xff] }
 0x18e   : > { %5534 = vmatmul.mubr.f32.gmra.mrb[6].mxu0 %v9343_v51  ;;  %v9371_v51 = vld [vmem:[#allocation34_spill] sm:$0xff] }
 0x18f   : > { %v7948_v57 = vadd.f32 %v4817_v15, %v7807_v55  ;;  %v4818_v47 = vpop.f32.mrb[68].mxu1  ;;  %5536 = vmatprep.mubr.f32.mxu0 %v9344_v18  ;;  %6131 = vmatpush3.bf16.msra.mxu0 %v6128_v3  ;;  %v9347_v55 = vand.u32 4294901760, %v9320_v26  ;;  %v9350_v26 = vand.u32 4294901760, %v7732_v39  ;;  %v9370_v3 = vld [vmem:[#allocation72_spill] sm:$0xff] }
 0x190   : > { %v4819_v6 = vpop.f32.mrb[69].mxu1  ;;  %1936 = vmatmul.mubr.f32.gmra.mrb[174].mxu1 %v9294_v5  ;;  %6133 = vmatprep.subr.bf16.mxu0 %v6132_v7 }
 0x191   : > { %v4820_v0 = vadd.f32 %v4819_v6, %v4818_v47  ;;  %1941 = vmatprep.mubr.f32.mxu1 %v9295_v17  ;;  %v6136_v54 = vpack.c.bf16 %v9350_v26, %v9349_v32  ;;  %v9372_v47 = vld [vmem:[#allocation4_spill] sm:$0xff]  ;;  %v9379_v26 = vld [vmem:[#allocation43_spill] sm:$0xff] }
 0x192   : > { %5537 = vmatmul.mubr.f32.gmra.mrb[8].mxu0 %v9347_v55 }
 0x193   : > { %v7961_v33 = vadd.f32 %v4820_v0, %v7817_v40  ;;  %v4821_v34 = vpop.f32.mrb[70].mxu1  ;;  %5539 = vmatprep.mubr.f32.mxu0 %v9348_v9  ;;  %6135 = vmatpush3.bf16.msra.mxu0 %v6132_v7  ;;  %v9351_v40 = vand.u32 4294901760, %v9326_v20  ;;  %v9353_v20 = vand.u32 4294901760, %v9330_v53  ;;  %v9373_v0 = vld [vmem:[#allocation36_spill] sm:$0xff]  ;;  %v9375_v7 = vld [vmem:[#allocation27_spill] sm:$0xff]  ;;  %v9377_v9 = vld [vmem:[#allocation37_spill] sm:$0xff] }
 0x194   : > { %v4822_v5 = vpop.f32.mrb[71].mxu1  ;;  %1943 = vmatmul.mubr.f32.gmra.mrb[176].mxu1 %v9297_v50  ;;  %6137 = vmatprep.subr.bf16.mxu0 %v6136_v54 }
 0x195   : > { %v4823_v17 = vadd.f32 %v4822_v5, %v4821_v34  ;;  %1948 = vmatprep.mubr.f32.mxu1 %v9298_v49  ;;  %v9376_v34 = vld [vmem:[#allocation77_spill] sm:$0xff]  ;;  %v9378_v5 = vld [vmem:[#allocation26_spill] sm:$0xff] }
 0x196   : > { %5540 = vmatmul.mubr.f32.gmra.mrb[10].mxu0 %v9351_v40  ;;  %v9380_v40 = vld [vmem:[#allocation78_spill] sm:$0xff] }
 0x197   : > { %v7974_v36 = vadd.f32 %v4823_v17, %v7826_v56  ;;  %v4824_v41 = vpop.f32.mrb[72].mxu1  ;;  %5542 = vmatprep.mubr.f32.mxu0 %v9352_v44  ;;  %6139 = vmatpush3.bf16.msra.mxu0 %v6136_v54  ;;  %v9354_v56 = vand.u32 4294901760, %v9331_v2  ;;  %v9381_v44 = vld [vmem:[#allocation44_spill] sm:$0xff] }
 0x198   : > { %v4825_v50 = vpop.f32.mrb[73].mxu1  ;;  %1950 = vmatmul.mubr.f32.gmra.mrb[178].mxu1 %v9299_v28  ;;  %6141 = vmatprep.subr.bf16.mxu0 %v7366_v27 }
 0x199   : > { %v4826_v49 = vadd.f32 %v4825_v50, %v4824_v41  ;;  %1955 = vmatprep.mubr.f32.mxu1 %v9300_v45  ;;  %v9355_v45 = vand.u32 4294901760, %v7737_v46  ;;  %v9361_v46 = vld [vmem:[#allocation25_spill] sm:$0xff] }
 0x19a   : > { %5543 = vmatmul.mubr.f32.gmra.mrb[12].mxu0 %v9353_v20  ;;  %v9382_v50 = vld [vmem:[#allocation5_spill] sm:$0xff] }
 0x19b   : > { %v7984_v61 = vadd.f32 %v4826_v49, %v7834_v43  ;;  %v4827_v39 = vpop.f32.mrb[74].mxu1  ;;  %5545 = vmatprep.mubr.f32.mxu0 %v9354_v56 }
 0x19c   : > { %v4828_v48 = vpop.f32.mrb[75].mxu1  ;;  %1957 = vmatmul.mubr.f32.gmra.mrb[180].mxu1 %v9301_v31  ;;  %v9360_v31 = vld [vmem:[#allocation79_spill] sm:$0xff] }
 0x19d   : > { %v4829_v28 = vadd.f32 %v4828_v48, %v4827_v39  ;;  %1962 = vmatprep.mubr.f32.mxu1 %v9302_v24  ;;  %v9383_v39 = vld [vmem:[#allocation50_spill] sm:$0xff] }
 0x19e   : > { %5546 = vmatmul.mubr.f32.gmra.mrb[14].mxu0 %v9355_v45 }
 0x19f   : > { %v7993_v22 = vadd.f32 %v4829_v28, %v7841_v14  ;;  %v4830_v53 = vpop.f32.mrb[76].mxu1  ;;  %5564 = vmatprep.mubr.f32.mxu0 %v9356_v25  ;;  %v9384_v28 = vld [vmem:[#allocation53_spill] sm:$0xff] }
 0x1a0   : > { %v4831_v43 = vpop.f32.mrb[77].mxu1  ;;  %1964 = vmatmul.mubr.f32.gmra.mrb[182].mxu1 %v9357_v63 }
 0x1a1   : > { %v4832_v2 = vadd.f32 %v4831_v43, %v4830_v53  ;;  %1969 = vmatprep.mubr.f32.mxu1 %v9358_v8  ;;  %v9385_v43 = vld [vmem:[#allocation59_spill] sm:$0xff]  ;;  %v9386_v8 = vld [vmem:[#allocation60_spill] sm:$0xff] }
 0x1a2   : > { %5565 = vmatmul.mubr.f32.vlgmr.msra.gmra.mrb[0].mxu0 %v9359_v12 }
 0x1a3   : > { %v8000_v38 = vadd.f32 %v4832_v2, %v9360_v31  ;;  %v4833_v24 = vpop.f32.mrb[78].mxu1  ;;  %5567 = vmatprep.mubr.f32.mxu0 %v9361_v46  ;;  %6143 = vmatpush3.bf16.msra.mxu0 %v7366_v27  ;;  %v9368_v27 = vld [vmem:[#allocation71_spill] sm:$0xff] }
 0x1a4   : > { %v4834_v14 = vpop.f32.mrb[79].mxu1  ;;  %1971 = vmatmul.mubr.f32.gmra.mrb[184].mxu1 %v9362_v52  ;;  %6145 = vmatprep.subr.bf16.mxu0 %v9363_v59 }
 0x1a5   : > { %v4835_v42 = vadd.f32 %v4834_v14, %v4833_v24  ;;  %1976 = vmatprep.mubr.f32.mxu1 %v9364_v37  ;;  %v9387_v14 = vld [vmem:[#allocation68_spill] sm:$0xff] }
 0x1a6   : > { %5568 = vmatmul.mubr.f32.gmra.mrb[2].mxu0 %v9365_v1 }
 0x1a7   : > { %v8009_v4 = vadd.f32 %v4835_v42, %v9366_v11  ;;  %v4836_v10 = vpop.f32.mrb[80].mxu1  ;;  %5570 = vmatprep.mubr.f32.mxu0 %v9367_v29  ;;  %6147 = vmatpush3.bf16.msra.mxu0 %v9363_v59  ;;  %v9388_v42 = vld [vmem:[#allocation75_spill] sm:$0xff] }
 0x1a8   : > { %v4837_v15 = vpop.f32.mrb[81].mxu1  ;;  %1978 = vmatmul.mubr.f32.gmra.mrb[186].mxu1 %v9368_v27  ;;  %6149 = vmatprep.subr.bf16.mxu0 %v9369_v16 }
 0x1a9   : > { %v4838_v13 = vadd.f32 %v4837_v15, %v4836_v10  ;;  %1983 = vmatprep.mubr.f32.mxu1 %v9370_v3 }
 0x1aa   : > { %5571 = vmatmul.mubr.f32.gmra.mrb[4].mxu0 %v9371_v51 }
 0x1ab   : > { %v8018_v18 = vadd.f32 %v4838_v13, %v9372_v47  ;;  %v4839_v6 = vpop.f32.mrb[82].mxu1  ;;  %5573 = vmatprep.mubr.f32.mxu0 %v9373_v0  ;;  %6151 = vmatpush3.bf16.msra.mxu0 %v9369_v16 }
 0x1ac   : > { %v4840_v58 = vpop.f32.mrb[83].mxu1  ;;  %1985 = vmatmul.mubr.f32.gmra.mrb[188].mxu1 %v9374_v60  ;;  %6153 = vmatprep.subr.bf16.mxu0 %v9375_v7 }
 0x1ad   : > { %v4841_v55 = vadd.f32 %v4840_v58, %v4839_v6  ;;  %1990 = vmatprep.mubr.f32.mxu1 %v9376_v34  ;;  %v8088_v6 = vld [vmem:[%s8695_s2 + $0x10] sm:$0xff] }
 0x1ae   : > { %5574 = vmatmul.mubr.f32.gmra.mrb[6].mxu0 %v9377_v9  ;;  %v3317_v60 = vand.u32 4294901760, %v8088_v6 }
 0x1af   : > { %v8027_v17 = vadd.f32 %v4841_v55, %v9378_v5  ;;  %v4842_v32 = vpop.f32.mrb[84].mxu1  ;;  %5576 = vmatprep.mubr.f32.mxu0 %v9379_v26  ;;  %6155 = vmatpush3.bf16.msra.mxu0 %v9375_v7  ;;  %v8113_v5 = vld [vmem:[%s8695_s2 + $0x20] sm:$0xff] }
 0x1b0   : > { %v4843_v54 = vpop.f32.mrb[85].mxu1  ;;  %1992 = vmatmul.mubr.f32.gmra.mrb[190].mxu1 %v9380_v40 }
 0x1b1   : > { %v4844_v41 = vadd.f32 %v4843_v54, %v4842_v32  ;;  %v3323_v54 = vand.u32 4294901760, %v8113_v5 }
 0x1b2   : > { %5577 = vmatmul.mubr.f32.gmra.mrb[8].mxu0 %v9381_v44 }
 0x1b3   : > { %v8034_v49 = vadd.f32 %v4844_v41, %v9382_v50  ;;  %v4845_v20 = vpop.f32.mrb[86].mxu1  ;;  %5579 = vmatprep.mubr.f32.mxu0 %v9383_v39 }
 0x1b4   : > { %v4846_v56 = vpop.f32.mrb[87].mxu1 }
 0x1b5   : > { %v4847_v48 = vadd.f32 %v4846_v56, %v4845_v20  ;;  %v8138_v20 = vld [vmem:[%s8695_s2 + $0x30] sm:$0xff] }
 0x1b6   : > { %5580 = vmatmul.mubr.f32.gmra.mrb[10].mxu0 %v9384_v28 }
 0x1b7   : > { %v8039_v45 = vadd.f32 %v4847_v48, %v7890_v21  ;;  %v4848_v53 = vpop.f32.mrb[88].mxu1  ;;  %5582 = vmatprep.mubr.f32.mxu0 %v9385_v43  ;;  %v3329_v48 = vand.u32 4294901760, %v8138_v20 }
 0x1b8   : > { %v4849_v63 = vpop.f32.mrb[89].mxu1 }
 0x1b9   : > { %v4850_v2 = vadd.f32 %v4849_v63, %v4848_v53 }
 0x1ba   : > { %5583 = vmatmul.mubr.f32.gmra.mrb[12].mxu0 %v9386_v8 }
 0x1bb   : > { %v8044_v31 = vadd.f32 %v4850_v2, %v7897_v62  ;;  %v4851_v24 = vpop.f32.mrb[90].mxu1  ;;  %5585 = vmatprep.mubr.f32.mxu0 %v9387_v14 }
 0x1bc   : > { %v4852_v52 = vpop.f32.mrb[91].mxu1 }
 0x1bd   : > { %v4853_v59 = vadd.f32 %v4852_v52, %v4851_v24 }
 0x1be   : > { %5586 = vmatmul.mubr.f32.gmra.mrb[14].mxu0 %v9388_v42 }
 0x1bf   : > { %v8049_v21 = vadd.f32 %v4853_v59, %v7904_v19  ;;  %v4854_v37 = vpop.f32.mrb[92].mxu1  ;;  %5604 = vmatprep.mubr.f32.mxu0 %v9356_v25  ;;  %v8065_v25 = vld [vmem:[%s8695_s2] sm:$0xff] }
 0x1c0   : > { %v4855_v11 = vpop.f32.mrb[93].mxu1 }
 0x1c1   : > { %v4856_v10 = vadd.f32 %v4855_v11, %v4854_v37 }
 0x1c2   : > { %5605 = vmatmul.mubr.f32.vlgmr.msra.gmra.mrb[0].mxu0 %v9359_v12 }
 0x1c3   : > { %v8054_v62 = vadd.f32 %v4856_v10, %v7913_v35  ;;  %v4857_v15 = vpop.f32.mrb[94].mxu1  ;;  %5607 = vmatprep.mubr.f32.mxu0 %v9361_v46  ;;  %v8070_v35 = vld [vmem:[%s8695_s2 + $0x8] sm:$0xff]  ;;  %v3311_v46 = vand.u32 4294901760, %v8065_v25 }
 0x1c4   : > { %v4858_v27 = vpop.f32.mrb[95].mxu1 }
 0x1c5   : > { %v4859_v16 = vadd.f32 %v4858_v27, %v4857_v15 }
 0x1c6   : > { %5608 = vmatmul.mubr.f32.gmra.mrb[2].mxu0 %v9365_v1  ;;  %v3314_v1 = vand.u32 4294901760, %v8070_v35 }
 0x1c7   : > { %v8059_v19 = vadd.f32 %v4859_v16, %v7922_v30  ;;  %v4892_v13 = vpop.f32.mrb[96].mxu1  ;;  %5610 = vmatprep.mubr.f32.mxu0 %v9367_v29 }
 0x1c8   : > { %v4893_v12 = vpop.f32.mrb[97].mxu1  ;;  %v8079_v29 = vpack.c.bf16 %v3314_v1, %v3311_v46 }
 0x1c9   : > { %v4894_v30 = vadd.f32 %v4893_v12, %v4892_v13 }
 0x1ca   : > { %5611 = vmatmul.mubr.f32.gmra.mrb[4].mxu0 %v9371_v51  ;;  %v8093_v51 = vld [vmem:[%s8695_s2 + $0x18] sm:$0xff]  ;;  %6157 = vmatprep.subr.bf16.mxu0 %v8079_v29 }
 0x1cb   : > { %v8082_v3 = vadd.f32 %v4894_v30, %v7935_v23  ;;  %v4895_v47 = vpop.f32.mrb[98].mxu1  ;;  %5613 = vmatprep.mubr.f32.mxu0 %v9373_v0  ;;  %v3320_v23 = vand.u32 4294901760, %v8093_v51  ;;  %6159 = vmatpush3.bf16.msra.mxu0 %v8079_v29 }
 0x1cc   : > { %v4896_v58 = vpop.f32.mrb[99].mxu1 }
 0x1cd   : > { %v4897_v7 = vadd.f32 %v4896_v58, %v4895_v47  ;;  %v8104_v0 = vpack.c.bf16 %v3320_v23, %v3317_v60 }
 0x1ce   : > { %5614 = vmatmul.mubr.f32.gmra.mrb[6].mxu0 %v9377_v9  ;;  %v8118_v9 = vld [vmem:[%s8695_s2 + $0x28] sm:$0xff] }
 0x1cf   : > { %v8107_v55 = vadd.f32 %v4897_v7, %v7948_v57  ;;  %v4898_v34 = vpop.f32.mrb[100].mxu1  ;;  %5616 = vmatprep.mubr.f32.mxu0 %v9379_v26  ;;  %6161 = vmatprep.subr.bf16.mxu0 %v8104_v0  ;;  %v3326_v57 = vand.u32 4294901760, %v8118_v9 }
 0x1d0   : > { %v4899_v32 = vpop.f32.mrb[101].mxu1  ;;  %6163 = vmatpush3.bf16.msra.mxu0 %v8104_v0 }
 0x1d1   : > { %v4900_v40 = vadd.f32 %v4899_v32, %v4898_v34  ;;  %v8129_v26 = vpack.c.bf16 %v3326_v57, %v3323_v54 }
 0x1d2   : > { %5617 = vmatmul.mubr.f32.gmra.mrb[8].mxu0 %v9381_v44  ;;  %v8143_v44 = vld [vmem:[%s8695_s2 + $0x38] sm:$0xff] }
 0x1d3   : > { %v8132_v41 = vadd.f32 %v4900_v40, %v7961_v33  ;;  %v4901_v50 = vpop.f32.mrb[102].mxu1  ;;  %5619 = vmatprep.mubr.f32.mxu0 %v9383_v39  ;;  %6165 = vmatprep.subr.bf16.mxu0 %v8129_v26  ;;  %v3332_v33 = vand.u32 4294901760, %v8143_v44 }
 0x1d4   : > { %v4902_v56 = vpop.f32.mrb[103].mxu1  ;;  %6167 = vmatpush3.bf16.msra.mxu0 %v8129_v26 }
 0x1d5   : > { %v4903_v53 = vadd.f32 %v4902_v56, %v4901_v50  ;;  %v8154_v39 = vpack.c.bf16 %v3332_v33, %v3329_v48 }
 0x1d6   : > { %5620 = vmatmul.mubr.f32.gmra.mrb[10].mxu0 %v9384_v28 }
 0x1d7   : > { %v8157_v63 = vadd.f32 %v4903_v53, %v7974_v36  ;;  %v4904_v2 = vpop.f32.mrb[104].mxu1  ;;  %5622 = vmatprep.mubr.f32.mxu0 %v9385_v43  ;;  %6169 = vmatprep.subr.bf16.mxu0 %v8154_v39 }
 0x1d8   : > { %v4905_v24 = vpop.f32.mrb[105].mxu1  ;;  %6171 = vmatpush3.bf16.msra.mxu0 %v8154_v39 }
 0x1d9   : > { %v4906_v52 = vadd.f32 %v4905_v24, %v4904_v2 }
 0x1da   : > { %5623 = vmatmul.mubr.f32.gmra.mrb[12].mxu0 %v9386_v8 }
 0x1db   : > { %v8164_v28 = vadd.f32 %v4906_v52, %v7984_v61  ;;  %v4907_v59 = vpop.f32.mrb[106].mxu1  ;;  %5625 = vmatprep.mubr.f32.mxu0 %v9387_v14 }
 0x1dc   : > { %v4908_v37 = vpop.f32.mrb[107].mxu1 }
 0x1dd   : > { %v4909_v36 = vadd.f32 %v4908_v37, %v4907_v59 }
 0x1de   : > { %5626 = vmatmul.mubr.f32.gmra.mrb[14].mxu0 %v9388_v42 }
 0x1df   : > { %v8169_v43 = vadd.f32 %v4909_v36, %v7993_v22  ;;  %v4910_v11 = vpop.f32.mrb[108].mxu1  ;;  %v8200_v36 = vsub.f32 %v8070_v35, %v3314_v1  ;;  %v8221_v35 = vsub.f32 %v8093_v51, %v3320_v23  ;;  %v8239_v51 = vsub.f32 %v8113_v5, %v3323_v54 }
 0x1e0   : > { %v4911_v10 = vpop.f32.mrb[109].mxu1 }
 0x1e1   : > { %v4912_v15 = vadd.f32 %v4911_v10, %v4910_v11 }
 0x1e3   : > { %v8172_v27 = vadd.f32 %v4912_v15, %v8000_v38  ;;  %v4913_v8 = vpop.f32.mrb[110].mxu1  ;;  %v3553_v15 = vand.u32 4294901760, %v8200_v36 }
 0x1e4   : > { %v4914_v16 = vpop.f32.mrb[111].mxu1 }
 0x1e5   : > { %v4915_v61 = vadd.f32 %v4914_v16, %v4913_v8 }
 0x1e7   : > { %v8175_v13 = vadd.f32 %v4915_v61, %v8009_v4  ;;  %v4916_v14 = vpop.f32.mrb[112].mxu1 }
 0x1e8   : > { %v4917_v12 = vpop.f32.mrb[113].mxu1 }
 0x1e9   : > { %v4918_v30 = vadd.f32 %v4917_v12, %v4916_v14 }
 0x1eb   : > { %v8178_v42 = vadd.f32 %v4918_v30, %v8018_v18  ;;  %v4919_v22 = vpop.f32.mrb[114].mxu1 }
 0x1ec   : > { %v4920_v47 = vpop.f32.mrb[115].mxu1 }
 0x1ed   : > { %v4921_v58 = vadd.f32 %v4920_v47, %v4919_v22  ;;  %v3567_v22 = vand.u32 4294901760, %v8221_v35 }
 0x1ef   : > { %v8181_v7 = vadd.f32 %v4921_v58, %v8027_v17  ;;  %v4922_v38 = vpop.f32.mrb[116].mxu1 }
 0x1f0   : > { %v4923_v34 = vpop.f32.mrb[117].mxu1 }
 0x1f1   : > { %v4924_v32 = vadd.f32 %v4923_v34, %v4922_v38  ;;  %v8247_v38 = vsub.f32 %v8118_v9, %v3326_v57  ;;  %v8260_v9 = vsub.f32 %v8138_v20, %v3329_v48  ;;  %v8265_v57 = vsub.f32 %v8143_v44, %v3332_v33 }
 0x1f3   : > { %v8184_v40 = vadd.f32 %v4924_v32, %v8034_v49  ;;  %v4925_v4 = vpop.f32.mrb[118].mxu1  ;;  %v8195_v49 = vsub.f32 %v8065_v25, %v3311_v46  ;;  %v3554_v46 = vsub.f32 %v8200_v36, %v3553_v15  ;;  %v8993_v5 = vand.u32 4294901760, %v8247_v38 }
 0x1f4   : > { %v4926_v50 = vpop.f32.mrb[119].mxu1  ;;  %v8986_v20 = vand.u32 4294901760, %v8265_v57 }
 0x1f5   : > { %v4927_v56 = vadd.f32 %v4926_v50, %v4925_v4  ;;  %v3555_v12 = vand.u32 4294901760, %v3554_v46  ;;  %v8995_v50 = vand.u32 4294901760, %v8239_v51 }
 0x1f7   : > { %v8187_v53 = vadd.f32 %v4927_v56, %v8039_v45  ;;  %v4928_v18 = vpop.f32.mrb[120].mxu1 }
 0x1f8   : > { %v4929_v2 = vpop.f32.mrb[121].mxu1 }
 0x1f9   : > { %v4930_v24 = vadd.f32 %v4929_v2, %v4928_v18 }
 0x1fb   : > { %v8190_v52 = vadd.f32 %v4930_v24, %v8044_v31  ;;  %v4931_v17 = vpop.f32.mrb[122].mxu1  ;;  %v3546_v31 = vand.u32 4294901760, %v8195_v49  ;;  %v3582_v24 = vsub.f32 %v8247_v38, %v8993_v5 }
 0x1fc   : > { %v4932_v59 = vpop.f32.mrb[123].mxu1 }
 0x1fd   : > { %v4933_v37 = vadd.f32 %v4932_v59, %v4931_v17  ;;  %v3547_v25 = vsub.f32 %v8195_v49, %v3546_v31 }
 0x1ff   : > { %v8203_v45 = vadd.f32 %v4933_v37, %v8049_v21  ;;  %v4934_v11 = vpop.f32.mrb[124].mxu1  ;;  %v8216_v21 = vsub.f32 %v8088_v6, %v3317_v60  ;;  %v3548_v14 = vand.u32 4294901760, %v3547_v25  ;;  %v8987_v37 = vand.u32 4294901760, %v8260_v9 }
 0x200   : > { %v4935_v10 = vpop.f32.mrb[125].mxu1 }
 0x201   : > { %v4936_v8 = vadd.f32 %v4935_v10, %v4934_v11  ;;  %v3560_v30 = vand.u32 4294901760, %v8216_v21  ;;  %v8228_v58 = vpack.c.bf16 %v3555_v12, %v3548_v14  ;;  %v3583_v11 = vand.u32 4294901760, %v3582_v24 }
 0x202   : > { %v3589_v44 = vsub.f32 %v8260_v9, %v8987_v37 }
 0x203   : > { %v8224_v1 = vadd.f32 %v4936_v8, %v8054_v62  ;;  %v4937_v16 = vpop.f32.mrb[126].mxu1  ;;  %v3561_v6 = vsub.f32 %v8216_v21, %v3560_v30  ;;  %v3568_v62 = vsub.f32 %v8221_v35, %v3567_v22  ;;  %6173 = vmatprep.subr.bf16.mxu0 %v8228_v58 }
 0x204   : > { %v4938_v61 = vpop.f32.mrb[127].mxu1  ;;  %v3590_v46 = vand.u32 4294901760, %v3589_v44 }
 0x205   : > { %v4939_v47 = vadd.f32 %v4938_v61, %v4937_v16  ;;  %v3562_v32 = vand.u32 4294901760, %v3561_v6  ;;  %v3569_v4 = vand.u32 4294901760, %v3568_v62 }
 0x207   : > { %v8242_v60 = vadd.f32 %v4939_v47, %v8059_v19  ;;  %v4972_v23 = vpop.f32.mrb[128].mxu1  ;;  %v8252_v54 = vpack.c.bf16 %v3569_v4, %v3562_v32  ;;  %v3575_v19 = vsub.f32 %v8239_v51, %v8995_v50  ;;  %v8296_v32 = vpack.c.bf16 %v8200_v36, %v8195_v49 }
 0x208   : > { %v4973_v34 = vpop.f32.mrb[129].mxu1  ;;  %v6224_v49 = vpack.c.bf16 %v3567_v22, %v3560_v30  ;;  %v9396_v30 = vand.u32 4294901760, %v8265_v57 }
 0x209   : > { %v4974_v56 = vadd.f32 %v4973_v34, %v4972_v23  ;;  %v3576_v59 = vand.u32 4294901760, %v3575_v19 }
 0x20b   : > { %v8268_v18 = vadd.f32 %v4974_v56, %v8082_v3  ;;  %v4975_v2 = vpop.f32.mrb[130].mxu1  ;;  %v3596_v3 = vsub.f32 %v8265_v57, %v8986_v20  ;;  %v8284_v8 = vpack.c.bf16 %v3583_v11, %v3576_v59 }
 0x20c   : > { %v4976_v17 = vpop.f32.mrb[131].mxu1 }
 0x20d   : > { %v4977_v48 = vadd.f32 %v4976_v17, %v4975_v2  ;;  %v3597_v16 = vand.u32 4294901760, %v3596_v3 }
 0x20f   : > { %v8282_v33 = vadd.f32 %v4977_v48, %v8107_v55  ;;  %v4978_v10 = vpop.f32.mrb[132].mxu1  ;;  %v8286_v14 = vpack.c.bf16 %v3597_v16, %v3590_v46 }
 0x210   : > { %v4979_v25 = vpop.f32.mrb[133].mxu1 }
 0x211   : > { %v4980_v61 = vadd.f32 %v4979_v25, %v4978_v10 }
 0x213   : > { %v8289_v12 = vadd.f32 %v4980_v61, %v8132_v41  ;;  %v4981_v47 = vpop.f32.mrb[134].mxu1 }
 0x214   : > { %v4982_v6 = vpop.f32.mrb[135].mxu1 }
 0x215   : > { %v4983_v62 = vadd.f32 %v4982_v6, %v4981_v47 }
 0x217   : > { %v8292_v23 = vadd.f32 %v4983_v62, %v8157_v63  ;;  %v4984_v55 = vpop.f32.mrb[136].mxu1  ;;  %v8306_v63 = vpack.c.bf16 %v8221_v35, %v8216_v21  ;;  %v9395_v35 = vand.u32 4294901760, %v8260_v9 }
 0x218   : > { %v4985_v34 = vpop.f32.mrb[137].mxu1 }
 0x219   : > { %v4986_v4 = vadd.f32 %v4985_v34, %v4984_v55  ;;  %v6232_v22 = vpack.c.bf16 %v9396_v30, %v9395_v35 }
 0x21b   : > { %v8299_v56 = vadd.f32 %v4986_v4, %v8164_v28  ;;  %v4987_v19 = vpop.f32.mrb[138].mxu1 }
 0x21c   : > { %v4988_v2 = vpop.f32.mrb[139].mxu1 }
 0x21d   : > { %v4989_v41 = vadd.f32 %v4988_v2, %v4987_v19 }
 0x21f   : > { %v8302_v24 = vadd.f32 %v4989_v41, %v8169_v43  ;;  %v4990_v17 = vpop.f32.mrb[140].mxu1  ;;  %v8316_v43 = vpack.c.bf16 %v8247_v38, %v8239_v51 }
 0x220   : > { %v4991_v59 = vpop.f32.mrb[141].mxu1 }
 0x221   : > { %v4992_v48 = vadd.f32 %v4991_v59, %v4990_v17 }
 0x223   : > { %v8309_v11 = vadd.f32 %v4992_v48, %v8172_v27  ;;  %v4993_v44 = vpop.f32.mrb[142].mxu1 }
 0x224   : > { %v4994_v3 = vpop.f32.mrb[143].mxu1 }
 0x225   : > { %v4995_v28 = vadd.f32 %v4994_v3, %v4993_v44 }
 0x227   : > { %v8312_v10 = vadd.f32 %v4995_v28, %v8175_v13  ;;  %v4996_v25 = vpop.f32.mrb[144].mxu1  ;;  %v8326_v13 = vpack.c.bf16 %v8265_v57, %v8260_v9 }
 0x228   : > { %v4997_v46 = vpop.f32.mrb[145].mxu1 }
 0x229   : > { %v4998_v16 = vadd.f32 %v4997_v46, %v4996_v25 }
 0x22b   : > { %v8319_v61 = vadd.f32 %v4998_v16, %v8178_v42  ;;  %v4999_v47 = vpop.f32.mrb[146].mxu1 }
 0x22c   : > { %v5000_v6 = vpop.f32.mrb[147].mxu1 }
 0x22d   : > { %v5001_v27 = vadd.f32 %v5000_v6, %v4999_v47 }
 0x22f   : > { %v8322_v62 = vadd.f32 %v5001_v27, %v8181_v7  ;;  %v5002_v55 = vpop.f32.mrb[148].mxu1 }
 0x230   : > { %v5003_v34 = vpop.f32.mrb[149].mxu1 }
 0x231   : > { %v5004_v4 = vadd.f32 %v5003_v34, %v5002_v55 }
 0x233   : > { %v8329_v19 = vadd.f32 %v5004_v4, %v8184_v40  ;;  %v5005_v2 = vpop.f32.mrb[150].mxu1 }
 0x234   : > { %v5006_v41 = vpop.f32.mrb[151].mxu1 }
 0x235   : > { %v5007_v42 = vadd.f32 %v5006_v41, %v5005_v2 }
 0x237   : > { %v8332_v17 = vadd.f32 %v5007_v42, %v8187_v53  ;;  %v5008_v59 = vpop.f32.mrb[152].mxu1 }
 0x238   : > { %v5009_v48 = vpop.f32.mrb[153].mxu1 }
 0x239   : > { %v5010_v7 = vadd.f32 %v5009_v48, %v5008_v59 }
 0x23b   : > { %v8335_v44 = vadd.f32 %v5010_v7, %v8190_v52  ;;  %v5011_v3 = vpop.f32.mrb[154].mxu1 }
 0x23c   : > { %v5012_v28 = vpop.f32.mrb[155].mxu1 }
 0x23d   : > { %v5013_v25 = vadd.f32 %v5012_v28, %v5011_v3 }
 0x23f   : > { %v8338_v46 = vadd.f32 %v5013_v25, %v8203_v45  ;;  %v5014_v40 = vpop.f32.mrb[156].mxu1 }
 0x240   : > { %v5015_v16 = vpop.f32.mrb[157].mxu1 }
 0x241   : > { %v5016_v47 = vadd.f32 %v5015_v16, %v5014_v40 }
 0x243   : > { %v8341_v6 = vadd.f32 %v5016_v47, %v8224_v1  ;;  %v5017_v53 = vpop.f32.mrb[158].mxu1 }
 0x244   : > { %v5018_v27 = vpop.f32.mrb[159].mxu1 }
 0x245   : > { %v5019_v55 = vadd.f32 %v5018_v27, %v5017_v53 }
 0x247   : > { %v8344_v34 = vadd.f32 %v5019_v55, %v8242_v60  ;;  %v5052_v52 = vpop.f32.mrb[160].mxu1 }
 0x248   : > { %v5053_v4 = vpop.f32.mrb[161].mxu1 }
 0x249   : > { %v5054_v2 = vadd.f32 %v5053_v4, %v5052_v52 }
 0x24b   : > { %v1889_v41 = vadd.f32 %v5054_v2, %v8268_v18  ;;  %v5055_v42 = vpop.f32.mrb[162].mxu1 }
 0x24c   : > { %v5056_v45 = vpop.f32.mrb[163].mxu1 }
 0x24d   : > { %v3263_v59 = vsel %vm2031_vm0, %v1889_v41, 0  ;;  %v5057_v48 = vadd.f32 %v5056_v45, %v5055_v42 }
 0x24e   : > { %v8348_v7 = vand.u32 4294901760, %v3263_v59 }
 0x24f   : > { %v1896_v1 = vadd.f32 %v5057_v48, %v8282_v33  ;;  %v5058_v3 = vpop.f32.mrb[164].mxu1 }
 0x250   : > { %v8352_v28 = vsub.f32 %v3263_v59, %v8348_v7  ;;  %v5059_v60 = vpop.f32.mrb[165].mxu1 }
 0x251   : > { %v3266_v25 = vsel %vm2031_vm0, %v1896_v1, 0  ;;  %v5060_v40 = vadd.f32 %v5059_v60, %v5058_v3 }
 0x252   : > { %v8355_v16 = vand.u32 4294901760, %v3266_v25  ;;  %v3385_v18 = vand.u32 4294901760, %v8352_v28 }
 0x253   : > { %v1903_v47 = vadd.f32 %v5060_v40, %v8289_v12  ;;  %v5061_v53 = vpop.f32.mrb[166].mxu1 }
 0x254   : > { %v8360_v27 = vsub.f32 %v3266_v25, %v8355_v16  ;;  %v5062_v55 = vpop.f32.mrb[167].mxu1  ;;  %v3386_v33 = vsub.f32 %v8352_v28, %v3385_v18 }
 0x255   : > { %v3269_v52 = vsel %vm2031_vm0, %v1903_v47, 0  ;;  %v5063_v4 = vadd.f32 %v5062_v55, %v5061_v53 }
 0x256   : > { %v8999_v2 = vand.u32 4294901760, %v8360_v27  ;;  %v8367_v41 = vand.u32 4294901760, %v3269_v52  ;;  %v3387_v42 = vand.u32 4294901760, %v3386_v33  ;;  %v9389_v36 = vand.u32 4294901760, %v8360_v27 }
 0x257   : > { %v1910_v45 = vadd.f32 %v5063_v4, %v8292_v23  ;;  %v5064_v12 = vpop.f32.mrb[168].mxu1 }
 0x258   : > { %v3396_v59 = vsub.f32 %v8360_v27, %v8999_v2  ;;  %v8374_v48 = vsub.f32 %v3269_v52, %v8367_v41  ;;  %v5065_v1 = vpop.f32.mrb[169].mxu1  ;;  %5644 = vmatprep.mubr.f32.mxu0 %v3387_v42 }
 0x259   : > { %v3272_v3 = vsel %vm2031_vm0, %v1910_v45, 0  ;;  %v5066_v60 = vadd.f32 %v5065_v1, %v5064_v12 }
 0x25a   : > { %v3397_v25 = vand.u32 4294901760, %v3396_v59  ;;  %v8377_v40 = vand.u32 4294901760, %v3272_v3  ;;  %v8997_v47 = vand.u32 4294901760, %v8374_v48 }
 0x25b   : > { %v1917_v23 = vadd.f32 %v5066_v60, %v8299_v56  ;;  %v5067_v53 = vpop.f32.mrb[170].mxu1 }
 0x25c   : > { %v8382_v55 = vsub.f32 %v3272_v3, %v8377_v40  ;;  %v5068_v33 = vpop.f32.mrb[171].mxu1  ;;  %5645 = vmatmul.mubr.f32.vlgmr.msra.gmra.mrb[0].mxu0 %v3397_v25  ;;  %v3406_v52 = vsub.f32 %v8374_v48, %v8997_v47 }
 0x25d   : > { %v3275_v4 = vsel %vm2031_vm0, %v1917_v23, 0  ;;  %v5069_v42 = vadd.f32 %v5068_v33, %v5067_v53  ;;  %6175 = vmatpush3.bf16.msra.mxu0 %v8228_v58 }
 0x25e   : > { %v8389_v45 = vand.u32 4294901760, %v3275_v4  ;;  %v3407_v12 = vand.u32 4294901760, %v3406_v52  ;;  %v8991_v56 = vand.u32 4294901760, %v8382_v55  ;;  %6177 = vmatprep.subr.bf16.mxu0 %v8252_v54 }
 0x25f   : > { %v1924_v59 = vadd.f32 %v5069_v42, %v8302_v24  ;;  %v5070_v1 = vpop.f32.mrb[172].mxu1 }
 0x260   : > { %v8395_v3 = vsub.f32 %v3275_v4, %v8389_v45  ;;  %v5071_v60 = vpop.f32.mrb[173].mxu1  ;;  %5647 = vmatprep.mubr.f32.mxu0 %v3407_v12  ;;  %v3416_v25 = vsub.f32 %v8382_v55, %v8991_v56 }
 0x261   : > { %v3278_v58 = vsel %vm2031_vm0, %v1924_v59, 0  ;;  %v5072_v23 = vadd.f32 %v5071_v60, %v5070_v1  ;;  %6179 = vmatpush3.bf16.msra.mxu0 %v8252_v54 }
 0x262   : > { %v8402_v53 = vand.u32 4294901760, %v3278_v58  ;;  %v3417_v33 = vand.u32 4294901760, %v3416_v25  ;;  %v8989_v24 = vand.u32 4294901760, %v8395_v3  ;;  %6181 = vmatprep.subr.bf16.mxu0 %v8284_v8  ;;  %v9394_v21 = vand.u32 4294901760, %v8395_v3 }
 0x263   : > { %v1931_v52 = vadd.f32 %v5072_v23, %v8309_v11  ;;  %v5073_v4 = vpop.f32.mrb[174].mxu1 }
 0x264   : > { %v8408_v42 = vsub.f32 %v3278_v58, %v8402_v53  ;;  %v5074_v12 = vpop.f32.mrb[175].mxu1  ;;  %5648 = vmatmul.mubr.f32.gmra.mrb[2].mxu0 %v3417_v33  ;;  %v3426_v59 = vsub.f32 %v8395_v3, %v8989_v24 }
 0x265   : > { %v3281_v54 = vsel %vm2031_vm0, %v1931_v52, 0  ;;  %v5075_v1 = vadd.f32 %v5074_v12, %v5073_v4  ;;  %6183 = vmatpush3.bf16.msra.mxu0 %v8284_v8 }
 0x266   : > { %v8415_v60 = vand.u32 4294901760, %v3281_v54  ;;  %v3427_v25 = vand.u32 4294901760, %v3426_v59  ;;  %v8988_v11 = vand.u32 4294901760, %v8408_v42  ;;  %6185 = vmatprep.subr.bf16.mxu0 %v8286_v14 }
 0x267   : > { %v1938_v58 = vadd.f32 %v5075_v1, %v8312_v10  ;;  %v5076_v23 = vpop.f32.mrb[176].mxu1 }
 0x268   : > { %v8421_v33 = vsub.f32 %v3281_v54, %v8415_v60  ;;  %v5077_v20 = vpop.f32.mrb[177].mxu1  ;;  %5650 = vmatprep.mubr.f32.mxu0 %v3427_v25  ;;  %v3436_v52 = vsub.f32 %v8408_v42, %v8988_v11 }
 0x269   : > { %v3284_v8 = vsel %vm2031_vm0, %v1938_v58, 0  ;;  %v5078_v4 = vadd.f32 %v5077_v20, %v5076_v23  ;;  %6187 = vmatpush3.bf16.msra.mxu0 %v8286_v14 }
 0x26a   : > { %v8428_v12 = vand.u32 4294901760, %v3284_v8  ;;  %v3437_v59 = vand.u32 4294901760, %v3436_v52  ;;  %v8990_v10 = vand.u32 4294901760, %v8421_v33  ;;  %6189 = vmatprep.subr.bf16.mxu0 %v8296_v32 }
 0x26b   : > { %v1945_v54 = vadd.f32 %v5078_v4, %v8319_v61  ;;  %v5079_v1 = vpop.f32.mrb[178].mxu1 }
 0x26c   : > { %v8434_v25 = vsub.f32 %v3284_v8, %v8428_v12  ;;  %v5080_v37 = vpop.f32.mrb[179].mxu1  ;;  %5651 = vmatmul.mubr.f32.gmra.mrb[4].mxu0 %v3437_v59  ;;  %v3446_v20 = vsub.f32 %v8421_v33, %v8990_v10 }
 0x26d   : > { %v3287_v14 = vsel %vm2031_vm0, %v1945_v54, 0  ;;  %v5081_v58 = vadd.f32 %v5080_v37, %v5079_v1 }
 0x26e   : > { %v8440_v23 = vand.u32 4294901760, %v3287_v14  ;;  %v3447_v52 = vand.u32 4294901760, %v3446_v20  ;;  %v8992_v11 = vand.u32 4294901760, %v8434_v25 }
 0x26f   : > { %v1952_v61 = vadd.f32 %v5081_v58, %v8322_v62  ;;  %v5082_v4 = vpop.f32.mrb[180].mxu1 }
 0x270   : > { %v8445_v8 = vsub.f32 %v3287_v14, %v8440_v23  ;;  %v5083_v24 = vpop.f32.mrb[181].mxu1  ;;  %5653 = vmatprep.mubr.f32.mxu0 %v3447_v52  ;;  %v3456_v59 = vsub.f32 %v8434_v25, %v8992_v11 }
 0x271   : > { %v3290_v54 = vsel %vm2031_vm0, %v1952_v61, 0  ;;  %v5084_v37 = vadd.f32 %v5083_v24, %v5082_v4 }
 0x272   : > { %v8451_v1 = vand.u32 4294901760, %v3290_v54  ;;  %v3457_v20 = vand.u32 4294901760, %v3456_v59  ;;  %v8994_v10 = vand.u32 4294901760, %v8445_v8 }
 0x273   : > { %v1959_v62 = vadd.f32 %v5084_v37, %v8329_v19  ;;  %v5085_v58 = vpop.f32.mrb[182].mxu1 }
 0x274   : > { %v8456_v14 = vsub.f32 %v3290_v54, %v8451_v1  ;;  %v5086_v56 = vpop.f32.mrb[183].mxu1  ;;  %5654 = vmatmul.mubr.f32.gmra.mrb[6].mxu0 %v3457_v20  ;;  %v3466_v52 = vsub.f32 %v8445_v8, %v8994_v10 }
 0x275   : > { %v3293_v61 = vsel %vm2031_vm0, %v1959_v62, 0  ;;  %v5087_v24 = vadd.f32 %v5086_v56, %v5085_v58 }
 0x276   : > { %v8462_v4 = vand.u32 4294901760, %v3293_v61  ;;  %v3467_v59 = vand.u32 4294901760, %v3466_v52  ;;  %v8996_v11 = vand.u32 4294901760, %v8456_v14  ;;  %v9401_v9 = vand.u32 4294901760, %v8456_v14 }
 0x277   : > { %v1966_v19 = vadd.f32 %v5087_v24, %v8332_v17  ;;  %v5088_v37 = vpop.f32.mrb[184].mxu1 }
 0x278   : > { %v8467_v54 = vsub.f32 %v3293_v61, %v8462_v4  ;;  %v5089_v5 = vpop.f32.mrb[185].mxu1  ;;  %5656 = vmatprep.mubr.f32.mxu0 %v3467_v59  ;;  %v3476_v20 = vsub.f32 %v8456_v14, %v8996_v11 }
 0x279   : > { %v3296_v62 = vsel %vm2031_vm0, %v1966_v19, 0  ;;  %v5090_v56 = vadd.f32 %v5089_v5, %v5088_v37 }
 0x27a   : > { %v8473_v58 = vand.u32 4294901760, %v3296_v62  ;;  %v3477_v52 = vand.u32 4294901760, %v3476_v20  ;;  %v8998_v10 = vand.u32 4294901760, %v8467_v54  ;;  %v9402_v57 = vand.u32 4294901760, %v8467_v54 }
 0x27b   : > { %v1973_v17 = vadd.f32 %v5090_v56, %v8335_v44  ;;  %v5091_v24 = vpop.f32.mrb[186].mxu1 }
 0x27c   : > { %v8478_v61 = vsub.f32 %v3296_v62, %v8473_v58  ;;  %v5092_v50 = vpop.f32.mrb[187].mxu1  ;;  %5657 = vmatmul.mubr.f32.gmra.mrb[8].mxu0 %v3477_v52  ;;  %v3486_v59 = vsub.f32 %v8467_v54, %v8998_v10 }
 0x27d   : > { %v3299_v19 = vsel %vm2031_vm0, %v1973_v17, 0  ;;  %v5093_v5 = vadd.f32 %v5092_v50, %v5091_v24 }
 0x27e   : > { %v8484_v37 = vand.u32 4294901760, %v3299_v19  ;;  %v3487_v20 = vand.u32 4294901760, %v3486_v59  ;;  %v9000_v11 = vand.u32 4294901760, %v8478_v61 }
 0x27f   : > { %v1980_v44 = vadd.f32 %v5093_v5, %v8338_v46  ;;  %v5094_v56 = vpop.f32.mrb[188].mxu1 }
 0x280   : > { %v8489_v62 = vsub.f32 %v3299_v19, %v8484_v37  ;;  %v5095_v47 = vpop.f32.mrb[189].mxu1  ;;  %5659 = vmatprep.mubr.f32.mxu0 %v3487_v20  ;;  %v3496_v52 = vsub.f32 %v8478_v61, %v9000_v11 }
 0x281   : > { %v3302_v17 = vsel %vm2031_vm0, %v1980_v44, 0  ;;  %v5096_v50 = vadd.f32 %v5095_v47, %v5094_v56 }
 0x282   : > { %v8495_v24 = vand.u32 4294901760, %v3302_v17  ;;  %v3497_v59 = vand.u32 4294901760, %v3496_v52  ;;  %v9001_v10 = vand.u32 4294901760, %v8489_v62 }
 0x283   : > { %v1987_v46 = vadd.f32 %v5096_v50, %v8341_v6  ;;  %v5097_v5 = vpop.f32.mrb[190].mxu1 }
 0x284   : > { %v8500_v19 = vsub.f32 %v3302_v17, %v8495_v24  ;;  %v5098_v2 = vpop.f32.mrb[191].mxu1  ;;  %5660 = vmatmul.mubr.f32.gmra.mrb[10].mxu0 %v3497_v59  ;;  %v3506_v20 = vsub.f32 %v8489_v62, %v9001_v10 }
 0x285   : > { %v3305_v44 = vsel %vm2031_vm0, %v1987_v46, 0  ;;  %v5099_v47 = vadd.f32 %v5098_v2, %v5097_v5 }
 0x286   : > { %v8506_v56 = vand.u32 4294901760, %v3305_v44  ;;  %v3507_v52 = vand.u32 4294901760, %v3506_v20  ;;  %v3515_v11 = vand.u32 4294901760, %v8500_v19 }
 0x287   : > { %v1994_v6 = vadd.f32 %v5099_v47, %v8344_v34 }
 0x288   : > { %v8511_v50 = vsub.f32 %v3305_v44, %v8506_v56  ;;  %5662 = vmatprep.mubr.f32.mxu0 %v3507_v52  ;;  %v3516_v17 = vsub.f32 %v8500_v19, %v3515_v11 }
 0x289   : > { %v3308_v59 = vsel %vm2031_vm0, %v1994_v6, 0 }
 0x28a   : > { %v8517_v10 = vand.u32 4294901760, %v3308_v59  ;;  %v3517_v2 = vand.u32 4294901760, %v3516_v17  ;;  %v3525_v46 = vand.u32 4294901760, %v8511_v50 }
 0x28c   : > { %v8521_v5 = vsub.f32 %v3308_v59, %v8517_v10  ;;  %5663 = vmatmul.mubr.f32.gmra.mrb[12].mxu0 %v3517_v2  ;;  %v3526_v34 = vsub.f32 %v8511_v50, %v3525_v46 }
 0x28e   : > { %v3527_v20 = vand.u32 4294901760, %v3526_v34  ;;  %v3535_v44 = vand.u32 4294901760, %v8521_v5 }
 0x290   : > { %5665 = vmatprep.mubr.f32.mxu0 %v3527_v20  ;;  %v3536_v47 = vsub.f32 %v8521_v5, %v3535_v44 }
 0x292   : > { %v3537_v52 = vand.u32 4294901760, %v3536_v47 }
 0x294   : > { %5666 = vmatmul.mubr.f32.gmra.mrb[14].mxu0 %v3537_v52 }
 0x295   : > { %5684 = vmatprep.mubr.f32.mxu0 %v8348_v7 }
 0x298   : > { %5685 = vmatmul.mubr.f32.vlgmr.msra.gmra.mrb[0].mxu0 %v8355_v16 }
 0x299   : > { %5687 = vmatprep.mubr.f32.mxu0 %v8367_v41  ;;  %6191 = vmatpush3.bf16.msra.mxu0 %v8296_v32  ;;  %v6220_v32 = vpack.c.bf16 %v3553_v15, %v3546_v31  ;;  %v9390_v31 = vand.u32 4294901760, %v8374_v48  ;;  %v9391_v15 = vand.u32 4294901760, %v8239_v51  ;;  %v9398_v51 = vand.u32 4294901760, %v8421_v33 }
 0x29a   : > { %6193 = vmatprep.subr.bf16.mxu0 %v8306_v63 }
 0x29c   : > { %5688 = vmatmul.mubr.f32.gmra.mrb[2].mxu0 %v8377_v40 }
 0x29d   : > { %5690 = vmatprep.mubr.f32.mxu0 %v8389_v45  ;;  %6195 = vmatpush3.bf16.msra.mxu0 %v8306_v63  ;;  %v9392_v63 = vand.u32 4294901760, %v8247_v38  ;;  %v9399_v38 = vand.u32 4294901760, %v8434_v25 }
 0x29e   : > { %6197 = vmatprep.subr.bf16.mxu0 %v8316_v43 }
 0x2a0   : > { %5691 = vmatmul.mubr.f32.gmra.mrb[4].mxu0 %v8402_v53 }
 0x2a1   : > { %5693 = vmatprep.mubr.f32.mxu0 %v8415_v60  ;;  %6199 = vmatpush3.bf16.msra.mxu0 %v8316_v43  ;;  %v6228_v43 = vpack.c.bf16 %v9392_v63, %v9391_v15 }
 0x2a2   : > { %6201 = vmatprep.subr.bf16.mxu0 %v8326_v13 }
 0x2a4   : > { %5694 = vmatmul.mubr.f32.gmra.mrb[6].mxu0 %v8428_v12 }
 0x2a5   : > { %5696 = vmatprep.mubr.f32.mxu0 %v8440_v23  ;;  %6203 = vmatpush3.bf16.msra.mxu0 %v8326_v13  ;;  %v9393_v13 = vand.u32 4294901760, %v8382_v55 }
 0x2a6   : > { %6205 = vmatprep.subr.bf16.mxu0 %v8079_v29 }
 0x2a8   : > { %5697 = vmatmul.mubr.f32.gmra.mrb[8].mxu0 %v8451_v1 }
 0x2a9   : > { %5699 = vmatprep.mubr.f32.mxu0 %v8462_v4 }
 0x2ac   : > { %5700 = vmatmul.mubr.f32.gmra.mrb[10].mxu0 %v8473_v58 }
 0x2ad   : > { %5702 = vmatprep.mubr.f32.mxu0 %v8484_v37 }
 0x2b0   : > { %5703 = vmatmul.mubr.f32.gmra.mrb[12].mxu0 %v8495_v24 }
 0x2b1   : > { %5705 = vmatprep.mubr.f32.mxu0 %v8506_v56 }
 0x2b4   : > { %5706 = vmatmul.mubr.f32.gmra.mrb[14].mxu0 %v8517_v10 }
 0x2b5   : > { %5724 = vmatprep.mubr.f32.mxu0 %v8352_v28  ;;  %v9397_v28 = vand.u32 4294901760, %v8408_v42 }
 0x2b8   : > { %5725 = vmatmul.mubr.f32.vlgmr.msra.gmra.mrb[0].mxu0 %v8360_v27  ;;  %v9403_v27 = vand.u32 4294901760, %v8478_v61 }
 0x2b9   : > { %5727 = vmatprep.mubr.f32.mxu0 %v8374_v48  ;;  %6207 = vmatpush3.bf16.msra.mxu0 %v8079_v29  ;;  %v9404_v48 = vand.u32 4294901760, %v8489_v62 }
 0x2ba   : > { %6209 = vmatprep.subr.bf16.mxu0 %v8104_v0 }
 0x2bc   : > { %5728 = vmatmul.mubr.f32.gmra.mrb[2].mxu0 %v8382_v55 }
 0x2bd   : > { %5730 = vmatprep.mubr.f32.mxu0 %v8395_v3  ;;  %6211 = vmatpush3.bf16.msra.mxu0 %v8104_v0 }
 0x2be   : > { %6213 = vmatprep.subr.bf16.mxu0 %v8129_v26 }
 0x2c0   : > { %5731 = vmatmul.mubr.f32.gmra.mrb[4].mxu0 %v8408_v42 }
 0x2c1   : > { %5733 = vmatprep.mubr.f32.mxu0 %v8421_v33  ;;  %6215 = vmatpush3.bf16.msra.mxu0 %v8129_v26 }
 0x2c2   : > { %6217 = vmatprep.subr.bf16.mxu0 %v8154_v39 }
 0x2c4   : > { %5734 = vmatmul.mubr.f32.gmra.mrb[6].mxu0 %v8434_v25 }
 0x2c5   : > { %5736 = vmatprep.mubr.f32.mxu0 %v8445_v8  ;;  %6219 = vmatpush3.bf16.msra.mxu0 %v8154_v39 }
 0x2c6   : > { %6221 = vmatprep.subr.bf16.mxu0 %v6220_v32 }
 0x2c8   : > { %5737 = vmatmul.mubr.f32.gmra.mrb[8].mxu0 %v8456_v14 }
 0x2c9   : > { %5739 = vmatprep.mubr.f32.mxu0 %v8467_v54 }
 0x2cc   : > { %5740 = vmatmul.mubr.f32.gmra.mrb[10].mxu0 %v8478_v61 }
 0x2cd   : > { %5742 = vmatprep.mubr.f32.mxu0 %v8489_v62 }
 0x2d0   : > { %5743 = vmatmul.mubr.f32.gmra.mrb[12].mxu0 %v8500_v19 }
 0x2d1   : > { %5745 = vmatprep.mubr.f32.mxu0 %v8511_v50 }
 0x2d4   : > { %5746 = vmatmul.mubr.f32.gmra.mrb[14].mxu0 %v8521_v5 }
 0x2d5   : > { %5764 = vmatprep.mubr.f32.mxu0 %v3385_v18  ;;  %v9400_v18 = vand.u32 4294901760, %v8445_v8 }
 0x2d8   : > { %5765 = vmatmul.mubr.f32.vlgmr.msra.gmra.mrb[0].mxu0 %v9389_v36 }
 0x2d9   : > { %5767 = vmatprep.mubr.f32.mxu0 %v9390_v31  ;;  %6223 = vmatpush3.bf16.msra.mxu0 %v6220_v32 }
 0x2da   : > { %6225 = vmatprep.subr.bf16.mxu0 %v6224_v49 }
 0x2dc   : > { %5768 = vmatmul.mubr.f32.gmra.mrb[2].mxu0 %v9393_v13 }
 0x2dd   : > { %5770 = vmatprep.mubr.f32.mxu0 %v9394_v21  ;;  %6227 = vmatpush3.bf16.msra.mxu0 %v6224_v49 }
 0x2de   : > { %6229 = vmatprep.subr.bf16.mxu0 %v6228_v43 }
 0x2e0   : > { %5771 = vmatmul.mubr.f32.gmra.mrb[4].mxu0 %v9397_v28 }
 0x2e1   : > { %5773 = vmatprep.mubr.f32.mxu0 %v9398_v51  ;;  %6231 = vmatpush3.bf16.msra.mxu0 %v6228_v43 }
 0x2e2   : > { %6233 = vmatprep.subr.bf16.mxu0 %v6232_v22 }
 0x2e4   : > { %5774 = vmatmul.mubr.f32.gmra.mrb[6].mxu0 %v9399_v38 }
 0x2e5   : > { %5776 = vmatprep.mubr.f32.mxu0 %v9400_v18  ;;  %6235 = vmatpush3.bf16.msra.mxu0 %v6232_v22 }
 0x2e6   : > { %6237 = vmatprep.subr.bf16.mxu0 %v8079_v29 }
 0x2e8   : > { %5777 = vmatmul.mubr.f32.gmra.mrb[8].mxu0 %v9401_v9 }
 0x2e9   : > { %5779 = vmatprep.mubr.f32.mxu0 %v9402_v57 }
 0x2ec   : > { %5780 = vmatmul.mubr.f32.gmra.mrb[10].mxu0 %v9403_v27 }
 0x2ed   : > { %5782 = vmatprep.mubr.f32.mxu0 %v9404_v48 }
 0x2f0   : > { %5783 = vmatmul.mubr.f32.gmra.mrb[12].mxu0 %v3515_v11 }
 0x2f1   : > { %5785 = vmatprep.mubr.f32.mxu0 %v3525_v46 }
 0x2f4   : > { %5786 = vmatmul.mubr.f32.gmra.mrb[14].mxu0 %v3535_v44 }
 0x2f5   : > { %5804 = vmatprep.mubr.f32.mxu0 %v8348_v7 }
 0x2f8   : > { %5805 = vmatmul.mubr.f32.vlgmr.msra.gmra.mrb[0].mxu0 %v8355_v16 }
 0x2f9   : > { %5807 = vmatprep.mubr.f32.mxu0 %v8367_v41  ;;  %6239 = vmatpush3.bf16.msra.mxu0 %v8079_v29  ;;  %v4616_v29 = vld [vmem:[%s8697_s4] ss:$0 sm:$0xff] }
 0x2fa   : > { %6241 = vmatprep.subr.bf16.mxu0 %v8104_v0 }
 0x2fc   : > { %5808 = vmatmul.mubr.f32.gmra.mrb[2].mxu0 %v8377_v40 }
 0x2fd   : > { %5810 = vmatprep.mubr.f32.mxu0 %v8389_v45  ;;  %6243 = vmatpush3.bf16.msra.mxu0 %v8104_v0 }
 0x2fe   : > { %6245 = vmatprep.subr.bf16.mxu0 %v8129_v26 }
 0x300   : > { %5811 = vmatmul.mubr.f32.gmra.mrb[4].mxu0 %v8402_v53 }
 0x301   : > { %5813 = vmatprep.mubr.f32.mxu0 %v8415_v60  ;;  %6247 = vmatpush3.bf16.msra.mxu0 %v8129_v26 }
 0x302   : > { %6249 = vmatprep.subr.bf16.mxu0 %v8154_v39 }
 0x304   : > { %5814 = vmatmul.mubr.f32.gmra.mrb[6].mxu0 %v8428_v12 }
 0x305   : > { %5816 = vmatprep.mubr.f32.mxu0 %v8440_v23  ;;  %6251 = vmatpush3.bf16.msra.mxu0 %v8154_v39 }
 0x308   : > { %5817 = vmatmul.mubr.f32.gmra.mrb[8].mxu0 %v8451_v1 }
 0x309   : > { %5819 = vmatprep.mubr.f32.mxu0 %v8462_v4 }
 0x30c   : > { %5820 = vmatmul.mubr.f32.gmra.mrb[10].mxu0 %v8473_v58 }
 0x30d   : > { %5822 = vmatprep.mubr.f32.mxu0 %v8484_v37 }
 0x310   : > { %5823 = vmatmul.mubr.f32.gmra.mrb[12].mxu0 %v8495_v24 }
 0x311   : > { %5825 = vmatprep.mubr.f32.mxu0 %v8506_v56 }
 0x314   : > { %5826 = vmatmul.mubr.f32.gmra.mrb[14].mxu0 %v8517_v10 }
 0x315   : > { %5844 = vmatprep.mubr.f32.mxu0 %v8348_v7 }
 0x318   : > { %5845 = vmatmul.mubr.f32.vlgmr.msra.gmra.mrb[0].mxu0 %v8355_v16 }
 0x319   : > { %5847 = vmatprep.mubr.f32.mxu0 %v8367_v41 }
 0x31c   : > { %5848 = vmatmul.mubr.f32.gmra.mrb[2].mxu0 %v8377_v40 }
 0x31d   : > { %5850 = vmatprep.mubr.f32.mxu0 %v8389_v45 }
 0x320   : > { %5851 = vmatmul.mubr.f32.gmra.mrb[4].mxu0 %v8402_v53 }
 0x321   : > { %5853 = vmatprep.mubr.f32.mxu0 %v8415_v60 }
 0x324   : > { %5854 = vmatmul.mubr.f32.gmra.mrb[6].mxu0 %v8428_v12 }
 0x325   : > { %5856 = vmatprep.mubr.f32.mxu0 %v8440_v23 }
 0x328   : > { %5857 = vmatmul.mubr.f32.gmra.mrb[8].mxu0 %v8451_v1 }
 0x329   : > { %5859 = vmatprep.mubr.f32.mxu0 %v8462_v4 }
 0x32c   : > { %5860 = vmatmul.mubr.f32.gmra.mrb[10].mxu0 %v8473_v58 }
 0x32d   : > { %5862 = vmatprep.mubr.f32.mxu0 %v8484_v37 }
 0x330   : > { %5863 = vmatmul.mubr.f32.gmra.mrb[12].mxu0 %v8495_v24 }
 0x331   : > { %5865 = vmatprep.mubr.f32.mxu0 %v8506_v56 }
 0x334   : > { %5866 = vmatmul.mubr.f32.gmra.mrb[14].mxu0 %v8517_v10 }
 0x3eb   : > { %v5846_v0 = vpop.f32.mrb[0].mxu0 }
 0x3ec   : > { %v4500_v26 = vadd.f32 %v5846_v0, %v4616_v29  ;;  %v4398_v39 = vpop.f32.mrb[1].mxu0 }
 0x3ed   : > { %v4499_v7 = vadd.f32 %v4616_v29, %v4398_v39 }
 0x3ee   : > { %v4516_v16 = vmax.f32 %v4500_v26, 0.0 }
 0x3ef   : > { %v4515_v41 = vmax.f32 %v4499_v7, 0.0  ;;  %v5849_v40 = vpop.f32.mrb[2].mxu0 }
 0x3f0   : > { %4532 = vst [vmem:[%s8672_s15 + $0x8] sm:$0xff] %v4516_v16  ;;  %v4502_v55 = vadd.f32 %v5849_v40, %v4616_v29  ;;  %v4410_v45 = vpop.f32.mrb[3].mxu0 }
 0x3f1   : > { %4531 = vst [vmem:[%s8672_s15] sm:$0xff] %v4515_v41  ;;  %v4501_v3 = vadd.f32 %v4616_v29, %v4410_v45 }
 0x3f2   : > { %v4518_v53 = vmax.f32 %v4502_v55, 0.0 }
 0x3f3   : > { %v4517_v42 = vmax.f32 %v4501_v3, 0.0  ;;  %v5852_v60 = vpop.f32.mrb[4].mxu0 }
 0x3f4   : > { %4534 = vst [vmem:[%s8672_s15 + $0x18] sm:$0xff] %v4518_v53  ;;  %v4504_v11 = vadd.f32 %v5852_v60, %v4616_v29  ;;  %v4422_v33 = vpop.f32.mrb[5].mxu0 }
 0x3f5   : > { %4533 = vst [vmem:[%s8672_s15 + $0x10] sm:$0xff] %v4517_v42  ;;  %v4503_v12 = vadd.f32 %v4616_v29, %v4422_v33 }
 0x3f6   : > { %v4520_v10 = vmax.f32 %v4504_v11, 0.0 }
 0x3f7   : > { %v4519_v25 = vmax.f32 %v4503_v12, 0.0  ;;  %v5855_v23 = vpop.f32.mrb[6].mxu0 }
 0x3f8   : > { %4536 = vst [vmem:[%s8672_s15 + $0x28] sm:$0xff] %v4520_v10  ;;  %v4506_v8 = vadd.f32 %v5855_v23, %v4616_v29  ;;  %v4434_v1 = vpop.f32.mrb[7].mxu0 }
 0x3f9   : > { %4535 = vst [vmem:[%s8672_s15 + $0x20] sm:$0xff] %v4519_v25  ;;  %v4505_v14 = vadd.f32 %v4616_v29, %v4434_v1 }
 0x3fa   : > { %v4522_v4 = vmax.f32 %v4506_v8, 0.0 }
 0x3fb   : > { %v4521_v54 = vmax.f32 %v4505_v14, 0.0  ;;  %v5858_v58 = vpop.f32.mrb[8].mxu0 }
 0x3fc   : > { %4538 = vst [vmem:[%s8672_s15 + $0x38] sm:$0xff] %v4522_v4  ;;  %v4508_v61 = vadd.f32 %v5858_v58, %v4616_v29  ;;  %v4446_v37 = vpop.f32.mrb[9].mxu0 }
 0x3fd   : > { %4537 = vst [vmem:[%s8672_s15 + $0x30] sm:$0xff] %v4521_v54  ;;  %v4507_v62 = vadd.f32 %v4616_v29, %v4446_v37 }
 0x3fe   : > { %v4524_v24 = vmax.f32 %v4508_v61, 0.0 }
 0x3ff   : > { %v4523_v19 = vmax.f32 %v4507_v62, 0.0  ;;  %v5861_v56 = vpop.f32.mrb[10].mxu0 }
 0x400   : > { %4540 = vst [vmem:[%s8672_s15 + $0x48] sm:$0xff] %v4524_v24  ;;  %v4510_v6 = vadd.f32 %v5861_v56, %v4616_v29  ;;  %v4458_v50 = vpop.f32.mrb[11].mxu0 }
 0x401   : > { %4539 = vst [vmem:[%s8672_s15 + $0x40] sm:$0xff] %v4523_v19  ;;  %v4509_v17 = vadd.f32 %v4616_v29, %v4458_v50 }
 0x402   : > { %v4526_v59 = vmax.f32 %v4510_v6, 0.0 }
 0x403   : > { %v4525_v2 = vmax.f32 %v4509_v17, 0.0  ;;  %v5864_v46 = vpop.f32.mrb[12].mxu0 }
 0x404   : > { %4542 = vst [vmem:[%s8672_s15 + $0x58] sm:$0xff] %v4526_v59  ;;  %v4512_v5 = vadd.f32 %v5864_v46, %v4616_v29  ;;  %v4470_v34 = vpop.f32.mrb[13].mxu0 }
 0x405   : > { %4541 = vst [vmem:[%s8672_s15 + $0x50] sm:$0xff] %v4525_v2  ;;  %v4511_v20 = vadd.f32 %v4616_v29, %v4470_v34 }
 0x406   : > { %v4528_v44 = vmax.f32 %v4512_v5, 0.0 }
 0x407   : > { %v4527_v47 = vmax.f32 %v4511_v20, 0.0  ;;  %v5867_v52 = vpop.f32.mrb[14].mxu0 }
 0x408   : > { %4544 = vst [vmem:[%s8672_s15 + $0x68] sm:$0xff] %v4528_v44  ;;  %v4514_v32 = vadd.f32 %v5867_v52, %v4616_v29  ;;  %v4482_v49 = vpop.f32.mrb[15].mxu0 }
 0x409   : > { %4543 = vst [vmem:[%s8672_s15 + $0x60] sm:$0xff] %v4527_v47  ;;  %v4513_v36 = vadd.f32 %v4616_v29, %v4482_v49 }
 0x40a   : > { %v4530_v31 = vmax.f32 %v4514_v32, 0.0 }
 0x40b   : > { %v4529_v15 = vmax.f32 %v4513_v36, 0.0 }
 0x40c   : > { %4546 = vst [vmem:[%s8672_s15 + $0x78] sm:$0xff] %v4530_v31 }
 0x40d   : > { %4545 = vst [vmem:[%s8672_s15 + $0x70] sm:$0xff] %v4529_v15 }
 0x40e PF: > { %s15_s18 = sadd.s32 1, %s6442_s18  }
 0x40f   : > { %p12_p4 = scmp.ge.s32.totalorder %s15_s18, 4  }
 0x411   :  { %14 = sbr.rel (!%p12_p4) target bundleno = 1 (0x1), region = 71 }

// kernel: sage_forward.5
= control target key start
LH: loop header
LB: loop body
LE: loop exit
PB: predicated region body
PF: predicated region fallthrough
CT: control target
= control target key end

     0   :  { %s7066_s18 = smov 0   ;;  %s9685_s0 = inlined_call_operand.vmem [shape: f32[256,256], index: 0, kind: input, shape index: {}]   ;;  %s9686_s1 = inlined_call_operand.vmem [shape: f32[256,128], index: 1, kind: input, shape index: {}]   ;;  %s9687_s2 = inlined_call_operand.vmem [shape: f32[128,64], index: 2, kind: input, shape index: {}]   ;;  %s9688_s3 = inlined_call_operand.vmem [shape: f32[128,64], index: 3, kind: input, shape index: {}]   ;;  %s9689_s4 = inlined_call_operand.vmem [shape: f32[1,64], index: 4, kind: input, shape index: {}]   ;;  %s9690_s5 = inlined_call_operand.vmem [shape: f32[256,64], index: 5, kind: output, shape index: {}]  }
   0x1 LB: > { %s4717_s19 = sadd.s32 4294967295, %s7034_s18   ;;  %p4721_p0 = scmp.ge.s32.totalorder %s7034_s18, 1  ;;  %s7034_s18 = sphi %s7066_s18, %s15_s18  }
   0x2   : > { %p189_p1 = scmp.lt.s32.totalorder %s7034_s18, 3 }
   0x4   : > { %p190_p2 = pnand %p4721_p0, %p189_p1 }
   0x6   : > { %193 = sbr.rel (%p190_p2) target bundleno = 1037 (0x40d), region = 40 }
   0xd   : > { %v279_v0 = vld [vmem:[%s9686_s1 + $0x80] sm:$0xff]  ;;  %v280_v1 = vld [vmem:[%s9686_s1 + $0x88] sm:$0xff]  ;;  %s7085_s26 = sshll.u32 %s4717_s19, 4  ;;  %v281_v7 = vld [vmem:[%s9686_s1 + $0x90] sm:$0xff]  ;;  %s4727_s24 = sshll.u32 %s4717_s19, 7  ;;  %vm4642_vm0 = vcmask 523264  }
   0xe   : > { %v263_v2 = vld [vmem:[%s9686_s1] sm:$0xff]  ;;  %v344_v3 = vand.u32 4294901760, %v279_v0  ;;  %v347_v4 = vand.u32 4294901760, %v280_v1  ;;  %v264_v5 = vld [vmem:[%s9686_s1 + $0x8] sm:$0xff]  ;;  %v282_v8 = vld [vmem:[%s9686_s1 + $0x98] sm:$0xff]  ;;  %v350_v10 = vand.u32 4294901760, %v281_v7  ;;  %s8089_s6 = scalar_lea.vmem %s9686_s1, %s4727_s24 }
   0xf   : > { %v296_v6 = vand.u32 4294901760, %v263_v2  ;;  %v299_v9 = vand.u32 4294901760, %v264_v5  ;;  %v353_v11 = vand.u32 4294901760, %v282_v8  ;;  %v265_v12 = vld [vmem:[%s9686_s1 + $0x10] sm:$0xff]  ;;  %v266_v13 = vld [vmem:[%s9686_s1 + $0x18] sm:$0xff]  ;;  %v283_v14 = vld [vmem:[%s9686_s1 + $0xa0] sm:$0xff] }
  0x10   : > { %v7105_v15 = vpack.c.bf16 %v347_v4, %v344_v3  ;;  %v7107_v16 = vsub.f32 %v279_v0, %v344_v3  ;;  %v7109_v17 = vsub.f32 %v280_v1, %v347_v4  ;;  %v284_v19 = vld [vmem:[%s9686_s1 + $0xa8] sm:$0xff]  ;;  %v267_v20 = vld [vmem:[%s9686_s1 + $0x20] sm:$0xff]  ;;  %p219_p3 = scmp.lt.s32.totalorder %s7085_s26, 31  ;;  %v7129_v25 = vsub.f32 %v281_v7, %v350_v10  ;;  %v285_v26 = vld [vmem:[%s9686_s1 + $0xb0] sm:$0xff] }
  0x11   : > { %v7111_v18 = vsub.f32 %v263_v2, %v296_v6  ;;  %v268_v21 = vld [vmem:[%s9686_s1 + $0x28] sm:$0xff]  ;;  %v7123_v22 = vpack.c.bf16 %v299_v9, %v296_v6  ;;  %v7125_v23 = vsub.f32 %v264_v5, %v299_v9  ;;  %v7127_v24 = vpack.c.bf16 %v353_v11, %v350_v10  ;;  %v286_v31 = vld [vmem:[%s9686_s1 + $0xb8] sm:$0xff]  ;;  %v269_v36 = vld [vmem:[%s9686_s1 + $0x30] sm:$0xff] }
  0x12   : > { %10053 = vst [vmem:[#allocation2_spill] sm:$0xff] %v7105_v15  ;;  %6269 = vmatprep.subr.bf16.mxu1 %v7105_v15  ;;  %v7135_v27 = vsub.f32 %v282_v8, %v353_v11  ;;  %v302_v28 = vand.u32 4294901760, %v265_v12  ;;  %v305_v29 = vand.u32 4294901760, %v266_v13  ;;  %v356_v30 = vand.u32 4294901760, %v283_v14  ;;  %v270_v37 = vld [vmem:[%s9686_s1 + $0x38] sm:$0xff]  ;;  %v287_v42 = vld [vmem:[%s9686_s1 + $0xc0] sm:$0xff] }
  0x13   : > { %10054 = vst [vmem:[#allocation3_spill] sm:$0xff] %v7123_v22  ;;  %10055 = vst [vmem:[#allocation4_spill] sm:$0xff] %v7127_v24  ;;  %6271 = vmatpush3.bf16.msra.mxu1 %v7123_v22  ;;  %v359_v32 = vand.u32 4294901760, %v284_v19  ;;  %v308_v33 = vand.u32 4294901760, %v267_v20  ;;  %v311_v34 = vand.u32 4294901760, %v268_v21  ;;  %v362_v35 = vand.u32 4294901760, %v285_v26 }
  0x14   : > { %6273 = vmatprep.subr.bf16.mxu1 %v7127_v24  ;;  %v7148_v38 = vpack.c.bf16 %v305_v29, %v302_v28  ;;  %v7150_v39 = vsub.f32 %v265_v12, %v302_v28  ;;  %v7152_v40 = vsub.f32 %v266_v13, %v305_v29  ;;  %v7154_v41 = vsub.f32 %v283_v14, %v356_v30  ;;  %v288_v43 = vld [vmem:[%s9686_s1 + $0xc8] sm:$0xff]  ;;  %v271_v44 = vld [vmem:[%s9686_s1 + $0x40] sm:$0xff]  ;;  %s10558_s26 = smov (!%p219_p3, %s7085_s26), 31  ;;  %v289_v58 = vld [vmem:[%s9686_s1 + $0xd0] sm:$0xff] }
  0x15   : > { %v7170_v45 = vpack.c.bf16 %v359_v32, %v356_v30  ;;  %v7172_v46 = vsub.f32 %v284_v19, %v359_v32  ;;  %v7174_v47 = vpack.c.bf16 %v311_v34, %v308_v33  ;;  %v7176_v48 = vsub.f32 %v267_v20, %v308_v33  ;;  %v272_v49 = vld [vmem:[%s9686_s1 + $0x48] sm:$0xff]  ;;  %v290_v59 = vld [vmem:[%s9686_s1 + $0xd8] sm:$0xff]  ;;  %v273_v0 = vld [vmem:[%s9686_s1 + $0x50] sm:$0xff]  ;;  %s4731_s27 = sshll.u32 %s10558_s26, 4  ;;  %s4726_s22 = sshll.u32 %s10558_s26, 3 }
  0x16   : > { %10056 = vst [vmem:[#allocation5_spill] sm:$0xff] %v7148_v38  ;;  %v7181_v50 = vsub.f32 %v268_v21, %v311_v34  ;;  %v365_v51 = vand.u32 4294901760, %v286_v31  ;;  %v7183_v52 = vsub.f32 %v285_v26, %v362_v35  ;;  %v314_v53 = vand.u32 4294901760, %v269_v36  ;;  %v274_v1 = vld [vmem:[%s9686_s1 + $0x58] sm:$0xff]  ;;  %v291_v2 = vld [vmem:[%s9686_s1 + $0xe0] sm:$0xff]  ;;  %v292_v7 = vld [vmem:[%s9686_s1 + $0xe8] sm:$0xff]  ;;  %s7238_s11 = scalar_lea.vmem %s9685_s0, %s4731_s27  ;;  %s9648_s28 = scalar_lea.vmem %s9690_s5, %s4726_s22 }
  0x17   : > { %10057 = vst [vmem:[#allocation6_spill] sm:$0xff] %v7170_v45  ;;  %10058 = vst [vmem:[#allocation7_spill] sm:$0xff] %v7174_v47  ;;  %6275 = vmatpush3.bf16.msra.mxu1 %v7148_v38  ;;  %v317_v54 = vand.u32 4294901760, %v270_v37  ;;  %v368_v55 = vand.u32 4294901760, %v287_v42  ;;  %v371_v56 = vand.u32 4294901760, %v288_v43  ;;  %v320_v57 = vand.u32 4294901760, %v271_v44 }
  0x18   : > { %6277 = vmatprep.subr.bf16.mxu1 %v7170_v45  ;;  %v7193_v60 = vpack.c.bf16 %v365_v51, %v362_v35  ;;  %v7195_v61 = vsub.f32 %v286_v31, %v365_v51  ;;  %v7197_v62 = vsub.f32 %v269_v36, %v314_v53  ;;  %v323_v63 = vand.u32 4294901760, %v272_v49  ;;  %v275_v8 = vld [vmem:[%s9686_s1 + $0x60] sm:$0xff]  ;;  %v276_v9 = vld [vmem:[%s9686_s1 + $0x68] sm:$0xff]  ;;  %v293_v31 = vld [vmem:[%s9686_s1 + $0xf0] sm:$0xff] }
  0x19   : > { %v7209_v3 = vpack.c.bf16 %v317_v54, %v314_v53  ;;  %v7211_v4 = vsub.f32 %v270_v37, %v317_v54  ;;  %v7213_v5 = vpack.c.bf16 %v371_v56, %v368_v55  ;;  %v7215_v6 = vsub.f32 %v287_v42, %v368_v55  ;;  %v294_v36 = vld [vmem:[%s9686_s1 + $0xf8] sm:$0xff]  ;;  %v277_v37 = vld [vmem:[%s9686_s1 + $0x70] sm:$0xff]  ;;  %v232_v53 = vld [vmem:[%s7238_s11 + $0x8] sm:$0xff] }
  0x1a   : > { %10059 = vst [vmem:[#allocation8_spill] sm:$0xff] %v7193_v60  ;;  %v7226_v10 = vsub.f32 %v288_v43, %v371_v56  ;;  %v7228_v11 = vpack.c.bf16 %v323_v63, %v320_v57  ;;  %v7230_v12 = vsub.f32 %v271_v44, %v320_v57  ;;  %v7232_v13 = vsub.f32 %v272_v49, %v323_v63  ;;  %v278_v42 = vld [vmem:[%s9686_s1 + $0x78] sm:$0xff]  ;;  %v231_v54 = vld [vmem:[%s7238_s11] sm:$0xff] }
  0x1b   : > { %10060 = vst [vmem:[#allocation9_spill] sm:$0xff] %v7209_v3  ;;  %10061 = vst [vmem:[#allocation10_spill] sm:$0xff] %v7213_v5  ;;  %6279 = vmatpush3.bf16.msra.mxu1 %v7174_v47  ;;  %v374_v14 = vand.u32 4294901760, %v289_v58  ;;  %v377_v19 = vand.u32 4294901760, %v290_v59  ;;  %v326_v20 = vand.u32 4294901760, %v273_v0  ;;  %v329_v21 = vand.u32 4294901760, %v274_v1 }
  0x1c   : > { %10062 = vst [vmem:[#allocation11_spill] sm:$0xff] %v7228_v11  ;;  %6281 = vmatprep.subr.bf16.mxu1 %v7193_v60  ;;  %v380_v26 = vand.u32 4294901760, %v291_v2  ;;  %v383_v28 = vand.u32 4294901760, %v292_v7  ;;  %v332_v29 = vand.u32 4294901760, %v275_v8  ;;  %v335_v30 = vand.u32 4294901760, %v276_v9 }
  0x1d   : > { %v7244_v32 = vpack.c.bf16 %v377_v19, %v374_v14  ;;  %v7246_v33 = vsub.f32 %v289_v58, %v374_v14  ;;  %v7248_v34 = vsub.f32 %v290_v59, %v377_v19  ;;  %v7250_v35 = vpack.c.bf16 %v329_v21, %v326_v20 }
  0x1e   : > { %v7261_v43 = vsub.f32 %v273_v0, %v326_v20  ;;  %v7263_v44 = vsub.f32 %v274_v1, %v329_v21  ;;  %v7265_v49 = vpack.c.bf16 %v383_v28, %v380_v26  ;;  %v7267_v51 = vsub.f32 %v291_v2, %v380_v26  ;;  %v234_v26 = vld [vmem:[%s7238_s11 + $0x18] sm:$0xff] }
  0x1f   : > { %10063 = vst [vmem:[#allocation12_spill] sm:$0xff] %v7244_v32  ;;  %10064 = vst [vmem:[#allocation13_spill] sm:$0xff] %v7250_v35  ;;  %6283 = vmatpush3.bf16.msra.mxu1 %v7209_v3  ;;  %v7272_v55 = vsub.f32 %v292_v7, %v383_v28  ;;  %v7274_v56 = vpack.c.bf16 %v335_v30, %v332_v29  ;;  %v7276_v57 = vsub.f32 %v275_v8, %v332_v29  ;;  %v233_v28 = vld [vmem:[%s7238_s11 + $0x10] sm:$0xff] }
  0x20   : > { %10065 = vst [vmem:[#allocation14_spill] sm:$0xff] %v7265_v49  ;;  %v7278_v58 = vsub.f32 %v276_v9, %v335_v30  ;;  %6285 = vmatprep.subr.bf16.mxu1 %v7213_v5  ;;  %v386_v59 = vand.u32 4294901760, %v293_v31  ;;  %v389_v63 = vand.u32 4294901760, %v294_v36  ;;  %v338_v0 = vand.u32 4294901760, %v277_v37 }
  0x21   : > { %10066 = vst [vmem:[#allocation15_spill] sm:$0xff] %v7274_v56  ;;  %v341_v1 = vand.u32 4294901760, %v278_v42  ;;  %v7281_v2 = vand.u32 4294901760, %v232_v53  ;;  %v7283_v14 = vand.u32 4294901760, %v231_v54 }
  0x22   : > { %v7287_v20 = vpack.c.bf16 %v389_v63, %v386_v59  ;;  %v7289_v8 = vsub.f32 %v293_v31, %v386_v59  ;;  %v7291_v9 = vsub.f32 %v294_v36, %v389_v63  ;;  %v7298_v29 = vsub.f32 %v277_v37, %v338_v0 }
  0x23   : > { %10067 = vst [vmem:[#allocation16_spill] sm:$0xff] %v7281_v2  ;;  %10068 = vst [vmem:[#allocation17_spill] sm:$0xff] %v7283_v14  ;;  %v7293_v21 = vpack.c.bf16 %v341_v1, %v338_v0  ;;  %6287 = vmatpush3.bf16.msra.mxu1 %v7228_v11  ;;  %v7300_v30 = vsub.f32 %v278_v42, %v341_v1  ;;  %v7303_v7 = vsub.f32 %v232_v53, %v7281_v2 }
  0x24   : > { %10069 = vst [vmem:[#allocation18_spill] sm:$0xff] %v7287_v20  ;;  %v7306_v19 = vsub.f32 %v231_v54, %v7283_v14  ;;  %6289 = vmatprep.subr.bf16.mxu1 %v7244_v32  ;;  %v10073_v31 = vand.u32 4294901760, %v7107_v16  ;;  %v10074_v59 = vand.u32 4294901760, %v7109_v17  ;;  %v9701_v37 = vand.u32 4294901760, %v7111_v18  ;;  %v236_v32 = vld [vmem:[%s7238_s11 + $0x28] sm:$0xff] }
  0x25   : > { %10070 = vst [vmem:[#allocation19_spill] sm:$0xff] %v7293_v21  ;;  %10071 = vst [vmem:[#allocation20_spill] sm:$0xff] %v7303_v7  ;;  %v9702_v42 = vand.u32 4294901760, %v7125_v23  ;;  %v9711_v53 = vand.u32 4294901760, %v7303_v7  ;;  %v7319_v0 = vand.u32 4294901760, %v234_v26  ;;  %v7321_v1 = vand.u32 4294901760, %v233_v28 }
  0x26   : > { %10072 = vst [vmem:[#allocation21_spill] sm:$0xff] %v7306_v19  ;;  %v748_v36 = vsub.f32 %v7107_v16, %v10073_v31  ;;  %v755_v63 = vsub.f32 %v7109_v17, %v10074_v59  ;;  %v636_v59 = vsub.f32 %v7111_v18, %v9701_v37  ;;  %v10077_v3 = vand.u32 4294901760, %v7306_v19  ;;  %v235_v37 = vld [vmem:[%s7238_s11 + $0x20] sm:$0xff] }
  0x27   : > { %10075 = vst [vmem:[#allocation22_spill] sm:$0xff] %v7319_v0  ;;  %10076 = vst [vmem:[#allocation23_spill] sm:$0xff] %v7321_v1  ;;  %v643_v5 = vsub.f32 %v7125_v23, %v9702_v42  ;;  %6291 = vmatpush3.bf16.msra.mxu1 %v7250_v35  ;;  %v394_v54 = vsub.f32 %v7303_v7, %v9711_v53  ;;  %v7345_v45 = vand.u32 4294901760, %v236_v32  ;;  %v7352_v22 = vand.u32 4294901760, %v235_v37 }
  0x28   : > { %v749_v11 = vand.u32 4294901760, %v748_v36  ;;  %v756_v31 = vand.u32 4294901760, %v755_v63  ;;  %v400_v60 = vsub.f32 %v7306_v19, %v10077_v3  ;;  %v7338_v36 = vsub.f32 %v234_v26, %v7319_v0  ;;  %6293 = vmatprep.subr.bf16.mxu1 %v7265_v49 }
  0x29   : > { %v7341_v63 = vsub.f32 %v233_v28, %v7321_v1  ;;  %v637_v47 = vand.u32 4294901760, %v636_v59  ;;  %v644_v35 = vand.u32 4294901760, %v643_v5  ;;  %10080 = vst [vmem:[#allocation26_spill] sm:$0xff] %v7345_v45  ;;  %v395_v38 = vand.u32 4294901760, %v394_v54  ;;  %10082 = vst [vmem:[#allocation28_spill] sm:$0xff] %v7352_v22  ;;  %v238_v59 = vld [vmem:[%s7238_s11 + $0x38] sm:$0xff] }
  0x2a   : > { %10078 = vst [vmem:[#allocation24_spill] sm:$0xff] %v7338_v36  ;;  %v6300_v42 = vpack.c.bf16 %v756_v31, %v749_v11  ;;  %v401_v53 = vand.u32 4294901760, %v400_v60  ;;  %v9717_v24 = vand.u32 4294901760, %v7338_v36  ;;  %v7350_v28 = vsub.f32 %v236_v32, %v7345_v45 }
  0x2b   : > { %10079 = vst [vmem:[#allocation25_spill] sm:$0xff] %v7341_v63  ;;  %v9716_v3 = vand.u32 4294901760, %v7341_v63  ;;  %v6302_v26 = vpack.c.bf16 %v644_v35, %v637_v47  ;;  %v9726_v11 = vand.u32 4294901760, %v7129_v25  ;;  %6295 = vmatpush3.bf16.msra.mxu1 %v7274_v56  ;;  %396 = vmatprep.mubr.f32.mxu1 %v395_v38  ;;  %v7367_v38 = vsub.f32 %v235_v37, %v7352_v22  ;;  %v240_v37 = vld [vmem:[%s7238_s11 + $0x48] sm:$0xff] }
  0x2c   : > { %10081 = vst [vmem:[#allocation27_spill] sm:$0xff] %v7350_v28  ;;  %v409_v60 = vsub.f32 %v7338_v36, %v9717_v24  ;;  %6297 = vmatprep.subr.bf16.mxu1 %v7287_v20  ;;  %v10084_v32 = vand.u32 4294901760, %v7135_v27  ;;  %v10085_v56 = vand.u32 4294901760, %v7150_v39  ;;  %v10086_v49 = vand.u32 4294901760, %v7350_v28 }
  0x2d   : > { %v415_v47 = vsub.f32 %v7341_v63, %v9716_v3  ;;  %10083 = vst [vmem:[#allocation29_spill] sm:$0xff] %v7367_v38  ;;  %v762_v54 = vsub.f32 %v7129_v25, %v9726_v11  ;;  %v237_v3 = vld [vmem:[%s7238_s11 + $0x30] sm:$0xff]  ;;  %v9741_v11 = vand.u32 4294901760, %v7367_v38  ;;  %v10087_v36 = vand.u32 4294901760, %v7152_v40 }
  0x2e   : > { %v410_v24 = vand.u32 4294901760, %v409_v60  ;;  %v769_v20 = vsub.f32 %v7135_v27, %v10084_v32  ;;  %v650_v35 = vsub.f32 %v7150_v39, %v10085_v56  ;;  %v424_v63 = vsub.f32 %v7350_v28, %v10086_v49 }
  0x2f   : > { %v416_v5 = vand.u32 4294901760, %v415_v47  ;;  %v763_v31 = vand.u32 4294901760, %v762_v54  ;;  %v657_v60 = vsub.f32 %v7152_v40, %v10087_v36  ;;  %v239_v47 = vld [vmem:[%s7238_s11 + $0x40] sm:$0xff]  ;;  %6299 = vmatpush3.bf16.msra.mxu1 %v7293_v21  ;;  %v7391_v7 = vand.u32 4294901760, %v238_v59 }
  0x30   : > { %v770_v32 = vand.u32 4294901760, %v769_v20  ;;  %v651_v19 = vand.u32 4294901760, %v650_v35  ;;  %v7393_v56 = vand.u32 4294901760, %v237_v3  ;;  %6301 = vmatprep.subr.bf16.mxu1 %v6300_v42  ;;  %v425_v15 = vand.u32 4294901760, %v424_v63 }
  0x31   : > { %10088 = vst [vmem:[#allocation30_spill] sm:$0xff] %v7391_v7  ;;  %v430_v49 = vsub.f32 %v7367_v38, %v9741_v11  ;;  %v658_v54 = vand.u32 4294901760, %v657_v60  ;;  %v7398_v28 = vand.u32 4294901760, %v240_v37  ;;  %v7401_v36 = vsub.f32 %v238_v59, %v7391_v7 }
  0x32   : > { %10089 = vst [vmem:[#allocation31_spill] sm:$0xff] %v7393_v56  ;;  %v6304_v22 = vpack.c.bf16 %v770_v32, %v763_v31  ;;  %v7404_v20 = vsub.f32 %v237_v3, %v7393_v56  ;;  %v7406_v35 = vand.u32 4294901760, %v239_v47  ;;  %402 = vmatmul.mubr.f32.vlgmr.msra.gmra.mrb[0].mxu1 %v401_v53  ;;  %v9742_v11 = vand.u32 4294901760, %v7154_v41 }
  0x33   : > { %10090 = vst [vmem:[#allocation32_spill] sm:$0xff] %v7398_v28  ;;  %10091 = vst [vmem:[#allocation33_spill] sm:$0xff] %v7401_v36  ;;  %v431_v21 = vand.u32 4294901760, %v430_v49  ;;  %v6306_v42 = vpack.c.bf16 %v658_v54, %v651_v19  ;;  %v7409_v63 = vsub.f32 %v240_v37, %v7398_v28  ;;  %6303 = vmatpush3.bf16.msra.mxu1 %v6302_v26  ;;  %411 = vmatprep.mubr.f32.mxu1 %v410_v24  ;;  %v242_v49 = vld [vmem:[%s7238_s11 + $0x58] sm:$0xff] }
  0x34   : > { %10092 = vst [vmem:[#allocation34_spill] sm:$0xff] %v7404_v20  ;;  %10093 = vst [vmem:[#allocation35_spill] sm:$0xff] %v7406_v35  ;;  %v9743_v31 = vand.u32 4294901760, %v7401_v36  ;;  %v9744_v59 = vand.u32 4294901760, %v7404_v20  ;;  %v7415_v3 = vsub.f32 %v239_v47, %v7406_v35  ;;  %v9747_v60 = vand.u32 4294901760, %v7172_v46  ;;  %6305 = vmatprep.subr.bf16.mxu1 %v6304_v22  ;;  %v241_v22 = vld [vmem:[%s7238_s11 + $0x50] sm:$0xff] }
  0x35   : > { %10094 = vst [vmem:[#allocation36_spill] sm:$0xff] %v7409_v63  ;;  %v9752_v19 = vand.u32 4294901760, %v7409_v63  ;;  %v776_v53 = vsub.f32 %v7154_v41, %v9742_v11  ;;  %v9759_v24 = vand.u32 4294901760, %v7176_v48  ;;  %v9764_v26 = vand.u32 4294901760, %v7181_v50 }
  0x36   : > { %10095 = vst [vmem:[#allocation37_spill] sm:$0xff] %v7415_v3  ;;  %v439_v37 = vsub.f32 %v7401_v36, %v9743_v31  ;;  %v445_v47 = vsub.f32 %v7404_v20, %v9744_v59  ;;  %v783_v32 = vsub.f32 %v7172_v46, %v9747_v60  ;;  %417 = vmatmul.mubr.f32.gmra.mrb[2].mxu1 %v416_v5  ;;  %v244_v20 = vld [vmem:[%s7238_s11 + $0x68] sm:$0xff]  ;;  %v10096_v5 = vand.u32 4294901760, %v7415_v3 }
  0x37   : > { %v454_v54 = vsub.f32 %v7409_v63, %v9752_v19  ;;  %v777_v11 = vand.u32 4294901760, %v776_v53  ;;  %v664_v31 = vsub.f32 %v7176_v48, %v9759_v24  ;;  %v671_v59 = vsub.f32 %v7181_v50, %v9764_v26  ;;  %426 = vmatprep.mubr.f32.mxu1 %v425_v15  ;;  %6307 = vmatpush3.bf16.msra.mxu1 %v6306_v42  ;;  %v243_v53 = vld [vmem:[%s7238_s11 + $0x60] sm:$0xff] }
  0x38   : > { %v440_v60 = vand.u32 4294901760, %v439_v37  ;;  %v446_v36 = vand.u32 4294901760, %v445_v47  ;;  %v460_v38 = vsub.f32 %v7415_v3, %v10096_v5  ;;  %v784_v19 = vand.u32 4294901760, %v783_v32  ;;  %v246_v32 = vld [vmem:[%s7238_s11 + $0x78] sm:$0xff] }
  0x39   : > { %v455_v63 = vand.u32 4294901760, %v454_v54  ;;  %v665_v35 = vand.u32 4294901760, %v664_v31  ;;  %v672_v28 = vand.u32 4294901760, %v671_v59  ;;  %v7450_v24 = vand.u32 4294901760, %v242_v49 }
  0x3a   : > { %v461_v56 = vand.u32 4294901760, %v460_v38  ;;  %v6308_v7 = vpack.c.bf16 %v784_v19, %v777_v11  ;;  %v7452_v26 = vand.u32 4294901760, %v241_v22  ;;  %v7454_v45 = vand.u32 4294901760, %v244_v20  ;;  %432 = vmatmul.mubr.f32.gmra.mrb[4].mxu1 %v431_v21 }
  0x3b   : > { %10097 = vst [vmem:[#allocation38_spill] sm:$0xff] %v7450_v24  ;;  %v6310_v15 = vpack.c.bf16 %v672_v28, %v665_v35  ;;  %v7457_v42 = vsub.f32 %v242_v49, %v7450_v24  ;;  %v7459_v37 = vand.u32 4294901760, %v243_v53  ;;  %v9769_v47 = vand.u32 4294901760, %v7183_v52  ;;  %441 = vmatprep.mubr.f32.mxu1 %v440_v60 }
  0x3c   : > { %10098 = vst [vmem:[#allocation39_spill] sm:$0xff] %v7452_v26  ;;  %10099 = vst [vmem:[#allocation40_spill] sm:$0xff] %v7454_v45  ;;  %6309 = vmatprep.subr.bf16.mxu1 %v6308_v7  ;;  %v7463_v31 = vsub.f32 %v241_v22, %v7452_v26  ;;  %v7466_v11 = vsub.f32 %v244_v20, %v7454_v45  ;;  %v9768_v38 = vand.u32 4294901760, %v7195_v61  ;;  %v9767_v21 = vand.u32 4294901760, %v7197_v62 }
  0x3d   : > { %10100 = vst [vmem:[#allocation41_spill] sm:$0xff] %v7457_v42  ;;  %10101 = vst [vmem:[#allocation42_spill] sm:$0xff] %v7459_v37  ;;  %6311 = vmatpush3.bf16.msra.mxu1 %v6310_v15  ;;  %v9770_v28 = vand.u32 4294901760, %v7457_v42  ;;  %v7472_v35 = vsub.f32 %v243_v53, %v7459_v37  ;;  %v790_v7 = vsub.f32 %v7183_v52, %v9769_v47  ;;  %v9775_v59 = vand.u32 4294901760, %v7211_v4  ;;  %v245_v15 = vld [vmem:[%s7238_s11 + $0x70] sm:$0xff] }
  0x3e   : > { %10102 = vst [vmem:[#allocation43_spill] sm:$0xff] %v7463_v31  ;;  %10103 = vst [vmem:[#allocation44_spill] sm:$0xff] %v7466_v11  ;;  %v9782_v20 = vand.u32 4294901760, %v7463_v31  ;;  %v9785_v60 = vand.u32 4294901760, %v7466_v11  ;;  %v797_v19 = vsub.f32 %v7195_v61, %v9768_v38  ;;  %v678_v22 = vsub.f32 %v7197_v62, %v9767_v21  ;;  %447 = vmatmul.mubr.f32.gmra.mrb[6].mxu1 %v446_v36 }
  0x3f   : > { %10104 = vst [vmem:[#allocation45_spill] sm:$0xff] %v7472_v35  ;;  %v469_v49 = vsub.f32 %v7457_v42, %v9770_v28  ;;  %v9786_v54 = vand.u32 4294901760, %v7472_v35  ;;  %v791_v5 = vand.u32 4294901760, %v790_v7  ;;  %v685_v53 = vsub.f32 %v7211_v4, %v9775_v59  ;;  %456 = vmatprep.mubr.f32.mxu1 %v455_v63  ;;  %v248_v28 = vld [vmem:[%s7238_s11 + $0x88] sm:$0xff]  ;;  %v247_v63 = vld [vmem:[%s7238_s11 + $0x80] sm:$0xff] }
  0x40   : > { %v475_v21 = vsub.f32 %v7463_v31, %v9782_v20  ;;  %v484_v36 = vsub.f32 %v7466_v11, %v9785_v60  ;;  %v798_v38 = vand.u32 4294901760, %v797_v19  ;;  %v679_v47 = vand.u32 4294901760, %v678_v22 }
  0x41   : > { %v470_v42 = vand.u32 4294901760, %v469_v49  ;;  %v490_v7 = vsub.f32 %v7472_v35, %v9786_v54  ;;  %v686_v3 = vand.u32 4294901760, %v685_v53  ;;  %v7505_v59 = vand.u32 4294901760, %v246_v32 }
  0x42   : > { %v476_v37 = vand.u32 4294901760, %v475_v21  ;;  %v485_v45 = vand.u32 4294901760, %v484_v36  ;;  %v6312_v26 = vpack.c.bf16 %v798_v38, %v791_v5  ;;  %v7508_v20 = vand.u32 4294901760, %v245_v15  ;;  %462 = vmatmul.mubr.f32.gmra.mrb[8].mxu1 %v461_v56 }
  0x43   : > { %10105 = vst [vmem:[#allocation46_spill] sm:$0xff] %v7505_v59  ;;  %v491_v31 = vand.u32 4294901760, %v490_v7  ;;  %v6314_v60 = vpack.c.bf16 %v686_v3, %v679_v47  ;;  %v7511_v19 = vsub.f32 %v246_v32, %v7505_v59  ;;  %v7513_v22 = vand.u32 4294901760, %v248_v28  ;;  %471 = vmatprep.mubr.f32.mxu1 %v470_v42 }
  0x44   : > { %10106 = vst [vmem:[#allocation47_spill] sm:$0xff] %v7508_v20  ;;  %6313 = vmatprep.subr.bf16.mxu1 %v6312_v26  ;;  %v7516_v49 = vsub.f32 %v245_v15, %v7508_v20  ;;  %v7518_v53 = vand.u32 4294901760, %v247_v63  ;;  %v9789_v21 = vand.u32 4294901760, %v7215_v6  ;;  %v9788_v38 = vand.u32 4294901760, %v7226_v10  ;;  %v252_v15 = vld [vmem:[%s7238_s11 + $0xa8] sm:$0xff] }
  0x45   : > { %10107 = vst [vmem:[#allocation48_spill] sm:$0xff] %v7511_v19  ;;  %10108 = vst [vmem:[#allocation49_spill] sm:$0xff] %v7513_v22  ;;  %6315 = vmatpush3.bf16.msra.mxu1 %v6314_v60  ;;  %v9787_v56 = vand.u32 4294901760, %v7511_v19  ;;  %v7524_v3 = vsub.f32 %v248_v28, %v7513_v22  ;;  %v9794_v47 = vand.u32 4294901760, %v7230_v12  ;;  %v9799_v26 = vand.u32 4294901760, %v7232_v13 }
  0x46   : > { %10109 = vst [vmem:[#allocation50_spill] sm:$0xff] %v7516_v49  ;;  %10110 = vst [vmem:[#allocation51_spill] sm:$0xff] %v7518_v53  ;;  %v9802_v42 = vand.u32 4294901760, %v7516_v49  ;;  %v7530_v32 = vsub.f32 %v247_v63, %v7518_v53  ;;  %v804_v60 = vsub.f32 %v7215_v6, %v9789_v21  ;;  %v811_v28 = vsub.f32 %v7226_v10, %v9788_v38  ;;  %v250_v63 = vld [vmem:[%s7238_s11 + $0x98] sm:$0xff]  ;;  %v249_v21 = vld [vmem:[%s7238_s11 + $0x90] sm:$0xff] }
  0x47   : > { %10111 = vst [vmem:[#allocation52_spill] sm:$0xff] %v7524_v3  ;;  %477 = vmatmul.mubr.f32.gmra.mrb[10].mxu1 %v476_v37  ;;  %v499_v5 = vsub.f32 %v7511_v19, %v9787_v56  ;;  %v692_v36 = vsub.f32 %v7230_v12, %v9794_v47  ;;  %v699_v7 = vsub.f32 %v7232_v13, %v9799_v26  ;;  %v10113_v35 = vand.u32 4294901760, %v7524_v3  ;;  %v251_v26 = vld [vmem:[%s7238_s11 + $0xa0] sm:$0xff] }
  0x48   : > { %10112 = vst [vmem:[#allocation53_spill] sm:$0xff] %v7530_v32  ;;  %486 = vmatprep.mubr.f32.mxu1 %v485_v45  ;;  %v505_v37 = vsub.f32 %v7516_v49, %v9802_v42  ;;  %v9807_v54 = vand.u32 4294901760, %v7530_v32  ;;  %v805_v56 = vand.u32 4294901760, %v804_v60  ;;  %v812_v38 = vand.u32 4294901760, %v811_v28 }
  0x49   : > { %v500_v19 = vand.u32 4294901760, %v499_v5  ;;  %v514_v47 = vsub.f32 %v7524_v3, %v10113_v35  ;;  %v693_v11 = vand.u32 4294901760, %v692_v36  ;;  %v700_v53 = vand.u32 4294901760, %v699_v7 }
  0x4a   : > { %v506_v22 = vand.u32 4294901760, %v505_v37  ;;  %v520_v45 = vsub.f32 %v7530_v32, %v9807_v54  ;;  %v6316_v42 = vpack.c.bf16 %v812_v38, %v805_v56  ;;  %v7562_v49 = vand.u32 4294901760, %v250_v63 }
  0x4b   : > { %492 = vmatmul.mubr.f32.gmra.mrb[12].mxu1 %v491_v31  ;;  %v515_v60 = vand.u32 4294901760, %v514_v47  ;;  %v6318_v28 = vpack.c.bf16 %v700_v53, %v693_v11  ;;  %v7564_v20 = vand.u32 4294901760, %v249_v21  ;;  %v7566_v5 = vand.u32 4294901760, %v252_v15 }
  0x4c   : > { %10114 = vst [vmem:[#allocation54_spill] sm:$0xff] %v7562_v49  ;;  %501 = vmatprep.mubr.f32.mxu1 %v500_v19  ;;  %v521_v35 = vand.u32 4294901760, %v520_v45  ;;  %6317 = vmatprep.subr.bf16.mxu1 %v6316_v42  ;;  %v7569_v36 = vsub.f32 %v250_v63, %v7562_v49  ;;  %v7571_v7 = vand.u32 4294901760, %v251_v26  ;;  %v9808_v38 = vand.u32 4294901760, %v7246_v33  ;;  %v254_v45 = vld [vmem:[%s7238_s11 + $0xb8] sm:$0xff]  ;;  %v253_v63 = vld [vmem:[%s7238_s11 + $0xb0] sm:$0xff] }
  0x4d   : > { %10115 = vst [vmem:[#allocation55_spill] sm:$0xff] %v7564_v20  ;;  %10116 = vst [vmem:[#allocation56_spill] sm:$0xff] %v7566_v5  ;;  %6319 = vmatpush3.bf16.msra.mxu1 %v6318_v28  ;;  %v7575_v31 = vsub.f32 %v249_v21, %v7564_v20  ;;  %v7578_v11 = vsub.f32 %v252_v15, %v7566_v5  ;;  %v9809_v53 = vand.u32 4294901760, %v7248_v34  ;;  %v9810_v19 = vand.u32 4294901760, %v7261_v43 }
  0x4e   : > { %10117 = vst [vmem:[#allocation57_spill] sm:$0xff] %v7569_v36  ;;  %10118 = vst [vmem:[#allocation58_spill] sm:$0xff] %v7571_v7  ;;  %v9817_v56 = vand.u32 4294901760, %v7569_v36  ;;  %v7584_v47 = vsub.f32 %v251_v26, %v7571_v7  ;;  %v818_v42 = vsub.f32 %v7246_v33, %v9808_v38  ;;  %v9822_v21 = vand.u32 4294901760, %v7263_v44  ;;  %v256_v7 = vld [vmem:[%s7238_s11 + $0xc8] sm:$0xff] }
  0x4f   : > { %10119 = vst [vmem:[#allocation59_spill] sm:$0xff] %v7575_v31  ;;  %10120 = vst [vmem:[#allocation60_spill] sm:$0xff] %v7578_v11  ;;  %507 = vmatmul.mubr.f32.gmra.mrb[14].mxu1 %v506_v22  ;;  %v9827_v15 = vand.u32 4294901760, %v7575_v31  ;;  %v825_v37 = vsub.f32 %v7248_v34, %v9809_v53  ;;  %v706_v26 = vsub.f32 %v7261_v43, %v9810_v19  ;;  %v10122_v19 = vand.u32 4294901760, %v7578_v11 }
  0x50   : > { %10121 = vst [vmem:[#allocation61_spill] sm:$0xff] %v7584_v47  ;;  %516 = vmatprep.mubr.f32.mxu1 %v515_v60  ;;  %v529_v22 = vsub.f32 %v7569_v36, %v9817_v56  ;;  %v9830_v28 = vand.u32 4294901760, %v7584_v47  ;;  %v819_v54 = vand.u32 4294901760, %v818_v42  ;;  %v713_v38 = vsub.f32 %v7263_v44, %v9822_v21  ;;  %v255_v21 = vld [vmem:[%s7238_s11 + $0xc0] sm:$0xff] }
  0x51   : > { %v535_v53 = vsub.f32 %v7575_v31, %v9827_v15  ;;  %v544_v60 = vsub.f32 %v7578_v11, %v10122_v19  ;;  %v826_v32 = vand.u32 4294901760, %v825_v37  ;;  %v707_v3 = vand.u32 4294901760, %v706_v26 }
  0x52   : > { %v530_v56 = vand.u32 4294901760, %v529_v22  ;;  %v550_v42 = vsub.f32 %v7584_v47, %v9830_v28  ;;  %v714_v36 = vand.u32 4294901760, %v713_v38  ;;  %v7617_v5 = vand.u32 4294901760, %v254_v45 }
  0x53   : > { %522 = vmatmul.mubr.f32.gmra.mrb[16].mxu1 %v521_v35  ;;  %v536_v20 = vand.u32 4294901760, %v535_v53  ;;  %v545_v49 = vand.u32 4294901760, %v544_v60  ;;  %v6320_v15 = vpack.c.bf16 %v826_v32, %v819_v54  ;;  %v7620_v31 = vand.u32 4294901760, %v253_v63 }
  0x54   : > { %10123 = vst [vmem:[#allocation62_spill] sm:$0xff] %v7617_v5  ;;  %531 = vmatprep.mubr.f32.mxu1 %v530_v56  ;;  %v551_v19 = vand.u32 4294901760, %v550_v42  ;;  %v6322_v37 = vpack.c.bf16 %v714_v36, %v707_v3  ;;  %v7623_v26 = vsub.f32 %v254_v45, %v7617_v5  ;;  %v7625_v22 = vand.u32 4294901760, %v256_v7  ;;  %v258_v42 = vld [vmem:[%s7238_s11 + $0xd8] sm:$0xff] }
  0x55   : > { %10124 = vst [vmem:[#allocation63_spill] sm:$0xff] %v7620_v31  ;;  %6321 = vmatprep.subr.bf16.mxu1 %v6320_v15  ;;  %v7628_v38 = vsub.f32 %v253_v63, %v7620_v31  ;;  %v7630_v28 = vand.u32 4294901760, %v255_v21  ;;  %v9832_v35 = vand.u32 4294901760, %v7267_v51  ;;  %v9831_v54 = vand.u32 4294901760, %v7272_v55 }
  0x56   : > { %10125 = vst [vmem:[#allocation64_spill] sm:$0xff] %v7623_v26  ;;  %10126 = vst [vmem:[#allocation65_spill] sm:$0xff] %v7625_v22  ;;  %6323 = vmatpush3.bf16.msra.mxu1 %v6322_v37  ;;  %v9833_v32 = vand.u32 4294901760, %v7623_v26  ;;  %v7636_v3 = vsub.f32 %v256_v7, %v7625_v22  ;;  %v9838_v36 = vand.u32 4294901760, %v7276_v57  ;;  %v9845_v53 = vand.u32 4294901760, %v7278_v58  ;;  %v259_v22 = vld [vmem:[%s7238_s11 + $0xe0] sm:$0xff] }
  0x57   : > { %10127 = vst [vmem:[#allocation66_spill] sm:$0xff] %v7628_v38  ;;  %10128 = vst [vmem:[#allocation67_spill] sm:$0xff] %v7630_v28  ;;  %537 = vmatmul.mubr.f32.gmra.mrb[18].mxu1 %v536_v20  ;;  %v9846_v56 = vand.u32 4294901760, %v7628_v38  ;;  %v7642_v15 = vsub.f32 %v255_v21, %v7630_v28  ;;  %v832_v63 = vsub.f32 %v7267_v51, %v9832_v35  ;;  %v7674_v31 = vand.u32 4294901760, %v258_v42 }
  0x58   : > { %10129 = vst [vmem:[#allocation68_spill] sm:$0xff] %v7636_v3  ;;  %v839_v7 = vsub.f32 %v7272_v55, %v9831_v54  ;;  %546 = vmatprep.mubr.f32.mxu1 %v545_v49  ;;  %v559_v20 = vsub.f32 %v7623_v26, %v9833_v32  ;;  %v720_v21 = vsub.f32 %v7276_v57, %v9838_v36  ;;  %v257_v32 = vld [vmem:[%s7238_s11 + $0xd0] sm:$0xff]  ;;  %v260_v26 = vld [vmem:[%s7238_s11 + $0xe8] sm:$0xff]  ;;  %v10131_v47 = vand.u32 4294901760, %v7636_v3 }
  0x59   : > { %10130 = vst [vmem:[#allocation69_spill] sm:$0xff] %v7642_v15  ;;  %v727_v60 = vsub.f32 %v7278_v58, %v9845_v53  ;;  %v565_v49 = vsub.f32 %v7628_v38, %v9846_v56  ;;  %v9853_v37 = vand.u32 4294901760, %v7642_v15  ;;  %v833_v54 = vand.u32 4294901760, %v832_v63  ;;  %10132 = vst [vmem:[#allocation70_spill] sm:$0xff] %v7674_v31 }
  0x5a   : > { %v840_v35 = vand.u32 4294901760, %v839_v7  ;;  %v560_v45 = vand.u32 4294901760, %v559_v20  ;;  %v574_v36 = vsub.f32 %v7636_v3, %v10131_v47  ;;  %v721_v11 = vand.u32 4294901760, %v720_v21 }
  0x5b   : > { %v728_v28 = vand.u32 4294901760, %v727_v60  ;;  %552 = vmatmul.mubr.f32.gmra.mrb[20].mxu1 %v551_v19  ;;  %v566_v53 = vand.u32 4294901760, %v565_v49  ;;  %v580_v56 = vsub.f32 %v7642_v15, %v9853_v37  ;;  %v7676_v20 = vand.u32 4294901760, %v257_v32 }
  0x5c   : > { %v6324_v38 = vpack.c.bf16 %v840_v35, %v833_v54  ;;  %561 = vmatprep.mubr.f32.mxu1 %v560_v45  ;;  %v575_v63 = vand.u32 4294901760, %v574_v36  ;;  %v7678_v5 = vand.u32 4294901760, %v260_v26  ;;  %v7681_v21 = vsub.f32 %v258_v42, %v7674_v31  ;;  %v262_v42 = vld [vmem:[%s7238_s11 + $0xf8] sm:$0xff] }
  0x5d   : > { %v6326_v7 = vpack.c.bf16 %v728_v28, %v721_v11  ;;  %10133 = vst [vmem:[#allocation71_spill] sm:$0xff] %v7676_v20  ;;  %v581_v47 = vand.u32 4294901760, %v580_v56  ;;  %v7683_v19 = vand.u32 4294901760, %v259_v22  ;;  %v9854_v60 = vand.u32 4294901760, %v7289_v8 }
  0x5e   : > { %10134 = vst [vmem:[#allocation72_spill] sm:$0xff] %v7678_v5  ;;  %6325 = vmatprep.subr.bf16.mxu1 %v6324_v38  ;;  %10135 = vst [vmem:[#allocation73_spill] sm:$0xff] %v7681_v21  ;;  %v7687_v35 = vsub.f32 %v257_v32, %v7676_v20  ;;  %v7690_v11 = vsub.f32 %v260_v26, %v7678_v5  ;;  %v9855_v28 = vand.u32 4294901760, %v7291_v9  ;;  %v9856_v54 = vand.u32 4294901760, %v7298_v29 }
  0x5f   : > { %10136 = vst [vmem:[#allocation74_spill] sm:$0xff] %v7683_v19  ;;  %6327 = vmatpush3.bf16.msra.mxu1 %v6326_v7  ;;  %v9861_v38 = vand.u32 4294901760, %v7681_v21  ;;  %v7696_v36 = vsub.f32 %v259_v22, %v7683_v19  ;;  %v846_v56 = vsub.f32 %v7289_v8, %v9854_v60  ;;  %v9866_v32 = vand.u32 4294901760, %v7300_v30  ;;  %v261_v60 = vld [vmem:[%s7238_s11 + $0xf0] sm:$0xff] }
  0x60   : > { %10137 = vst [vmem:[#allocation75_spill] sm:$0xff] %v7687_v35  ;;  %10138 = vst [vmem:[#allocation76_spill] sm:$0xff] %v7690_v11  ;;  %567 = vmatmul.mubr.f32.gmra.mrb[22].mxu1 %v566_v53  ;;  %v9873_v26 = vand.u32 4294901760, %v7687_v35  ;;  %v9874_v45 = vand.u32 4294901760, %v7690_v11  ;;  %v853_v53 = vsub.f32 %v7291_v9, %v9855_v28  ;;  %v734_v22 = vsub.f32 %v7298_v29, %v9856_v54 }
  0x61   : > { %576 = vmatprep.mubr.f32.mxu1 %v575_v63  ;;  %v589_v49 = vsub.f32 %v7681_v21, %v9861_v38  ;;  %v9877_v7 = vand.u32 4294901760, %v7696_v36  ;;  %v847_v63 = vand.u32 4294901760, %v846_v56  ;;  %v741_v37 = vsub.f32 %v7300_v30, %v9866_v32 }
  0x62   : > { %v595_v28 = vsub.f32 %v7687_v35, %v9873_v26  ;;  %v604_v54 = vsub.f32 %v7690_v11, %v9874_v45  ;;  %v854_v15 = vand.u32 4294901760, %v853_v53  ;;  %v735_v3 = vand.u32 4294901760, %v734_v22 }
  0x63   : > { %v590_v38 = vand.u32 4294901760, %v589_v49  ;;  %v610_v56 = vsub.f32 %v7696_v36, %v9877_v7  ;;  %v742_v21 = vand.u32 4294901760, %v741_v37  ;;  %v7728_v19 = vand.u32 4294901760, %v262_v42  ;;  %v10157_v7 = vld [vmem:[#allocation56_spill] sm:$0xff] }
  0x64   : > { %582 = vmatmul.mubr.f32.gmra.mrb[24].mxu1 %v581_v47  ;;  %v596_v32 = vand.u32 4294901760, %v595_v28  ;;  %v605_v5 = vand.u32 4294901760, %v604_v54  ;;  %v6328_v20 = vpack.c.bf16 %v854_v15, %v847_v63  ;;  %v7730_v31 = vand.u32 4294901760, %v261_v60  ;;  %v10143_v63 = vld [vmem:[#allocation28_spill] sm:$0xff] }
  0x65   : > { %10139 = vst [vmem:[#allocation77_spill] sm:$0xff] %v7728_v19  ;;  %591 = vmatprep.mubr.f32.mxu1 %v590_v38  ;;  %v6330_v26 = vpack.c.bf16 %v742_v21, %v735_v3  ;;  %v7733_v45 = vsub.f32 %v262_v42, %v7728_v19  ;;  %v6332_v47 = vpack.c.bf16 %v7109_v17, %v7107_v16  ;;  %v611_v53 = vand.u32 4294901760, %v610_v56  ;;  %v10144_v56 = vld [vmem:[#allocation30_spill] sm:$0xff] }
  0x66   : > { %10140 = vst [vmem:[#allocation78_spill] sm:$0xff] %v7730_v31  ;;  %6329 = vmatprep.subr.bf16.mxu1 %v6328_v20  ;;  %v7738_v22 = vsub.f32 %v261_v60, %v7730_v31  ;;  %v6336_v37 = vpack.c.bf16 %v7135_v27, %v7129_v25  ;;  %v6338_v15 = vpack.c.bf16 %v7152_v40, %v7150_v39 }
  0x67   : > { %10141 = vst [vmem:[#allocation79_spill] sm:$0xff] %v7733_v45  ;;  %v9876_v3 = vand.u32 4294901760, %v7733_v45  ;;  %v6340_v21 = vpack.c.bf16 %v7172_v46, %v7154_v41  ;;  %v6342_v28 = vpack.c.bf16 %v7181_v50, %v7176_v48  ;;  %v6344_v20 = vpack.c.bf16 %v7195_v61, %v7183_v52  ;;  %6331 = vmatpush3.bf16.msra.mxu1 %v6330_v26  ;;  %v10142_v26 = vld [vmem:[#allocation26_spill] sm:$0xff] }
  0x68   : > { %597 = vmatmul.mubr.f32.gmra.mrb[26].mxu1 %v596_v32  ;;  %v9875_v60 = vand.u32 4294901760, %v7738_v22  ;;  %v6346_v54 = vpack.c.bf16 %v7211_v4, %v7197_v62  ;;  %6333 = vmatprep.subr.bf16.mxu1 %v6332_v47  ;;  %v6348_v47 = vpack.c.bf16 %v7226_v10, %v7215_v6 }
  0x69   : > { %606 = vmatprep.mubr.f32.mxu1 %v605_v5  ;;  %v619_v38 = vsub.f32 %v7733_v45, %v9876_v3  ;;  %v6334_v5 = vpack.c.bf16 %v7125_v23, %v7111_v18  ;;  %v10156_v3 = vld [vmem:[#allocation55_spill] sm:$0xff] }
  0x6a   : > { %v625_v32 = vsub.f32 %v7738_v22, %v9875_v60  ;;  %v10155_v60 = vld [vmem:[#allocation54_spill] sm:$0xff] }
  0x6b   : > { %v620_v42 = vand.u32 4294901760, %v619_v38  ;;  %v10146_v38 = vld [vmem:[#allocation32_spill] sm:$0xff] }
  0x6c   : > { %612 = vmatmul.mubr.f32.gmra.mrb[28].mxu1 %v611_v53  ;;  %v626_v49 = vand.u32 4294901760, %v625_v32  ;;  %v10145_v53 = vld [vmem:[#allocation31_spill] sm:$0xff]  ;;  %v10149_v32 = vld [vmem:[#allocation40_spill] sm:$0xff] }
  0x6d   : > { %621 = vmatprep.mubr.f32.mxu1 %v620_v42  ;;  %v6358_v42 = vpack.c.bf16 %v7278_v58, %v7276_v57 }
  0x70   : > { %627 = vmatmul.mubr.f32.gmra.mrb[30].mxu1 %v626_v49  ;;  %v6360_v49 = vpack.c.bf16 %v7291_v9, %v7289_v8 }
  0x71   : > { %857 = vmatprep.mubr.f32.mxu1 %v7281_v2  ;;  %v10203_v2 = vld [vmem:[#allocation59_spill] sm:$0xff] }
  0x74   : > { %859 = vmatmul.mubr.f32.vlgmr.msra.gmra.mrb[32].mxu1 %v7283_v14  ;;  %v10202_v14 = vld [vmem:[#allocation57_spill] sm:$0xff] }
  0x75   : > { %6335 = vmatpush3.bf16.msra.mxu1 %v6334_v5  ;;  %864 = vmatprep.mubr.f32.mxu1 %v7319_v0  ;;  %v10150_v5 = vld [vmem:[#allocation42_spill] sm:$0xff] }
  0x76   : > { %6337 = vmatprep.subr.bf16.mxu1 %v6336_v37  ;;  %v6350_v37 = vpack.c.bf16 %v7232_v13, %v7230_v12  ;;  %v10198_v0 = vld [vmem:[#allocation50_spill] sm:$0xff] }
  0x78   : > { %866 = vmatmul.mubr.f32.gmra.mrb[34].mxu1 %v7321_v1  ;;  %v10195_v1 = vld [vmem:[#allocation18_spill] sm:$0xff] }
  0x79   : > { %871 = vmatprep.mubr.f32.mxu1 %v10142_v26  ;;  %6339 = vmatpush3.bf16.msra.mxu1 %v6338_v15  ;;  %v6352_v15 = vpack.c.bf16 %v7248_v34, %v7246_v33  ;;  %v10192_v26 = vld [vmem:[#allocation45_spill] sm:$0xff] }
  0x7a   : > { %6341 = vmatprep.subr.bf16.mxu1 %v6340_v21  ;;  %v10147_v21 = vld [vmem:[#allocation35_spill] sm:$0xff] }
  0x7c   : > { %873 = vmatmul.mubr.f32.gmra.mrb[36].mxu1 %v10143_v63  ;;  %v10187_v63 = vld [vmem:[#allocation12_spill] sm:$0xff] }
  0x7d   : > { %878 = vmatprep.mubr.f32.mxu1 %v10144_v56  ;;  %6343 = vmatpush3.bf16.msra.mxu1 %v6342_v28  ;;  %v6354_v28 = vpack.c.bf16 %v7263_v44, %v7261_v43  ;;  %v10186_v56 = vld [vmem:[#allocation11_spill] sm:$0xff] }
  0x7e   : > { %6345 = vmatprep.subr.bf16.mxu1 %v6344_v20  ;;  %v6356_v20 = vpack.c.bf16 %v7272_v55, %v7267_v51 }
  0x80   : > { %880 = vmatmul.mubr.f32.gmra.mrb[38].mxu1 %v10145_v53  ;;  %v10185_v53 = vld [vmem:[#allocation41_spill] sm:$0xff] }
  0x81   : > { %885 = vmatprep.mubr.f32.mxu1 %v10146_v38  ;;  %6347 = vmatpush3.bf16.msra.mxu1 %v6346_v54  ;;  %v10148_v54 = vld [vmem:[#allocation39_spill] sm:$0xff]  ;;  %v10184_v38 = vld [vmem:[#allocation37_spill] sm:$0xff] }
  0x82   : > { %6349 = vmatprep.subr.bf16.mxu1 %v6348_v47  ;;  %v6362_v47 = vpack.c.bf16 %v7300_v30, %v7298_v29 }
  0x84   : > { %887 = vmatmul.mubr.f32.gmra.mrb[40].mxu1 %v10147_v21  ;;  %v10183_v21 = vld [vmem:[#allocation10_spill] sm:$0xff] }
  0x85   : > { %892 = vmatprep.mubr.f32.mxu1 %v7450_v24  ;;  %6351 = vmatpush3.bf16.msra.mxu1 %v6350_v37  ;;  %v10151_v37 = vld [vmem:[#allocation47_spill] sm:$0xff]  ;;  %v10182_v24 = vld [vmem:[#allocation9_spill] sm:$0xff] }
  0x86   : > { %6353 = vmatprep.subr.bf16.mxu1 %v6352_v15  ;;  %v10152_v15 = vld [vmem:[#allocation49_spill] sm:$0xff] }
  0x88   : > { %894 = vmatmul.mubr.f32.gmra.mrb[42].mxu1 %v10148_v54  ;;  %v10181_v54 = vld [vmem:[#allocation36_spill] sm:$0xff] }
  0x89   : > { %899 = vmatprep.mubr.f32.mxu1 %v10149_v32  ;;  %6355 = vmatpush3.bf16.msra.mxu1 %v6354_v28  ;;  %v10153_v28 = vld [vmem:[#allocation2_spill] sm:$0xff] }
  0x8a   : > { %6357 = vmatprep.subr.bf16.mxu1 %v6356_v20  ;;  %v10154_v20 = vld [vmem:[#allocation51_spill] sm:$0xff]  ;;  %v10180_v32 = vld [vmem:[#allocation34_spill] sm:$0xff] }
  0x8c   : > { %901 = vmatmul.mubr.f32.gmra.mrb[44].mxu1 %v10150_v5  ;;  %v10164_v5 = vld [vmem:[#allocation71_spill] sm:$0xff] }
  0x8d   : > { %906 = vmatprep.mubr.f32.mxu1 %v7505_v59  ;;  %6359 = vmatpush3.bf16.msra.mxu1 %v6358_v42  ;;  %v10158_v42 = vld [vmem:[#allocation58_spill] sm:$0xff] }
  0x8e   : > { %6361 = vmatprep.subr.bf16.mxu1 %v6360_v49  ;;  %v10159_v59 = vld [vmem:[#allocation62_spill] sm:$0xff]  ;;  %v10160_v49 = vld [vmem:[#allocation63_spill] sm:$0xff] }
  0x90   : > { %908 = vmatmul.mubr.f32.gmra.mrb[46].mxu1 %v10151_v37  ;;  %v10161_v37 = vld [vmem:[#allocation65_spill] sm:$0xff] }
  0x91   : > { %913 = vmatprep.mubr.f32.mxu1 %v10152_v15  ;;  %6363 = vmatpush3.bf16.msra.mxu1 %v6362_v47  ;;  %v10162_v15 = vld [vmem:[#allocation67_spill] sm:$0xff]  ;;  %v10163_v47 = vld [vmem:[#allocation70_spill] sm:$0xff] }
  0x92   : > { %6365 = vmatprep.subr.bf16.mxu1 %v10153_v28 }
  0x94   : > { %915 = vmatmul.mubr.f32.gmra.mrb[48].mxu1 %v10154_v20  ;;  %v10165_v20 = vld [vmem:[#allocation72_spill] sm:$0xff] }
  0x95   : > { %920 = vmatprep.mubr.f32.mxu1 %v10155_v60  ;;  %v10166_v60 = vld [vmem:[#allocation74_spill] sm:$0xff] }
  0x98   : > { %922 = vmatmul.mubr.f32.gmra.mrb[50].mxu1 %v10156_v3  ;;  %v10179_v3 = vld [vmem:[#allocation8_spill] sm:$0xff] }
  0x99   : > { %927 = vmatprep.mubr.f32.mxu1 %v10157_v7  ;;  %v10178_v7 = vld [vmem:[#allocation7_spill] sm:$0xff] }
  0x9c   : > { %929 = vmatmul.mubr.f32.gmra.mrb[52].mxu1 %v10158_v42  ;;  %v10167_v42 = vld [vmem:[#allocation20_spill] sm:$0xff] }
  0x9d   : > { %934 = vmatprep.mubr.f32.mxu1 %v10159_v59  ;;  %v10168_v59 = vld [vmem:[#allocation21_spill] sm:$0xff] }
  0xa0   : > { %936 = vmatmul.mubr.f32.gmra.mrb[54].mxu1 %v10160_v49  ;;  %v10169_v49 = vld [vmem:[#allocation3_spill] sm:$0xff] }
  0xa1   : > { %941 = vmatprep.mubr.f32.mxu1 %v10161_v37  ;;  %v10170_v37 = vld [vmem:[#allocation24_spill] sm:$0xff] }
  0xa4   : > { %943 = vmatmul.mubr.f32.gmra.mrb[56].mxu1 %v10162_v15  ;;  %v10171_v15 = vld [vmem:[#allocation4_spill] sm:$0xff] }
  0xa5   : > { %948 = vmatprep.mubr.f32.mxu1 %v10163_v47  ;;  %v10172_v47 = vld [vmem:[#allocation25_spill] sm:$0xff] }
  0xa8   : > { %950 = vmatmul.mubr.f32.gmra.mrb[58].mxu1 %v10164_v5  ;;  %v10173_v5 = vld [vmem:[#allocation27_spill] sm:$0xff] }
  0xa9   : > { %955 = vmatprep.mubr.f32.mxu1 %v10165_v20  ;;  %v10174_v20 = vld [vmem:[#allocation5_spill] sm:$0xff] }
  0xac   : > { %957 = vmatmul.mubr.f32.gmra.mrb[60].mxu1 %v10166_v60  ;;  %v10175_v60 = vld [vmem:[#allocation6_spill] sm:$0xff] }
  0xad   : > { %962 = vmatprep.mubr.f32.mxu1 %v7728_v19  ;;  %v10176_v19 = vld [vmem:[#allocation29_spill] sm:$0xff] }
  0xb0   : > { %964 = vmatmul.mubr.f32.gmra.mrb[62].mxu1 %v7730_v31  ;;  %v10177_v31 = vld [vmem:[#allocation33_spill] sm:$0xff] }
  0xb1   : > { %1099 = vmatprep.mubr.f32.mxu1 %v10167_v42 }
  0xb4   : > { %1102 = vmatmul.mubr.f32.vlgmr.msra.gmra.mrb[64].mxu1 %v10168_v59 }
  0xb5   : > { %6367 = vmatpush3.bf16.msra.mxu1 %v10169_v49  ;;  %1108 = vmatprep.mubr.f32.mxu1 %v10170_v37  ;;  %v10199_v49 = vld [vmem:[#allocation52_spill] sm:$0xff] }
  0xb6   : > { %6369 = vmatprep.subr.bf16.mxu1 %v10171_v15 }
  0xb8   : > { %1111 = vmatmul.mubr.f32.gmra.mrb[66].mxu1 %v10172_v47 }
  0xb9   : > { %1117 = vmatprep.mubr.f32.mxu1 %v10173_v5  ;;  %6371 = vmatpush3.bf16.msra.mxu1 %v10174_v20  ;;  %v10191_v20 = vld [vmem:[#allocation14_spill] sm:$0xff] }
  0xba   : > { %6373 = vmatprep.subr.bf16.mxu1 %v10175_v60  ;;  %v10188_v60 = vld [vmem:[#allocation43_spill] sm:$0xff] }
  0xbc   : > { %1120 = vmatmul.mubr.f32.gmra.mrb[68].mxu1 %v10176_v19 }
  0xbd   : > { %1126 = vmatprep.mubr.f32.mxu1 %v10177_v31  ;;  %6375 = vmatpush3.bf16.msra.mxu1 %v10178_v7  ;;  %v10189_v7 = vld [vmem:[#allocation44_spill] sm:$0xff] }
  0xbe   : > { %6377 = vmatprep.subr.bf16.mxu1 %v10179_v3  ;;  %v10190_v3 = vld [vmem:[#allocation13_spill] sm:$0xff] }
  0xc0   : > { %1129 = vmatmul.mubr.f32.gmra.mrb[70].mxu1 %v10180_v32 }
  0xc1   : > { %1135 = vmatprep.mubr.f32.mxu1 %v10181_v54  ;;  %6379 = vmatpush3.bf16.msra.mxu1 %v10182_v24  ;;  %v10193_v24 = vld [vmem:[#allocation48_spill] sm:$0xff] }
  0xc2   : > { %6381 = vmatprep.subr.bf16.mxu1 %v10183_v21  ;;  %v10194_v21 = vld [vmem:[#allocation15_spill] sm:$0xff] }
  0xc4   : > { %1138 = vmatmul.mubr.f32.gmra.mrb[72].mxu1 %v10184_v38 }
  0xc5   : > { %1144 = vmatprep.mubr.f32.mxu1 %v10185_v53  ;;  %6383 = vmatpush3.bf16.msra.mxu1 %v10186_v56  ;;  %v10196_v56 = vand.u32 4294901760, %v7107_v16  ;;  %v10206_v16 = vld [vmem:[#allocation64_spill] sm:$0xff] }
  0xc6   : > { %6385 = vmatprep.subr.bf16.mxu1 %v10187_v63  ;;  %v10197_v63 = vand.u32 4294901760, %v7109_v17  ;;  %v10207_v17 = vld [vmem:[#allocation66_spill] sm:$0xff] }
  0xc8   : > { %1147 = vmatmul.mubr.f32.gmra.mrb[74].mxu1 %v10188_v60  ;;  %v6396_v15 = vpack.c.bf16 %v10197_v63, %v10196_v56  ;;  %v10208_v63 = vld [vmem:[#allocation68_spill] sm:$0xff]  ;;  %v10209_v56 = vld [vmem:[#allocation69_spill] sm:$0xff] }
  0xc9   : > { %1153 = vmatprep.mubr.f32.mxu1 %v10189_v7  ;;  %6387 = vmatpush3.bf16.msra.mxu1 %v10190_v3  ;;  %v10200_v3 = vld [vmem:[#allocation19_spill] sm:$0xff] }
  0xca   : > { %6389 = vmatprep.subr.bf16.mxu1 %v10191_v20  ;;  %v10201_v20 = vld [vmem:[#allocation53_spill] sm:$0xff] }
  0xcc   : > { %1156 = vmatmul.mubr.f32.gmra.mrb[76].mxu1 %v10192_v26 }
  0xcd   : > { %1162 = vmatprep.mubr.f32.mxu1 %v10193_v24  ;;  %6391 = vmatpush3.bf16.msra.mxu1 %v10194_v21  ;;  %v10204_v21 = vld [vmem:[#allocation60_spill] sm:$0xff] }
  0xce   : > { %6393 = vmatprep.subr.bf16.mxu1 %v10195_v1  ;;  %v10205_v1 = vld [vmem:[#allocation61_spill] sm:$0xff] }
  0xd0   : > { %1165 = vmatmul.mubr.f32.gmra.mrb[78].mxu1 %v10198_v0 }
  0xd1   : > { %1171 = vmatprep.mubr.f32.mxu1 %v10199_v49  ;;  %6395 = vmatpush3.bf16.msra.mxu1 %v10200_v3  ;;  %v10210_v3 = vld [vmem:[#allocation73_spill] sm:$0xff] }
  0xd2   : > { %6397 = vmatprep.subr.bf16.mxu1 %v6396_v15  ;;  %v10211_v15 = vand.u32 4294901760, %v10167_v42  ;;  %v10218_v42 = vand.u32 4294901760, %v7150_v39 }
  0xd4   : > { %1174 = vmatmul.mubr.f32.gmra.mrb[80].mxu1 %v10201_v20 }
  0xd5   : > { %1180 = vmatprep.mubr.f32.mxu1 %v10202_v14 }
  0xd8   : > { %1183 = vmatmul.mubr.f32.gmra.mrb[82].mxu1 %v10203_v2 }
  0xd9   : > { %1189 = vmatprep.mubr.f32.mxu1 %v10204_v21 }
  0xdc   : > { %1192 = vmatmul.mubr.f32.gmra.mrb[84].mxu1 %v10205_v1 }
  0xdd   : > { %1198 = vmatprep.mubr.f32.mxu1 %v10206_v16 }
  0xe0   : > { %1201 = vmatmul.mubr.f32.gmra.mrb[86].mxu1 %v10207_v17  ;;  %v10212_v17 = vand.u32 4294901760, %v7111_v18 }
  0xe1   : > { %1207 = vmatprep.mubr.f32.mxu1 %v10208_v63  ;;  %v10213_v63 = vand.u32 4294901760, %v7125_v23  ;;  %v7883_v23 = vld [vmem:[%s9688_s3] sm:$0xff] }
  0xe2   : > { %v2048_v39 = vand.u32 4294901760, %v7883_v23 }
  0xe4   : > { %1210 = vmatmul.mubr.f32.gmra.mrb[88].mxu1 %v10209_v56  ;;  %v6398_v56 = vpack.c.bf16 %v10213_v63, %v10212_v17  ;;  %v10228_v17 = vand.u32 4294901760, %v7195_v61  ;;  %v10232_v61 = vand.u32 4294901760, %v7197_v62 }
  0xe5   : > { %1216 = vmatprep.mubr.f32.mxu1 %v10210_v3  ;;  %v10214_v3 = vand.u32 4294901760, %v7129_v25  ;;  %v7888_v25 = vld [vmem:[%s9688_s3 + $0x8] sm:$0xff] }
  0xe8   : > { %1219 = vmatmul.mubr.f32.gmra.mrb[90].mxu1 %v7687_v35  ;;  %v10215_v35 = vand.u32 4294901760, %v7135_v27  ;;  %v10220_v27 = vand.u32 4294901760, %v7154_v41  ;;  %v10225_v41 = vand.u32 4294901760, %v7176_v48 }
  0xe9   : > { %1225 = vmatprep.mubr.f32.mxu1 %v7690_v11  ;;  %v10216_v11 = vand.u32 4294901760, %v10168_v59  ;;  %v10221_v59 = vand.u32 4294901760, %v7172_v46  ;;  %v10226_v46 = vand.u32 4294901760, %v7181_v50 }
  0xea   : > { %v6400_v16 = vpack.c.bf16 %v10215_v35, %v10214_v3  ;;  %v10224_v3 = vand.u32 4294901760, %v10173_v5  ;;  %v10227_v5 = vand.u32 4294901760, %v7183_v52  ;;  %v10231_v52 = vand.u32 4294901760, %v10177_v31 }
  0xeb   : > { %v6404_v35 = vpack.c.bf16 %v10221_v59, %v10220_v27  ;;  %v7950_v27 = vld [vmem:[%s9688_s3 + $0x28] sm:$0xff]  ;;  %v10234_v31 = vand.u32 4294901760, %v7215_v6  ;;  %v10235_v59 = vand.u32 4294901760, %v7226_v10  ;;  %v10238_v6 = vand.u32 4294901760, %v10181_v54 }
  0xec   : > { %1228 = vmatmul.mubr.f32.gmra.mrb[92].mxu1 %v7696_v36  ;;  %v6408_v63 = vpack.c.bf16 %v10228_v17, %v10227_v5  ;;  %v10239_v10 = vand.u32 4294901760, %v7230_v12  ;;  %v10241_v54 = vand.u32 4294901760, %v7246_v33  ;;  %v10242_v5 = vand.u32 4294901760, %v7248_v34 }
  0xed   : > { %1234 = vmatprep.mubr.f32.mxu1 %v7733_v45  ;;  %v10217_v45 = vand.u32 4294901760, %v10170_v37  ;;  %v6406_v37 = vpack.c.bf16 %v10226_v46, %v10225_v41  ;;  %v10240_v41 = vand.u32 4294901760, %v7232_v13  ;;  %v10245_v33 = vand.u32 4294901760, %v10185_v53 }
  0xee   : > { %v6416_v17 = vpack.c.bf16 %v10242_v5, %v10241_v54  ;;  %v10246_v34 = vand.u32 4294901760, %v7261_v43  ;;  %v10248_v53 = vand.u32 4294901760, %v7267_v51  ;;  %v8048_v54 = vld [vmem:[%s9688_s3 + $0x58] sm:$0xff]  ;;  %v10256_v5 = vand.u32 4294901760, %v7291_v9 }
  0xef   : > { %v6414_v46 = vpack.c.bf16 %v10240_v41, %v10239_v10  ;;  %v10253_v10 = vand.u32 4294901760, %v7276_v57  ;;  %v10254_v41 = vand.u32 4294901760, %v7278_v58  ;;  %v9905_v58 = vand.u32 4294901760, %v8048_v54 }
  0xf0   : > { %1237 = vmatmul.mubr.f32.gmra.mrb[94].mxu1 %v7738_v22 }
  0xf1   : > { %1341 = vmatprep.mubr.f32.mxu1 %v10211_v15  ;;  %v10219_v15 = vand.u32 4294901760, %v7152_v40  ;;  %v2051_v40 = vand.u32 4294901760, %v7888_v25 }
  0xf3   : > { %v6402_v18 = vpack.c.bf16 %v10219_v15, %v10218_v42  ;;  %v10233_v15 = vand.u32 4294901760, %v7211_v4  ;;  %v2063_v4 = vand.u32 4294901760, %v7950_v27 }
  0xf4   : > { %1345 = vmatmul.mubr.f32.vlgmr.msra.gmra.mrb[96].mxu1 %v10216_v11  ;;  %v10222_v11 = vand.u32 4294901760, %v10172_v47  ;;  %v7913_v47 = vld [vmem:[%s9688_s3 + $0x10] sm:$0xff] }
  0xf5   : > { %6399 = vmatpush3.bf16.msra.mxu1 %v6398_v56  ;;  %1352 = vmatprep.mubr.f32.mxu1 %v10217_v45  ;;  %v7902_v45 = vpack.c.bf16 %v2051_v40, %v2048_v39  ;;  %v2054_v48 = vand.u32 4294901760, %v7913_v47  ;;  %v10229_v56 = vand.u32 4294901760, %v10176_v19  ;;  %v7945_v19 = vld [vmem:[%s9688_s3 + $0x20] sm:$0xff] }
  0xf6   : > { %6401 = vmatprep.subr.bf16.mxu1 %v6400_v16  ;;  %v7918_v16 = vld [vmem:[%s9688_s3 + $0x18] sm:$0xff]  ;;  %v2060_v62 = vand.u32 4294901760, %v7945_v19 }
  0xf7   : > { %10223 = vst [vmem:[#allocation2_spill] sm:$0xff] %v7902_v45  ;;  %6461 = vmatprep.subr.bf16.mxu0 %v7902_v45  ;;  %v2057_v50 = vand.u32 4294901760, %v7918_v16 }
  0xf8   : > { %1356 = vmatmul.mubr.f32.gmra.mrb[98].mxu1 %v10222_v11  ;;  %6463 = vmatpush3.bf16.msra.mxu0 %v7902_v45  ;;  %v10236_v11 = vand.u32 4294901760, %v10180_v32  ;;  %v7977_v32 = vld [vmem:[%s9688_s3 + $0x30] sm:$0xff] }
  0xf9   : > { %1363 = vmatprep.mubr.f32.mxu1 %v10224_v3  ;;  %6403 = vmatpush3.bf16.msra.mxu1 %v6402_v18  ;;  %v7934_v42 = vpack.c.bf16 %v2057_v50, %v2054_v48  ;;  %v6410_v18 = vpack.c.bf16 %v10233_v15, %v10232_v61  ;;  %v7966_v3 = vpack.c.bf16 %v2063_v4, %v2060_v62  ;;  %v2066_v12 = vand.u32 4294901760, %v7977_v32  ;;  %v8014_v15 = vld [vmem:[%s9688_s3 + $0x48] sm:$0xff] }
  0xfa   : > { %6405 = vmatprep.subr.bf16.mxu1 %v6404_v35  ;;  %v6412_v35 = vpack.c.bf16 %v10235_v59, %v10234_v31 }
  0xfb   : > { %10230 = vst [vmem:[#allocation20_spill] sm:$0xff] %v7934_v42  ;;  %6465 = vmatprep.subr.bf16.mxu0 %v7934_v42  ;;  %10237 = vst [vmem:[#allocation21_spill] sm:$0xff] %v7966_v3 }
  0xfc   : > { %1367 = vmatmul.mubr.f32.gmra.mrb[100].mxu1 %v10229_v56  ;;  %6467 = vmatpush3.bf16.msra.mxu0 %v7934_v42 }
  0xfd   : > { %1374 = vmatprep.mubr.f32.mxu1 %v10231_v52  ;;  %6407 = vmatpush3.bf16.msra.mxu1 %v6406_v37  ;;  %v7982_v37 = vld [vmem:[%s9688_s3 + $0x38] sm:$0xff]  ;;  %v10247_v52 = vand.u32 4294901760, %v7263_v44  ;;  %v9907_v44 = vand.u32 4294901760, %v8014_v15 }
  0xfe   : > { %6409 = vmatprep.subr.bf16.mxu1 %v6408_v63  ;;  %6469 = vmatprep.subr.bf16.mxu0 %v7966_v3  ;;  %v9913_v13 = vand.u32 4294901760, %v7982_v37  ;;  %v10243_v63 = vand.u32 4294901760, %v10184_v38  ;;  %v8009_v38 = vld [vmem:[%s9688_s3 + $0x40] sm:$0xff] }
  0xff   : > { %v6418_v61 = vpack.c.bf16 %v10247_v52, %v10246_v34  ;;  %v9912_v43 = vand.u32 4294901760, %v8009_v38  ;;  %v10257_v34 = vand.u32 4294901760, %v10192_v26  ;;  %v10259_v52 = vand.u32 4294901760, %v10193_v24  ;;  %v1999_v24 = vld [vmem:[%s8089_s6] sm:$0xff] }
 0x100   : > { %1378 = vmatmul.mubr.f32.gmra.mrb[102].mxu1 %v10236_v11  ;;  %6471 = vmatpush3.bf16.msra.mxu0 %v7966_v3  ;;  %v7998_v56 = vpack.c.bf16 %v9913_v13, %v2066_v12  ;;  %v10250_v11 = vand.u32 4294901760, %v10188_v60  ;;  %v8043_v60 = vld [vmem:[%s9688_s3 + $0x50] sm:$0xff] }
 0x101   : > { %1385 = vmatprep.mubr.f32.mxu1 %v10238_v6  ;;  %6411 = vmatpush3.bf16.msra.mxu1 %v6410_v18  ;;  %v10249_v18 = vand.u32 4294901760, %v7272_v55  ;;  %v8030_v51 = vpack.c.bf16 %v9907_v44, %v9912_v43  ;;  %v10252_v6 = vand.u32 4294901760, %v10189_v7  ;;  %v10255_v7 = vand.u32 4294901760, %v7289_v8  ;;  %v10308_v3 = vld [vmem:[#allocation76_spill] sm:$0xff] }
 0x102   : > { %6413 = vmatprep.subr.bf16.mxu1 %v6412_v35  ;;  %10244 = vst [vmem:[#allocation24_spill] sm:$0xff] %v7998_v56  ;;  %6473 = vmatprep.subr.bf16.mxu0 %v7998_v56  ;;  %v9906_v57 = vand.u32 4294901760, %v8043_v60 }
 0x103   : > { %v6420_v31 = vpack.c.bf16 %v10249_v18, %v10248_v53  ;;  %10251 = vst [vmem:[#allocation25_spill] sm:$0xff] %v8030_v51  ;;  %v10261_v53 = vand.u32 4294901760, %v7300_v30  ;;  %v8079_v18 = vld [vmem:[%s9688_s3 + $0x60] sm:$0xff] }
 0x104   : > { %1389 = vmatmul.mubr.f32.gmra.mrb[104].mxu1 %v10243_v63  ;;  %6475 = vmatpush3.bf16.msra.mxu0 %v7998_v56  ;;  %v8064_v8 = vpack.c.bf16 %v9905_v58, %v9906_v57  ;;  %v10273_v58 = vand.u32 4294901760, %v10203_v2 }
 0x105   : > { %1396 = vmatprep.mubr.f32.mxu1 %v10245_v33  ;;  %6415 = vmatpush3.bf16.msra.mxu1 %v6414_v46  ;;  %v4764_v59 = vpop.f32.mrb[0].mxu1  ;;  %v6422_v46 = vpack.c.bf16 %v10254_v41, %v10253_v10  ;;  %v10263_v10 = vand.u32 4294901760, %v10198_v0 }
 0x106   : > { %6417 = vmatprep.subr.bf16.mxu1 %v6416_v17  ;;  %v4765_v35 = vpop.f32.mrb[1].mxu1  ;;  %v6424_v17 = vpack.c.bf16 %v10256_v5, %v10255_v7  ;;  %6477 = vmatprep.subr.bf16.mxu0 %v8030_v51  ;;  %10258 = vst [vmem:[#allocation27_spill] sm:$0xff] %v8064_v8  ;;  %v8112_v7 = vsub.f32 %v7883_v23, %v2048_v39  ;;  %v8131_v23 = vld [vmem:[%s9688_s3 + $0x78] sm:$0xff] }
 0x107   : > { %v8032_v55 = vadd.f32 %v4765_v35, %v4764_v59  ;;  %v8096_v35 = vand.u32 4294901760, %v1999_v24  ;;  %v8117_v5 = vsub.f32 %v7888_v25, %v2051_v40  ;;  %v9898_v39 = vand.u32 4294901760, %v8131_v23 }
 0x108   : > { %1400 = vmatmul.mubr.f32.gmra.mrb[106].mxu1 %v10250_v11  ;;  %6479 = vmatpush3.bf16.msra.mxu0 %v8030_v51  ;;  %v2000_v11 = vld [vmem:[%s8089_s6 + $0x8] sm:$0xff]  ;;  %v2009_v51 = vld [vmem:[%s8089_s6 + $0x50] sm:$0xff] }
 0x109   : > { %1407 = vmatprep.mubr.f32.mxu1 %v10252_v6  ;;  %6419 = vmatpush3.bf16.msra.mxu1 %v6418_v61  ;;  %v4767_v63 = vpop.f32.mrb[2].mxu1  ;;  %v10260_v61 = vand.u32 4294901760, %v7298_v29  ;;  %v9903_v29 = vand.u32 4294901760, %v8079_v18  ;;  %10262 = vst [vmem:[#allocation29_spill] sm:$0xff] %v8096_v35  ;;  %v8134_v25 = vsub.f32 %v1999_v24, %v8096_v35 }
 0x10a   : > { %6421 = vmatprep.subr.bf16.mxu1 %v6420_v31  ;;  %v4768_v33 = vpop.f32.mrb[3].mxu1  ;;  %v8084_v31 = vld [vmem:[%s9688_s3 + $0x68] sm:$0xff]  ;;  %6481 = vmatprep.subr.bf16.mxu0 %v8064_v8 }
 0x10b   : > { %v8068_v9 = vadd.f32 %v4768_v33, %v4767_v63  ;;  %v6426_v26 = vpack.c.bf16 %v10261_v53, %v10260_v61  ;;  %v9897_v30 = vand.u32 4294901760, %v8084_v31  ;;  %v8126_v63 = vld [vmem:[%s9688_s3 + $0x70] sm:$0xff]  ;;  %v9902_v33 = vand.u32 4294901760, %v8112_v7 }
 0x10c   : > { %1411 = vmatmul.mubr.f32.gmra.mrb[108].mxu1 %v10257_v34  ;;  %6483 = vmatpush3.bf16.msra.mxu0 %v8064_v8  ;;  %v2001_v34 = vld [vmem:[%s8089_s6 + $0x10] sm:$0xff]  ;;  %v9900_v61 = vand.u32 4294901760, %v8134_v25  ;;  %v9901_v53 = vand.u32 4294901760, %v8117_v5  ;;  %v10290_v8 = vand.u32 4294901760, %v7982_v37 }
 0x10d   : > { %1418 = vmatprep.mubr.f32.mxu1 %v10259_v52  ;;  %6423 = vmatpush3.bf16.msra.mxu1 %v6422_v46  ;;  %v4770_v59 = vpop.f32.mrb[4].mxu1  ;;  %v8105_v41 = vpack.c.bf16 %v9897_v30, %v9903_v29  ;;  %v8107_v46 = vand.u32 4294901760, %v2000_v11 }
 0x10e   : > { %6425 = vmatprep.subr.bf16.mxu1 %v6424_v17  ;;  %v4771_v6 = vpop.f32.mrb[5].mxu1  ;;  %v10266_v17 = vand.u32 4294901760, %v10199_v49  ;;  %v9899_v49 = vand.u32 4294901760, %v8126_v63 }
 0x10f   : > { %10264 = vst [vmem:[#allocation33_spill] sm:$0xff] %v8105_v41  ;;  %10265 = vst [vmem:[#allocation34_spill] sm:$0xff] %v8107_v46  ;;  %v8119_v0 = vadd.f32 %v4771_v6, %v4770_v59  ;;  %6485 = vmatprep.subr.bf16.mxu0 %v8105_v41  ;;  %v8141_v40 = vsub.f32 %v2000_v11, %v8107_v46  ;;  %v10268_v59 = vand.u32 4294901760, %v10201_v20  ;;  %v10271_v20 = vand.u32 4294901760, %v10202_v14 }
 0x110   : > { %1422 = vmatmul.mubr.f32.gmra.mrb[110].mxu1 %v10263_v10  ;;  %6487 = vmatpush3.bf16.msra.mxu0 %v8105_v41  ;;  %v8157_v11 = vpack.c.bf16 %v9898_v39, %v9899_v49  ;;  %v2292_v10 = vsub.f32 %v8112_v7, %v9902_v33  ;;  %v2299_v39 = vsub.f32 %v8117_v5, %v9901_v53 }
 0x111   : > { %1429 = vmatprep.mubr.f32.mxu1 %v10266_v17  ;;  %6427 = vmatpush3.bf16.msra.mxu1 %v6426_v26  ;;  %v4773_v52 = vpop.f32.mrb[6].mxu1  ;;  %v2002_v26 = vld [vmem:[%s8089_s6 + $0x18] sm:$0xff]  ;;  %v9904_v6 = vand.u32 4294901760, %v8141_v40 }
 0x112   : > { %6429 = vmatprep.subr.bf16.mxu1 %v10153_v28  ;;  %v8148_v28 = vand.u32 4294901760, %v2001_v34  ;;  %v4774_v24 = vpop.f32.mrb[7].mxu1  ;;  %10269 = vst [vmem:[#allocation37_spill] sm:$0xff] %v8157_v11  ;;  %v8163_v17 = vand.u32 4294901760, %v2002_v26  ;;  %6489 = vmatprep.subr.bf16.mxu0 %v8157_v11  ;;  %v2293_v14 = vand.u32 4294901760, %v2292_v10  ;;  %v2300_v33 = vand.u32 4294901760, %v2299_v39 }
 0x113   : > { %v8165_v30 = vadd.f32 %v4774_v24, %v4773_v52  ;;  %v2141_v52 = vsub.f32 %v8141_v40, %v9904_v6  ;;  %v8196_v10 = vsub.f32 %v7918_v16, %v2057_v50 }
 0x114   : > { %10267 = vst [vmem:[#allocation36_spill] sm:$0xff] %v8148_v28  ;;  %1433 = vmatmul.mubr.f32.gmra.mrb[112].mxu1 %v10268_v59  ;;  %10270 = vst [vmem:[#allocation41_spill] sm:$0xff] %v8163_v17  ;;  %v2131_v59 = vsub.f32 %v8134_v25, %v9900_v61  ;;  %v8176_v49 = vsub.f32 %v2001_v34, %v8148_v28  ;;  %v8183_v24 = vsub.f32 %v2002_v26, %v8163_v17  ;;  %v2003_v61 = vld [vmem:[%s8089_s6 + $0x20] sm:$0xff]  ;;  %v2004_v26 = vld [vmem:[%s8089_s6 + $0x28] sm:$0xff] }
 0x115   : > { %1440 = vmatprep.mubr.f32.mxu1 %v10271_v20  ;;  %v8188_v20 = vsub.f32 %v7913_v47, %v2054_v48  ;;  %v4776_v53 = vpop.f32.mrb[8].mxu1  ;;  %6491 = vmatpush3.bf16.msra.mxu0 %v8157_v11  ;;  %v2142_v47 = vand.u32 4294901760, %v2141_v52  ;;  %v8203_v44 = vand.u32 4294901760, %v2003_v61  ;;  %v6492_v16 = vpack.c.bf16 %v2300_v33, %v2293_v14  ;;  %v2008_v11 = vld [vmem:[%s8089_s6 + $0x48] sm:$0xff] }
 0x116   : > { %10272 = vst [vmem:[#allocation43_spill] sm:$0xff] %v8183_v24  ;;  %v2132_v34 = vand.u32 4294901760, %v2131_v59  ;;  %v9909_v29 = vand.u32 4294901760, %v8176_v49  ;;  %v4777_v6 = vpop.f32.mrb[9].mxu1  ;;  %v9908_v48 = vand.u32 4294901760, %v8183_v24  ;;  %v10275_v59 = vand.u32 4294901760, %v10204_v21 }
 0x117   : > { %v9910_v57 = vand.u32 4294901760, %v8188_v20  ;;  %10274 = vst [vmem:[#allocation44_spill] sm:$0xff] %v8203_v44  ;;  %v8205_v39 = vadd.f32 %v4777_v6, %v4776_v53  ;;  %v9911_v50 = vand.u32 4294901760, %v8196_v10  ;;  %v8220_v53 = vsub.f32 %v2003_v61, %v8203_v44  ;;  %6493 = vmatprep.subr.bf16.mxu0 %v6492_v16  ;;  %v2005_v61 = vld [vmem:[%s8089_s6 + $0x30] sm:$0xff] }
 0x118   : > { %1444 = vmatmul.mubr.f32.gmra.mrb[114].mxu1 %v10273_v58  ;;  %5628 = vmatprep.mubr.f32.mxu0 %v2132_v34  ;;  %v2151_v2 = vsub.f32 %v8176_v49, %v9909_v29  ;;  %v2161_v58 = vsub.f32 %v8183_v24, %v9908_v48  ;;  %v8222_v6 = vand.u32 4294901760, %v2004_v26  ;;  %v8230_v34 = vsub.f32 %v7945_v19, %v2060_v62  ;;  %v10280_v62 = vld [vmem:[#allocation64_spill] sm:$0xff]  ;;  %v2011_v24 = vld [vmem:[%s8089_s6 + $0x60] sm:$0xff] }
 0x119   : > { %1451 = vmatprep.mubr.f32.mxu1 %v10275_v59  ;;  %5629 = vmatmul.mubr.f32.vlgmr.msra.gmra.mrb[0].mxu0 %v2142_v47  ;;  %v2306_v21 = vsub.f32 %v8188_v20, %v9910_v57  ;;  %10276 = vst [vmem:[#allocation45_spill] sm:$0xff] %v8220_v53  ;;  %v2313_v14 = vsub.f32 %v8196_v10, %v9911_v50  ;;  %v2006_v59 = vld [vmem:[%s8089_s6 + $0x38] sm:$0xff]  ;;  %v10278_v29 = vand.u32 4294901760, %v10205_v1  ;;  %v9914_v50 = vand.u32 4294901760, %v8220_v53 }
 0x11a   : > { %10277 = vst [vmem:[#allocation48_spill] sm:$0xff] %v8222_v6  ;;  %v4779_v33 = vpop.f32.mrb[10].mxu1  ;;  %v2152_v52 = vand.u32 4294901760, %v2151_v2  ;;  %v8235_v47 = vsub.f32 %v7950_v27, %v2063_v4  ;;  %6495 = vmatpush3.bf16.msra.mxu0 %v6492_v16  ;;  %v2162_v2 = vand.u32 4294901760, %v2161_v58  ;;  %v8243_v43 = vsub.f32 %v2004_v26, %v8222_v6 }
 0x11b   : > { %v4780_v48 = vpop.f32.mrb[11].mxu1  ;;  %v2307_v57 = vand.u32 4294901760, %v2306_v21  ;;  %v10281_v13 = vand.u32 4294901760, %v10280_v62  ;;  %v2314_v27 = vand.u32 4294901760, %v2313_v14  ;;  %v9915_v4 = vand.u32 4294901760, %v8230_v34 }
 0x11c   : > { %1455 = vmatmul.mubr.f32.gmra.mrb[116].mxu1 %v10278_v29  ;;  %10279 = vst [vmem:[#allocation50_spill] sm:$0xff] %v8243_v43  ;;  %v8245_v19 = vadd.f32 %v4780_v48, %v4779_v33  ;;  %5631 = vmatprep.mubr.f32.mxu0 %v2152_v52  ;;  %v9916_v1 = vand.u32 4294901760, %v8235_v47  ;;  %v2171_v29 = vsub.f32 %v8220_v53, %v9914_v50  ;;  %v9921_v26 = vand.u32 4294901760, %v8243_v43 }
 0x11d   : > { %1462 = vmatprep.mubr.f32.mxu1 %v10281_v13  ;;  %5632 = vmatmul.mubr.f32.gmra.mrb[2].mxu0 %v2162_v2  ;;  %v8255_v48 = vand.u32 4294901760, %v2005_v61  ;;  %v8257_v16 = vand.u32 4294901760, %v2006_v59  ;;  %v6496_v58 = vpack.c.bf16 %v2314_v27, %v2307_v57  ;;  %v2320_v21 = vsub.f32 %v8230_v34, %v9915_v4  ;;  %v10284_v2 = vld [vmem:[#allocation66_spill] sm:$0xff] }
 0x11e   : > { %v4782_v13 = vpop.f32.mrb[12].mxu1  ;;  %v2327_v33 = vsub.f32 %v8235_v47, %v9916_v1  ;;  %v8268_v52 = vsub.f32 %v7977_v32, %v2066_v12  ;;  %v10285_v62 = vand.u32 4294901760, %v10284_v2  ;;  %v2172_v50 = vand.u32 4294901760, %v2171_v29  ;;  %v2007_v1 = vld [vmem:[%s8089_s6 + $0x40] sm:$0xff]  ;;  %v10288_v32 = vld [vmem:[#allocation68_spill] sm:$0xff] }
 0x11f   : > { %10282 = vst [vmem:[#allocation52_spill] sm:$0xff] %v8255_v48  ;;  %10283 = vst [vmem:[#allocation53_spill] sm:$0xff] %v8257_v16  ;;  %v4783_v14 = vpop.f32.mrb[13].mxu1  ;;  %v2181_v57 = vsub.f32 %v8243_v43, %v9921_v26  ;;  %v8276_v27 = vsub.f32 %v2005_v61, %v8255_v48  ;;  %v8279_v4 = vsub.f32 %v2006_v59, %v8257_v16  ;;  %v10289_v12 = vand.u32 4294901760, %v10288_v32 }
 0x120   : > { %1466 = vmatmul.mubr.f32.gmra.mrb[118].mxu1 %v10285_v62  ;;  %v8283_v41 = vadd.f32 %v4783_v14, %v4782_v13  ;;  %6497 = vmatprep.subr.bf16.mxu0 %v6496_v58  ;;  %v2321_v2 = vand.u32 4294901760, %v2320_v21  ;;  %v2328_v29 = vand.u32 4294901760, %v2327_v33  ;;  %v9924_v62 = vand.u32 4294901760, %v8268_v52 }
 0x121   : > { %10286 = vst [vmem:[#allocation57_spill] sm:$0xff] %v8276_v27  ;;  %10287 = vst [vmem:[#allocation59_spill] sm:$0xff] %v8279_v4  ;;  %1473 = vmatprep.mubr.f32.mxu1 %v10289_v12  ;;  %6499 = vmatpush3.bf16.msra.mxu0 %v6496_v58  ;;  %v2182_v26 = vand.u32 4294901760, %v2181_v57  ;;  %v9929_v61 = vand.u32 4294901760, %v8276_v27  ;;  %v9930_v59 = vand.u32 4294901760, %v8279_v4  ;;  %v8293_v13 = vsub.f32 %v7982_v37, %v10290_v8  ;;  %v10293_v57 = vld [vmem:[#allocation69_spill] sm:$0xff] }
 0x122   : > { %5634 = vmatprep.mubr.f32.mxu0 %v2172_v50  ;;  %v4785_v14 = vpop.f32.mrb[14].mxu1  ;;  %v6500_v32 = vpack.c.bf16 %v2328_v29, %v2321_v2  ;;  %v2334_v21 = vsub.f32 %v8268_v52, %v9924_v62  ;;  %v8298_v33 = vand.u32 4294901760, %v2007_v1  ;;  %v8300_v50 = vand.u32 4294901760, %v2008_v11  ;;  %v2010_v2 = vld [vmem:[%s8089_s6 + $0x58] sm:$0xff] }
 0x123   : > { %v4786_v58 = vpop.f32.mrb[15].mxu1  ;;  %v10294_v12 = vand.u32 4294901760, %v10293_v57  ;;  %5635 = vmatmul.mubr.f32.gmra.mrb[4].mxu0 %v2182_v26  ;;  %v2191_v37 = vsub.f32 %v8276_v27, %v9929_v61  ;;  %v2201_v8 = vsub.f32 %v8279_v4, %v9930_v59  ;;  %v10295_v29 = vand.u32 4294901760, %v8009_v38  ;;  %v10296_v57 = vld [vmem:[#allocation73_spill] sm:$0xff] }
 0x124   : > { %10291 = vst [vmem:[#allocation60_spill] sm:$0xff] %v8298_v33  ;;  %10292 = vst [vmem:[#allocation61_spill] sm:$0xff] %v8300_v50  ;;  %v8317_v56 = vadd.f32 %v4786_v58, %v4785_v14  ;;  %v10297_v26 = vand.u32 4294901760, %v10296_v57  ;;  %6501 = vmatprep.subr.bf16.mxu0 %v6500_v32  ;;  %v8322_v61 = vsub.f32 %v2007_v1, %v8298_v33  ;;  %v10301_v1 = vand.u32 4294901760, %v8014_v15 }
 0x125   : > { %1477 = vmatmul.mubr.f32.gmra.mrb[120].mxu1 %v10294_v12  ;;  %v8314_v62 = vsub.f32 %v8009_v38, %v10295_v29  ;;  %v2335_v12 = vand.u32 4294901760, %v2334_v21  ;;  %v8325_v59 = vsub.f32 %v2008_v11, %v8300_v50  ;;  %6503 = vmatpush3.bf16.msra.mxu0 %v6500_v32  ;;  %v2192_v4 = vand.u32 4294901760, %v2191_v37 }
 0x126   : > { %1484 = vmatprep.mubr.f32.mxu1 %v10297_v26  ;;  %10298 = vst [vmem:[#allocation64_spill] sm:$0xff] %v8322_v61  ;;  %v2202_v27 = vand.u32 4294901760, %v2201_v8  ;;  %v10300_v38 = vand.u32 4294901760, %v8293_v13  ;;  %v4788_v29 = vpop.f32.mrb[16].mxu1  ;;  %v8337_v11 = vsub.f32 %v8014_v15, %v10301_v1  ;;  %v8339_v32 = vand.u32 4294901760, %v2009_v51  ;;  %v10303_v8 = vld [vmem:[#allocation75_spill] sm:$0xff] }
 0x127   : > { %10299 = vst [vmem:[#allocation66_spill] sm:$0xff] %v8325_v59  ;;  %v9941_v58 = vand.u32 4294901760, %v8314_v62  ;;  %v4789_v37 = vpop.f32.mrb[17].mxu1  ;;  %v10304_v26 = vand.u32 4294901760, %v10303_v8  ;;  %5637 = vmatprep.mubr.f32.mxu0 %v2192_v4  ;;  %v8346_v21 = vand.u32 4294901760, %v2010_v2  ;;  %v10306_v43 = vand.u32 4294901760, %v8043_v60 }
 0x128   : > { %v2341_v14 = vsub.f32 %v8293_v13, %v10300_v38  ;;  %10302 = vst [vmem:[#allocation68_spill] sm:$0xff] %v8339_v32  ;;  %v8353_v1 = vadd.f32 %v4789_v37, %v4788_v29  ;;  %v10309_v53 = vand.u32 4294901760, %v10308_v3  ;;  %5638 = vmatmul.mubr.f32.gmra.mrb[6].mxu0 %v2202_v27  ;;  %v10310_v4 = vand.u32 4294901760, %v8322_v61 }
 0x129   : > { %1488 = vmatmul.mubr.f32.gmra.mrb[122].mxu1 %v10304_v26  ;;  %v2348_v57 = vsub.f32 %v8314_v62, %v9941_v58  ;;  %10305 = vst [vmem:[#allocation69_spill] sm:$0xff] %v8346_v21  ;;  %v8351_v15 = vsub.f32 %v8043_v60, %v10306_v43  ;;  %v10311_v8 = vand.u32 4294901760, %v8325_v59  ;;  %v9948_v58 = vand.u32 4294901760, %v8337_v11 }
 0x12a   : > { %v2342_v38 = vand.u32 4294901760, %v2341_v14  ;;  %10307 = vst [vmem:[#allocation73_spill] sm:$0xff] %v8353_v1  ;;  %1495 = vmatprep.mubr.f32.mxu1 %v10309_v53  ;;  %v2211_v14 = vsub.f32 %v8322_v61, %v10310_v4  ;;  %v8366_v60 = vsub.f32 %v2009_v51, %v8339_v32  ;;  %v8369_v3 = vsub.f32 %v2010_v2, %v8346_v21  ;;  %v2012_v53 = vld [vmem:[%s8089_s6 + $0x68] sm:$0xff]  ;;  %v4791_v27 = vpop.f32.mrb[18].mxu1 }
 0x12b   : > { %v2221_v26 = vsub.f32 %v8325_v59, %v10311_v8  ;;  %v2349_v43 = vand.u32 4294901760, %v2348_v57  ;;  %v2355_v4 = vsub.f32 %v8337_v11, %v9948_v58  ;;  %v4792_v59 = vpop.f32.mrb[19].mxu1  ;;  %v10315_v57 = vand.u32 4294901760, %v8048_v54  ;;  %v10318_v58 = vld [vmem:[#allocation79_spill] sm:$0xff] }
 0x12c   : > { %v6504_v42 = vpack.c.bf16 %v2342_v38, %v2335_v12  ;;  %10312 = vst [vmem:[#allocation75_spill] sm:$0xff] %v8366_v60  ;;  %10313 = vst [vmem:[#allocation76_spill] sm:$0xff] %v8369_v3  ;;  %v2212_v29 = vand.u32 4294901760, %v2211_v14  ;;  %v10314_v12 = vand.u32 4294901760, %v7696_v36  ;;  %v8385_v14 = vand.u32 4294901760, %v2011_v24 }
 0x12d   : > { %v2222_v37 = vand.u32 4294901760, %v2221_v26  ;;  %v8383_v38 = vsub.f32 %v8048_v54, %v10315_v57  ;;  %v8387_v26 = vadd.f32 %v4792_v59, %v4791_v27  ;;  %v10319_v8 = vand.u32 4294901760, %v10318_v58 }
 0x12e   : > { %1499 = vmatmul.mubr.f32.gmra.mrb[124].mxu1 %v10314_v12  ;;  %6505 = vmatprep.subr.bf16.mxu0 %v6504_v42  ;;  %10316 = vst [vmem:[#allocation80_spill] sm:$0xff] %v8385_v14  ;;  %v2356_v36 = vand.u32 4294901760, %v2355_v4  ;;  %v10320_v12 = vand.u32 4294901760, %v8351_v15  ;;  %v8394_v51 = vand.u32 4294901760, %v2012_v53  ;;  %v10322_v54 = vand.u32 4294901760, %v8366_v60  ;;  %v4794_v4 = vpop.f32.mrb[20].mxu1 }
 0x12f   : > { %10317 = vst [vmem:[#allocation81_spill] sm:$0xff] %v8387_v26  ;;  %1506 = vmatprep.mubr.f32.mxu1 %v10319_v8  ;;  %6507 = vmatpush3.bf16.msra.mxu0 %v6504_v42  ;;  %v10323_v59 = vand.u32 4294901760, %v8369_v3  ;;  %v8404_v42 = vsub.f32 %v2011_v24, %v8385_v14  ;;  %v2014_v26 = vld [vmem:[%s8089_s6 + $0x78] sm:$0xff]  ;;  %v10327_v27 = vand.u32 4294901760, %v7738_v22  ;;  %v10331_v22 = vand.u32 4294901760, %v8084_v31 }
 0x130   : > { %v2362_v2 = vsub.f32 %v8351_v15, %v10320_v12  ;;  %10321 = vst [vmem:[#allocation79_spill] sm:$0xff] %v8394_v51  ;;  %5640 = vmatprep.mubr.f32.mxu0 %v2212_v29  ;;  %v2231_v57 = vsub.f32 %v8366_v60, %v10322_v54  ;;  %v6508_v8 = vpack.c.bf16 %v2356_v36, %v2349_v43  ;;  %v10326_v29 = vand.u32 4294901760, %v8079_v18  ;;  %v2013_v60 = vld [vmem:[%s8089_s6 + $0x70] sm:$0xff] }
 0x131   : > { %v2241_v58 = vsub.f32 %v8369_v3, %v10323_v59  ;;  %10324 = vst [vmem:[#allocation82_spill] sm:$0xff] %v8404_v42  ;;  %5641 = vmatmul.mubr.f32.gmra.mrb[8].mxu0 %v2222_v37  ;;  %v8407_v61 = vsub.f32 %v2012_v53, %v8394_v51  ;;  %v4795_v59 = vpop.f32.mrb[21].mxu1  ;;  %v10328_v37 = vand.u32 4294901760, %v8383_v38  ;;  %v9955_v53 = vand.u32 4294901760, %v8404_v42  ;;  %v10330_v36 = vld [vmem:[#allocation16_spill] sm:$0xff] }
 0x132   : > { %v2363_v12 = vand.u32 4294901760, %v2362_v2  ;;  %v8412_v54 = vsub.f32 %v8079_v18, %v10326_v29  ;;  %1510 = vmatmul.mubr.f32.gmra.mrb[126].mxu1 %v10327_v27  ;;  %v2232_v24 = vand.u32 4294901760, %v2231_v57  ;;  %v8422_v2 = vadd.f32 %v4795_v59, %v4794_v4  ;;  %6509 = vmatprep.subr.bf16.mxu0 %v6508_v8 }
 0x133   : > { %10325 = vst [vmem:[#allocation83_spill] sm:$0xff] %v8407_v61  ;;  %v2242_v3 = vand.u32 4294901760, %v2241_v58  ;;  %v2369_v43 = vsub.f32 %v8383_v38, %v10328_v37  ;;  %1676 = vmatprep.mubr.f32.mxu1 %v10330_v36  ;;  %v9958_v18 = vand.u32 4294901760, %v8407_v61  ;;  %v8430_v57 = vsub.f32 %v8084_v31, %v10331_v22  ;;  %6511 = vmatpush3.bf16.msra.mxu0 %v6508_v8  ;;  %v4797_v37 = vpop.f32.mrb[22].mxu1 }
 0x134   : > { %10329 = vst [vmem:[#allocation84_spill] sm:$0xff] %v8422_v2  ;;  %5643 = vmatprep.mubr.f32.mxu0 %v2232_v24  ;;  %v2251_v27 = vsub.f32 %v8404_v42, %v9955_v53  ;;  %v8435_v4 = vand.u32 4294901760, %v2013_v60  ;;  %v8437_v59 = vand.u32 4294901760, %v2014_v26  ;;  %v10334_v31 = vand.u32 4294901760, %v8412_v54  ;;  %v4798_v53 = vpop.f32.mrb[23].mxu1  ;;  %v10336_v42 = vld [vmem:[#allocation17_spill] sm:$0xff] }
 0x135   : > { %v2370_v58 = vand.u32 4294901760, %v2369_v43  ;;  %5644 = vmatmul.mubr.f32.gmra.mrb[10].mxu0 %v2242_v3  ;;  %v2261_v29 = vsub.f32 %v8407_v61, %v9958_v18  ;;  %v10335_v43 = vand.u32 4294901760, %v8126_v63  ;;  %v8458_v61 = vadd.f32 %v4798_v53, %v4797_v37  ;;  %v10341_v24 = vld [vmem:[#allocation22_spill] sm:$0xff] }
 0x136   : > { %10332 = vst [vmem:[#allocation85_spill] sm:$0xff] %v8435_v4  ;;  %10333 = vst [vmem:[#allocation86_spill] sm:$0xff] %v8437_v59  ;;  %v2376_v8 = vsub.f32 %v8412_v54, %v10334_v31  ;;  %1678 = vmatmul.mubr.f32.vlgmr.msra.gmra.mrb[128].mxu1 %v10336_v42  ;;  %v2252_v3 = vand.u32 4294901760, %v2251_v27  ;;  %v8453_v36 = vsub.f32 %v2013_v60, %v8435_v4  ;;  %v10340_v31 = vld [vmem:[#allocation3_spill] sm:$0xff] }
 0x137   : > { %v8449_v22 = vsub.f32 %v8126_v63, %v10335_v43  ;;  %v6512_v2 = vpack.c.bf16 %v2370_v58, %v2363_v12  ;;  %v8456_v18 = vsub.f32 %v2014_v26, %v8437_v59  ;;  %10339 = vst [vmem:[#allocation89_spill] sm:$0xff] %v8458_v61  ;;  %6431 = vmatpush3.bf16.msra.mxu1 %v10340_v31  ;;  %v2262_v1 = vand.u32 4294901760, %v2261_v29  ;;  %v10343_v12 = vld [vmem:[#allocation4_spill] sm:$0xff]  ;;  %v4800_v29 = vpop.f32.mrb[24].mxu1  ;;  %v10346_v31 = vld [vmem:[#allocation23_spill] sm:$0xff] }
 0x138   : > { %10337 = vst [vmem:[#allocation87_spill] sm:$0xff] %v8453_v36  ;;  %1683 = vmatprep.mubr.f32.mxu1 %v10341_v24  ;;  %v2377_v63 = vand.u32 4294901760, %v2376_v8  ;;  %v10342_v43 = vand.u32 4294901760, %v8430_v57  ;;  %6433 = vmatprep.subr.bf16.mxu1 %v10343_v12  ;;  %v9961_v60 = vand.u32 4294901760, %v8453_v36  ;;  %v10344_v58 = vand.u32 4294901760, %v8131_v23  ;;  %v4801_v8 = vpop.f32.mrb[25].mxu1 }
 0x139   : > { %10338 = vst [vmem:[#allocation88_spill] sm:$0xff] %v8456_v18  ;;  %6513 = vmatprep.subr.bf16.mxu0 %v6512_v2  ;;  %v9964_v26 = vand.u32 4294901760, %v8456_v18  ;;  %v9967_v53 = vand.u32 4294901760, %v8449_v22  ;;  %5646 = vmatprep.mubr.f32.mxu0 %v2252_v3  ;;  %v8485_v3 = vadd.f32 %v4801_v8, %v4800_v29  ;;  %v10350_v24 = vld [vmem:[#allocation28_spill] sm:$0xff] }
 0x13a   : > { %v2383_v42 = vsub.f32 %v8430_v57, %v10342_v43  ;;  %v8472_v27 = vsub.f32 %v8131_v23, %v10344_v58  ;;  %6515 = vmatpush3.bf16.msra.mxu0 %v6512_v2  ;;  %1685 = vmatmul.mubr.f32.gmra.mrb[130].mxu1 %v10346_v31  ;;  %v2271_v43 = vsub.f32 %v8453_v36, %v9961_v60  ;;  %v10348_v58 = vld [vmem:[#allocation5_spill] sm:$0xff]  ;;  %v10349_v31 = vld [vmem:[#allocation6_spill] sm:$0xff] }
 0x13b   : > { %5647 = vmatmul.mubr.f32.gmra.mrb[12].mxu0 %v2262_v1  ;;  %v2281_v12 = vsub.f32 %v8456_v18, %v9964_v26  ;;  %v2390_v23 = vsub.f32 %v8449_v22, %v9967_v53  ;;  %6435 = vmatpush3.bf16.msra.mxu1 %v10348_v58  ;;  %v4803_v18 = vpop.f32.mrb[26].mxu1  ;;  %v10351_v58 = vld [vmem:[#allocation30_spill] sm:$0xff] }
 0x13c   : > { %10345 = vst [vmem:[#allocation3_spill] sm:$0xff] %v8472_v27  ;;  %v2384_v37 = vand.u32 4294901760, %v2383_v42  ;;  %v9968_v2 = vand.u32 4294901760, %v8472_v27  ;;  %v10347_v42 = vld [vmem:[#allocation26_spill] sm:$0xff]  ;;  %6437 = vmatprep.subr.bf16.mxu1 %v10349_v31  ;;  %v2272_v60 = vand.u32 4294901760, %v2271_v43  ;;  %v4804_v61 = vpop.f32.mrb[27].mxu1 }
 0x13d   : > { %1690 = vmatprep.mubr.f32.mxu1 %v10347_v42  ;;  %v2391_v36 = vand.u32 4294901760, %v2390_v23  ;;  %v2282_v53 = vand.u32 4294901760, %v2281_v12  ;;  %v8494_v8 = vadd.f32 %v4804_v61, %v4803_v18  ;;  %v6524_v12 = vpack.c.bf16 %v8117_v5, %v8112_v7  ;;  %v10355_v61 = vld [vmem:[#allocation32_spill] sm:$0xff]  ;;  %v10356_v18 = vld [vmem:[#allocation9_spill] sm:$0xff] }
 0x13e   : > { %v6516_v1 = vpack.c.bf16 %v2384_v37, %v2377_v63  ;;  %v2397_v26 = vsub.f32 %v8472_v27, %v9968_v2  ;;  %1692 = vmatmul.mubr.f32.gmra.mrb[132].mxu1 %v10350_v24  ;;  %v10352_v63 = vld [vmem:[#allocation7_spill] sm:$0xff]  ;;  %v10353_v37 = vld [vmem:[#allocation8_spill] sm:$0xff]  ;;  %5649 = vmatprep.mubr.f32.mxu0 %v2272_v60 }
 0x13f   : > { %1697 = vmatprep.mubr.f32.mxu1 %v10351_v58  ;;  %6439 = vmatpush3.bf16.msra.mxu1 %v10352_v63  ;;  %v4806_v43 = vpop.f32.mrb[28].mxu1  ;;  %v10354_v2 = vld [vmem:[#allocation31_spill] sm:$0xff] }
 0x140   : > { %6517 = vmatprep.subr.bf16.mxu0 %v6516_v1  ;;  %v2398_v29 = vand.u32 4294901760, %v2397_v26  ;;  %6441 = vmatprep.subr.bf16.mxu1 %v10353_v37  ;;  %v4807_v23 = vpop.f32.mrb[29].mxu1  ;;  %v10360_v37 = vld [vmem:[#allocation38_spill] sm:$0xff] }
 0x141   : > { %6519 = vmatpush3.bf16.msra.mxu0 %v6516_v1  ;;  %v8502_v26 = vadd.f32 %v4807_v23, %v4806_v43  ;;  %v10357_v1 = vld [vmem:[#allocation10_spill] sm:$0xff]  ;;  %v10361_v43 = vld [vmem:[#allocation11_spill] sm:$0xff]  ;;  %v10362_v23 = vld [vmem:[#allocation12_spill] sm:$0xff] }
 0x142   : > { %v6520_v31 = vpack.c.bf16 %v2398_v29, %v2391_v36  ;;  %5650 = vmatmul.mubr.f32.gmra.mrb[14].mxu0 %v2282_v53  ;;  %1699 = vmatmul.mubr.f32.gmra.mrb[134].mxu1 %v10354_v2  ;;  %v10358_v53 = vld [vmem:[#allocation35_spill] sm:$0xff]  ;;  %v6528_v29 = vpack.c.bf16 %v8196_v10, %v8188_v20 }
 0x143   : > { %1704 = vmatprep.mubr.f32.mxu1 %v10355_v61  ;;  %6443 = vmatpush3.bf16.msra.mxu1 %v10356_v18  ;;  %v4809_v60 = vpop.f32.mrb[30].mxu1 }
 0x144   : > { %6521 = vmatprep.subr.bf16.mxu0 %v6520_v31  ;;  %6445 = vmatprep.subr.bf16.mxu1 %v10357_v1  ;;  %v4810_v36 = vpop.f32.mrb[31].mxu1  ;;  %v10363_v1 = vld [vmem:[#allocation39_spill] sm:$0xff] }
 0x145   : > { %6523 = vmatpush3.bf16.msra.mxu0 %v6520_v31  ;;  %5684 = vmatprep.mubr.f32.mxu0 %v8096_v35  ;;  %v8511_v63 = vadd.f32 %v4810_v36, %v4809_v60  ;;  %v6532_v60 = vpack.c.bf16 %v8235_v47, %v8230_v34  ;;  %v10364_v35 = vld [vmem:[#allocation40_spill] sm:$0xff] }
 0x146   : > { %6525 = vmatprep.subr.bf16.mxu0 %v6524_v12  ;;  %1706 = vmatmul.mubr.f32.gmra.mrb[136].mxu1 %v10358_v53 }
 0x147   : > { %10359 = vst [vmem:[#allocation4_spill] sm:$0xff] %v8511_v63  ;;  %1711 = vmatprep.mubr.f32.mxu1 %v10360_v37  ;;  %6447 = vmatpush3.bf16.msra.mxu1 %v10361_v43  ;;  %v4844_v31 = vpop.f32.mrb[32].mxu1  ;;  %v10365_v63 = vld [vmem:[#allocation13_spill] sm:$0xff]  ;;  %v10366_v43 = vld [vmem:[#allocation14_spill] sm:$0xff] }
 0x148   : > { %6449 = vmatprep.subr.bf16.mxu1 %v10362_v23  ;;  %5685 = vmatmul.mubr.f32.vlgmr.msra.gmra.mrb[0].mxu0 %v8107_v46  ;;  %v4845_v18 = vpop.f32.mrb[33].mxu1  ;;  %v10367_v46 = vld [vmem:[#allocation42_spill] sm:$0xff] }
 0x149   : > { %6527 = vmatpush3.bf16.msra.mxu0 %v6524_v12  ;;  %5687 = vmatprep.mubr.f32.mxu0 %v8148_v28  ;;  %v4846_v36 = vadd.f32 %v4845_v18, %v4844_v31  ;;  %v6536_v31 = vpack.c.bf16 %v8293_v13, %v8268_v52 }
 0x14a   : > { %1713 = vmatmul.mubr.f32.gmra.mrb[138].mxu1 %v10363_v1  ;;  %6529 = vmatprep.subr.bf16.mxu0 %v6528_v29 }
 0x14b   : > { %1718 = vmatprep.mubr.f32.mxu1 %v10364_v35  ;;  %6451 = vmatpush3.bf16.msra.mxu1 %v10365_v63  ;;  %v8526_v12 = vadd.f32 %v4846_v36, %v8032_v55  ;;  %v4847_v23 = vpop.f32.mrb[34].mxu1  ;;  %v10368_v63 = vld [vmem:[#allocation46_spill] sm:$0xff] }
 0x14c   : > { %6453 = vmatprep.subr.bf16.mxu1 %v10366_v43  ;;  %5688 = vmatmul.mubr.f32.gmra.mrb[2].mxu0 %v8163_v17  ;;  %v4848_v28 = vpop.f32.mrb[35].mxu1  ;;  %v10369_v43 = vld [vmem:[#allocation15_spill] sm:$0xff]  ;;  %v10370_v17 = vld [vmem:[#allocation18_spill] sm:$0xff] }
 0x14d   : > { %6531 = vmatpush3.bf16.msra.mxu0 %v6528_v29  ;;  %5690 = vmatprep.mubr.f32.mxu0 %v8203_v44  ;;  %v4849_v18 = vadd.f32 %v4848_v28, %v4847_v23  ;;  %v10371_v44 = vld [vmem:[#allocation47_spill] sm:$0xff]  ;;  %v6540_v28 = vpack.c.bf16 %v8337_v11, %v8314_v62 }
 0x14e   : > { %1720 = vmatmul.mubr.f32.gmra.mrb[140].mxu1 %v10367_v46  ;;  %6533 = vmatprep.subr.bf16.mxu0 %v6532_v60 }
 0x14f   : > { %1725 = vmatprep.mubr.f32.mxu1 %v10368_v63  ;;  %6455 = vmatpush3.bf16.msra.mxu1 %v10369_v43  ;;  %v8537_v55 = vadd.f32 %v4849_v18, %v8068_v9  ;;  %v4850_v29 = vpop.f32.mrb[36].mxu1  ;;  %v10372_v43 = vld [vmem:[#allocation49_spill] sm:$0xff] }
 0x150   : > { %6457 = vmatprep.subr.bf16.mxu1 %v10370_v17  ;;  %5691 = vmatmul.mubr.f32.gmra.mrb[4].mxu0 %v8222_v6  ;;  %v4851_v36 = vpop.f32.mrb[37].mxu1  ;;  %v10373_v17 = vld [vmem:[#allocation19_spill] sm:$0xff]  ;;  %v10375_v6 = vld [vmem:[#allocation54_spill] sm:$0xff] }
 0x151   : > { %6535 = vmatpush3.bf16.msra.mxu0 %v6532_v60  ;;  %5693 = vmatprep.mubr.f32.mxu0 %v8255_v48  ;;  %v4852_v23 = vadd.f32 %v4851_v36, %v4850_v29  ;;  %v10374_v48 = vld [vmem:[#allocation51_spill] sm:$0xff]  ;;  %v6544_v29 = vpack.c.bf16 %v8383_v38, %v8351_v15 }
 0x152   : > { %1727 = vmatmul.mubr.f32.gmra.mrb[142].mxu1 %v10371_v44  ;;  %6537 = vmatprep.subr.bf16.mxu0 %v6536_v31 }
 0x153   : > { %1732 = vmatprep.mubr.f32.mxu1 %v10372_v43  ;;  %6459 = vmatpush3.bf16.msra.mxu1 %v10373_v17  ;;  %v8547_v9 = vadd.f32 %v4852_v23, %v8119_v0  ;;  %v4853_v60 = vpop.f32.mrb[38].mxu1  ;;  %v10376_v23 = vld [vmem:[#allocation55_spill] sm:$0xff] }
 0x154   : > { %5694 = vmatmul.mubr.f32.gmra.mrb[6].mxu0 %v8257_v16  ;;  %v4854_v18 = vpop.f32.mrb[39].mxu1 }
 0x155   : > { %6539 = vmatpush3.bf16.msra.mxu0 %v6536_v31  ;;  %5696 = vmatprep.mubr.f32.mxu0 %v8298_v33  ;;  %v4855_v36 = vadd.f32 %v4854_v18, %v4853_v60  ;;  %v6548_v33 = vpack.c.bf16 %v8430_v57, %v8412_v54  ;;  %v10377_v60 = vld [vmem:[#allocation56_spill] sm:$0xff] }
 0x156   : > { %1734 = vmatmul.mubr.f32.gmra.mrb[144].mxu1 %v10374_v48  ;;  %6541 = vmatprep.subr.bf16.mxu0 %v6540_v28 }
 0x157   : > { %1739 = vmatprep.mubr.f32.mxu1 %v10375_v6  ;;  %v8556_v17 = vadd.f32 %v4855_v36, %v8165_v30  ;;  %v4856_v0 = vpop.f32.mrb[40].mxu1  ;;  %v10378_v36 = vld [vmem:[#allocation58_spill] sm:$0xff] }
 0x158   : > { %5697 = vmatmul.mubr.f32.gmra.mrb[8].mxu0 %v8300_v50  ;;  %v4857_v31 = vpop.f32.mrb[41].mxu1 }
 0x159   : > { %6543 = vmatpush3.bf16.msra.mxu0 %v6540_v28  ;;  %5699 = vmatprep.mubr.f32.mxu0 %v8339_v32  ;;  %v4858_v16 = vadd.f32 %v4857_v31, %v4856_v0  ;;  %v6552_v32 = vpack.c.bf16 %v8472_v27, %v8449_v22  ;;  %v10379_v0 = vld [vmem:[#allocation62_spill] sm:$0xff]  ;;  %v10416_v27 = vld [vmem:[#allocation27_spill] sm:$0xff] }
 0x15a   : > { %1741 = vmatmul.mubr.f32.gmra.mrb[146].mxu1 %v10376_v23  ;;  %6545 = vmatprep.subr.bf16.mxu0 %v6544_v29 }
 0x15b   : > { %1746 = vmatprep.mubr.f32.mxu1 %v10377_v60  ;;  %v8565_v18 = vadd.f32 %v4858_v16, %v8205_v39  ;;  %v4859_v30 = vpop.f32.mrb[42].mxu1 }
 0x15c   : > { %5700 = vmatmul.mubr.f32.gmra.mrb[10].mxu0 %v8346_v21  ;;  %v4860_v28 = vpop.f32.mrb[43].mxu1  ;;  %v10382_v21 = vld [vmem:[#allocation65_spill] sm:$0xff] }
 0x15d   : > { %6547 = vmatpush3.bf16.msra.mxu0 %v6544_v29  ;;  %5702 = vmatprep.mubr.f32.mxu0 %v8385_v14  ;;  %v4861_v50 = vadd.f32 %v4860_v28, %v4859_v30  ;;  %v10381_v29 = vld [vmem:[#allocation63_spill] sm:$0xff] }
 0x15e   : > { %1748 = vmatmul.mubr.f32.gmra.mrb[148].mxu1 %v10378_v36  ;;  %6549 = vmatprep.subr.bf16.mxu0 %v6548_v33 }
 0x15f   : > { %1753 = vmatprep.mubr.f32.mxu1 %v10379_v0  ;;  %v8574_v31 = vadd.f32 %v4861_v50, %v8245_v19  ;;  %v4862_v39 = vpop.f32.mrb[44].mxu1  ;;  %v10410_v0 = vld [vmem:[#allocation22_spill] sm:$0xff] }
 0x160   : > { %5703 = vmatmul.mubr.f32.gmra.mrb[12].mxu0 %v8394_v51  ;;  %v4863_v16 = vpop.f32.mrb[45].mxu1  ;;  %v10389_v51 = vld [vmem:[#allocation72_spill] sm:$0xff] }
 0x161   : > { %10380 = vst [vmem:[#allocation26_spill] sm:$0xff] %v8574_v31  ;;  %6551 = vmatpush3.bf16.msra.mxu0 %v6548_v33  ;;  %5705 = vmatprep.mubr.f32.mxu0 %v8435_v4  ;;  %v4864_v14 = vadd.f32 %v4863_v16, %v4862_v39  ;;  %v10384_v33 = vld [vmem:[#allocation67_spill] sm:$0xff]  ;;  %v10385_v4 = vld [vmem:[#allocation70_spill] sm:$0xff]  ;;  %v10409_v31 = vld [vmem:[#allocation25_spill] sm:$0xff] }
 0x162   : > { %1755 = vmatmul.mubr.f32.gmra.mrb[150].mxu1 %v10381_v29  ;;  %6553 = vmatprep.subr.bf16.mxu0 %v6552_v32  ;;  %v10403_v29 = vld [vmem:[#allocation16_spill] sm:$0xff] }
 0x163   : > { %1760 = vmatprep.mubr.f32.mxu1 %v10382_v21  ;;  %v8581_v30 = vadd.f32 %v4864_v14, %v8283_v41  ;;  %v4865_v28 = vpop.f32.mrb[46].mxu1  ;;  %v10388_v14 = vld [vmem:[#allocation20_spill] sm:$0xff] }
 0x164   : > { %5706 = vmatmul.mubr.f32.gmra.mrb[14].mxu0 %v8437_v59  ;;  %v4866_v19 = vpop.f32.mrb[47].mxu1  ;;  %v10402_v21 = vld [vmem:[#allocation24_spill] sm:$0xff] }
 0x165   : > { %10383 = vst [vmem:[#allocation5_spill] sm:$0xff] %v8581_v30  ;;  %6555 = vmatpush3.bf16.msra.mxu0 %v6552_v32  ;;  %5740 = vmatprep.mubr.f32.mxu0 %v8134_v25  ;;  %v4867_v50 = vadd.f32 %v4866_v19, %v4865_v28  ;;  %v10387_v32 = vld [vmem:[#allocation71_spill] sm:$0xff]  ;;  %v10391_v19 = vld [vmem:[#allocation73_spill] sm:$0xff] }
 0x166   : > { %1762 = vmatmul.mubr.f32.gmra.mrb[152].mxu1 %v10384_v33  ;;  %6557 = vmatprep.subr.bf16.mxu0 %v7902_v45  ;;  %v10390_v28 = vld [vmem:[#allocation43_spill] sm:$0xff]  ;;  %v10395_v33 = vld [vmem:[#allocation21_spill] sm:$0xff] }
 0x167   : > { %1767 = vmatprep.mubr.f32.mxu1 %v10385_v4  ;;  %v8589_v39 = vadd.f32 %v4867_v50, %v8317_v56  ;;  %v4868_v16 = vpop.f32.mrb[48].mxu1  ;;  %v10393_v50 = vld [vmem:[#allocation45_spill] sm:$0xff] }
 0x168   : > { %5741 = vmatmul.mubr.f32.vlgmr.msra.gmra.mrb[0].mxu0 %v8141_v40  ;;  %v4869_v41 = vpop.f32.mrb[49].mxu1  ;;  %v10396_v30 = vld [vmem:[#allocation77_spill] sm:$0xff] }
 0x169   : > { %10386 = vst [vmem:[#allocation6_spill] sm:$0xff] %v8589_v39  ;;  %6559 = vmatpush3.bf16.msra.mxu0 %v7902_v45  ;;  %5743 = vmatprep.mubr.f32.mxu0 %v8176_v49  ;;  %v4870_v59 = vadd.f32 %v4869_v41, %v4868_v16  ;;  %v10394_v45 = vld [vmem:[#allocation74_spill] sm:$0xff]  ;;  %v10398_v41 = vld [vmem:[#allocation81_spill] sm:$0xff] }
 0x16a   : > { %1769 = vmatmul.mubr.f32.gmra.mrb[154].mxu1 %v10387_v32  ;;  %6561 = vmatprep.subr.bf16.mxu0 %v10388_v14  ;;  %v10397_v16 = vld [vmem:[#allocation50_spill] sm:$0xff] }
 0x16b   : > { %1774 = vmatprep.mubr.f32.mxu1 %v10389_v51  ;;  %v8598_v4 = vadd.f32 %v4870_v59, %v10391_v19  ;;  %v4871_v56 = vpop.f32.mrb[50].mxu1  ;;  %v10400_v19 = vld [vmem:[#allocation57_spill] sm:$0xff] }
 0x16c   : > { %5744 = vmatmul.mubr.f32.gmra.mrb[2].mxu0 %v10390_v28  ;;  %v4872_v39 = vpop.f32.mrb[51].mxu1 }
 0x16d   : > { %10392 = vst [vmem:[#allocation28_spill] sm:$0xff] %v8598_v4  ;;  %6563 = vmatpush3.bf16.msra.mxu0 %v10388_v14  ;;  %5746 = vmatprep.mubr.f32.mxu0 %v10393_v50  ;;  %v4873_v32 = vadd.f32 %v4872_v39, %v4871_v56  ;;  %v10401_v14 = vld [vmem:[#allocation78_spill] sm:$0xff]  ;;  %v10404_v39 = vld [vmem:[#allocation59_spill] sm:$0xff]  ;;  %v10405_v56 = vld [vmem:[#allocation84_spill] sm:$0xff] }
 0x16e   : > { %1776 = vmatmul.mubr.f32.gmra.mrb[156].mxu1 %v10394_v45  ;;  %6565 = vmatprep.subr.bf16.mxu0 %v10395_v33 }
 0x16f   : > { %1781 = vmatprep.mubr.f32.mxu1 %v10396_v30  ;;  %v8607_v51 = vadd.f32 %v4873_v32, %v10398_v41  ;;  %v4874_v59 = vpop.f32.mrb[52].mxu1  ;;  %v10407_v41 = vld [vmem:[#allocation64_spill] sm:$0xff] }
 0x170   : > { %5747 = vmatmul.mubr.f32.gmra.mrb[4].mxu0 %v10397_v16  ;;  %v4875_v4 = vpop.f32.mrb[53].mxu1 }
 0x171   : > { %10399 = vst [vmem:[#allocation30_spill] sm:$0xff] %v8607_v51  ;;  %6567 = vmatpush3.bf16.msra.mxu0 %v10395_v33  ;;  %5749 = vmatprep.mubr.f32.mxu0 %v10400_v19  ;;  %v4876_v45 = vadd.f32 %v4875_v4, %v4874_v59  ;;  %v10408_v33 = vld [vmem:[#allocation17_spill] sm:$0xff]  ;;  %v10411_v4 = vld [vmem:[#allocation66_spill] sm:$0xff] }
 0x172   : > { %1783 = vmatmul.mubr.f32.gmra.mrb[158].mxu1 %v10401_v14  ;;  %6569 = vmatprep.subr.bf16.mxu0 %v10402_v21 }
 0x173   : > { %1885 = vmatprep.mubr.f32.mxu1 %v10403_v29  ;;  %v8616_v30 = vadd.f32 %v4876_v45, %v10405_v56  ;;  %v4877_v32 = vpop.f32.mrb[54].mxu1  ;;  %v10412_v29 = vld [vmem:[#allocation89_spill] sm:$0xff]  ;;  %v10414_v56 = vld [vmem:[#allocation75_spill] sm:$0xff] }
 0x174   : > { %5750 = vmatmul.mubr.f32.gmra.mrb[6].mxu0 %v10404_v39  ;;  %v4878_v51 = vpop.f32.mrb[55].mxu1 }
 0x175   : > { %10406 = vst [vmem:[#allocation7_spill] sm:$0xff] %v8616_v30  ;;  %6571 = vmatpush3.bf16.msra.mxu0 %v10402_v21  ;;  %5752 = vmatprep.mubr.f32.mxu0 %v10407_v41  ;;  %v4879_v14 = vadd.f32 %v4878_v51, %v4877_v32  ;;  %v10415_v21 = vld [vmem:[#allocation23_spill] sm:$0xff]  ;;  %v10417_v51 = vld [vmem:[#allocation76_spill] sm:$0xff]  ;;  %v10419_v32 = vld [vmem:[#allocation82_spill] sm:$0xff] }
 0x176   : > { %1887 = vmatmul.mubr.f32.vlgmr.msra.gmra.mrb[160].mxu1 %v10408_v33  ;;  %6573 = vmatprep.subr.bf16.mxu0 %v10409_v31 }
 0x177   : > { %1892 = vmatprep.mubr.f32.mxu1 %v10410_v0  ;;  %v8625_v59 = vadd.f32 %v4879_v14, %v10412_v29  ;;  %v4880_v45 = vpop.f32.mrb[56].mxu1 }
 0x178   : > { %5753 = vmatmul.mubr.f32.gmra.mrb[8].mxu0 %v10411_v4  ;;  %v4881_v30 = vpop.f32.mrb[57].mxu1 }
 0x179   : > { %10413 = vst [vmem:[#allocation8_spill] sm:$0xff] %v8625_v59  ;;  %6575 = vmatpush3.bf16.msra.mxu0 %v10409_v31  ;;  %5755 = vmatprep.mubr.f32.mxu0 %v10414_v56  ;;  %v4882_v33 = vadd.f32 %v4881_v30, %v4880_v45  ;;  %v10420_v59 = vld [vmem:[#allocation33_spill] sm:$0xff]  ;;  %v10421_v30 = vld [vmem:[#allocation83_spill] sm:$0xff] }
 0x17a   : > { %1894 = vmatmul.mubr.f32.gmra.mrb[162].mxu1 %v10415_v21  ;;  %6577 = vmatprep.subr.bf16.mxu0 %v10416_v27  ;;  %v10423_v45 = vld [vmem:[#allocation87_spill] sm:$0xff] }
 0x17b   : > { %1899 = vmatprep.mubr.f32.mxu1 %v10347_v42  ;;  %v8634_v0 = vadd.f32 %v4882_v33, %v8485_v3  ;;  %v4883_v14 = vpop.f32.mrb[58].mxu1 }
 0x17c   : > { %5756 = vmatmul.mubr.f32.gmra.mrb[10].mxu0 %v10417_v51  ;;  %v4884_v29 = vpop.f32.mrb[59].mxu1 }
 0x17d   : > { %10418 = vst [vmem:[#allocation31_spill] sm:$0xff] %v8634_v0  ;;  %6579 = vmatpush3.bf16.msra.mxu0 %v10416_v27  ;;  %5758 = vmatprep.mubr.f32.mxu0 %v10419_v32  ;;  %v4885_v21 = vadd.f32 %v4884_v29, %v4883_v14  ;;  %v10424_v0 = vld [vmem:[#allocation37_spill] sm:$0xff]  ;;  %v10426_v14 = vand.u32 4294901760, %v8117_v5  ;;  %v10430_v5 = vand.u32 4294901760, %v8196_v10  ;;  %v10435_v10 = vand.u32 4294901760, %v8235_v47 }
 0x17e   : > { %1901 = vmatmul.mubr.f32.gmra.mrb[164].mxu1 %v10350_v24  ;;  %6581 = vmatprep.subr.bf16.mxu0 %v10420_v59  ;;  %v10425_v24 = vand.u32 4294901760, %v8112_v7  ;;  %v10429_v7 = vand.u32 4294901760, %v8188_v20  ;;  %v10434_v20 = vand.u32 4294901760, %v8230_v34  ;;  %v10438_v34 = vand.u32 4294901760, %v8268_v52 }
 0x17f   : > { %1906 = vmatprep.mubr.f32.mxu1 %v10351_v58  ;;  %v8643_v42 = vadd.f32 %v4885_v21, %v8494_v8  ;;  %v4886_v3 = vpop.f32.mrb[60].mxu1  ;;  %v10427_v8 = vld [vmem:[#allocation88_spill] sm:$0xff]  ;;  %v10439_v47 = vand.u32 4294901760, %v8293_v13  ;;  %v10442_v52 = vand.u32 4294901760, %v8314_v62  ;;  %v10443_v13 = vand.u32 4294901760, %v8337_v11 }
 0x180   : > { %5759 = vmatmul.mubr.f32.gmra.mrb[12].mxu0 %v10421_v30  ;;  %v4887_v33 = vpop.f32.mrb[61].mxu1  ;;  %v6588_v58 = vpack.c.bf16 %v10426_v14, %v10425_v24  ;;  %v10433_v14 = vand.u32 4294901760, %v8176_v49  ;;  %v10446_v62 = vand.u32 4294901760, %v8351_v15  ;;  %v10447_v11 = vand.u32 4294901760, %v8383_v38 }
 0x181   : > { %10422 = vst [vmem:[#allocation32_spill] sm:$0xff] %v8643_v42  ;;  %6583 = vmatpush3.bf16.msra.mxu0 %v10420_v59  ;;  %5761 = vmatprep.mubr.f32.mxu0 %v10423_v45  ;;  %v4888_v29 = vadd.f32 %v4887_v33, %v4886_v3  ;;  %v10432_v33 = vld [vmem:[#allocation4_spill] sm:$0xff]  ;;  %v10450_v15 = vand.u32 4294901760, %v8412_v54  ;;  %v10451_v38 = vand.u32 4294901760, %v8430_v57  ;;  %v10454_v54 = vand.u32 4294901760, %v8449_v22  ;;  %v10455_v57 = vld [vmem:[#allocation3_spill] sm:$0xff] }
 0x182   : > { %1908 = vmatmul.mubr.f32.gmra.mrb[166].mxu1 %v10354_v2  ;;  %6585 = vmatprep.subr.bf16.mxu0 %v10424_v0  ;;  %v10428_v2 = vand.u32 4294901760, %v8134_v25 }
 0x183   : > { %1913 = vmatprep.mubr.f32.mxu1 %v10355_v61  ;;  %v8656_v21 = vadd.f32 %v4888_v29, %v8502_v26  ;;  %v4889_v42 = vpop.f32.mrb[62].mxu1  ;;  %v6592_v61 = vpack.c.bf16 %v10430_v5, %v10429_v7  ;;  %v10431_v26 = vand.u32 4294901760, %v8141_v40  ;;  %v10436_v40 = vand.u32 4294901760, %v10390_v28 }
 0x184   : > { %5762 = vmatmul.mubr.f32.gmra.mrb[14].mxu0 %v10427_v8  ;;  %v4890_v59 = vpop.f32.mrb[63].mxu1  ;;  %v10445_v5 = vand.u32 4294901760, %v10407_v41 }
 0x185   : > { %6587 = vmatpush3.bf16.msra.mxu0 %v10424_v0  ;;  %5796 = vmatprep.mubr.f32.mxu0 %v10428_v2  ;;  %v4891_v3 = vadd.f32 %v4890_v59, %v4889_v42  ;;  %v10441_v2 = vand.u32 4294901760, %v10400_v19 }
 0x186   : > { %1915 = vmatmul.mubr.f32.gmra.mrb[168].mxu1 %v10358_v53  ;;  %6589 = vmatprep.subr.bf16.mxu0 %v6588_v58 }
 0x187   : > { %1920 = vmatprep.mubr.f32.mxu1 %v10360_v37  ;;  %v8670_v24 = vadd.f32 %v4891_v3, %v10432_v33  ;;  %v4924_v25 = vpop.f32.mrb[64].mxu1  ;;  %v6596_v37 = vpack.c.bf16 %v10435_v10, %v10434_v20  ;;  %v10449_v3 = vand.u32 4294901760, %v10414_v56  ;;  %v10453_v33 = vand.u32 4294901760, %v10419_v32 }
 0x188   : > { %5797 = vmatmul.mubr.f32.vlgmr.msra.gmra.mrb[0].mxu0 %v10431_v26  ;;  %v4925_v53 = vpop.f32.mrb[65].mxu1  ;;  %v10460_v10 = vand.u32 4294901760, %v10423_v45  ;;  %v10466_v45 = vld [vmem:[#allocation67_spill] sm:$0xff] }
 0x189   : > { %6591 = vmatpush3.bf16.msra.mxu0 %v6588_v58  ;;  %5799 = vmatprep.mubr.f32.mxu0 %v10433_v14  ;;  %v4926_v59 = vadd.f32 %v4925_v53, %v4924_v25  ;;  %v10437_v58 = vand.u32 4294901760, %v10393_v50  ;;  %v10456_v25 = vand.u32 4294901760, %v10455_v57  ;;  %v10459_v53 = vld [vmem:[#allocation26_spill] sm:$0xff]  ;;  %v10487_v57 = vld [vmem:[#allocation7_spill] sm:$0xff] }
 0x18a   : > { %1922 = vmatmul.mubr.f32.gmra.mrb[170].mxu1 %v10363_v1  ;;  %6593 = vmatprep.subr.bf16.mxu0 %v6592_v61 }
 0x18b   : > { %1927 = vmatprep.mubr.f32.mxu1 %v10364_v35  ;;  %v8683_v42 = vadd.f32 %v4926_v59, %v8526_v12  ;;  %v4927_v49 = vpop.f32.mrb[66].mxu1  ;;  %v6600_v35 = vpack.c.bf16 %v10439_v47, %v10438_v34  ;;  %v10440_v12 = vand.u32 4294901760, %v10397_v16  ;;  %v10462_v59 = vld [vmem:[#allocation65_spill] sm:$0xff]  ;;  %v10467_v47 = vld [vmem:[#allocation2_spill] sm:$0xff] }
 0x18c   : > { %5800 = vmatmul.mubr.f32.gmra.mrb[2].mxu0 %v10436_v40  ;;  %v4928_v1 = vpop.f32.mrb[67].mxu1  ;;  %v10463_v40 = vand.u32 4294901760, %v10427_v8 }
 0x18d   : > { %6595 = vmatpush3.bf16.msra.mxu0 %v6592_v61  ;;  %5802 = vmatprep.mubr.f32.mxu0 %v10437_v58  ;;  %v4929_v29 = vadd.f32 %v4928_v1, %v4927_v49  ;;  %v10465_v1 = vld [vmem:[#allocation29_spill] sm:$0xff] }
 0x18e   : > { %1929 = vmatmul.mubr.f32.gmra.mrb[172].mxu1 %v10367_v46  ;;  %6597 = vmatprep.subr.bf16.mxu0 %v6596_v37 }
 0x18f   : > { %1934 = vmatprep.mubr.f32.mxu1 %v10368_v63  ;;  %v8696_v28 = vadd.f32 %v4929_v29, %v8537_v55  ;;  %v4930_v50 = vpop.f32.mrb[68].mxu1  ;;  %v6604_v63 = vpack.c.bf16 %v10443_v13, %v10442_v52  ;;  %v10444_v55 = vand.u32 4294901760, %v10404_v39  ;;  %v10468_v29 = vld [vmem:[#allocation70_spill] sm:$0xff]  ;;  %v10472_v13 = vld [vmem:[#allocation71_spill] sm:$0xff] }
 0x190   : > { %5803 = vmatmul.mubr.f32.gmra.mrb[4].mxu0 %v10440_v12  ;;  %v4931_v46 = vpop.f32.mrb[69].mxu1  ;;  %v10469_v12 = vld [vmem:[#allocation34_spill] sm:$0xff] }
 0x191   : > { %6599 = vmatpush3.bf16.msra.mxu0 %v6596_v37  ;;  %5805 = vmatprep.mubr.f32.mxu0 %v10441_v2  ;;  %v4932_v7 = vadd.f32 %v4931_v46, %v4930_v50  ;;  %v10461_v37 = vld [vmem:[#allocation63_spill] sm:$0xff]  ;;  %v10470_v50 = vld [vmem:[#allocation6_spill] sm:$0xff]  ;;  %v10471_v46 = vld [vmem:[#allocation36_spill] sm:$0xff] }
 0x192   : > { %1936 = vmatmul.mubr.f32.gmra.mrb[174].mxu1 %v10371_v44  ;;  %6601 = vmatprep.subr.bf16.mxu0 %v6600_v35 }
 0x193   : > { %1941 = vmatprep.mubr.f32.mxu1 %v10372_v43  ;;  %v8709_v16 = vadd.f32 %v4932_v7, %v8547_v9  ;;  %v4933_v19 = vpop.f32.mrb[70].mxu1  ;;  %v6608_v43 = vpack.c.bf16 %v10447_v11, %v10446_v62  ;;  %v10448_v9 = vand.u32 4294901760, %v10411_v4  ;;  %v10477_v11 = vld [vmem:[#allocation44_spill] sm:$0xff] }
 0x194   : > { %5806 = vmatmul.mubr.f32.gmra.mrb[6].mxu0 %v10444_v55  ;;  %v4934_v44 = vpop.f32.mrb[71].mxu1  ;;  %v10474_v55 = vld [vmem:[#allocation72_spill] sm:$0xff] }
 0x195   : > { %6603 = vmatpush3.bf16.msra.mxu0 %v6600_v35  ;;  %5808 = vmatprep.mubr.f32.mxu0 %v10445_v5  ;;  %v4935_v61 = vadd.f32 %v4934_v44, %v4933_v19  ;;  %v10475_v19 = vld [vmem:[#allocation41_spill] sm:$0xff]  ;;  %v10476_v5 = vld [vmem:[#allocation28_spill] sm:$0xff] }
 0x196   : > { %1943 = vmatmul.mubr.f32.gmra.mrb[176].mxu1 %v10374_v48  ;;  %6605 = vmatprep.subr.bf16.mxu0 %v6604_v63 }
 0x197   : > { %1948 = vmatprep.mubr.f32.mxu1 %v10375_v6  ;;  %v8722_v39 = vadd.f32 %v4935_v61, %v8556_v17  ;;  %v4936_v41 = vpop.f32.mrb[72].mxu1  ;;  %v6612_v6 = vpack.c.bf16 %v10451_v38, %v10450_v15  ;;  %v10452_v17 = vand.u32 4294901760, %v10417_v51  ;;  %v10457_v51 = vld [vmem:[#allocation62_spill] sm:$0xff] }
 0x198   : > { %5809 = vmatmul.mubr.f32.gmra.mrb[8].mxu0 %v10448_v9  ;;  %v4937_v48 = vpop.f32.mrb[73].mxu1  ;;  %v10478_v61 = vld [vmem:[#allocation74_spill] sm:$0xff]  ;;  %v10479_v9 = vld [vmem:[#allocation21_spill] sm:$0xff] }
 0x199   : > { %6607 = vmatpush3.bf16.msra.mxu0 %v6604_v63  ;;  %5811 = vmatprep.mubr.f32.mxu0 %v10449_v3  ;;  %v4938_v26 = vadd.f32 %v4937_v48, %v4936_v41  ;;  %v10473_v63 = vld [vmem:[#allocation20_spill] sm:$0xff]  ;;  %v10480_v3 = vld [vmem:[#allocation77_spill] sm:$0xff]  ;;  %v10482_v15 = vld [vmem:[#allocation30_spill] sm:$0xff] }
 0x19a   : > { %1950 = vmatmul.mubr.f32.gmra.mrb[178].mxu1 %v10376_v23  ;;  %6609 = vmatprep.subr.bf16.mxu0 %v6608_v43  ;;  %v10481_v48 = vld [vmem:[#allocation48_spill] sm:$0xff] }
 0x19b   : > { %1955 = vmatprep.mubr.f32.mxu1 %v10377_v60  ;;  %v8735_v4 = vadd.f32 %v4938_v26, %v8565_v18  ;;  %v4939_v56 = vpop.f32.mrb[74].mxu1  ;;  %v6616_v60 = vpack.c.bf16 %v10456_v25, %v10454_v54  ;;  %v10458_v18 = vand.u32 4294901760, %v10421_v30  ;;  %v10464_v30 = vld [vmem:[#allocation5_spill] sm:$0xff]  ;;  %v10483_v26 = vld [vmem:[#allocation52_spill] sm:$0xff] }
 0x19c   : > { %5812 = vmatmul.mubr.f32.gmra.mrb[10].mxu0 %v10452_v17  ;;  %v4940_v23 = vpop.f32.mrb[75].mxu1  ;;  %v10486_v54 = vld [vmem:[#allocation53_spill] sm:$0xff] }
 0x19d   : > { %6611 = vmatpush3.bf16.msra.mxu0 %v6608_v43  ;;  %5814 = vmatprep.mubr.f32.mxu0 %v10453_v33  ;;  %v4941_v14 = vadd.f32 %v4940_v23, %v4939_v56  ;;  %v10484_v56 = vld [vmem:[#allocation78_spill] sm:$0xff]  ;;  %v10485_v33 = vld [vmem:[#allocation24_spill] sm:$0xff] }
 0x19e   : > { %1957 = vmatmul.mubr.f32.gmra.mrb[180].mxu1 %v10378_v36  ;;  %6613 = vmatprep.subr.bf16.mxu0 %v6612_v6 }
 0x19f   : > { %1962 = vmatprep.mubr.f32.mxu1 %v10457_v51  ;;  %v8748_v20 = vadd.f32 %v4941_v14, %v10459_v53  ;;  %v4942_v32 = vpop.f32.mrb[76].mxu1  ;;  %v10488_v14 = vld [vmem:[#allocation60_spill] sm:$0xff]  ;;  %v10489_v53 = vld [vmem:[#allocation61_spill] sm:$0xff] }
 0x1a0   : > { %5815 = vmatmul.mubr.f32.gmra.mrb[12].mxu0 %v10458_v18  ;;  %v4943_v36 = vpop.f32.mrb[77].mxu1 }
 0x1a1   : > { %6615 = vmatpush3.bf16.msra.mxu0 %v6612_v6  ;;  %5817 = vmatprep.mubr.f32.mxu0 %v10460_v10  ;;  %v4944_v22 = vadd.f32 %v4943_v36, %v4942_v32  ;;  %v10490_v32 = vld [vmem:[#allocation8_spill] sm:$0xff] }
 0x1a2   : > { %1964 = vmatmul.mubr.f32.gmra.mrb[182].mxu1 %v10461_v37  ;;  %6617 = vmatprep.subr.bf16.mxu0 %v6616_v60  ;;  %v10491_v37 = vld [vmem:[#allocation68_spill] sm:$0xff] }
 0x1a3   : > { %1969 = vmatprep.mubr.f32.mxu1 %v10462_v59  ;;  %v8757_v49 = vadd.f32 %v4944_v22, %v10464_v30  ;;  %v4945_v58 = vpop.f32.mrb[78].mxu1  ;;  %v8811_v30 = vld [vmem:[%s9687_s2 + $0x8] sm:$0xff] }
 0x1a4   : > { %5818 = vmatmul.mubr.f32.gmra.mrb[14].mxu0 %v10463_v40  ;;  %v4946_v34 = vpop.f32.mrb[79].mxu1  ;;  %v8806_v40 = vld [vmem:[%s9687_s2] sm:$0xff] }
 0x1a5   : > { %6619 = vmatpush3.bf16.msra.mxu0 %v6616_v60  ;;  %5852 = vmatprep.mubr.f32.mxu0 %v10465_v1  ;;  %v4947_v35 = vadd.f32 %v4946_v34, %v4945_v58  ;;  %v10492_v58 = vld [vmem:[#allocation69_spill] sm:$0xff]  ;;  %v10493_v34 = vld [vmem:[#allocation31_spill] sm:$0xff] }
 0x1a6   : > { %1971 = vmatmul.mubr.f32.gmra.mrb[184].mxu1 %v10466_v45  ;;  %6621 = vmatprep.subr.bf16.mxu0 %v10467_v47 }
 0x1a7   : > { %1976 = vmatprep.mubr.f32.mxu1 %v10468_v29  ;;  %v8765_v8 = vadd.f32 %v4947_v35, %v10470_v50  ;;  %v4948_v2 = vpop.f32.mrb[80].mxu1  ;;  %v10495_v29 = vld [vmem:[#allocation33_spill] sm:$0xff]  ;;  %v3334_v50 = vand.u32 4294901760, %v8806_v40 }
 0x1a8   : > { %5853 = vmatmul.mubr.f32.vlgmr.msra.gmra.mrb[0].mxu0 %v10469_v12  ;;  %v4949_v52 = vpop.f32.mrb[81].mxu1 }
 0x1a9   : > { %6623 = vmatpush3.bf16.msra.mxu0 %v10467_v47  ;;  %5855 = vmatprep.mubr.f32.mxu0 %v10471_v46  ;;  %v4950_v7 = vadd.f32 %v4949_v52, %v4948_v2  ;;  %v10494_v47 = vld [vmem:[#allocation80_spill] sm:$0xff]  ;;  %v3337_v2 = vand.u32 4294901760, %v8811_v30 }
 0x1aa   : > { %1978 = vmatmul.mubr.f32.gmra.mrb[186].mxu1 %v10472_v13  ;;  %6625 = vmatprep.subr.bf16.mxu0 %v10473_v63  ;;  %v8825_v13 = vld [vmem:[%s9687_s2 + $0x10] sm:$0xff] }
 0x1ab   : > { %1983 = vmatprep.mubr.f32.mxu1 %v10474_v55  ;;  %v8774_v44 = vadd.f32 %v4950_v7, %v10476_v5  ;;  %v4951_v62 = vpop.f32.mrb[82].mxu1  ;;  %v10497_v7 = vld [vmem:[#allocation32_spill] sm:$0xff] }
 0x1ac   : > { %5856 = vmatmul.mubr.f32.gmra.mrb[2].mxu0 %v10475_v19  ;;  %v4952_v43 = vpop.f32.mrb[83].mxu1 }
 0x1ad   : > { %6627 = vmatpush3.bf16.msra.mxu0 %v10473_v63  ;;  %5858 = vmatprep.mubr.f32.mxu0 %v10477_v11  ;;  %v4953_v41 = vadd.f32 %v4952_v43, %v4951_v62  ;;  %v8830_v63 = vld [vmem:[%s9687_s2 + $0x18] sm:$0xff] }
 0x1ae   : > { %1985 = vmatmul.mubr.f32.gmra.mrb[188].mxu1 %v10478_v61  ;;  %6629 = vmatprep.subr.bf16.mxu0 %v10479_v9  ;;  %v10498_v62 = vld [vmem:[#allocation85_spill] sm:$0xff]  ;;  %v8843_v61 = vpack.c.bf16 %v3337_v2, %v3334_v50 }
 0x1af   : > { %1990 = vmatprep.mubr.f32.mxu1 %v10480_v3  ;;  %v8783_v38 = vadd.f32 %v4953_v41, %v10482_v15  ;;  %v4954_v6 = vpop.f32.mrb[84].mxu1  ;;  %v3343_v41 = vand.u32 4294901760, %v8830_v63  ;;  %v8850_v15 = vld [vmem:[%s9687_s2 + $0x20] sm:$0xff] }
 0x1b0   : > { %5859 = vmatmul.mubr.f32.gmra.mrb[4].mxu0 %v10481_v48  ;;  %v4955_v17 = vpop.f32.mrb[85].mxu1 }
 0x1b1   : > { %6631 = vmatpush3.bf16.msra.mxu0 %v10479_v9  ;;  %5861 = vmatprep.mubr.f32.mxu0 %v10483_v26  ;;  %v4956_v23 = vadd.f32 %v4955_v17, %v4954_v6  ;;  %v3340_v9 = vand.u32 4294901760, %v8825_v13  ;;  %v8855_v6 = vld [vmem:[%s9687_s2 + $0x28] sm:$0xff]  ;;  %v10499_v17 = vld [vmem:[#allocation86_spill] sm:$0xff] }
 0x1b2   : > { %1992 = vmatmul.mubr.f32.gmra.mrb[190].mxu1 %v10484_v56  ;;  %6633 = vmatprep.subr.bf16.mxu0 %v10485_v33 }
 0x1b3   : > { %v8791_v25 = vadd.f32 %v4956_v23, %v10487_v57  ;;  %v4957_v60 = vpop.f32.mrb[86].mxu1  ;;  %v8868_v57 = vpack.c.bf16 %v3343_v41, %v3340_v9 }
 0x1b4   : > { %5862 = vmatmul.mubr.f32.gmra.mrb[6].mxu0 %v10486_v54  ;;  %v4958_v51 = vpop.f32.mrb[87].mxu1 }
 0x1b5   : > { %6635 = vmatpush3.bf16.msra.mxu0 %v10485_v33  ;;  %5864 = vmatprep.mubr.f32.mxu0 %v10488_v14  ;;  %v4959_v18 = vadd.f32 %v4958_v51, %v4957_v60  ;;  %v3346_v60 = vand.u32 4294901760, %v8850_v15  ;;  %v3349_v51 = vand.u32 4294901760, %v8855_v6 }
 0x1b6   : > { %6637 = vmatprep.subr.bf16.mxu0 %v10409_v31 }
 0x1b7   : > { %v8798_v10 = vadd.f32 %v4959_v18, %v10490_v32  ;;  %v4960_v36 = vpop.f32.mrb[88].mxu1 }
 0x1b8   : > { %5865 = vmatmul.mubr.f32.gmra.mrb[8].mxu0 %v10489_v53  ;;  %v4961_v22 = vpop.f32.mrb[89].mxu1 }
 0x1b9   : > { %6639 = vmatpush3.bf16.msra.mxu0 %v10409_v31  ;;  %5867 = vmatprep.mubr.f32.mxu0 %v10491_v37  ;;  %v4962_v59 = vadd.f32 %v4961_v22, %v4960_v36  ;;  %v8893_v22 = vpack.c.bf16 %v3349_v51, %v3346_v60 }
 0x1ba   : > { %6641 = vmatprep.subr.bf16.mxu0 %v10416_v27 }
 0x1bb   : > { %v8815_v31 = vadd.f32 %v4962_v59, %v10493_v34  ;;  %v4963_v45 = vpop.f32.mrb[90].mxu1  ;;  %v8900_v34 = vld [vmem:[%s9687_s2 + $0x40] sm:$0xff] }
 0x1bc   : > { %5868 = vmatmul.mubr.f32.gmra.mrb[10].mxu0 %v10492_v58  ;;  %v4964_v35 = vpop.f32.mrb[91].mxu1 }
 0x1bd   : > { %6643 = vmatpush3.bf16.msra.mxu0 %v10416_v27  ;;  %5870 = vmatprep.mubr.f32.mxu0 %v10494_v47  ;;  %v4965_v52 = vadd.f32 %v4964_v35, %v4963_v45  ;;  %v10496_v27 = vld [vmem:[#allocation79_spill] sm:$0xff] }
 0x1be   : > { %6645 = vmatprep.subr.bf16.mxu0 %v10495_v29 }
 0x1bf   : > { %v8834_v55 = vadd.f32 %v4965_v52, %v10497_v7  ;;  %v4966_v5 = vpop.f32.mrb[92].mxu1  ;;  %v3358_v7 = vand.u32 4294901760, %v8900_v34 }
 0x1c0   : > { %5871 = vmatmul.mubr.f32.gmra.mrb[12].mxu0 %v10496_v27  ;;  %v4967_v43 = vpop.f32.mrb[93].mxu1 }
 0x1c1   : > { %6647 = vmatpush3.bf16.msra.mxu0 %v10495_v29  ;;  %5873 = vmatprep.mubr.f32.mxu0 %v10498_v62  ;;  %v4968_v3 = vadd.f32 %v4967_v43, %v4966_v5  ;;  %v8925_v5 = vld [vmem:[%s9687_s2 + $0x50] sm:$0xff] }
 0x1c2   : > { %6649 = vmatprep.subr.bf16.mxu0 %v10424_v0 }
 0x1c3   : > { %v8859_v56 = vadd.f32 %v4968_v3, %v8656_v21  ;;  %v4969_v33 = vpop.f32.mrb[94].mxu1 }
 0x1c4   : > { %5874 = vmatmul.mubr.f32.gmra.mrb[14].mxu0 %v10499_v17  ;;  %v4970_v23 = vpop.f32.mrb[95].mxu1 }
 0x1c5   : > { %6651 = vmatpush3.bf16.msra.mxu0 %v10424_v0  ;;  %5908 = vmatprep.mubr.f32.mxu0 %v10465_v1  ;;  %v4971_v21 = vadd.f32 %v4970_v23, %v4969_v33  ;;  %v8875_v0 = vld [vmem:[%s9687_s2 + $0x30] sm:$0xff]  ;;  %v8880_v1 = vld [vmem:[%s9687_s2 + $0x38] sm:$0xff] }
 0x1c6   : > { %6653 = vmatprep.subr.bf16.mxu0 %v8843_v61  ;;  %v3352_v59 = vand.u32 4294901760, %v8875_v0 }
 0x1c7   : > { %v8884_v18 = vadd.f32 %v4971_v21, %v8670_v24  ;;  %v5004_v32 = vpop.f32.mrb[96].mxu1  ;;  %v10009_v21 = vand.u32 4294901760, %v8925_v5 }
 0x1c8   : > { %5909 = vmatmul.mubr.f32.vlgmr.msra.gmra.mrb[0].mxu0 %v10469_v12  ;;  %v5005_v36 = vpop.f32.mrb[97].mxu1  ;;  %v3355_v12 = vand.u32 4294901760, %v8880_v1 }
 0x1c9   : > { %6655 = vmatpush3.bf16.msra.mxu0 %v8843_v61  ;;  %5911 = vmatprep.mubr.f32.mxu0 %v10471_v46  ;;  %v5006_v24 = vadd.f32 %v5005_v36, %v5004_v32  ;;  %v8905_v46 = vld [vmem:[%s9687_s2 + $0x48] sm:$0xff]  ;;  %v8950_v32 = vld [vmem:[%s9687_s2 + $0x60] sm:$0xff] }
 0x1ca   : > { %6657 = vmatprep.subr.bf16.mxu0 %v8868_v57  ;;  %v8918_v52 = vpack.c.bf16 %v3355_v12, %v3352_v59 }
 0x1cb   : > { %v8909_v45 = vadd.f32 %v5006_v24, %v8683_v42  ;;  %v5007_v35 = vpop.f32.mrb[98].mxu1 }
 0x1cc   : > { %5912 = vmatmul.mubr.f32.gmra.mrb[2].mxu0 %v10475_v19  ;;  %v5008_v29 = vpop.f32.mrb[99].mxu1  ;;  %v3361_v19 = vand.u32 4294901760, %v8905_v46 }
 0x1cd   : > { %6659 = vmatpush3.bf16.msra.mxu0 %v8868_v57  ;;  %5914 = vmatprep.mubr.f32.mxu0 %v10477_v11  ;;  %v5009_v42 = vadd.f32 %v5008_v29, %v5007_v35  ;;  %v8930_v11 = vld [vmem:[%s9687_s2 + $0x58] sm:$0xff] }
 0x1ce   : > { %6661 = vmatprep.subr.bf16.mxu0 %v8893_v22  ;;  %v8943_v23 = vpack.c.bf16 %v3361_v19, %v3358_v7 }
 0x1cf   : > { %v8934_v43 = vadd.f32 %v5009_v42, %v8696_v28  ;;  %v5010_v3 = vpop.f32.mrb[100].mxu1  ;;  %v3370_v42 = vand.u32 4294901760, %v8950_v32 }
 0x1d0   : > { %5915 = vmatmul.mubr.f32.gmra.mrb[4].mxu0 %v10481_v48  ;;  %v5011_v33 = vpop.f32.mrb[101].mxu1  ;;  %v10008_v48 = vand.u32 4294901760, %v8930_v11 }
 0x1d1   : > { %6663 = vmatpush3.bf16.msra.mxu0 %v8893_v22  ;;  %5917 = vmatprep.mubr.f32.mxu0 %v10483_v26  ;;  %v5012_v28 = vadd.f32 %v5011_v33, %v5010_v3  ;;  %v8955_v26 = vld [vmem:[%s9687_s2 + $0x68] sm:$0xff]  ;;  %v8975_v3 = vld [vmem:[%s9687_s2 + $0x70] sm:$0xff] }
 0x1d2   : > { %6665 = vmatprep.subr.bf16.mxu0 %v8918_v52  ;;  %v8968_v29 = vpack.c.bf16 %v10008_v48, %v10009_v21  ;;  %v10012_v48 = vand.u32 4294901760, %v8975_v3 }
 0x1d3   : > { %v8959_v36 = vadd.f32 %v5012_v28, %v8709_v16  ;;  %v5013_v24 = vpop.f32.mrb[102].mxu1 }
 0x1d4   : > { %5918 = vmatmul.mubr.f32.gmra.mrb[6].mxu0 %v10486_v54  ;;  %v5014_v35 = vpop.f32.mrb[103].mxu1  ;;  %v10010_v54 = vand.u32 4294901760, %v8955_v26 }
 0x1d5   : > { %6667 = vmatpush3.bf16.msra.mxu0 %v8918_v52  ;;  %5920 = vmatprep.mubr.f32.mxu0 %v10488_v14  ;;  %v5015_v16 = vadd.f32 %v5014_v35, %v5013_v24  ;;  %v8980_v14 = vld [vmem:[%s9687_s2 + $0x78] sm:$0xff] }
 0x1d6   : > { %6669 = vmatprep.subr.bf16.mxu0 %v8943_v23  ;;  %v8993_v35 = vpack.c.bf16 %v10010_v54, %v3370_v42 }
 0x1d7   : > { %v8984_v33 = vadd.f32 %v5015_v16, %v8722_v39  ;;  %v5016_v28 = vpop.f32.mrb[104].mxu1 }
 0x1d8   : > { %5921 = vmatmul.mubr.f32.gmra.mrb[8].mxu0 %v10489_v53  ;;  %v5017_v24 = vpop.f32.mrb[105].mxu1  ;;  %v10011_v53 = vand.u32 4294901760, %v8980_v14 }
 0x1d9   : > { %6671 = vmatpush3.bf16.msra.mxu0 %v8943_v23  ;;  %5923 = vmatprep.mubr.f32.mxu0 %v10491_v37  ;;  %v5018_v39 = vadd.f32 %v5017_v24, %v5016_v28 }
 0x1da   : > { %6673 = vmatprep.subr.bf16.mxu0 %v8968_v29  ;;  %v9008_v54 = vpack.c.bf16 %v10011_v53, %v10012_v48 }
 0x1db   : > { %v8999_v16 = vadd.f32 %v5018_v39, %v8735_v4  ;;  %v5019_v37 = vpop.f32.mrb[106].mxu1 }
 0x1dc   : > { %5924 = vmatmul.mubr.f32.gmra.mrb[10].mxu0 %v10492_v58  ;;  %v5020_v21 = vpop.f32.mrb[107].mxu1 }
 0x1dd   : > { %6675 = vmatpush3.bf16.msra.mxu0 %v8968_v29  ;;  %5926 = vmatprep.mubr.f32.mxu0 %v10494_v47  ;;  %v5021_v28 = vadd.f32 %v5020_v21, %v5019_v37 }
 0x1de   : > { %6677 = vmatprep.subr.bf16.mxu0 %v8993_v35 }
 0x1df   : > { %v9012_v4 = vadd.f32 %v5021_v28, %v8748_v20  ;;  %v5022_v58 = vpop.f32.mrb[108].mxu1 }
 0x1e0   : > { %5927 = vmatmul.mubr.f32.gmra.mrb[12].mxu0 %v10496_v27  ;;  %v5023_v47 = vpop.f32.mrb[109].mxu1 }
 0x1e1   : > { %6679 = vmatpush3.bf16.msra.mxu0 %v8993_v35  ;;  %5929 = vmatprep.mubr.f32.mxu0 %v10498_v62  ;;  %v5024_v24 = vadd.f32 %v5023_v47, %v5022_v58 }
 0x1e2   : > { %6681 = vmatprep.subr.bf16.mxu0 %v9008_v54 }
 0x1e3   : > { %v9019_v39 = vadd.f32 %v5024_v24, %v8757_v49  ;;  %v5025_v21 = vpop.f32.mrb[110].mxu1  ;;  %v9031_v49 = vsub.f32 %v8806_v40, %v3334_v50  ;;  %v9036_v24 = vsub.f32 %v8811_v30, %v3337_v2  ;;  %v9057_v30 = vsub.f32 %v8830_v63, %v3343_v41 }
 0x1e4   : > { %5930 = vmatmul.mubr.f32.gmra.mrb[14].mxu0 %v10499_v17  ;;  %v5026_v27 = vpop.f32.mrb[111].mxu1 }
 0x1e5   : > { %6683 = vmatpush3.bf16.msra.mxu0 %v9008_v54  ;;  %v5027_v20 = vadd.f32 %v5026_v27, %v5025_v21  ;;  %v10013_v21 = vand.u32 4294901760, %v9036_v24 }
 0x1e7   : > { %v9023_v37 = vadd.f32 %v5027_v20, %v8765_v8  ;;  %v5028_v28 = vpop.f32.mrb[112].mxu1  ;;  %v3585_v50 = vsub.f32 %v9036_v24, %v10013_v21 }
 0x1e8   : > { %v5029_v53 = vpop.f32.mrb[113].mxu1 }
 0x1e9   : > { %v5030_v62 = vadd.f32 %v5029_v53, %v5028_v28 }
 0x1eb   : > { %v9026_v48 = vadd.f32 %v5030_v62, %v8774_v44  ;;  %v5031_v58 = vpop.f32.mrb[114].mxu1  ;;  %v10028_v44 = vand.u32 4294901760, %v9031_v49 }
 0x1ec   : > { %v5032_v47 = vpop.f32.mrb[115].mxu1 }
 0x1ed   : > { %v5033_v17 = vadd.f32 %v5032_v47, %v5031_v58  ;;  %v3578_v40 = vsub.f32 %v9031_v49, %v10028_v44  ;;  %v3586_v58 = vand.u32 4294901760, %v3585_v50 }
 0x1ef   : > { %v9039_v8 = vadd.f32 %v5033_v17, %v8783_v38  ;;  %v5034_v53 = vpop.f32.mrb[116].mxu1  ;;  %v9052_v38 = vsub.f32 %v8825_v13, %v3340_v9  ;;  %v3579_v62 = vand.u32 4294901760, %v3578_v40  ;;  %v9080_v9 = vsub.f32 %v8855_v6, %v3349_v51 }
 0x1f0   : > { %v5035_v27 = vpop.f32.mrb[117].mxu1  ;;  %v9099_v6 = vsub.f32 %v8880_v1, %v3355_v12 }
 0x1f1   : > { %v5036_v20 = vadd.f32 %v5035_v27, %v5034_v53  ;;  %v10025_v47 = vand.u32 4294901760, %v9052_v38  ;;  %v10024_v53 = vand.u32 4294901760, %v9057_v30  ;;  %v9064_v21 = vpack.c.bf16 %v3586_v58, %v3579_v62  ;;  %10501 = vst [vmem:[#allocation10_spill] sm:$0xff] %v9080_v9 }
 0x1f2   : > { %10503 = vst [vmem:[#allocation38_spill] sm:$0xff] %v9099_v6 }
 0x1f3   : > { %v9060_v2 = vadd.f32 %v5036_v20, %v8791_v25  ;;  %v5037_v28 = vpop.f32.mrb[118].mxu1  ;;  %v3592_v13 = vsub.f32 %v9052_v38, %v10025_v47  ;;  %v9072_v25 = vsub.f32 %v8850_v15, %v3346_v60  ;;  %v3599_v63 = vsub.f32 %v9057_v30, %v10024_v53  ;;  %6685 = vmatprep.subr.bf16.mxu0 %v9064_v21 }
 0x1f4   : > { %v5038_v17 = vpop.f32.mrb[119].mxu1 }
 0x1f5   : > { %v5039_v27 = vadd.f32 %v5038_v17, %v5037_v28  ;;  %10500 = vst [vmem:[#allocation9_spill] sm:$0xff] %v9072_v25  ;;  %v3593_v40 = vand.u32 4294901760, %v3592_v13  ;;  %v10014_v50 = vand.u32 4294901760, %v9072_v25  ;;  %v3600_v60 = vand.u32 4294901760, %v3599_v63 }
 0x1f6   : > { %v10020_v28 = vand.u32 4294901760, %v9080_v9 }
 0x1f7   : > { %v9083_v41 = vadd.f32 %v5039_v27, %v8798_v10  ;;  %v3606_v58 = vsub.f32 %v9072_v25, %v10014_v50  ;;  %v9094_v10 = vsub.f32 %v8875_v0, %v3352_v59  ;;  %v9101_v51 = vpack.c.bf16 %v3600_v60, %v3593_v40 }
 0x1f8   : > { %v5040_v20 = vpop.f32.mrb[120].mxu1  ;;  %v3613_v17 = vsub.f32 %v9080_v9, %v10020_v28  ;;  %v10015_v0 = vand.u32 4294901760, %v9099_v6  ;;  %v9127_v60 = vsub.f32 %v8905_v46, %v3361_v19  ;;  %v10506_v46 = vand.u32 4294901760, %v8925_v5 }
 0x1f9   : > { %v5041_v15 = vpop.f32.mrb[121].mxu1  ;;  %10502 = vst [vmem:[#allocation35_spill] sm:$0xff] %v9094_v10  ;;  %v3607_v63 = vand.u32 4294901760, %v3606_v58 }
 0x1fa   : > { %v5042_v62 = vadd.f32 %v5041_v15, %v5040_v20  ;;  %v10016_v20 = vand.u32 4294901760, %v9094_v10  ;;  %v3614_v15 = vand.u32 4294901760, %v3613_v17  ;;  %v3627_v12 = vsub.f32 %v9099_v6, %v10015_v0  ;;  %10505 = vst [vmem:[#allocation12_spill] sm:$0xff] %v9127_v60 }
 0x1fc   : > { %v9107_v27 = vadd.f32 %v5042_v62, %v8815_v31  ;;  %v5043_v13 = vpop.f32.mrb[122].mxu1  ;;  %v3620_v1 = vsub.f32 %v9094_v10, %v10016_v20  ;;  %v9120_v31 = vsub.f32 %v8900_v34, %v3358_v7  ;;  %v9122_v40 = vpack.c.bf16 %v3614_v15, %v3607_v63 }
 0x1fd   : > { %v5044_v59 = vpop.f32.mrb[123].mxu1  ;;  %v10017_v20 = vand.u32 4294901760, %v9127_v60 }
 0x1fe   : > { %v5045_v50 = vadd.f32 %v5044_v59, %v5043_v13  ;;  %10504 = vst [vmem:[#allocation11_spill] sm:$0xff] %v9120_v31  ;;  %v3621_v17 = vand.u32 4294901760, %v3620_v1  ;;  %v3628_v13 = vand.u32 4294901760, %v3627_v12  ;;  %v10019_v59 = vand.u32 4294901760, %v9120_v31 }
 0x1ff   : > { %v3641_v19 = vsub.f32 %v9127_v60, %v10017_v20 }
 0x200   : > { %v9130_v62 = vadd.f32 %v5045_v50, %v8834_v55  ;;  %v9134_v7 = vpack.c.bf16 %v3628_v13, %v3621_v17  ;;  %v3634_v63 = vsub.f32 %v9120_v31, %v10019_v59  ;;  %v9142_v55 = vsub.f32 %v8925_v5, %v10506_v46 }
 0x201   : > { %v5046_v58 = vpop.f32.mrb[124].mxu1  ;;  %v10508_v50 = vand.u32 4294901760, %v8930_v11  ;;  %v3642_v13 = vand.u32 4294901760, %v3641_v19 }
 0x202   : > { %v5047_v0 = vpop.f32.mrb[125].mxu1  ;;  %10507 = vst [vmem:[#allocation39_spill] sm:$0xff] %v9142_v55  ;;  %v3635_v12 = vand.u32 4294901760, %v3634_v63 }
 0x203   : > { %v5048_v34 = vadd.f32 %v5047_v0, %v5046_v58  ;;  %v9150_v15 = vsub.f32 %v8930_v11, %v10508_v50  ;;  %v10018_v58 = vand.u32 4294901760, %v9142_v55  ;;  %v9163_v11 = vsub.f32 %v8950_v32, %v3370_v42 }
 0x204   : > { %v9170_v63 = vpack.c.bf16 %v3642_v13, %v3635_v12 }
 0x205   : > { %10509 = vst [vmem:[#allocation40_spill] sm:$0xff] %v9150_v15  ;;  %v9153_v0 = vadd.f32 %v5048_v34, %v8859_v56  ;;  %v5049_v1 = vpop.f32.mrb[126].mxu1  ;;  %v10023_v5 = vand.u32 4294901760, %v9150_v15  ;;  %v3648_v20 = vsub.f32 %v9142_v55, %v10018_v58  ;;  %10510 = vst [vmem:[#allocation13_spill] sm:$0xff] %v9163_v11  ;;  %v10511_v56 = vand.u32 4294901760, %v8955_v26 }
 0x206   : > { %v5050_v17 = vpop.f32.mrb[127].mxu1  ;;  %v10021_v58 = vand.u32 4294901760, %v9163_v11 }
 0x207   : > { %v5051_v46 = vadd.f32 %v5050_v17, %v5049_v1  ;;  %v9168_v34 = vsub.f32 %v8955_v26, %v10511_v56  ;;  %v3655_v19 = vsub.f32 %v9150_v15, %v10023_v5  ;;  %v3649_v17 = vand.u32 4294901760, %v3648_v20 }
 0x208   : > { %v3662_v26 = vsub.f32 %v9163_v11, %v10021_v58 }
 0x209   : > { %10512 = vst [vmem:[#allocation14_spill] sm:$0xff] %v9168_v34  ;;  %v9176_v50 = vadd.f32 %v5051_v46, %v8884_v18  ;;  %v5084_v1 = vpop.f32.mrb[128].mxu1  ;;  %v10022_v32 = vand.u32 4294901760, %v9168_v34  ;;  %v3656_v59 = vand.u32 4294901760, %v3655_v19  ;;  %v10513_v18 = vand.u32 4294901760, %v8975_v3 }
 0x20a   : > { %v5085_v42 = vpop.f32.mrb[129].mxu1  ;;  %v10515_v46 = vand.u32 4294901760, %v8980_v14 }
 0x20b   : > { %v5086_v28 = vadd.f32 %v5085_v42, %v5084_v1  ;;  %v3669_v12 = vsub.f32 %v9168_v34, %v10022_v32  ;;  %v9189_v13 = vsub.f32 %v8975_v3, %v10513_v18  ;;  %v9191_v20 = vpack.c.bf16 %v3656_v59, %v3649_v17 }
 0x20c   : > { %v9196_v56 = vsub.f32 %v8980_v14, %v10515_v46  ;;  %v3663_v42 = vand.u32 4294901760, %v3662_v26 }
 0x20d   : > { %10514 = vst [vmem:[#allocation42_spill] sm:$0xff] %v9189_v13  ;;  %v9199_v19 = vadd.f32 %v5086_v28, %v8909_v45  ;;  %v5087_v1 = vpop.f32.mrb[130].mxu1  ;;  %v3670_v58 = vand.u32 4294901760, %v3669_v12  ;;  %v10026_v32 = vand.u32 4294901760, %v9189_v13 }
 0x20e   : > { %10516 = vst [vmem:[#allocation46_spill] sm:$0xff] %v9196_v56  ;;  %v5088_v5 = vpop.f32.mrb[131].mxu1  ;;  %v10027_v53 = vand.u32 4294901760, %v9196_v56 }
 0x20f   : > { %v5089_v3 = vadd.f32 %v5088_v5, %v5087_v1  ;;  %v9203_v18 = vpack.c.bf16 %v3670_v58, %v3663_v42  ;;  %v3676_v59 = vsub.f32 %v9189_v13, %v10026_v32  ;;  %v9221_v32 = vpack.c.bf16 %v9036_v24, %v9031_v49 }
 0x210   : > { %v3683_v45 = vsub.f32 %v9196_v56, %v10027_v53 }
 0x211   : > { %v9212_v14 = vadd.f32 %v5089_v3, %v8934_v43  ;;  %v5090_v28 = vpop.f32.mrb[132].mxu1  ;;  %v3677_v17 = vand.u32 4294901760, %v3676_v59 }
 0x212   : > { %v5091_v26 = vpop.f32.mrb[133].mxu1  ;;  %v3684_v12 = vand.u32 4294901760, %v3683_v45  ;;  %v9228_v45 = vpack.c.bf16 %v9057_v30, %v9052_v38 }
 0x213   : > { %v5092_v46 = vadd.f32 %v5091_v26, %v5090_v28 }
 0x214   : > { %v9214_v47 = vpack.c.bf16 %v3684_v12, %v3677_v17  ;;  %v9235_v12 = vpack.c.bf16 %v9080_v9, %v9072_v25 }
 0x215   : > { %v9217_v58 = vadd.f32 %v5092_v46, %v8959_v36  ;;  %v5093_v5 = vpop.f32.mrb[134].mxu1 }
 0x216   : > { %v5094_v1 = vpop.f32.mrb[135].mxu1 }
 0x217   : > { %v5095_v42 = vadd.f32 %v5094_v1, %v5093_v5 }
 0x219   : > { %v9224_v43 = vadd.f32 %v5095_v42, %v8984_v33  ;;  %v5096_v3 = vpop.f32.mrb[136].mxu1  ;;  %v9242_v42 = vpack.c.bf16 %v9099_v6, %v9094_v10 }
 0x21a   : > { %v5097_v59 = vpop.f32.mrb[137].mxu1 }
 0x21b   : > { %v5098_v53 = vadd.f32 %v5097_v59, %v5096_v3 }
 0x21d   : > { %v9231_v36 = vadd.f32 %v5098_v53, %v8999_v16  ;;  %v5099_v28 = vpop.f32.mrb[138].mxu1 }
 0x21e   : > { %v5100_v17 = vpop.f32.mrb[139].mxu1 }
 0x21f   : > { %v5101_v26 = vadd.f32 %v5100_v17, %v5099_v28  ;;  %v9249_v28 = vpack.c.bf16 %v9127_v60, %v9120_v31 }
 0x221   : > { %v9238_v33 = vadd.f32 %v5101_v26, %v9012_v4  ;;  %v5102_v46 = vpop.f32.mrb[140].mxu1 }
 0x222   : > { %v5103_v5 = vpop.f32.mrb[141].mxu1 }
 0x223   : > { %v5104_v1 = vadd.f32 %v5103_v5, %v5102_v46  ;;  %v9256_v5 = vpack.c.bf16 %v9150_v15, %v9142_v55 }
 0x225   : > { %v9245_v16 = vadd.f32 %v5104_v1, %v9019_v39  ;;  %v5105_v53 = vpop.f32.mrb[142].mxu1 }
 0x226   : > { %v5106_v3 = vpop.f32.mrb[143].mxu1 }
 0x227   : > { %v5107_v59 = vadd.f32 %v5106_v3, %v5105_v53  ;;  %v9263_v3 = vpack.c.bf16 %v9168_v34, %v9163_v11 }
 0x229   : > { %v9252_v4 = vadd.f32 %v5107_v59, %v9023_v37  ;;  %v5108_v17 = vpop.f32.mrb[144].mxu1 }
 0x22a   : > { %v5109_v26 = vpop.f32.mrb[145].mxu1 }
 0x22b   : > { %v5110_v46 = vadd.f32 %v5109_v26, %v5108_v17  ;;  %v9270_v26 = vpack.c.bf16 %v9196_v56, %v9189_v13 }
 0x22d   : > { %v9259_v39 = vadd.f32 %v5110_v46, %v9026_v48  ;;  %v5111_v1 = vpop.f32.mrb[146].mxu1 }
 0x22e   : > { %v5112_v44 = vpop.f32.mrb[147].mxu1 }
 0x22f   : > { %v5113_v53 = vadd.f32 %v5112_v44, %v5111_v1 }
 0x231   : > { %v9266_v37 = vadd.f32 %v5113_v53, %v9039_v8  ;;  %v5114_v59 = vpop.f32.mrb[148].mxu1 }
 0x232   : > { %v5115_v60 = vpop.f32.mrb[149].mxu1 }
 0x233   : > { %v5116_v17 = vadd.f32 %v5115_v60, %v5114_v59 }
 0x235   : > { %v9273_v48 = vadd.f32 %v5116_v17, %v9060_v2  ;;  %v5117_v46 = vpop.f32.mrb[150].mxu1 }
 0x236   : > { %v5118_v15 = vpop.f32.mrb[151].mxu1 }
 0x237   : > { %v5119_v44 = vadd.f32 %v5118_v15, %v5117_v46 }
 0x239   : > { %v9276_v1 = vadd.f32 %v5119_v44, %v9083_v41  ;;  %v5120_v34 = vpop.f32.mrb[152].mxu1 }
 0x23a   : > { %v5121_v11 = vpop.f32.mrb[153].mxu1 }
 0x23b   : > { %v5122_v8 = vadd.f32 %v5121_v11, %v5120_v34 }
 0x23d   : > { %v9279_v53 = vadd.f32 %v5122_v8, %v9107_v27  ;;  %v5123_v60 = vpop.f32.mrb[154].mxu1 }
 0x23e   : > { %v5124_v59 = vpop.f32.mrb[155].mxu1 }
 0x23f   : > { %v5125_v55 = vadd.f32 %v5124_v59, %v5123_v60 }
 0x241   : > { %v9282_v56 = vadd.f32 %v5125_v55, %v9130_v62  ;;  %v5126_v2 = vpop.f32.mrb[156].mxu1 }
 0x242   : > { %v5127_v17 = vpop.f32.mrb[157].mxu1 }
 0x243   : > { %v5128_v13 = vadd.f32 %v5127_v17, %v5126_v2 }
 0x245   : > { %v9285_v15 = vadd.f32 %v5128_v13, %v9153_v0  ;;  %v5129_v41 = vpop.f32.mrb[158].mxu1 }
 0x246   : > { %v5130_v46 = vpop.f32.mrb[159].mxu1 }
 0x247   : > { %v5131_v44 = vadd.f32 %v5130_v46, %v5129_v41 }
 0x249   : > { %v9288_v11 = vadd.f32 %v5131_v44, %v9176_v50  ;;  %v5164_v27 = vpop.f32.mrb[160].mxu1 }
 0x24a   : > { %v5165_v34 = vpop.f32.mrb[161].mxu1 }
 0x24b   : > { %v5166_v8 = vadd.f32 %v5165_v34, %v5164_v27 }
 0x24d   : > { %v1889_v60 = vadd.f32 %v5166_v8, %v9199_v19  ;;  %v5167_v59 = vpop.f32.mrb[162].mxu1 }
 0x24e   : > { %v5168_v62 = vpop.f32.mrb[163].mxu1 }
 0x24f   : > { %v9291_v55 = vand.u32 4294901760, %v1889_v60  ;;  %v5169_v31 = vadd.f32 %v5168_v62, %v5167_v59 }
 0x251   : > { %v9294_v2 = vsub.f32 %v1889_v60, %v9291_v55  ;;  %v1896_v0 = vadd.f32 %v5169_v31, %v9212_v14  ;;  %v5170_v13 = vpop.f32.mrb[164].mxu1 }
 0x252   : > { %v5171_v17 = vpop.f32.mrb[165].mxu1 }
 0x253   : > { %v9297_v41 = vand.u32 4294901760, %v1896_v0  ;;  %v5172_v50 = vadd.f32 %v5171_v17, %v5170_v13  ;;  %v10037_v46 = vand.u32 4294901760, %v9294_v2 }
 0x255   : > { %v9301_v44 = vsub.f32 %v1896_v0, %v9297_v41  ;;  %v1903_v19 = vadd.f32 %v5172_v50, %v9217_v58  ;;  %v5173_v27 = vpop.f32.mrb[166].mxu1  ;;  %v3417_v34 = vsub.f32 %v9294_v2, %v10037_v46 }
 0x256   : > { %v5174_v8 = vpop.f32.mrb[167].mxu1 }
 0x257   : > { %v10048_v31 = vand.u32 4294901760, %v9301_v44  ;;  %v9308_v14 = vand.u32 4294901760, %v1903_v19  ;;  %v5175_v60 = vadd.f32 %v5174_v8, %v5173_v27  ;;  %v3418_v59 = vand.u32 4294901760, %v3417_v34 }
 0x259   : > { %v3427_v62 = vsub.f32 %v9301_v44, %v10048_v31  ;;  %v9314_v0 = vsub.f32 %v1903_v19, %v9308_v14  ;;  %v1910_v58 = vadd.f32 %v5175_v60, %v9224_v43  ;;  %v5176_v13 = vpop.f32.mrb[168].mxu1  ;;  %5964 = vmatprep.mubr.f32.mxu0 %v3418_v59 }
 0x25a   : > { %v5177_v17 = vpop.f32.mrb[169].mxu1 }
 0x25b   : > { %v3428_v50 = vand.u32 4294901760, %v3427_v62  ;;  %v9317_v46 = vand.u32 4294901760, %v1910_v58  ;;  %v5178_v6 = vadd.f32 %v5177_v17, %v5176_v13  ;;  %v10047_v10 = vand.u32 4294901760, %v9314_v0 }
 0x25d   : > { %v9321_v27 = vsub.f32 %v1910_v58, %v9317_v46  ;;  %v1917_v34 = vadd.f32 %v5178_v6, %v9231_v36  ;;  %v5179_v8 = vpop.f32.mrb[170].mxu1  ;;  %5965 = vmatmul.mubr.f32.vlgmr.msra.gmra.mrb[0].mxu0 %v3428_v50  ;;  %v3437_v43 = vsub.f32 %v9314_v0, %v10047_v10 }
 0x25e   : > { %v5180_v19 = vpop.f32.mrb[171].mxu1  ;;  %6687 = vmatpush3.bf16.msra.mxu0 %v9064_v21 }
 0x25f   : > { %v9328_v60 = vand.u32 4294901760, %v1917_v34  ;;  %v5181_v59 = vadd.f32 %v5180_v19, %v5179_v8  ;;  %v3438_v62 = vand.u32 4294901760, %v3437_v43  ;;  %v10040_v13 = vand.u32 4294901760, %v9321_v27  ;;  %6689 = vmatprep.subr.bf16.mxu0 %v9101_v51 }
 0x261   : > { %v9333_v58 = vsub.f32 %v1917_v34, %v9328_v60  ;;  %v1924_v6 = vadd.f32 %v5181_v59, %v9238_v33  ;;  %v5182_v36 = vpop.f32.mrb[172].mxu1  ;;  %5967 = vmatprep.mubr.f32.mxu0 %v3438_v62  ;;  %v3447_v17 = vsub.f32 %v9321_v27, %v10040_v13 }
 0x262   : > { %v5183_v21 = vpop.f32.mrb[173].mxu1  ;;  %6691 = vmatpush3.bf16.msra.mxu0 %v9101_v51 }
 0x263   : > { %v9340_v50 = vand.u32 4294901760, %v1924_v6  ;;  %v5184_v8 = vadd.f32 %v5183_v21, %v5182_v36  ;;  %v3448_v43 = vand.u32 4294901760, %v3447_v17  ;;  %v10041_v19 = vand.u32 4294901760, %v9333_v58  ;;  %6693 = vmatprep.subr.bf16.mxu0 %v9122_v40 }
 0x265   : > { %v9345_v34 = vsub.f32 %v1924_v6, %v9340_v50  ;;  %v1931_v33 = vadd.f32 %v5184_v8, %v9245_v16  ;;  %v5185_v59 = vpop.f32.mrb[174].mxu1  ;;  %5968 = vmatmul.mubr.f32.gmra.mrb[2].mxu0 %v3448_v43  ;;  %v3457_v62 = vsub.f32 %v9333_v58, %v10041_v19 }
 0x266   : > { %v5186_v51 = vpop.f32.mrb[175].mxu1  ;;  %6695 = vmatpush3.bf16.msra.mxu0 %v9122_v40 }
 0x267   : > { %v9352_v36 = vand.u32 4294901760, %v1931_v33  ;;  %v5187_v17 = vadd.f32 %v5186_v51, %v5185_v59  ;;  %v3458_v21 = vand.u32 4294901760, %v3457_v62  ;;  %v10042_v13 = vand.u32 4294901760, %v9345_v34  ;;  %6697 = vmatprep.subr.bf16.mxu0 %v9134_v7 }
 0x269   : > { %v9357_v6 = vsub.f32 %v1931_v33, %v9352_v36  ;;  %v1938_v16 = vadd.f32 %v5187_v17, %v9252_v4  ;;  %v5188_v8 = vpop.f32.mrb[176].mxu1  ;;  %5970 = vmatprep.mubr.f32.mxu0 %v3458_v21  ;;  %v3467_v43 = vsub.f32 %v9345_v34, %v10042_v13 }
 0x26a   : > { %v5189_v40 = vpop.f32.mrb[177].mxu1  ;;  %6699 = vmatpush3.bf16.msra.mxu0 %v9134_v7 }
 0x26b   : > { %v9364_v59 = vand.u32 4294901760, %v1938_v16  ;;  %v5190_v62 = vadd.f32 %v5189_v40, %v5188_v8  ;;  %v3468_v51 = vand.u32 4294901760, %v3467_v43  ;;  %v10043_v19 = vand.u32 4294901760, %v9357_v6  ;;  %6701 = vmatprep.subr.bf16.mxu0 %v9170_v63 }
 0x26d   : > { %v9369_v33 = vsub.f32 %v1938_v16, %v9364_v59  ;;  %v1945_v4 = vadd.f32 %v5190_v62, %v9259_v39  ;;  %v5191_v17 = vpop.f32.mrb[178].mxu1  ;;  %5971 = vmatmul.mubr.f32.gmra.mrb[4].mxu0 %v3468_v51  ;;  %v3477_v21 = vsub.f32 %v9357_v6, %v10043_v19 }
 0x26e   : > { %v5192_v7 = vpop.f32.mrb[179].mxu1  ;;  %6703 = vmatpush3.bf16.msra.mxu0 %v9170_v63 }
 0x26f   : > { %v9376_v8 = vand.u32 4294901760, %v1945_v4  ;;  %v5193_v43 = vadd.f32 %v5192_v7, %v5191_v17  ;;  %v3478_v40 = vand.u32 4294901760, %v3477_v21  ;;  %v10044_v13 = vand.u32 4294901760, %v9369_v33  ;;  %6705 = vmatprep.subr.bf16.mxu0 %v9191_v20 }
 0x271   : > { %v9381_v16 = vsub.f32 %v1945_v4, %v9376_v8  ;;  %v1952_v39 = vadd.f32 %v5193_v43, %v9266_v37  ;;  %v5194_v62 = vpop.f32.mrb[180].mxu1  ;;  %5973 = vmatprep.mubr.f32.mxu0 %v3478_v40  ;;  %v3487_v51 = vsub.f32 %v9369_v33, %v10044_v13 }
 0x272   : > { %v5195_v63 = vpop.f32.mrb[181].mxu1  ;;  %6707 = vmatpush3.bf16.msra.mxu0 %v9191_v20 }
 0x273   : > { %v9388_v17 = vand.u32 4294901760, %v1952_v39  ;;  %v5196_v21 = vadd.f32 %v5195_v63, %v5194_v62  ;;  %v3488_v7 = vand.u32 4294901760, %v3487_v51  ;;  %v10045_v19 = vand.u32 4294901760, %v9381_v16  ;;  %6709 = vmatprep.subr.bf16.mxu0 %v9203_v18 }
 0x275   : > { %v9393_v4 = vsub.f32 %v1952_v39, %v9388_v17  ;;  %v1959_v37 = vadd.f32 %v5196_v21, %v9273_v48  ;;  %v5197_v43 = vpop.f32.mrb[182].mxu1  ;;  %5974 = vmatmul.mubr.f32.gmra.mrb[6].mxu0 %v3488_v7  ;;  %v3497_v40 = vsub.f32 %v9381_v16, %v10045_v19 }
 0x276   : > { %v5198_v20 = vpop.f32.mrb[183].mxu1  ;;  %6711 = vmatpush3.bf16.msra.mxu0 %v9203_v18 }
 0x277   : > { %v9400_v62 = vand.u32 4294901760, %v1959_v37  ;;  %v5199_v51 = vadd.f32 %v5198_v20, %v5197_v43  ;;  %v3498_v63 = vand.u32 4294901760, %v3497_v40  ;;  %v10046_v13 = vand.u32 4294901760, %v9393_v4  ;;  %6713 = vmatprep.subr.bf16.mxu0 %v9214_v47 }
 0x279   : > { %v9405_v39 = vsub.f32 %v1959_v37, %v9400_v62  ;;  %v1966_v48 = vadd.f32 %v5199_v51, %v9276_v1  ;;  %v5200_v21 = vpop.f32.mrb[184].mxu1  ;;  %5976 = vmatprep.mubr.f32.mxu0 %v3498_v63  ;;  %v3507_v7 = vsub.f32 %v9393_v4, %v10046_v13 }
 0x27a   : > { %v5201_v18 = vpop.f32.mrb[185].mxu1  ;;  %6715 = vmatpush3.bf16.msra.mxu0 %v9214_v47 }
 0x27b   : > { %v9412_v43 = vand.u32 4294901760, %v1966_v48  ;;  %v5202_v40 = vadd.f32 %v5201_v18, %v5200_v21  ;;  %v3508_v20 = vand.u32 4294901760, %v3507_v7  ;;  %v10049_v19 = vand.u32 4294901760, %v9405_v39  ;;  %6717 = vmatprep.subr.bf16.mxu0 %v9221_v32 }
 0x27d   : > { %v9417_v37 = vsub.f32 %v1966_v48, %v9412_v43  ;;  %v1973_v1 = vadd.f32 %v5202_v40, %v9279_v53  ;;  %v5203_v51 = vpop.f32.mrb[186].mxu1  ;;  %5977 = vmatmul.mubr.f32.gmra.mrb[8].mxu0 %v3508_v20  ;;  %v3517_v63 = vsub.f32 %v9405_v39, %v10049_v19 }
 0x27e   : > { %v5204_v47 = vpop.f32.mrb[187].mxu1 }
 0x27f   : > { %v9423_v13 = vand.u32 4294901760, %v1973_v1  ;;  %v5205_v21 = vadd.f32 %v5204_v47, %v5203_v51  ;;  %v3518_v7 = vand.u32 4294901760, %v3517_v63  ;;  %v10051_v18 = vand.u32 4294901760, %v9417_v37 }
 0x281   : > { %v9427_v10 = vsub.f32 %v1973_v1, %v9423_v13  ;;  %v1980_v48 = vadd.f32 %v5205_v21, %v9282_v56  ;;  %v5206_v31 = vpop.f32.mrb[188].mxu1  ;;  %5979 = vmatprep.mubr.f32.mxu0 %v3518_v7  ;;  %v3527_v53 = vsub.f32 %v9417_v37, %v10051_v18 }
 0x282   : > { %v5207_v40 = vpop.f32.mrb[189].mxu1 }
 0x283   : > { %v9433_v20 = vand.u32 4294901760, %v1980_v48  ;;  %v5208_v19 = vadd.f32 %v5207_v40, %v5206_v31  ;;  %v3528_v9 = vand.u32 4294901760, %v3527_v53  ;;  %v3536_v51 = vand.u32 4294901760, %v9427_v10 }
 0x285   : > { %v9437_v63 = vsub.f32 %v1980_v48, %v9433_v20  ;;  %v1987_v1 = vadd.f32 %v5208_v19, %v9285_v15  ;;  %v5209_v47 = vpop.f32.mrb[190].mxu1  ;;  %5980 = vmatmul.mubr.f32.gmra.mrb[10].mxu0 %v3528_v9  ;;  %v3537_v56 = vsub.f32 %v9427_v10, %v3536_v51 }
 0x286   : > { %v5210_v21 = vpop.f32.mrb[191].mxu1 }
 0x287   : > { %v9443_v7 = vand.u32 4294901760, %v1987_v1  ;;  %v5211_v18 = vadd.f32 %v5210_v21, %v5209_v47  ;;  %v3538_v25 = vand.u32 4294901760, %v3537_v56  ;;  %v3546_v31 = vand.u32 4294901760, %v9437_v63 }
 0x289   : > { %v9447_v53 = vsub.f32 %v1987_v1, %v9443_v7  ;;  %v1994_v48 = vadd.f32 %v5211_v18, %v9288_v11  ;;  %5982 = vmatprep.mubr.f32.mxu0 %v3538_v25  ;;  %v3547_v9 = vsub.f32 %v9437_v63, %v3546_v31 }
 0x28b   : > { %v9453_v15 = vand.u32 4294901760, %v1994_v48  ;;  %v3548_v19 = vand.u32 4294901760, %v3547_v9  ;;  %v3556_v40 = vand.u32 4294901760, %v9447_v53 }
 0x28d   : > { %v9457_v47 = vsub.f32 %v1994_v48, %v9453_v15  ;;  %5983 = vmatmul.mubr.f32.gmra.mrb[12].mxu0 %v3548_v19  ;;  %v3557_v1 = vsub.f32 %v9447_v53, %v3556_v40  ;;  %v10526_v48 = vld [vmem:[#allocation10_spill] sm:$0xff]  ;;  %v10528_v19 = vand.u32 4294901760, %v9321_v27 }
 0x28e   : > { %v10527_v9 = vand.u32 4294901760, %v10526_v48  ;;  %v10550_v48 = vld [vmem:[#allocation14_spill] sm:$0xff] }
 0x28f   : > { %v3558_v56 = vand.u32 4294901760, %v3557_v1  ;;  %v3566_v25 = vand.u32 4294901760, %v9457_v47  ;;  %v10532_v1 = vld [vmem:[#allocation38_spill] sm:$0xff] }
 0x291   : > { %5985 = vmatprep.mubr.f32.mxu0 %v3558_v56  ;;  %v3567_v11 = vsub.f32 %v9457_v47, %v3566_v25 }
 0x293   : > { %v3568_v18 = vand.u32 4294901760, %v3567_v11  ;;  %v10534_v11 = vand.u32 4294901760, %v9345_v34 }
 0x295   : > { %5986 = vmatmul.mubr.f32.gmra.mrb[14].mxu0 %v3568_v18  ;;  %v10535_v18 = vand.u32 4294901760, %v9357_v6 }
 0x296   : > { %6020 = vmatprep.mubr.f32.mxu0 %v9291_v55 }
 0x299   : > { %6021 = vmatmul.mubr.f32.vlgmr.msra.gmra.mrb[0].mxu0 %v9297_v41 }
 0x29a   : > { %6023 = vmatprep.mubr.f32.mxu0 %v9308_v14  ;;  %6719 = vmatpush3.bf16.msra.mxu0 %v9221_v32  ;;  %v10517_v32 = vand.u32 4294901760, %v9031_v49  ;;  %v10523_v49 = vand.u32 4294901760, %v9314_v0 }
 0x29b   : > { %6721 = vmatprep.subr.bf16.mxu0 %v9228_v45 }
 0x29d   : > { %6024 = vmatmul.mubr.f32.gmra.mrb[2].mxu0 %v9317_v46 }
 0x29e   : > { %6026 = vmatprep.mubr.f32.mxu0 %v9328_v60  ;;  %6723 = vmatpush3.bf16.msra.mxu0 %v9228_v45  ;;  %v10518_v45 = vand.u32 4294901760, %v9036_v24  ;;  %v10524_v24 = vld [vmem:[#allocation9_spill] sm:$0xff] }
 0x29f   : > { %6725 = vmatprep.subr.bf16.mxu0 %v9235_v12  ;;  %v10525_v21 = vand.u32 4294901760, %v10524_v24  ;;  %v10547_v24 = vand.u32 4294901760, %v9405_v39 }
 0x2a1   : > { %6027 = vmatmul.mubr.f32.gmra.mrb[4].mxu0 %v9340_v50 }
 0x2a2   : > { %6029 = vmatprep.mubr.f32.mxu0 %v9352_v36  ;;  %6727 = vmatpush3.bf16.msra.mxu0 %v9235_v12  ;;  %v6780_v12 = vpack.c.bf16 %v10518_v45, %v10517_v32  ;;  %v10538_v45 = vld [vmem:[#allocation12_spill] sm:$0xff] }
 0x2a3   : > { %6729 = vmatprep.subr.bf16.mxu0 %v9242_v42 }
 0x2a5   : > { %6030 = vmatmul.mubr.f32.gmra.mrb[6].mxu0 %v9364_v59 }
 0x2a6   : > { %6032 = vmatprep.mubr.f32.mxu0 %v9376_v8  ;;  %6731 = vmatpush3.bf16.msra.mxu0 %v9242_v42  ;;  %v10519_v42 = vand.u32 4294901760, %v9294_v2 }
 0x2a7   : > { %6733 = vmatprep.subr.bf16.mxu0 %v9249_v28 }
 0x2a9   : > { %6033 = vmatmul.mubr.f32.gmra.mrb[8].mxu0 %v9388_v17 }
 0x2aa   : > { %6035 = vmatprep.mubr.f32.mxu0 %v9400_v62  ;;  %6735 = vmatpush3.bf16.msra.mxu0 %v9249_v28  ;;  %v10520_v28 = vand.u32 4294901760, %v9052_v38  ;;  %v10529_v38 = vand.u32 4294901760, %v9333_v58 }
 0x2ab   : > { %6737 = vmatprep.subr.bf16.mxu0 %v9256_v5 }
 0x2ad   : > { %6036 = vmatmul.mubr.f32.gmra.mrb[10].mxu0 %v9412_v43 }
 0x2ae   : > { %6038 = vmatprep.mubr.f32.mxu0 %v9423_v13  ;;  %6739 = vmatpush3.bf16.msra.mxu0 %v9256_v5  ;;  %v10521_v5 = vand.u32 4294901760, %v9057_v30  ;;  %v10530_v30 = vld [vmem:[#allocation35_spill] sm:$0xff] }
 0x2af   : > { %6741 = vmatprep.subr.bf16.mxu0 %v9263_v3 }
 0x2b1   : > { %6039 = vmatmul.mubr.f32.gmra.mrb[12].mxu0 %v9433_v20 }
 0x2b2   : > { %6041 = vmatprep.mubr.f32.mxu0 %v9443_v7  ;;  %6743 = vmatpush3.bf16.msra.mxu0 %v9263_v3  ;;  %v6784_v3 = vpack.c.bf16 %v10521_v5, %v10520_v28  ;;  %v10541_v28 = vand.u32 4294901760, %v9381_v16 }
 0x2b3   : > { %6745 = vmatprep.subr.bf16.mxu0 %v9270_v26 }
 0x2b5   : > { %6042 = vmatmul.mubr.f32.gmra.mrb[14].mxu0 %v9453_v15 }
 0x2b6   : > { %6747 = vmatpush3.bf16.msra.mxu0 %v9270_v26  ;;  %6076 = vmatprep.mubr.f32.mxu0 %v9294_v2  ;;  %v10522_v26 = vand.u32 4294901760, %v9301_v44  ;;  %v6788_v2 = vpack.c.bf16 %v10527_v9, %v10525_v21 }
 0x2b7   : > { %6749 = vmatprep.subr.bf16.mxu0 %v8843_v61 }
 0x2b9   : > { %6077 = vmatmul.mubr.f32.vlgmr.msra.gmra.mrb[0].mxu0 %v9301_v44  ;;  %v10531_v44 = vand.u32 4294901760, %v10530_v30 }
 0x2ba   : > { %6079 = vmatprep.mubr.f32.mxu0 %v9314_v0  ;;  %6751 = vmatpush3.bf16.msra.mxu0 %v8843_v61  ;;  %v10533_v0 = vand.u32 4294901760, %v10532_v1 }
 0x2bb   : > { %6753 = vmatprep.subr.bf16.mxu0 %v8868_v57 }
 0x2bc   : > { %v6792_v56 = vpack.c.bf16 %v10533_v0, %v10531_v44 }
 0x2bd   : > { %6080 = vmatmul.mubr.f32.gmra.mrb[2].mxu0 %v9321_v27  ;;  %v10536_v27 = vld [vmem:[#allocation11_spill] sm:$0xff] }
 0x2be   : > { %6082 = vmatprep.mubr.f32.mxu0 %v9333_v58  ;;  %6755 = vmatpush3.bf16.msra.mxu0 %v8868_v57  ;;  %v10537_v32 = vand.u32 4294901760, %v10536_v27  ;;  %v10539_v58 = vand.u32 4294901760, %v10538_v45 }
 0x2bf   : > { %6757 = vmatprep.subr.bf16.mxu0 %v8893_v22 }
 0x2c1   : > { %6083 = vmatmul.mubr.f32.gmra.mrb[4].mxu0 %v9345_v34  ;;  %v10542_v34 = vld [vmem:[#allocation39_spill] sm:$0xff] }
 0x2c2   : > { %6085 = vmatprep.mubr.f32.mxu0 %v9357_v6  ;;  %6759 = vmatpush3.bf16.msra.mxu0 %v8893_v22  ;;  %v10543_v5 = vand.u32 4294901760, %v10542_v34 }
 0x2c3   : > { %6761 = vmatprep.subr.bf16.mxu0 %v8918_v52 }
 0x2c5   : > { %6086 = vmatmul.mubr.f32.gmra.mrb[6].mxu0 %v9369_v33 }
 0x2c6   : > { %6088 = vmatprep.mubr.f32.mxu0 %v9381_v16  ;;  %6763 = vmatpush3.bf16.msra.mxu0 %v8918_v52  ;;  %v10551_v16 = vand.u32 4294901760, %v10550_v48 }
 0x2c7   : > { %6765 = vmatprep.subr.bf16.mxu0 %v8943_v23 }
 0x2c9   : > { %6089 = vmatmul.mubr.f32.gmra.mrb[8].mxu0 %v9393_v4 }
 0x2ca   : > { %6091 = vmatprep.mubr.f32.mxu0 %v9405_v39  ;;  %6767 = vmatpush3.bf16.msra.mxu0 %v8943_v23 }
 0x2cb   : > { %6769 = vmatprep.subr.bf16.mxu0 %v8968_v29 }
 0x2cd   : > { %6092 = vmatmul.mubr.f32.gmra.mrb[10].mxu0 %v9417_v37 }
 0x2ce   : > { %6094 = vmatprep.mubr.f32.mxu0 %v9427_v10  ;;  %6771 = vmatpush3.bf16.msra.mxu0 %v8968_v29 }
 0x2cf   : > { %6773 = vmatprep.subr.bf16.mxu0 %v8993_v35 }
 0x2d1   : > { %6095 = vmatmul.mubr.f32.gmra.mrb[12].mxu0 %v9437_v63 }
 0x2d2   : > { %6097 = vmatprep.mubr.f32.mxu0 %v9447_v53  ;;  %6775 = vmatpush3.bf16.msra.mxu0 %v8993_v35 }
 0x2d3   : > { %6777 = vmatprep.subr.bf16.mxu0 %v9008_v54 }
 0x2d5   : > { %6098 = vmatmul.mubr.f32.gmra.mrb[14].mxu0 %v9457_v47 }
 0x2d6   : > { %6779 = vmatpush3.bf16.msra.mxu0 %v9008_v54  ;;  %6132 = vmatprep.mubr.f32.mxu0 %v10519_v42  ;;  %v10540_v42 = vand.u32 4294901760, %v9369_v33  ;;  %v10548_v33 = vld [vmem:[#allocation13_spill] sm:$0xff] }
 0x2d7   : > { %6781 = vmatprep.subr.bf16.mxu0 %v6780_v12  ;;  %v10549_v21 = vand.u32 4294901760, %v10548_v33 }
 0x2d9   : > { %6133 = vmatmul.mubr.f32.vlgmr.msra.gmra.mrb[0].mxu0 %v10522_v26  ;;  %v6804_v9 = vpack.c.bf16 %v10551_v16, %v10549_v21 }
 0x2da   : > { %6135 = vmatprep.mubr.f32.mxu0 %v10523_v49  ;;  %6783 = vmatpush3.bf16.msra.mxu0 %v6780_v12  ;;  %v6796_v12 = vpack.c.bf16 %v10539_v58, %v10537_v32  ;;  %v10546_v49 = vand.u32 4294901760, %v9393_v4  ;;  %v10553_v4 = vld [vmem:[#allocation42_spill] sm:$0xff] }
 0x2db   : > { %6785 = vmatprep.subr.bf16.mxu0 %v6784_v3 }
 0x2dd   : > { %6136 = vmatmul.mubr.f32.gmra.mrb[2].mxu0 %v10528_v19  ;;  %v10554_v19 = vand.u32 4294901760, %v10553_v4 }
 0x2de   : > { %6138 = vmatprep.mubr.f32.mxu0 %v10529_v38  ;;  %6787 = vmatpush3.bf16.msra.mxu0 %v6784_v3  ;;  %v10544_v3 = vld [vmem:[#allocation40_spill] sm:$0xff]  ;;  %v10555_v38 = vld [vmem:[#allocation46_spill] sm:$0xff] }
 0x2df   : > { %6789 = vmatprep.subr.bf16.mxu0 %v6788_v2  ;;  %v10545_v6 = vand.u32 4294901760, %v10544_v3  ;;  %v10556_v39 = vand.u32 4294901760, %v10555_v38 }
 0x2e1   : > { %6139 = vmatmul.mubr.f32.gmra.mrb[4].mxu0 %v10534_v11  ;;  %v6800_v26 = vpack.c.bf16 %v10545_v6, %v10543_v5  ;;  %v6808_v30 = vpack.c.bf16 %v10556_v39, %v10554_v19 }
 0x2e2   : > { %6141 = vmatprep.mubr.f32.mxu0 %v10535_v18  ;;  %6791 = vmatpush3.bf16.msra.mxu0 %v6788_v2  ;;  %v10552_v2 = vand.u32 4294901760, %v9417_v37 }
 0x2e3   : > { %6793 = vmatprep.subr.bf16.mxu0 %v6792_v56 }
 0x2e5   : > { %6142 = vmatmul.mubr.f32.gmra.mrb[6].mxu0 %v10540_v42 }
 0x2e6   : > { %6144 = vmatprep.mubr.f32.mxu0 %v10541_v28  ;;  %6795 = vmatpush3.bf16.msra.mxu0 %v6792_v56 }
 0x2e7   : > { %6797 = vmatprep.subr.bf16.mxu0 %v6796_v12 }
 0x2e9   : > { %6145 = vmatmul.mubr.f32.gmra.mrb[8].mxu0 %v10546_v49 }
 0x2ea   : > { %6147 = vmatprep.mubr.f32.mxu0 %v10547_v24  ;;  %6799 = vmatpush3.bf16.msra.mxu0 %v6796_v12 }
 0x2eb   : > { %6801 = vmatprep.subr.bf16.mxu0 %v6800_v26 }
 0x2ed   : > { %6148 = vmatmul.mubr.f32.gmra.mrb[10].mxu0 %v10552_v2 }
 0x2ee   : > { %6150 = vmatprep.mubr.f32.mxu0 %v3536_v51  ;;  %6803 = vmatpush3.bf16.msra.mxu0 %v6800_v26 }
 0x2ef   : > { %6805 = vmatprep.subr.bf16.mxu0 %v6804_v9 }
 0x2f1   : > { %6151 = vmatmul.mubr.f32.gmra.mrb[12].mxu0 %v3546_v31 }
 0x2f2   : > { %6153 = vmatprep.mubr.f32.mxu0 %v3556_v40  ;;  %6807 = vmatpush3.bf16.msra.mxu0 %v6804_v9 }
 0x2f3   : > { %6809 = vmatprep.subr.bf16.mxu0 %v6808_v30 }
 0x2f5   : > { %6154 = vmatmul.mubr.f32.gmra.mrb[14].mxu0 %v3566_v25 }
 0x2f6   : > { %6811 = vmatpush3.bf16.msra.mxu0 %v6808_v30  ;;  %6188 = vmatprep.mubr.f32.mxu0 %v9291_v55 }
 0x2f7   : > { %6813 = vmatprep.subr.bf16.mxu0 %v8843_v61 }
 0x2f9   : > { %6189 = vmatmul.mubr.f32.vlgmr.msra.gmra.mrb[0].mxu0 %v9297_v41 }
 0x2fa   : > { %6191 = vmatprep.mubr.f32.mxu0 %v9308_v14  ;;  %6815 = vmatpush3.bf16.msra.mxu0 %v8843_v61  ;;  %v4728_v61 = vld [vmem:[%s9689_s4] ss:$0 sm:$0xff] }
 0x2fb   : > { %6817 = vmatprep.subr.bf16.mxu0 %v8868_v57 }
 0x2fd   : > { %6192 = vmatmul.mubr.f32.gmra.mrb[2].mxu0 %v9317_v46 }
 0x2fe   : > { %6194 = vmatprep.mubr.f32.mxu0 %v9328_v60  ;;  %6819 = vmatpush3.bf16.msra.mxu0 %v8868_v57 }
 0x2ff   : > { %6821 = vmatprep.subr.bf16.mxu0 %v8893_v22 }
 0x301   : > { %6195 = vmatmul.mubr.f32.gmra.mrb[4].mxu0 %v9340_v50 }
 0x302   : > { %6197 = vmatprep.mubr.f32.mxu0 %v9352_v36  ;;  %6823 = vmatpush3.bf16.msra.mxu0 %v8893_v22 }
 0x303   : > { %6825 = vmatprep.subr.bf16.mxu0 %v8918_v52 }
 0x305   : > { %6198 = vmatmul.mubr.f32.gmra.mrb[6].mxu0 %v9364_v59 }
 0x306   : > { %6200 = vmatprep.mubr.f32.mxu0 %v9376_v8  ;;  %6827 = vmatpush3.bf16.msra.mxu0 %v8918_v52 }
 0x307   : > { %6829 = vmatprep.subr.bf16.mxu0 %v8943_v23 }
 0x309   : > { %6201 = vmatmul.mubr.f32.gmra.mrb[8].mxu0 %v9388_v17 }
 0x30a   : > { %6203 = vmatprep.mubr.f32.mxu0 %v9400_v62  ;;  %6831 = vmatpush3.bf16.msra.mxu0 %v8943_v23 }
 0x30b   : > { %6833 = vmatprep.subr.bf16.mxu0 %v8968_v29 }
 0x30d   : > { %6204 = vmatmul.mubr.f32.gmra.mrb[10].mxu0 %v9412_v43 }
 0x30e   : > { %6206 = vmatprep.mubr.f32.mxu0 %v9423_v13  ;;  %6835 = vmatpush3.bf16.msra.mxu0 %v8968_v29 }
 0x30f   : > { %6837 = vmatprep.subr.bf16.mxu0 %v8993_v35 }
 0x311   : > { %6207 = vmatmul.mubr.f32.gmra.mrb[12].mxu0 %v9433_v20 }
 0x312   : > { %6209 = vmatprep.mubr.f32.mxu0 %v9443_v7  ;;  %6839 = vmatpush3.bf16.msra.mxu0 %v8993_v35 }
 0x313   : > { %6841 = vmatprep.subr.bf16.mxu0 %v9008_v54 }
 0x315   : > { %6210 = vmatmul.mubr.f32.gmra.mrb[14].mxu0 %v9453_v15 }
 0x316   : > { %6843 = vmatpush3.bf16.msra.mxu0 %v9008_v54  ;;  %6244 = vmatprep.mubr.f32.mxu0 %v9291_v55 }
 0x319   : > { %6245 = vmatmul.mubr.f32.vlgmr.msra.gmra.mrb[0].mxu0 %v9297_v41 }
 0x31a   : > { %6247 = vmatprep.mubr.f32.mxu0 %v9308_v14 }
 0x31d   : > { %6248 = vmatmul.mubr.f32.gmra.mrb[2].mxu0 %v9317_v46 }
 0x31e   : > { %6250 = vmatprep.mubr.f32.mxu0 %v9328_v60 }
 0x321   : > { %6251 = vmatmul.mubr.f32.gmra.mrb[4].mxu0 %v9340_v50 }
 0x322   : > { %6253 = vmatprep.mubr.f32.mxu0 %v9352_v36 }
 0x325   : > { %6254 = vmatmul.mubr.f32.gmra.mrb[6].mxu0 %v9364_v59 }
 0x326   : > { %6256 = vmatprep.mubr.f32.mxu0 %v9376_v8 }
 0x329   : > { %6257 = vmatmul.mubr.f32.gmra.mrb[8].mxu0 %v9388_v17 }
 0x32a   : > { %6259 = vmatprep.mubr.f32.mxu0 %v9400_v62 }
 0x32d   : > { %6260 = vmatmul.mubr.f32.gmra.mrb[10].mxu0 %v9412_v43 }
 0x32e   : > { %6262 = vmatprep.mubr.f32.mxu0 %v9423_v13 }
 0x331   : > { %6263 = vmatmul.mubr.f32.gmra.mrb[12].mxu0 %v9433_v20 }
 0x332   : > { %6265 = vmatprep.mubr.f32.mxu0 %v9443_v7 }
 0x335   : > { %6266 = vmatmul.mubr.f32.gmra.mrb[14].mxu0 %v9453_v15 }
 0x3ec   : > { %v6246_v57 = vpop.f32.mrb[0].mxu0 }
 0x3ed   : > { %v4627_v22 = vadd.f32 %v6246_v57, %v4728_v61  ;;  %v4525_v52 = vpop.f32.mrb[1].mxu0 }
 0x3ee   : > { %v4626_v23 = vadd.f32 %v4728_v61, %v4525_v52 }
 0x3ef   : > { %4644 = vst.msk [vmem:[%s9648_s28 + $0x8] sm:$0xff] %vm4642_vm0, %v4627_v22 }
 0x3f0   : > { %4643 = vst.msk [vmem:[%s9648_s28] sm:$0xff] %vm4642_vm0, %v4626_v23  ;;  %v6249_v29 = vpop.f32.mrb[2].mxu0 }
 0x3f1   : > { %v4629_v54 = vadd.f32 %v6249_v29, %v4728_v61  ;;  %v4537_v35 = vpop.f32.mrb[3].mxu0 }
 0x3f2   : > { %v4628_v10 = vadd.f32 %v4728_v61, %v4537_v35 }
 0x3f3   : > { %4646 = vst.msk [vmem:[%s9648_s28 + $0x18] sm:$0xff] %vm4642_vm0, %v4629_v54 }
 0x3f4   : > { %4645 = vst.msk [vmem:[%s9648_s28 + $0x10] sm:$0xff] %vm4642_vm0, %v4628_v10  ;;  %v6252_v55 = vpop.f32.mrb[4].mxu0 }
 0x3f5   : > { %v4631_v41 = vadd.f32 %v6252_v55, %v4728_v61  ;;  %v4549_v46 = vpop.f32.mrb[5].mxu0 }
 0x3f6   : > { %v4630_v14 = vadd.f32 %v4728_v61, %v4549_v46 }
 0x3f7   : > { %4648 = vst.msk [vmem:[%s9648_s28 + $0x28] sm:$0xff] %vm4642_vm0, %v4631_v41 }
 0x3f8   : > { %4647 = vst.msk [vmem:[%s9648_s28 + $0x20] sm:$0xff] %vm4642_vm0, %v4630_v14  ;;  %v6255_v60 = vpop.f32.mrb[6].mxu0 }
 0x3f9   : > { %v4633_v13 = vadd.f32 %v6255_v60, %v4728_v61  ;;  %v4561_v50 = vpop.f32.mrb[7].mxu0 }
 0x3fa   : > { %v4632_v36 = vadd.f32 %v4728_v61, %v4561_v50 }
 0x3fb   : > { %4650 = vst.msk [vmem:[%s9648_s28 + $0x38] sm:$0xff] %vm4642_vm0, %v4633_v13 }
 0x3fc   : > { %4649 = vst.msk [vmem:[%s9648_s28 + $0x30] sm:$0xff] %vm4642_vm0, %v4632_v36  ;;  %v6258_v59 = vpop.f32.mrb[8].mxu0 }
 0x3fd   : > { %v4635_v8 = vadd.f32 %v6258_v59, %v4728_v61  ;;  %v4573_v17 = vpop.f32.mrb[9].mxu0 }
 0x3fe   : > { %v4634_v62 = vadd.f32 %v4728_v61, %v4573_v17 }
 0x3ff   : > { %4652 = vst.msk [vmem:[%s9648_s28 + $0x48] sm:$0xff] %vm4642_vm0, %v4635_v8 }
 0x400   : > { %4651 = vst.msk [vmem:[%s9648_s28 + $0x40] sm:$0xff] %vm4642_vm0, %v4634_v62  ;;  %v6261_v43 = vpop.f32.mrb[10].mxu0 }
 0x401   : > { %v4637_v37 = vadd.f32 %v6261_v43, %v4728_v61  ;;  %v4585_v20 = vpop.f32.mrb[11].mxu0 }
 0x402   : > { %v4636_v51 = vadd.f32 %v4728_v61, %v4585_v20 }
 0x403   : > { %4654 = vst.msk [vmem:[%s9648_s28 + $0x58] sm:$0xff] %vm4642_vm0, %v4637_v37 }
 0x404   : > { %4653 = vst.msk [vmem:[%s9648_s28 + $0x50] sm:$0xff] %vm4642_vm0, %v4636_v51  ;;  %v6264_v63 = vpop.f32.mrb[12].mxu0 }
 0x405   : > { %v4639_v7 = vadd.f32 %v6264_v63, %v4728_v61  ;;  %v4597_v31 = vpop.f32.mrb[13].mxu0 }
 0x406   : > { %v4638_v53 = vadd.f32 %v4728_v61, %v4597_v31 }
 0x407   : > { %4656 = vst.msk [vmem:[%s9648_s28 + $0x68] sm:$0xff] %vm4642_vm0, %v4639_v7 }
 0x408   : > { %4655 = vst.msk [vmem:[%s9648_s28 + $0x60] sm:$0xff] %vm4642_vm0, %v4638_v53  ;;  %v6267_v15 = vpop.f32.mrb[14].mxu0 }
 0x409   : > { %v4641_v40 = vadd.f32 %v6267_v15, %v4728_v61  ;;  %v4609_v47 = vpop.f32.mrb[15].mxu0 }
 0x40a   : > { %v4640_v25 = vadd.f32 %v4728_v61, %v4609_v47 }
 0x40b   : > { %4658 = vst.msk [vmem:[%s9648_s28 + $0x78] sm:$0xff] %vm4642_vm0, %v4641_v40 }
 0x40c   : > { %4657 = vst.msk [vmem:[%s9648_s28 + $0x70] sm:$0xff] %vm4642_vm0, %v4640_v25 }
 0x40d PF: > { %s15_s18 = sadd.s32 1, %s7034_s18  }
 0x40e   : > { %p12_p4 = scmp.ge.s32.totalorder %s15_s18, 4  }
 0x410   :  { %14 = sbr.rel (!%p12_p4) target bundleno = 1 (0x1), region = 71 }

</bundles_post_ra>
